<compile_context>
chip_gen: v6e
topology: v6e:2x2x1
jax: 0.10.0
libtpu: 0.0.40
codegen_flags: <defaults>
</compile_context>

<pallas_src>
import math

import numpy as np
import jax
import jax.numpy as jnp
from jax import lax
from jax.experimental import pallas as pl
from jax.experimental.pallas import tpu as pltpu

# ----------------------------------------------------------------------------
# Static network geometry (DQN: Conv2d(3,4,3,p=1) -> pool -> Conv2d(4,8,3,p=1)
# -> pool -> Linear(200,16) -> Linear(16,4); fc1(200)=8*5*5 implies 3x20x20).
# ----------------------------------------------------------------------------
CIN, C1, C2 = 3, 4, 8
H0 = W0 = 20
A0 = H0 * W0                 # 400 pixels per channel (input / conv1 output)
IN_W = CIN * A0              # 1200 flattened input features
H1 = W1 = 10
A1 = H1 * W1                 # 100 pixels per channel after pool1
P2 = 5
A2 = P2 * P2                 # 25 pixels per channel after pool2

L1 = C1 * A0                 # 1600 conv1 output features per image
ZW1 = 1600                   # pool1 window-max width (max selected lane 1578)
L1P = 1632                   # conv1 output padded width (>= ZW1 + 21)
L2 = C2 * A1                 # 800 conv2 output features per image
ZW2 = 800                    # pool2 window-max width (max selected lane 788)
L2P = 816                    # conv2 output padded width (>= ZW2 + 11)
NOUT1, NOUT2 = 16, 4


# ----------------------------------------------------------------------------
# Fused kernel: one grid step == one block of B_BLK images (batch on MXU M).
# ----------------------------------------------------------------------------
def _dqn_kernel(x_ref, w1_ref, b1_ref, w2_ref, b2_ref, wf1_ref, bf1_ref,
                wf2_ref, bf2_ref, o_ref, h1_scr, h2_scr):
    f32, bf16 = jnp.float32, jnp.bfloat16

    # conv1 (incl. its zero padding) as one dense matmul + bias + ReLU.
    x = x_ref[...].astype(bf16)                                     # (B, 1200)
    h1_scr[...] = jnp.maximum(
        jnp.dot(x, w1_ref[...], preferred_element_type=f32) + b1_ref[...], 0.0)

    # 2x2 max-pool #1: elementwise max of 4 shifted lane windows (VPU).
    z1 = jnp.maximum(
        jnp.maximum(h1_scr[:, pl.ds(0, ZW1)], h1_scr[:, pl.ds(1, ZW1)]),
        jnp.maximum(h1_scr[:, pl.ds(W0, ZW1)], h1_scr[:, pl.ds(W0 + 1, ZW1)]))

    # pool1 2x-downsample + conv2 folded into one dense matmul + bias + ReLU.
    h2_scr[...] = jnp.maximum(
        jnp.dot(z1.astype(bf16), w2_ref[...], preferred_element_type=f32)
        + b2_ref[...], 0.0)

    # 2x2 max-pool #2.
    z2 = jnp.maximum(
        jnp.maximum(h2_scr[:, pl.ds(0, ZW2)], h2_scr[:, pl.ds(1, ZW2)]),
        jnp.maximum(h2_scr[:, pl.ds(W1, ZW2)], h2_scr[:, pl.ds(W1 + 1, ZW2)]))

    # pool2 2x-downsample + torch view(-1,200) flatten folded into fc1; fc2.
    h3 = jnp.maximum(
        jnp.dot(z2.astype(bf16), wf1_ref[...], preferred_element_type=f32)
        + bf1_ref[...], 0.0)
    o_ref[...] = (jnp.dot(h3.astype(bf16), wf2_ref[...],
                          preferred_element_type=f32) + bf2_ref[...])


# ----------------------------------------------------------------------------
# Forward wrapper: single pallas_call, grid over batch blocks.
# ----------------------------------------------------------------------------
def dqn_forward(kp, x_nchw, block_b=None):
    n = x_nchw.shape[0]
    x = x_nchw.reshape(n, IN_W).astype(jnp.float32)   # free NCHW flatten

    if block_b is None:
        # Fill the MXU M / sublane dimension, but keep >= 2 grid blocks when
        # the batch allows (v7x dual TensorCore) and keep VMEM headroom.
        block_b = max(8, min(128, pl.next_power_of_2(max(n // 2, 1))))
    n_pad = pl.cdiv(n, block_b) * block_b
    if n_pad != n:
        x = jnp.pad(x, ((0, n_pad - n), (0, 0)))

    out = pl.pallas_call(
        _dqn_kernel,
        out_shape=jax.ShapeDtypeStruct((n_pad, NOUT2), jnp.float32),
        grid=(n_pad // block_b,),
        in_specs=[
            pl.BlockSpec((block_b, IN_W), lambda i: (i, 0)),    # x block
            pl.BlockSpec((IN_W, L1P), lambda i: (0, 0)),        # conv1 dense (bf16)
            pl.BlockSpec((1, L1P), lambda i: (0, 0)),           # b1 (f32)
            pl.BlockSpec((ZW1, L2P), lambda i: (0, 0)),         # pool1+conv2 dense
            pl.BlockSpec((1, L2P), lambda i: (0, 0)),           # b2
            pl.BlockSpec((ZW2, NOUT1), lambda i: (0, 0)),       # pool2+fc1 dense
            pl.BlockSpec((1, NOUT1), lambda i: (0, 0)),         # bf1
            pl.BlockSpec((NOUT1, NOUT2), lambda i: (0, 0)),     # fc2 weight
            pl.BlockSpec((1, NOUT2), lambda i: (0, 0)),         # bf2
        ],
        out_specs=pl.BlockSpec((block_b, NOUT2), lambda i: (i, 0)),
        scratch_shapes=[
            pltpu.VMEM((block_b, L1P), jnp.float32),   # conv1 post-ReLU
            pltpu.VMEM((block_b, L2P), jnp.float32),   # conv2 post-ReLU
        ],
        compiler_params=pltpu.CompilerParams(
            dimension_semantics=("parallel",),
            vmem_limit_bytes=48 * 1024 * 1024),
    )(x, kp["w1d"], kp["b1d"], kp["w2f"], kp["b2d"],
      kp["wf1f"], kp["bf1"], kp["wf2t"], kp["bf2"])

    return jnp.squeeze(out[:n])     # matches torch.squeeze semantics


# ----------------------------------------------------------------------------
# Parameters: PyTorch default-init style, then folded into kernel layouts.
# ----------------------------------------------------------------------------
def _uniform(key, shape, fan_in):
    bound = 1.0 / math.sqrt(fan_in)
    return jax.random.uniform(key, shape, jnp.float32, -bound, bound)


def init_torch_params(key):
    ks = jax.random.split(key, 8)
    return dict(
        w1=_uniform(ks[0], (C1, CIN, 3, 3), CIN * 9),
        b1=_uniform(ks[1], (C1,), CIN * 9),
        w2=_uniform(ks[2], (C2, C1, 3, 3), C1 * 9),
        b2=_uniform(ks[3], (C2,), C1 * 9),
        wf1=_uniform(ks[4], (NOUT1, 200), 200),
        bf1=_uniform(ks[5], (NOUT1,), 200),
        wf2=_uniform(ks[6], (NOUT2, NOUT1), NOUT1),
        bf2=_uniform(ks[7], (NOUT2,), NOUT1),
    )


def prepare_kernel_params(tp):
    w1 = np.asarray(tp["w1"]); b1 = np.asarray(tp["b1"])
    w2 = np.asarray(tp["w2"]); b2 = np.asarray(tp["b2"])
    wf1 = np.asarray(tp["wf1"])

    # conv1 (3x3, pad 1) on the 3x20x20 input as an exact dense linear map
    # (1200 -> 1632); columns >= 1600 are zero padding for the pool windows.
    w1d = np.zeros((IN_W, L1P), np.float32)
    b1d = np.zeros((1, L1P), np.float32)
    for o in range(C1):
        b1d[0, o * A0:(o + 1) * A0] = b1[o]
        for y in range(H0):
            for x in range(W0):
                col = o * A0 + y * W0 + x
                for c in range(CIN):
                    for ky in range(3):
                        for kx in range(3):
                            iy, ix = y + ky - 1, x + kx - 1
                            if 0 <= iy < H0 and 0 <= ix < W0:
                                w1d[c * A0 + iy * W0 + ix, col] = w1[o, c, ky, kx]

    # pool1 2x-downsample + conv2 folded into a dense (1600 -> 816) map.  Rows
    # use the pre-pool conv1-output layout; only rows the pool selects (even
    # y, even x) are nonzero, so junk lanes from the window max contribute 0.
    w2f = np.zeros((ZW1, L2P), np.float32)
    b2d = np.zeros((1, L2P), np.float32)
    for o in range(C2):
        b2d[0, o * A1:(o + 1) * A1] = b2[o]
        for y in range(H1):
            for x in range(W1):
                col = o * A1 + y * W1 + x
                for c in range(C1):
                    for ky in range(3):
                        for kx in range(3):
                            iy, ix = y + ky - 1, x + kx - 1
                            if 0 <= iy < H1 and 0 <= ix < W1:
                                row = c * A0 + (2 * iy) * W0 + (2 * ix)
                                w2f[row, col] = w2[o, c, ky, kx]

    # pool2 2x-downsample + torch's view(-1, 200) NCHW flatten folded into fc1.
    wf1f = np.zeros((ZW2, NOUT1), np.float32)
    for c in range(C2):
        for i in range(P2):
            for j in range(P2):
                row = c * A1 + (2 * i) * W1 + (2 * j)
                wf1f[row, :] = wf1[:, c * A2 + i * P2 + j]

    bf16 = jnp.bfloat16
    return dict(
        w1d=jnp.asarray(w1d, bf16), b1d=jnp.asarray(b1d),
        w2f=jnp.asarray(w2f, bf16), b2d=jnp.asarray(b2d),
        wf1f=jnp.asarray(wf1f, bf16),
        bf1=jnp.asarray(tp["bf1"]).reshape(1, NOUT1),
        wf2t=jnp.asarray(np.asarray(tp["wf2"]).T, bf16),
        bf2=jnp.asarray(tp["bf2"]).reshape(1, NOUT2),
    )


# ----------------------------------------------------------------------------
# Plain-JAX reference (mirrors the PyTorch module) for a self-check.
# ----------------------------------------------------------------------------
def dqn_reference(tp, x):
    def conv(y, w):
        return lax.conv_general_dilated(
            y, w, window_strides=(1, 1), padding=((1, 1), (1, 1)),
            dimension_numbers=("NCHW", "OIHW", "NCHW"),
            precision=lax.Precision.HIGHEST)

    def pool(y):
        n, c, hh, ww = y.shape
        return y.reshape(n, c, hh // 2, 2, ww // 2, 2).max(axis=(3, 5))

    y = pool(jnp.maximum(conv(x, tp["w1"]) + tp["b1"].reshape(1, -1, 1, 1), 0.0))
    y = pool(jnp.maximum(conv(y, tp["w2"]) + tp["b2"].reshape(1, -1, 1, 1), 0.0))
    v = y.reshape(-1, 200)
    h = jnp.maximum(v @ tp["wf1"].T + tp["bf1"], 0.0)
    return jnp.squeeze(h @ tp["wf2"].T + tp["bf2"])


# ----------------------------------------------------------------------------
if __name__ == "__main__":
    key = jax.random.PRNGKey(0)
    k_params, k_x = jax.random.split(key)

    torch_params = init_torch_params(k_params)
    kparams = prepare_kernel_params(torch_params)

    # fc1(200) = 8 channels * 5 * 5 after two 2x2 pools -> 3x20x20 input, batch 2.
    x = jax.random.normal(k_x, (2, CIN, H0, W0), dtype=jnp.float32)

    out = jax.jit(dqn_forward)(kparams, x)
    out = jax.block_until_ready(out)

    assert out.shape == (2, NOUT2), out.shape
    assert out.dtype == jnp.float32

    ref = dqn_reference(torch_params, x)
    assert jnp.allclose(out, ref, rtol=2e-2, atol=2e-2), \
        float(jnp.max(jnp.abs(out - ref)))

    print("KERNEL_OK")
</pallas_src>

<mosaic_0001>
module attributes {stable_mosaic.version = 11 : i64} {
  func.func @_dqn_kernel(%arg0: i32, %arg1: memref<8x1200xf32, #tpu.memory_space<vmem>>, %arg2: memref<1200x1632xbf16, #tpu.memory_space<vmem>>, %arg3: memref<1x1632xf32, #tpu.memory_space<vmem>>, %arg4: memref<1600x816xbf16, #tpu.memory_space<vmem>>, %arg5: memref<1x816xf32, #tpu.memory_space<vmem>>, %arg6: memref<800x16xbf16, #tpu.memory_space<vmem>>, %arg7: memref<1x16xf32, #tpu.memory_space<vmem>>, %arg8: memref<16x4xbf16, #tpu.memory_space<vmem>>, %arg9: memref<1x4xf32, #tpu.memory_space<vmem>>, %arg10: memref<8x4xf32, #tpu.memory_space<vmem>>, %arg11: memref<8x1632xf32, #tpu.memory_space<vmem>>, %arg12: memref<8x816xf32, #tpu.memory_space<vmem>>) attributes {dimension_semantics = [#tpu.dimension_semantics<parallel>], iteration_bounds = array<i64: 1>, scalar_prefetch = 0 : i64, scratch_operands = 2 : i64, tpu.core_type = #tpu.core_type<tc>, window_params = [{transform_indices = @transform_0, window_bounds = array<i64: 8, 1200>}, {pipeline_mode = #tpu.pipeline_mode<synchronous>, transform_indices = @transform_1, window_bounds = array<i64: 1200, 1632>}, {pipeline_mode = #tpu.pipeline_mode<synchronous>, transform_indices = @transform_2, window_bounds = array<i64: 1, 1632>}, {pipeline_mode = #tpu.pipeline_mode<synchronous>, transform_indices = @transform_3, window_bounds = array<i64: 1600, 816>}, {pipeline_mode = #tpu.pipeline_mode<synchronous>, transform_indices = @transform_4, window_bounds = array<i64: 1, 816>}, {pipeline_mode = #tpu.pipeline_mode<synchronous>, transform_indices = @transform_5, window_bounds = array<i64: 800, 16>}, {pipeline_mode = #tpu.pipeline_mode<synchronous>, transform_indices = @transform_6, window_bounds = array<i64: 1, 16>}, {pipeline_mode = #tpu.pipeline_mode<synchronous>, transform_indices = @transform_7, window_bounds = array<i64: 16, 4>}, {pipeline_mode = #tpu.pipeline_mode<synchronous>, transform_indices = @transform_8, window_bounds = array<i64: 1, 4>}, {transform_indices = @transform_9, window_bounds = array<i64: 8, 4>}]} {
    %c0 = arith.constant 0 : index
    %c0_0 = arith.constant 0 : index
    %0 = vector.load %arg1[%c0, %c0_0] : memref<8x1200xf32, #tpu.memory_space<vmem>>, vector<8x1200xf32>
    %1 = arith.truncf %0 : vector<8x1200xf32> to vector<8x1200xbf16>
    %c0_1 = arith.constant 0 : index
    %c0_2 = arith.constant 0 : index
    %2 = vector.load %arg2[%c0_1, %c0_2] : memref<1200x1632xbf16, #tpu.memory_space<vmem>>, vector<1200x1632xbf16>
    %cst = arith.constant dense<0.000000e+00> : vector<8x1632xf32>
    %3 = tpu.matmul %1, %2, %cst {dimension_numbers = #tpu.dot_dimension_numbers<[1], [0], [0], [1], [0, 0, 1, 1], [], []>} : vector<8x1200xbf16>, vector<1200x1632xbf16>, vector<8x1632xf32> -> vector<8x1632xf32>
    %c0_3 = arith.constant 0 : index
    %c0_4 = arith.constant 0 : index
    %4 = vector.load %arg3[%c0_3, %c0_4] : memref<1x1632xf32, #tpu.memory_space<vmem>>, vector<1x1632xf32>
    %5 = vector.broadcast %4 : vector<1x1632xf32> to vector<8x1632xf32>
    %6 = arith.addf %3, %5 : vector<8x1632xf32>
    %cst_5 = arith.constant 0.000000e+00 : f32
    %7 = vector.broadcast %cst_5 : f32 to vector<8x1632xf32>
    %8 = arith.maximumf %6, %7 : vector<8x1632xf32>
    %c0_6 = arith.constant 0 : index
    %c0_7 = arith.constant 0 : index
    %9 = vector.load %arg11[%c0_6, %c0_7] : memref<8x1632xf32, #tpu.memory_space<vmem>>, vector<8x1632xf32>
    tpu.vector_store %arg11[%c0_6, %c0_7], %8 {strides = array<i32>} : memref<8x1632xf32, #tpu.memory_space<vmem>>, vector<8x1632xf32>,
    %c0_8 = arith.constant 0 : index
    %c0_9 = arith.constant 0 : index
    %10 = vector.load %arg11[%c0_8, %c0_9] : memref<8x1632xf32, #tpu.memory_space<vmem>>, vector<8x1600xf32>
    %c0_10 = arith.constant 0 : index
    %c1 = arith.constant 1 : index
    %11 = vector.load %arg11[%c0_10, %c1] : memref<8x1632xf32, #tpu.memory_space<vmem>>, vector<8x1600xf32>
    %12 = arith.maximumf %10, %11 : vector<8x1600xf32>
    %c0_11 = arith.constant 0 : index
    %c20 = arith.constant 20 : index
    %13 = vector.load %arg11[%c0_11, %c20] : memref<8x1632xf32, #tpu.memory_space<vmem>>, vector<8x1600xf32>
    %c0_12 = arith.constant 0 : index
    %c21 = arith.constant 21 : index
    %14 = vector.load %arg11[%c0_12, %c21] : memref<8x1632xf32, #tpu.memory_space<vmem>>, vector<8x1600xf32>
    %15 = arith.maximumf %13, %14 : vector<8x1600xf32>
    %16 = arith.maximumf %12, %15 : vector<8x1600xf32>
    %17 = arith.truncf %16 : vector<8x1600xf32> to vector<8x1600xbf16>
    %c0_13 = arith.constant 0 : index
    %c0_14 = arith.constant 0 : index
    %18 = vector.load %arg4[%c0_13, %c0_14] : memref<1600x816xbf16, #tpu.memory_space<vmem>>, vector<1600x816xbf16>
    %cst_15 = arith.constant dense<0.000000e+00> : vector<8x816xf32>
    %19 = tpu.matmul %17, %18, %cst_15 {dimension_numbers = #tpu.dot_dimension_numbers<[1], [0], [0], [1], [0, 0, 1, 1], [], []>} : vector<8x1600xbf16>, vector<1600x816xbf16>, vector<8x816xf32> -> vector<8x816xf32>
    %c0_16 = arith.constant 0 : index
    %c0_17 = arith.constant 0 : index
    %20 = vector.load %arg5[%c0_16, %c0_17] : memref<1x816xf32, #tpu.memory_space<vmem>>, vector<1x816xf32>
    %21 = vector.broadcast %20 : vector<1x816xf32> to vector<8x816xf32>
    %22 = arith.addf %19, %21 : vector<8x816xf32>
    %cst_18 = arith.constant 0.000000e+00 : f32
    %23 = vector.broadcast %cst_18 : f32 to vector<8x816xf32>
    %24 = arith.maximumf %22, %23 : vector<8x816xf32>
    %c0_19 = arith.constant 0 : index
    %c0_20 = arith.constant 0 : index
    %25 = vector.load %arg12[%c0_19, %c0_20] : memref<8x816xf32, #tpu.memory_space<vmem>>, vector<8x816xf32>
    tpu.vector_store %arg12[%c0_19, %c0_20], %24 {strides = array<i32>} : memref<8x816xf32, #tpu.memory_space<vmem>>, vector<8x816xf32>,
    %c0_21 = arith.constant 0 : index
    %c0_22 = arith.constant 0 : index
    %26 = vector.load %arg12[%c0_21, %c0_22] : memref<8x816xf32, #tpu.memory_space<vmem>>, vector<8x800xf32>
    %c0_23 = arith.constant 0 : index
    %c1_24 = arith.constant 1 : index
    %27 = vector.load %arg12[%c0_23, %c1_24] : memref<8x816xf32, #tpu.memory_space<vmem>>, vector<8x800xf32>
    %28 = arith.maximumf %26, %27 : vector<8x800xf32>
    %c0_25 = arith.constant 0 : index
    %c10 = arith.constant 10 : index
    %29 = vector.load %arg12[%c0_25, %c10] : memref<8x816xf32, #tpu.memory_space<vmem>>, vector<8x800xf32>
    %c0_26 = arith.constant 0 : index
    %c11 = arith.constant 11 : index
    %30 = vector.load %arg12[%c0_26, %c11] : memref<8x816xf32, #tpu.memory_space<vmem>>, vector<8x800xf32>
    %31 = arith.maximumf %29, %30 : vector<8x800xf32>
    %32 = arith.maximumf %28, %31 : vector<8x800xf32>
    %33 = arith.truncf %32 : vector<8x800xf32> to vector<8x800xbf16>
    %c0_27 = arith.constant 0 : index
    %c0_28 = arith.constant 0 : index
    %34 = vector.load %arg6[%c0_27, %c0_28] : memref<800x16xbf16, #tpu.memory_space<vmem>>, vector<800x16xbf16>
    %cst_29 = arith.constant dense<0.000000e+00> : vector<8x16xf32>
    %35 = tpu.matmul %33, %34, %cst_29 {dimension_numbers = #tpu.dot_dimension_numbers<[1], [0], [0], [1], [0, 0, 1, 1], [], []>} : vector<8x800xbf16>, vector<800x16xbf16>, vector<8x16xf32> -> vector<8x16xf32>
    %c0_30 = arith.constant 0 : index
    %c0_31 = arith.constant 0 : index
    %36 = vector.load %arg7[%c0_30, %c0_31] : memref<1x16xf32, #tpu.memory_space<vmem>>, vector<1x16xf32>
    %37 = vector.broadcast %36 : vector<1x16xf32> to vector<8x16xf32>
    %38 = arith.addf %35, %37 : vector<8x16xf32>
    %cst_32 = arith.constant 0.000000e+00 : f32
    %39 = vector.broadcast %cst_32 : f32 to vector<8x16xf32>
    %40 = arith.maximumf %38, %39 : vector<8x16xf32>
    %41 = arith.truncf %40 : vector<8x16xf32> to vector<8x16xbf16>
    %c0_33 = arith.constant 0 : index
    %c0_34 = arith.constant 0 : index
    %42 = vector.load %arg8[%c0_33, %c0_34] : memref<16x4xbf16, #tpu.memory_space<vmem>>, vector<16x4xbf16>
    %cst_35 = arith.constant dense<0.000000e+00> : vector<8x4xf32>
    %43 = tpu.matmul %41, %42, %cst_35 {dimension_numbers = #tpu.dot_dimension_numbers<[1], [0], [0], [1], [0, 0, 1, 1], [], []>} : vector<8x16xbf16>, vector<16x4xbf16>, vector<8x4xf32> -> vector<8x4xf32>
    %c0_36 = arith.constant 0 : index
    %c0_37 = arith.constant 0 : index
    %44 = vector.load %arg9[%c0_36, %c0_37] : memref<1x4xf32, #tpu.memory_space<vmem>>, vector<1x4xf32>
    %45 = vector.broadcast %44 : vector<1x4xf32> to vector<8x4xf32>
    %46 = arith.addf %43, %45 : vector<8x4xf32>
    %c0_38 = arith.constant 0 : index
    %c0_39 = arith.constant 0 : index
    %47 = vector.load %arg10[%c0_38, %c0_39] : memref<8x4xf32, #tpu.memory_space<vmem>>, vector<8x4xf32>
    tpu.vector_store %arg10[%c0_38, %c0_39], %46 {strides = array<i32>} : memref<8x4xf32, #tpu.memory_space<vmem>>, vector<8x4xf32>,
    return
  }
  func.func @transform_0(%arg0: i32) -> (i32, i32) {
    %c0_i32 = arith.constant 0 : i32
    %c0_i32_0 = arith.constant 0 : i32
    return %arg0, %c0_i32 : i32, i32
  }
  func.func @transform_1(%arg0: i32) -> (i32, i32) {
    %c0_i32 = arith.constant 0 : i32
    %c0_i32_0 = arith.constant 0 : i32
    %c0_i32_1 = arith.constant 0 : i32
    return %c0_i32, %c0_i32_0 : i32, i32
  }
  func.func @transform_2(%arg0: i32) -> (i32, i32) {
    %c0_i32 = arith.constant 0 : i32
    %c0_i32_0 = arith.constant 0 : i32
    %c0_i32_1 = arith.constant 0 : i32
    return %c0_i32, %c0_i32_0 : i32, i32
  }
  func.func @transform_3(%arg0: i32) -> (i32, i32) {
    %c0_i32 = arith.constant 0 : i32
    %c0_i32_0 = arith.constant 0 : i32
    %c0_i32_1 = arith.constant 0 : i32
    return %c0_i32, %c0_i32_0 : i32, i32
  }
  func.func @transform_4(%arg0: i32) -> (i32, i32) {
    %c0_i32 = arith.constant 0 : i32
    %c0_i32_0 = arith.constant 0 : i32
    %c0_i32_1 = arith.constant 0 : i32
    return %c0_i32, %c0_i32_0 : i32, i32
  }
  func.func @transform_5(%arg0: i32) -> (i32, i32) {
    %c0_i32 = arith.constant 0 : i32
    %c0_i32_0 = arith.constant 0 : i32
    %c0_i32_1 = arith.constant 0 : i32
    return %c0_i32, %c0_i32_0 : i32, i32
  }
  func.func @transform_6(%arg0: i32) -> (i32, i32) {
    %c0_i32 = arith.constant 0 : i32
    %c0_i32_0 = arith.constant 0 : i32
    %c0_i32_1 = arith.constant 0 : i32
    return %c0_i32, %c0_i32_0 : i32, i32
  }
  func.func @transform_7(%arg0: i32) -> (i32, i32) {
    %c0_i32 = arith.constant 0 : i32
    %c0_i32_0 = arith.constant 0 : i32
    %c0_i32_1 = arith.constant 0 : i32
    return %c0_i32, %c0_i32_0 : i32, i32
  }
  func.func @transform_8(%arg0: i32) -> (i32, i32) {
    %c0_i32 = arith.constant 0 : i32
    %c0_i32_0 = arith.constant 0 : i32
    %c0_i32_1 = arith.constant 0 : i32
    return %c0_i32, %c0_i32_0 : i32, i32
  }
  func.func @transform_9(%arg0: i32) -> (i32, i32) {
    %c0_i32 = arith.constant 0 : i32
    %c0_i32_0 = arith.constant 0 : i32
    return %arg0, %c0_i32 : i32, i32
  }
}

</mosaic_0001>

<bundles_post_ra>
// kernel: dqn_forward.1
= control target key start
LH: loop header
LB: loop body
LE: loop exit
PB: predicated region body
PF: predicated region fallthrough
CT: control target
= control target key end

     0   :  { %vm6122_vm0 = vcmask 392192   ;;  %s18739_s14 = smov 127   ;;  %vm7635_vm1 = vcmask 1039360   ;;  %s18740_s10 = smov 108   ;;  %vm7713_vm2 = vcmask 883712   ;;  %vm7581_vm3 = vcmask 785408   ;;  %s24752_s1 = inlined_call_operand.vmem [shape: bf16[1200,1632], index: 1, kind: input, shape index: {}]   ;;  %s24753_s0 = inlined_call_operand.vmem [shape: f32[8,1200], index: 0, kind: input, shape index: {}]   ;;  %s24754_s2 = inlined_call_operand.vmem [shape: f32[1,1632], index: 2, kind: input, shape index: {}]   ;;  %s24755_s3 = inlined_call_operand.vmem [shape: bf16[1600,816], index: 3, kind: input, shape index: {}]   ;;  %s24756_s4 = inlined_call_operand.vmem [shape: f32[1,816], index: 4, kind: input, shape index: {}]   ;;  %s24757_s5 = inlined_call_operand.vmem [shape: bf16[800,16], index: 5, kind: input, shape index: {}]   ;;  %s24758_s7 = inlined_call_operand.vmem [shape: bf16[16,4], index: 7, kind: input, shape index: {}]   ;;  %s24759_s6 = inlined_call_operand.vmem [shape: f32[1,16], index: 6, kind: input, shape index: {}]   ;;  %s24760_s8 = inlined_call_operand.vmem [shape: f32[1,4], index: 8, kind: input, shape index: {}]   ;;  %s24761_s9 = inlined_call_operand.vmem [shape: f32[8,4], index: 9, kind: output, shape index: {}]  }
   0x1   :  { %v16250_v0 = vld [vmem:[%s24752_s1 + $0x2dc] ss:$52 sps:$4 sm:$0xff]   ;;  %v16254_v2 = vld [vmem:[%s24752_s1 + $0x2d8] ss:$52 sps:$4 sm:$0xff]   ;;  %v16256_v4 = vld [vmem:[%s24752_s1 + $0x274] ss:$52 sps:$4 sm:$0xff]  }
   0x2   :  { %v16252_v1 = vld [vmem:[%s24752_s1 + $0x95c] ss:$52 sps:$4 sm:$0xff]   ;;  %6126 = vmatprep.subr.bf16.mxu0 %v16250_v0  ;;  %v16255_v3 = vld [vmem:[%s24752_s1 + $0x958] ss:$52 sps:$4 sm:$0xff]   ;;  %v16258_v5 = vld [vmem:[%s24752_s1 + $0x8f4] ss:$52 sps:$4 sm:$0xff]  }
   0x3   :  { %6167 = vmatprep.subr.bf16.mxu1 %v16252_v1  ;;  %6127 = vmatpush1.bf16.msra.mxu0 %v16254_v2  ;;  %v16260_v6 = vld [vmem:[%s24752_s1 + $0x270] ss:$52 sps:$4 sm:$0xff]   ;;  %v16262_v8 = vld [vmem:[%s24752_s1 + $0x20c] ss:$52 sps:$4 sm:$0xff]   ;;  %v16266_v10 = vld [vmem:[%s24752_s1 + $0x208] ss:$52 sps:$4 sm:$0xff]  }
   0x4   :  { %6168 = vmatpush1.bf16.msra.mxu1 %v16255_v3  ;;  %6128 = vmatprep.subr.bf16.mxu0 %v16256_v4  ;;  %v16261_v7 = vld [vmem:[%s24752_s1 + $0x8f0] ss:$52 sps:$4 sm:$0xff]   ;;  %v16264_v9 = vld [vmem:[%s24752_s1 + $0x88c] ss:$52 sps:$4 sm:$0xff]   ;;  %v16267_v11 = vld [vmem:[%s24752_s1 + $0x888] ss:$52 sps:$4 sm:$0xff]  }
   0x5   :  { %6169 = vmatprep.subr.bf16.mxu1 %v16258_v5  ;;  %v16268_v12 = vld [vmem:[%s24752_s1 + $0x1a4] ss:$52 sps:$4 sm:$0xff]   ;;  %v16272_v14 = vld [vmem:[%s24752_s1 + $0x1a0] ss:$52 sps:$4 sm:$0xff]   ;;  %v16274_v16 = vld [vmem:[%s24752_s1 + $0x13c] ss:$52 sps:$4 sm:$0xff]  }
   0x6   :  { %v16270_v13 = vld [vmem:[%s24752_s1 + $0x824] ss:$52 sps:$4 sm:$0xff]   ;;  %v16273_v15 = vld [vmem:[%s24752_s1 + $0x820] ss:$52 sps:$4 sm:$0xff]   ;;  %v16276_v17 = vld [vmem:[%s24752_s1 + $0x7bc] ss:$52 sps:$4 sm:$0xff]  }
   0x7   :  { %6129 = vmatpush1.bf16.msra.mxu0 %v16260_v6  ;;  %v16278_v18 = vld [vmem:[%s24752_s1 + $0x138] ss:$52 sps:$4 sm:$0xff]   ;;  %v16280_v20 = vld [vmem:[%s24752_s1 + $0xd4] ss:$52 sps:$4 sm:$0xff]   ;;  %v16284_v22 = vld [vmem:[%s24752_s1 + $0xd0] ss:$52 sps:$4 sm:$0xff]  }
   0x8   :  { %6170 = vmatpush1.bf16.msra.mxu1 %v16261_v7  ;;  %6130 = vmatprep.subr.bf16.mxu0 %v16262_v8  ;;  %v16279_v19 = vld [vmem:[%s24752_s1 + $0x7b8] ss:$52 sps:$4 sm:$0xff]   ;;  %v16282_v21 = vld [vmem:[%s24752_s1 + $0x754] ss:$52 sps:$4 sm:$0xff]   ;;  %v16285_v23 = vld [vmem:[%s24752_s1 + $0x750] ss:$52 sps:$4 sm:$0xff]  }
   0x9   :  { %6171 = vmatprep.subr.bf16.mxu1 %v16264_v9  ;;  %v16286_v24 = vld [vmem:[%s24752_s1 + $0x6c] ss:$52 sps:$4 sm:$0xff]   ;;  %v16290_v26 = vld [vmem:[%s24752_s1 + $0x68] ss:$52 sps:$4 sm:$0xff]   ;;  %v16292_v28 = vld [vmem:[%s24752_s1 + $0x4] ss:$52 sps:$4 sm:$0xff]  }
   0xa   :  { %v16288_v25 = vld [vmem:[%s24752_s1 + $0x6ec] ss:$52 sps:$4 sm:$0xff]   ;;  %v16291_v27 = vld [vmem:[%s24752_s1 + $0x6e8] ss:$52 sps:$4 sm:$0xff]   ;;  %v16294_v29 = vld [vmem:[%s24752_s1 + $0x684] ss:$52 sps:$4 sm:$0xff]  }
   0xb   :  { %6131 = vmatpush1.bf16.msra.mxu0 %v16266_v10  ;;  %v16296_v30 = vld [vmem:[%s24752_s1] ss:$52 sps:$4 sm:$0xff]   ;;  %v16298_v32 = vld [vmem:[%s24752_s1 + $0x61c] ss:$52 sps:$4 sm:$0xff]   ;;  %v16302_v34 = vld [vmem:[%s24752_s1 + $0x618] ss:$52 sps:$4 sm:$0xff]  }
   0xc   :  { %6172 = vmatpush1.bf16.msra.mxu1 %v16267_v11  ;;  %6132 = vmatprep.subr.bf16.mxu0 %v16268_v12  ;;  %v16297_v31 = vld [vmem:[%s24752_s1 + $0x680] ss:$52 sps:$4 sm:$0xff]   ;;  %v16300_v33 = vld [vmem:[%s24752_s1 + $0xc9c] ss:$52 sps:$4 sm:$0xff]   ;;  %v16303_v35 = vld [vmem:[%s24752_s1 + $0xc98] ss:$52 sps:$4 sm:$0xff]  }
   0xd   :  { %6173 = vmatprep.subr.bf16.mxu1 %v16270_v13  ;;  %v16304_v36 = vld [vmem:[%s24752_s1 + $0x5b4] ss:$52 sps:$4 sm:$0xff]   ;;  %v16308_v38 = vld [vmem:[%s24752_s1 + $0x5b0] ss:$52 sps:$4 sm:$0xff]   ;;  %v16310_v40 = vld [vmem:[%s24752_s1 + $0x54c] ss:$52 sps:$4 sm:$0xff]  }
   0xe   :  { %v16306_v37 = vld [vmem:[%s24752_s1 + $0xc34] ss:$52 sps:$4 sm:$0xff]   ;;  %v16309_v39 = vld [vmem:[%s24752_s1 + $0xc30] ss:$52 sps:$4 sm:$0xff]   ;;  %v16312_v41 = vld [vmem:[%s24752_s1 + $0xbcc] ss:$52 sps:$4 sm:$0xff]  }
   0xf   :  { %6133 = vmatpush1.bf16.msra.mxu0 %v16272_v14  ;;  %v16314_v42 = vld [vmem:[%s24752_s1 + $0x548] ss:$52 sps:$4 sm:$0xff]   ;;  %v16316_v44 = vld [vmem:[%s24752_s1 + $0x4e4] ss:$52 sps:$4 sm:$0xff]   ;;  %v16320_v47 = vld [vmem:[%s24752_s1 + $0x4e0] ss:$52 sps:$4 sm:$0xff]  }
  0x10   :  { %6174 = vmatpush1.bf16.msra.mxu1 %v16273_v15  ;;  %6134 = vmatprep.subr.bf16.mxu0 %v16274_v16  ;;  %v16315_v43 = vld [vmem:[%s24752_s1 + $0xbc8] ss:$52 sps:$4 sm:$0xff]   ;;  %v16318_v45 = vld [vmem:[%s24752_s1 + $0xb64] ss:$52 sps:$4 sm:$0xff]   ;;  %v16321_v50 = vld [vmem:[%s24752_s1 + $0xb60] ss:$52 sps:$4 sm:$0xff]  }
  0x11   :  { %6175 = vmatprep.subr.bf16.mxu1 %v16276_v17  ;;  %v34_v46 = vld [vmem:[%s24753_s0 + $0x8] sm:$0xff]  ;;  %v36_v49 = vld [vmem:[%s24753_s0 + $0x18] sm:$0xff]  ;;  %v16332_v58 = vld [vmem:[%s24752_s1 + $0x410] ss:$52 sps:$4 sm:$0xff]   ;;  %vm12202_vm4 = vcmask 523264   ;;  %vm18743_vm5 = vmmov 0  }
  0x12   :  { %v18939_v48 = vpack.c.bf16 %v34_v46, %v34_v46  ;;  %v16322_v51 = vld [vmem:[%s24752_s1 + $0x47c] ss:$52 sps:$4 sm:$0xff]   ;;  %v18950_v52 = vpack.c.bf16 %v36_v49, %v36_v49  ;;  %v16326_v54 = vld [vmem:[%s24752_s1 + $0x478] ss:$52 sps:$4 sm:$0xff]   ;;  %v16328_v56 = vld [vmem:[%s24752_s1 + $0x414] ss:$52 sps:$4 sm:$0xff]  }
  0x13   :  { %6135 = vmatpush1.bf16.msra.mxu0 %v16278_v18  ;;  %v16324_v53 = vld [vmem:[%s24752_s1 + $0xafc] ss:$52 sps:$4 sm:$0xff]   ;;  %v16327_v55 = vld [vmem:[%s24752_s1 + $0xaf8] ss:$52 sps:$4 sm:$0xff]   ;;  %v16330_v57 = vld [vmem:[%s24752_s1 + $0xa94] ss:$52 sps:$4 sm:$0xff]  }
  0x14   :  { %6176 = vmatpush1.bf16.msra.mxu1 %v16279_v19  ;;  %6136 = vmatprep.subr.bf16.mxu0 %v16280_v20  ;;  %v16333_v59 = vld [vmem:[%s24752_s1 + $0xa90] ss:$52 sps:$4 sm:$0xff]   ;;  %v16334_v60 = vld [vmem:[%s24752_s1 + $0x3ac] ss:$52 sps:$4 sm:$0xff]   ;;  %v16338_v62 = vld [vmem:[%s24752_s1 + $0x3a8] ss:$52 sps:$4 sm:$0xff]  }
  0x15   :  { %6177 = vmatprep.subr.bf16.mxu1 %v16282_v21  ;;  %6158 = vmatprep.mubr.bf16.mxu0 %v18939_v48  ;;  %v16336_v61 = vld [vmem:[%s24752_s1 + $0xa2c] ss:$52 sps:$4 sm:$0xff]   ;;  %v16339_v63 = vld [vmem:[%s24752_s1 + $0xa28] ss:$52 sps:$4 sm:$0xff]   ;;  %v16340_v0 = vld [vmem:[%s24752_s1 + $0x344] ss:$52 sps:$4 sm:$0xff]  }
  0x16   :  { %6199 = vmatprep.mubr.bf16.mxu1 %v18950_v52  ;;  %v16342_v1 = vld [vmem:[%s24752_s1 + $0x9c4] ss:$52 sps:$4 sm:$0xff]   ;;  %v16344_v2 = vld [vmem:[%s24752_s1 + $0x340] ss:$52 sps:$4 sm:$0xff]   ;;  %v16348_v5 = vld [vmem:[%s24752_s1 + $0xfdc] ss:$52 sps:$4 sm:$0xff]  }
  0x17   :  { %6137 = vmatpush1.bf16.msra.mxu0 %v16284_v22  ;;  %v16345_v3 = vld [vmem:[%s24752_s1 + $0x9c0] ss:$52 sps:$4 sm:$0xff]   ;;  %v16351_v7 = vld [vmem:[%s24752_s1 + $0x165c] ss:$52 sps:$4 sm:$0xff]   ;;  %v16346_v9 = vld [vmem:[%s24752_s1 + $0xfd8] ss:$52 sps:$4 sm:$0xff]  }
  0x18   :  { %6178 = vmatpush1.bf16.msra.mxu1 %v16285_v23  ;;  %6138 = vmatprep.subr.bf16.mxu0 %v16286_v24  ;;  %v33_v4 = vld [vmem:[%s24753_s0] sm:$0xff]  ;;  %v35_v6 = vld [vmem:[%s24753_s0 + $0x10] sm:$0xff]  ;;  %v16349_v10 = vld [vmem:[%s24752_s1 + $0x1658] ss:$52 sps:$4 sm:$0xff]   ;;  %s18744_s13 = smov 118   ;;  %vm13430_vm6 = vcmask 965632  }
  0x19   :  { %6179 = vmatprep.subr.bf16.mxu1 %v16288_v25  ;;  %v19011_v8 = vpack.c.bf16 %v33_v4, %v33_v4  ;;  %v19019_v11 = vpack.c.bf16 %v35_v6, %v35_v6  ;;  %v16354_v12 = vld [vmem:[%s24752_s1 + $0xf74] ss:$52 sps:$4 sm:$0xff]   ;;  %v16352_v14 = vld [vmem:[%s24752_s1 + $0xf70] ss:$52 sps:$4 sm:$0xff]   ;;  %v16360_v16 = vld [vmem:[%s24752_s1 + $0xf0c] ss:$52 sps:$4 sm:$0xff]  }
  0x1a   :  { %v16357_v13 = vld [vmem:[%s24752_s1 + $0x15f4] ss:$52 sps:$4 sm:$0xff]   ;;  %v16355_v15 = vld [vmem:[%s24752_s1 + $0x15f0] ss:$52 sps:$4 sm:$0xff]   ;;  %v16363_v17 = vld [vmem:[%s24752_s1 + $0x158c] ss:$52 sps:$4 sm:$0xff]  }
  0x1b   :  { %6139 = vmatpush1.bf16.msra.mxu0 %v16290_v26  ;;  %v16358_v18 = vld [vmem:[%s24752_s1 + $0xf08] ss:$52 sps:$4 sm:$0xff]   ;;  %v16366_v20 = vld [vmem:[%s24752_s1 + $0xea4] ss:$52 sps:$4 sm:$0xff]   ;;  %v16364_v22 = vld [vmem:[%s24752_s1 + $0xea0] ss:$52 sps:$4 sm:$0xff]  }
  0x1c   :  { %6180 = vmatpush1.bf16.msra.mxu1 %v16291_v27  ;;  %6140 = vmatprep.subr.bf16.mxu0 %v16292_v28  ;;  %v16361_v19 = vld [vmem:[%s24752_s1 + $0x1588] ss:$52 sps:$4 sm:$0xff]   ;;  %v16369_v21 = vld [vmem:[%s24752_s1 + $0x1524] ss:$52 sps:$4 sm:$0xff]   ;;  %v16367_v23 = vld [vmem:[%s24752_s1 + $0x1520] ss:$52 sps:$4 sm:$0xff]  }
  0x1d   :  { %6181 = vmatprep.subr.bf16.mxu1 %v16294_v29  ;;  %v16372_v24 = vld [vmem:[%s24752_s1 + $0xe3c] ss:$52 sps:$4 sm:$0xff]   ;;  %v16370_v26 = vld [vmem:[%s24752_s1 + $0xe38] ss:$52 sps:$4 sm:$0xff]   ;;  %v16378_v28 = vld [vmem:[%s24752_s1 + $0xdd4] ss:$52 sps:$4 sm:$0xff]  }
  0x1e   :  { %v16375_v25 = vld [vmem:[%s24752_s1 + $0x14bc] ss:$52 sps:$4 sm:$0xff]   ;;  %v16373_v27 = vld [vmem:[%s24752_s1 + $0x14b8] ss:$52 sps:$4 sm:$0xff]   ;;  %v16381_v29 = vld [vmem:[%s24752_s1 + $0x1454] ss:$52 sps:$4 sm:$0xff]  }
  0x1f   :  { %6141 = vmatpush1.bf16.msra.mxu0 %v16296_v30  ;;  %v16376_v30 = vld [vmem:[%s24752_s1 + $0xdd0] ss:$52 sps:$4 sm:$0xff]   ;;  %v16394_v46 = vld [vmem:[%s24752_s1 + $0x1318] ss:$52 sps:$4 sm:$0xff]   ;;  %v16402_v49 = vld [vmem:[%s24752_s1 + $0x12b4] ss:$52 sps:$4 sm:$0xff]  }
  0x20   :  { %6182 = vmatpush1.bf16.msra.mxu1 %v16297_v31  ;;  %6142 = vmatprep.subr.bf16.mxu0 %v16298_v32  ;;  %v16379_v31 = vld [vmem:[%s24752_s1 + $0x1450] ss:$52 sps:$4 sm:$0xff]   ;;  %v16384_v32 = vld [vmem:[%s24752_s1 + $0xd6c] ss:$52 sps:$4 sm:$0xff]   ;;  %vm13865_vm7 = vcmask 261120   ;;  %vm14046_vm8 = vcmask 130048  }
  0x21   :  { %6183 = vmatprep.subr.bf16.mxu1 %v16300_v33  ;;  %v16387_v33 = vld [vmem:[%s24752_s1 + $0x13ec] ss:$52 sps:$4 sm:$0xff]   ;;  %v16424_v4 = vld [vmem:[%s24752_s1 + $0x1110] ss:$52 sps:$4 sm:$0xff]   ;;  %vm14090_vm9 = vcmask 31744  }
  0x22   :  { %v16432_v6 = vld [vmem:[%s24752_s1 + $0x10ac] ss:$52 sps:$4 sm:$0xff]  }
  0x23   :  { %6143 = vmatpush2.bf16.msra.mxu0 %v16302_v34  ;;  %v38_v34 = vld [vmem:[%s24753_s0 + $0x28] sm:$0xff] }
  0x24   :  { %6184 = vmatpush2.bf16.msra.mxu1 %v16303_v35  ;;  %6144 = vmatprep.subr.bf16.mxu0 %v16304_v36  ;;  %v16382_v35 = vld [vmem:[%s24752_s1 + $0xd68] ss:$52 sps:$4 sm:$0xff]   ;;  %v19095_v36 = vpack.c.bf16 %v38_v34, %v38_v34  ;;  %v16462_v34 = vld [vmem:[%s24752_s1 + $0x1ba4] ss:$52 sps:$4 sm:$0xff]  }
  0x25   :  { %6185 = vmatprep.subr.bf16.mxu1 %v16306_v37  ;;  %v40_v37 = vld [vmem:[%s24753_s0 + $0x38] sm:$0xff] }
  0x27   :  { %6145 = vmatpush2.bf16.msra.mxu0 %v16308_v38  ;;  %v16385_v38 = vld [vmem:[%s24752_s1 + $0x13e8] ss:$52 sps:$4 sm:$0xff]  }
  0x28   :  { %6186 = vmatpush2.bf16.msra.mxu1 %v16309_v39  ;;  %6146 = vmatprep.subr.bf16.mxu0 %v16310_v40  ;;  %v16390_v39 = vld [vmem:[%s24752_s1 + $0xd04] ss:$52 sps:$4 sm:$0xff]   ;;  %v19106_v40 = vpack.c.bf16 %v40_v37, %v40_v37  ;;  %v16460_v37 = vld [vmem:[%s24752_s1 + $0x1ba0] ss:$52 sps:$4 sm:$0xff]  }
  0x29   :  { %6187 = vmatprep.subr.bf16.mxu1 %v16312_v41  ;;  %v16393_v41 = vld [vmem:[%s24752_s1 + $0x1384] ss:$52 sps:$4 sm:$0xff]  }
  0x2b   :  { %6147 = vmatpush2.bf16.msra.mxu0 %v16314_v42  ;;  %v16388_v42 = vld [vmem:[%s24752_s1 + $0xd00] ss:$52 sps:$4 sm:$0xff]  }
  0x2c   :  { %6188 = vmatpush2.bf16.msra.mxu1 %v16315_v43  ;;  %6148 = vmatprep.subr.bf16.mxu0 %v16316_v44  ;;  %v16391_v43 = vld [vmem:[%s24752_s1 + $0x1380] ss:$52 sps:$4 sm:$0xff]   ;;  %v16396_v44 = vld [vmem:[%s24752_s1 + $0x131c] ss:$52 sps:$4 sm:$0xff]  }
  0x2d   :  { %6189 = vmatprep.subr.bf16.mxu1 %v16318_v45  ;;  %v16399_v45 = vld [vmem:[%s24752_s1 + $0x199c] ss:$52 sps:$4 sm:$0xff]  }
  0x2f   :  { %6149 = vmatpush2.bf16.msra.mxu0 %v16320_v47  ;;  %v16397_v47 = vld [vmem:[%s24752_s1 + $0x1998] ss:$52 sps:$4 sm:$0xff]  }
  0x30   :  { %6190 = vmatpush2.bf16.msra.mxu1 %v16321_v50  ;;  %6150 = vmatprep.subr.bf16.mxu0 %v16322_v51  ;;  %v16405_v50 = vld [vmem:[%s24752_s1 + $0x1934] ss:$52 sps:$4 sm:$0xff]   ;;  %v16400_v51 = vld [vmem:[%s24752_s1 + $0x12b0] ss:$52 sps:$4 sm:$0xff]  }
  0x31   :  { %6191 = vmatprep.subr.bf16.mxu1 %v16324_v53  ;;  %v16403_v53 = vld [vmem:[%s24752_s1 + $0x1930] ss:$52 sps:$4 sm:$0xff]  }
  0x33   :  { %6151 = vmatpush2.bf16.msra.mxu0 %v16326_v54  ;;  %v16408_v54 = vld [vmem:[%s24752_s1 + $0x124c] ss:$52 sps:$4 sm:$0xff]  }
  0x34   :  { %6192 = vmatpush2.bf16.msra.mxu1 %v16327_v55  ;;  %6152 = vmatprep.subr.bf16.mxu0 %v16328_v56  ;;  %v16411_v55 = vld [vmem:[%s24752_s1 + $0x18cc] ss:$52 sps:$4 sm:$0xff]   ;;  %v16406_v56 = vld [vmem:[%s24752_s1 + $0x1248] ss:$52 sps:$4 sm:$0xff]  }
  0x35   :  { %6193 = vmatprep.subr.bf16.mxu1 %v16330_v57  ;;  %v16409_v57 = vld [vmem:[%s24752_s1 + $0x18c8] ss:$52 sps:$4 sm:$0xff]  }
  0x37   :  { %6153 = vmatpush2.bf16.msra.mxu0 %v16332_v58  ;;  %v16414_v58 = vld [vmem:[%s24752_s1 + $0x11e4] ss:$52 sps:$4 sm:$0xff]  }
  0x38   :  { %6194 = vmatpush2.bf16.msra.mxu1 %v16333_v59  ;;  %6154 = vmatprep.subr.bf16.mxu0 %v16334_v60  ;;  %v16417_v59 = vld [vmem:[%s24752_s1 + $0x1864] ss:$52 sps:$4 sm:$0xff]   ;;  %v16412_v60 = vld [vmem:[%s24752_s1 + $0x11e0] ss:$52 sps:$4 sm:$0xff]  }
  0x39   :  { %6195 = vmatprep.subr.bf16.mxu1 %v16336_v61  ;;  %v16415_v61 = vld [vmem:[%s24752_s1 + $0x1860] ss:$52 sps:$4 sm:$0xff]  }
  0x3b   :  { %6155 = vmatpush2.bf16.msra.mxu0 %v16338_v62  ;;  %v16420_v62 = vld [vmem:[%s24752_s1 + $0x117c] ss:$52 sps:$4 sm:$0xff]  }
  0x3c   :  { %6196 = vmatpush2.bf16.msra.mxu1 %v16339_v63  ;;  %6156 = vmatprep.subr.bf16.mxu0 %v16340_v0  ;;  %v16423_v63 = vld [vmem:[%s24752_s1 + $0x17fc] ss:$52 sps:$4 sm:$0xff]   ;;  %v16418_v0 = vld [vmem:[%s24752_s1 + $0x1178] ss:$52 sps:$4 sm:$0xff]  }
  0x3d   :  { %6197 = vmatprep.subr.bf16.mxu1 %v16342_v1  ;;  %v16421_v1 = vld [vmem:[%s24752_s1 + $0x17f8] ss:$52 sps:$4 sm:$0xff]  }
  0x3f   :  { %6157 = vmatpush2.bf16.msra.mxu0 %v16344_v2  ;;  %v16426_v2 = vld [vmem:[%s24752_s1 + $0x1114] ss:$52 sps:$4 sm:$0xff]  }
  0x40   :  { %6198 = vmatpush2.bf16.msra.mxu1 %v16345_v3  ;;  %6208 = vmatprep.subr.bf16.mxu0 %v16348_v5  ;;  %v16429_v3 = vld [vmem:[%s24752_s1 + $0x1794] ss:$52 sps:$4 sm:$0xff]   ;;  %v16427_v5 = vld [vmem:[%s24752_s1 + $0x1790] ss:$52 sps:$4 sm:$0xff]  }
  0x41   :  { %6249 = vmatprep.subr.bf16.mxu1 %v16351_v7  ;;  %v16435_v7 = vld [vmem:[%s24752_s1 + $0x172c] ss:$52 sps:$4 sm:$0xff]  }
  0x42   :  { %6159 = vmatmul.mubr.bf16.vlgmr.msra.gmra.mxu0 %v19011_v8 }
  0x43   :  { %6200 = vmatmul.mubr.bf16.vlgmr.msra.gmra.mxu1 %v19019_v11  ;;  %6209 = vmatpush1.bf16.msra.mxu0 %v16346_v9  ;;  %v16430_v9 = vld [vmem:[%s24752_s1 + $0x10a8] ss:$52 sps:$4 sm:$0xff]  }
  0x44   :  { %6250 = vmatpush1.bf16.msra.mxu1 %v16349_v10  ;;  %6210 = vmatprep.subr.bf16.mxu0 %v16354_v12  ;;  %v16433_v10 = vld [vmem:[%s24752_s1 + $0x1728] ss:$52 sps:$4 sm:$0xff]   ;;  %v16438_v12 = vld [vmem:[%s24752_s1 + $0x1044] ss:$52 sps:$4 sm:$0xff]  }
  0x45   :  { %6251 = vmatprep.subr.bf16.mxu1 %v16357_v13  ;;  %6240 = vmatprep.mubr.bf16.mxu0 %v19095_v36  ;;  %v16441_v13 = vld [vmem:[%s24752_s1 + $0x16c4] ss:$52 sps:$4 sm:$0xff]  }
  0x46   :  { %6281 = vmatprep.mubr.bf16.mxu1 %v19106_v40 }
  0x47   :  { %6211 = vmatpush1.bf16.msra.mxu0 %v16352_v14  ;;  %v16436_v14 = vld [vmem:[%s24752_s1 + $0x1040] ss:$52 sps:$4 sm:$0xff]  }
  0x48   :  { %6252 = vmatpush1.bf16.msra.mxu1 %v16355_v15  ;;  %6212 = vmatprep.subr.bf16.mxu0 %v16360_v16  ;;  %v16439_v15 = vld [vmem:[%s24752_s1 + $0x16c0] ss:$52 sps:$4 sm:$0xff]  }
  0x49   :  { %6253 = vmatprep.subr.bf16.mxu1 %v16363_v17  ;;  %v37_v16 = vld [vmem:[%s24753_s0 + $0x20] sm:$0xff]  ;;  %v39_v17 = vld [vmem:[%s24753_s0 + $0x30] sm:$0xff] }
  0x4b   :  { %6213 = vmatpush1.bf16.msra.mxu0 %v16358_v18  ;;  %v16444_v18 = vld [vmem:[%s24752_s1 + $0x1cdc] ss:$52 sps:$4 sm:$0xff]  }
  0x4c   :  { %6254 = vmatpush1.bf16.msra.mxu1 %v16361_v19  ;;  %6214 = vmatprep.subr.bf16.mxu0 %v16366_v20  ;;  %v16447_v19 = vld [vmem:[%s24752_s1 + $0x2e4] ss:$52 sps:$4 sm:$0xff]   ;;  %v19227_v20 = vpack.c.bf16 %v37_v16, %v37_v16  ;;  %v16514_v16 = vld [vmem:[%s24752_s1 + $0x480] ss:$52 sps:$4 sm:$0xff]  }
  0x4d   :  { %6255 = vmatprep.subr.bf16.mxu1 %v16369_v21  ;;  %v19229_v21 = vpack.c.bf16 %v39_v17, %v39_v17  ;;  %v16517_v17 = vld [vmem:[%s24752_s1 + $0x8f8] ss:$52 sps:$4 sm:$0xff]  }
  0x4f   :  { %6215 = vmatpush1.bf16.msra.mxu0 %v16364_v22  ;;  %v42_v22 = vld [vmem:[%s24753_s0 + $0x48] sm:$0xff] }
  0x50   :  { %6256 = vmatpush1.bf16.msra.mxu1 %v16367_v23  ;;  %6216 = vmatprep.subr.bf16.mxu0 %v16372_v24  ;;  %v16442_v23 = vld [vmem:[%s24752_s1 + $0x1cd8] ss:$52 sps:$4 sm:$0xff]   ;;  %v16445_v24 = vld [vmem:[%s24752_s1 + $0x2e0] ss:$52 sps:$4 sm:$0xff]  }
  0x51   :  { %6257 = vmatprep.subr.bf16.mxu1 %v16375_v25  ;;  %v16450_v25 = vld [vmem:[%s24752_s1 + $0x1c74] ss:$52 sps:$4 sm:$0xff]  }
  0x53   :  { %6217 = vmatpush1.bf16.msra.mxu0 %v16370_v26  ;;  %v16453_v26 = vld [vmem:[%s24752_s1 + $0x27c] ss:$52 sps:$4 sm:$0xff]  }
  0x54   :  { %6258 = vmatpush1.bf16.msra.mxu1 %v16373_v27  ;;  %6218 = vmatprep.subr.bf16.mxu0 %v16378_v28  ;;  %v19246_v27 = vpack.c.bf16 %v42_v22, %v42_v22  ;;  %v16448_v28 = vld [vmem:[%s24752_s1 + $0x1c70] ss:$52 sps:$4 sm:$0xff]   ;;  %v16520_v22 = vld [vmem:[%s24752_s1 + $0x418] ss:$52 sps:$4 sm:$0xff]  }
  0x55   :  { %6259 = vmatprep.subr.bf16.mxu1 %v16381_v29  ;;  %v16451_v29 = vld [vmem:[%s24752_s1 + $0x278] ss:$52 sps:$4 sm:$0xff]  }
  0x57   :  { %6219 = vmatpush1.bf16.msra.mxu0 %v16376_v30  ;;  %v16456_v30 = vld [vmem:[%s24752_s1 + $0x1c0c] ss:$52 sps:$4 sm:$0xff]  }
  0x58   :  { %6260 = vmatpush1.bf16.msra.mxu1 %v16379_v31  ;;  %6220 = vmatprep.subr.bf16.mxu0 %v16384_v32  ;;  %v16459_v31 = vld [vmem:[%s24752_s1 + $0x214] ss:$52 sps:$4 sm:$0xff]  }
  0x59   :  { %6261 = vmatprep.subr.bf16.mxu1 %v16387_v33  ;;  %v16454_v32 = vld [vmem:[%s24752_s1 + $0x1c08] ss:$52 sps:$4 sm:$0xff]   ;;  %v16457_v33 = vld [vmem:[%s24752_s1 + $0x210] ss:$52 sps:$4 sm:$0xff]  }
  0x5b   :  { %6221 = vmatpush1.bf16.msra.mxu0 %v16382_v35  ;;  %v16465_v35 = vld [vmem:[%s24752_s1 + $0x1ac] ss:$52 sps:$4 sm:$0xff]  }
  0x5c   :  { %6262 = vmatpush1.bf16.msra.mxu1 %v16385_v38  ;;  %6222 = vmatprep.subr.bf16.mxu0 %v16390_v39  ;;  %v16463_v38 = vld [vmem:[%s24752_s1 + $0x1a8] ss:$52 sps:$4 sm:$0xff]  }
  0x5d   :  { %6263 = vmatprep.subr.bf16.mxu1 %v16393_v41  ;;  %v16468_v39 = vld [vmem:[%s24752_s1 + $0x1b3c] ss:$52 sps:$4 sm:$0xff]   ;;  %v16471_v41 = vld [vmem:[%s24752_s1 + $0x144] ss:$52 sps:$4 sm:$0xff]  }
  0x5f   :  { %6223 = vmatpush1.bf16.msra.mxu0 %v16388_v42  ;;  %v16466_v42 = vld [vmem:[%s24752_s1 + $0x1b38] ss:$52 sps:$4 sm:$0xff]  }
  0x60   :  { %6264 = vmatpush1.bf16.msra.mxu1 %v16391_v43  ;;  %6224 = vmatprep.subr.bf16.mxu0 %v16396_v44  ;;  %v16469_v43 = vld [vmem:[%s24752_s1 + $0x140] ss:$52 sps:$4 sm:$0xff]  }
  0x61   :  { %6265 = vmatprep.subr.bf16.mxu1 %v16399_v45  ;;  %v16474_v44 = vld [vmem:[%s24752_s1 + $0x1ad4] ss:$52 sps:$4 sm:$0xff]   ;;  %v16477_v45 = vld [vmem:[%s24752_s1 + $0xdc] ss:$52 sps:$4 sm:$0xff]  }
  0x63   :  { %6225 = vmatpush2.bf16.msra.mxu0 %v16394_v46  ;;  %v16472_v46 = vld [vmem:[%s24752_s1 + $0x1ad0] ss:$52 sps:$4 sm:$0xff]  }
  0x64   :  { %6266 = vmatpush2.bf16.msra.mxu1 %v16397_v47  ;;  %6226 = vmatprep.subr.bf16.mxu0 %v16402_v49  ;;  %v16475_v47 = vld [vmem:[%s24752_s1 + $0xd8] ss:$52 sps:$4 sm:$0xff]  }
  0x65   :  { %6267 = vmatprep.subr.bf16.mxu1 %v16405_v50  ;;  %v16480_v49 = vld [vmem:[%s24752_s1 + $0x1a6c] ss:$52 sps:$4 sm:$0xff]   ;;  %v16483_v50 = vld [vmem:[%s24752_s1 + $0x74] ss:$52 sps:$4 sm:$0xff]  }
  0x67   :  { %6227 = vmatpush2.bf16.msra.mxu0 %v16400_v51  ;;  %v16478_v51 = vld [vmem:[%s24752_s1 + $0x1a68] ss:$52 sps:$4 sm:$0xff]  }
  0x68   :  { %6268 = vmatpush2.bf16.msra.mxu1 %v16403_v53  ;;  %6228 = vmatprep.subr.bf16.mxu0 %v16408_v54  ;;  %v16481_v53 = vld [vmem:[%s24752_s1 + $0x70] ss:$52 sps:$4 sm:$0xff]  }
  0x69   :  { %6269 = vmatprep.subr.bf16.mxu1 %v16411_v55  ;;  %v16486_v54 = vld [vmem:[%s24752_s1 + $0x1a04] ss:$52 sps:$4 sm:$0xff]   ;;  %v16489_v55 = vld [vmem:[%s24752_s1 + $0xc] ss:$52 sps:$4 sm:$0xff]  }
  0x6b   :  { %6229 = vmatpush2.bf16.msra.mxu0 %v16406_v56  ;;  %v16484_v56 = vld [vmem:[%s24752_s1 + $0x1a00] ss:$52 sps:$4 sm:$0xff]  }
  0x6c   :  { %6270 = vmatpush2.bf16.msra.mxu1 %v16409_v57  ;;  %6230 = vmatprep.subr.bf16.mxu0 %v16414_v58  ;;  %v16487_v57 = vld [vmem:[%s24752_s1 + $0x8] ss:$52 sps:$4 sm:$0xff]  }
  0x6d   :  { %6271 = vmatprep.subr.bf16.mxu1 %v16417_v59  ;;  %v16492_v58 = vld [vmem:[%s24752_s1 + $0x1e14] ss:$52 sps:$4 sm:$0xff]   ;;  %v16495_v59 = vld [vmem:[%s24752_s1 + $0x624] ss:$52 sps:$4 sm:$0xff]  }
  0x6f   :  { %6231 = vmatpush2.bf16.msra.mxu0 %v16412_v60  ;;  %v16490_v60 = vld [vmem:[%s24752_s1 + $0x1e10] ss:$52 sps:$4 sm:$0xff]  }
  0x70   :  { %6272 = vmatpush2.bf16.msra.mxu1 %v16415_v61  ;;  %6232 = vmatprep.subr.bf16.mxu0 %v16420_v62  ;;  %v16493_v61 = vld [vmem:[%s24752_s1 + $0x620] ss:$52 sps:$4 sm:$0xff]  }
  0x71   :  { %6273 = vmatprep.subr.bf16.mxu1 %v16423_v63  ;;  %v16498_v62 = vld [vmem:[%s24752_s1 + $0x1dac] ss:$52 sps:$4 sm:$0xff]   ;;  %v16501_v63 = vld [vmem:[%s24752_s1 + $0x5bc] ss:$52 sps:$4 sm:$0xff]  }
  0x73   :  { %6233 = vmatpush2.bf16.msra.mxu0 %v16418_v0  ;;  %v16496_v0 = vld [vmem:[%s24752_s1 + $0x1da8] ss:$52 sps:$4 sm:$0xff]  }
  0x74   :  { %6274 = vmatpush2.bf16.msra.mxu1 %v16421_v1  ;;  %6234 = vmatprep.subr.bf16.mxu0 %v16426_v2  ;;  %v16499_v1 = vld [vmem:[%s24752_s1 + $0x5b8] ss:$52 sps:$4 sm:$0xff]  }
  0x75   :  { %6275 = vmatprep.subr.bf16.mxu1 %v16429_v3  ;;  %v16504_v2 = vld [vmem:[%s24752_s1 + $0x1d44] ss:$52 sps:$4 sm:$0xff]   ;;  %v16507_v3 = vld [vmem:[%s24752_s1 + $0x554] ss:$52 sps:$4 sm:$0xff]  }
  0x77   :  { %6235 = vmatpush2.bf16.msra.mxu0 %v16424_v4  ;;  %v16502_v4 = vld [vmem:[%s24752_s1 + $0x1d40] ss:$52 sps:$4 sm:$0xff]  }
  0x78   :  { %6276 = vmatpush2.bf16.msra.mxu1 %v16427_v5  ;;  %6236 = vmatprep.subr.bf16.mxu0 %v16432_v6  ;;  %v16505_v5 = vld [vmem:[%s24752_s1 + $0x550] ss:$52 sps:$4 sm:$0xff]  }
  0x79   :  { %6277 = vmatprep.subr.bf16.mxu1 %v16435_v7  ;;  %v41_v6 = vld [vmem:[%s24753_s0 + $0x40] sm:$0xff] }
  0x7a   :  { %v16510_v7 = vld [vmem:[%s24752_s1 + $0x4ec] ss:$52 sps:$4 sm:$0xff]  }
  0x7b   :  { %6237 = vmatpush2.bf16.msra.mxu0 %v16430_v9  ;;  %v16513_v9 = vld [vmem:[%s24752_s1 + $0x964] ss:$52 sps:$4 sm:$0xff]  }
  0x7c   :  { %6278 = vmatpush2.bf16.msra.mxu1 %v16433_v10  ;;  %6238 = vmatprep.subr.bf16.mxu0 %v16438_v12  ;;  %v19376_v10 = vpack.c.bf16 %v41_v6, %v41_v6  ;;  %v16508_v12 = vld [vmem:[%s24752_s1 + $0x4e8] ss:$52 sps:$4 sm:$0xff]   ;;  %v16591_v6 = vld [vmem:[%s24752_s1 + $0x1324] ss:$52 sps:$4 sm:$0xff]  }
  0x7d   :  { %6279 = vmatprep.subr.bf16.mxu1 %v16441_v13  ;;  %v16511_v13 = vld [vmem:[%s24752_s1 + $0x960] ss:$52 sps:$4 sm:$0xff]  }
  0x7f   :  { %6239 = vmatpush2.bf16.msra.mxu0 %v16436_v14  ;;  %v16516_v14 = vld [vmem:[%s24752_s1 + $0x484] ss:$52 sps:$4 sm:$0xff]  }
  0x80   :  { %6280 = vmatpush2.bf16.msra.mxu1 %v16439_v15  ;;  %6290 = vmatprep.subr.bf16.mxu0 %v16444_v18  ;;  %v16519_v15 = vld [vmem:[%s24752_s1 + $0x8fc] ss:$52 sps:$4 sm:$0xff]  }
  0x81   :  { %6331 = vmatprep.subr.bf16.mxu1 %v16447_v19  ;;  %v16522_v18 = vld [vmem:[%s24752_s1 + $0x41c] ss:$52 sps:$4 sm:$0xff]   ;;  %v16525_v19 = vld [vmem:[%s24752_s1 + $0x894] ss:$52 sps:$4 sm:$0xff]  }
  0x82   :  { %6241 = vmatmul.mubr.bf16.vlgmr.msra.gmra.mxu0 %v19227_v20 }
  0x83   :  { %6282 = vmatmul.mubr.bf16.vlgmr.msra.gmra.mxu1 %v19229_v21  ;;  %6291 = vmatpush1.bf16.msra.mxu0 %v16442_v23  ;;  %v16523_v23 = vld [vmem:[%s24752_s1 + $0x890] ss:$52 sps:$4 sm:$0xff]  }
  0x84   :  { %6332 = vmatpush1.bf16.msra.mxu1 %v16445_v24  ;;  %6292 = vmatprep.subr.bf16.mxu0 %v16450_v25  ;;  %v16528_v24 = vld [vmem:[%s24752_s1 + $0x3b4] ss:$52 sps:$4 sm:$0xff]   ;;  %v16531_v25 = vld [vmem:[%s24752_s1 + $0x82c] ss:$52 sps:$4 sm:$0xff]  }
  0x85   :  { %6333 = vmatprep.subr.bf16.mxu1 %v16453_v26  ;;  %15071 = vmatprep.mubr.msk.bf16.mxu0 %vm6122_vm0, %v19246_v27  ;;  %v16526_v26 = vld [vmem:[%s24752_s1 + $0x3b0] ss:$52 sps:$4 sm:$0xff]  }
  0x86   :  { %6363 = vmatprep.mubr.bf16.mxu1 %v18939_v48 }
  0x87   :  { %6293 = vmatpush1.bf16.msra.mxu0 %v16448_v28  ;;  %v16529_v28 = vld [vmem:[%s24752_s1 + $0x828] ss:$52 sps:$4 sm:$0xff]  }
  0x88   :  { %6334 = vmatpush1.bf16.msra.mxu1 %v16451_v29  ;;  %6294 = vmatprep.subr.bf16.mxu0 %v16456_v30  ;;  %v16534_v29 = vld [vmem:[%s24752_s1 + $0x34c] ss:$52 sps:$4 sm:$0xff]   ;;  %v16537_v30 = vld [vmem:[%s24752_s1 + $0x7c4] ss:$52 sps:$4 sm:$0xff]  }
  0x89   :  { %6335 = vmatprep.subr.bf16.mxu1 %v16459_v31  ;;  %v16532_v31 = vld [vmem:[%s24752_s1 + $0x348] ss:$52 sps:$4 sm:$0xff]  }
  0x8b   :  { %6295 = vmatpush1.bf16.msra.mxu0 %v16454_v32  ;;  %v16535_v32 = vld [vmem:[%s24752_s1 + $0x7c0] ss:$52 sps:$4 sm:$0xff]  }
  0x8c   :  { %6336 = vmatpush1.bf16.msra.mxu1 %v16457_v33  ;;  %6296 = vmatprep.subr.bf16.mxu0 %v16462_v34  ;;  %v16540_v33 = vld [vmem:[%s24752_s1 + $0x75c] ss:$52 sps:$4 sm:$0xff]   ;;  %v16543_v34 = vld [vmem:[%s24752_s1 + $0xfe4] ss:$52 sps:$4 sm:$0xff]  }
  0x8d   :  { %6337 = vmatprep.subr.bf16.mxu1 %v16465_v35  ;;  %v16538_v35 = vld [vmem:[%s24752_s1 + $0x758] ss:$52 sps:$4 sm:$0xff]  }
  0x8f   :  { %6297 = vmatpush1.bf16.msra.mxu0 %v16460_v37  ;;  %v16541_v37 = vld [vmem:[%s24752_s1 + $0xfe0] ss:$52 sps:$4 sm:$0xff]  }
  0x90   :  { %6338 = vmatpush1.bf16.msra.mxu1 %v16463_v38  ;;  %6298 = vmatprep.subr.bf16.mxu0 %v16468_v39  ;;  %v16546_v38 = vld [vmem:[%s24752_s1 + $0x6f4] ss:$52 sps:$4 sm:$0xff]   ;;  %v16549_v39 = vld [vmem:[%s24752_s1 + $0xf7c] ss:$52 sps:$4 sm:$0xff]  }
  0x91   :  { %6339 = vmatprep.subr.bf16.mxu1 %v16471_v41  ;;  %v16544_v41 = vld [vmem:[%s24752_s1 + $0x6f0] ss:$52 sps:$4 sm:$0xff]  }
  0x93   :  { %6299 = vmatpush1.bf16.msra.mxu0 %v16466_v42  ;;  %v16547_v42 = vld [vmem:[%s24752_s1 + $0xf78] ss:$52 sps:$4 sm:$0xff]  }
  0x94   :  { %6340 = vmatpush1.bf16.msra.mxu1 %v16469_v43  ;;  %6300 = vmatprep.subr.bf16.mxu0 %v16474_v44  ;;  %v16552_v43 = vld [vmem:[%s24752_s1 + $0x68c] ss:$52 sps:$4 sm:$0xff]   ;;  %v16555_v44 = vld [vmem:[%s24752_s1 + $0xf14] ss:$52 sps:$4 sm:$0xff]  }
  0x95   :  { %6341 = vmatprep.subr.bf16.mxu1 %v16477_v45  ;;  %v16550_v45 = vld [vmem:[%s24752_s1 + $0x688] ss:$52 sps:$4 sm:$0xff]  }
  0x97   :  { %6301 = vmatpush1.bf16.msra.mxu0 %v16472_v46  ;;  %v16553_v46 = vld [vmem:[%s24752_s1 + $0xf10] ss:$52 sps:$4 sm:$0xff]  }
  0x98   :  { %6342 = vmatpush1.bf16.msra.mxu1 %v16475_v47  ;;  %6302 = vmatprep.subr.bf16.mxu0 %v16480_v49  ;;  %v16558_v47 = vld [vmem:[%s24752_s1 + $0xca4] ss:$52 sps:$4 sm:$0xff]   ;;  %v16561_v49 = vld [vmem:[%s24752_s1 + $0xeac] ss:$52 sps:$4 sm:$0xff]  }
  0x99   :  { %6343 = vmatprep.subr.bf16.mxu1 %v16483_v50  ;;  %v16556_v50 = vld [vmem:[%s24752_s1 + $0xca0] ss:$52 sps:$4 sm:$0xff]  }
  0x9b   :  { %6303 = vmatpush1.bf16.msra.mxu0 %v16478_v51  ;;  %v16559_v51 = vld [vmem:[%s24752_s1 + $0xea8] ss:$52 sps:$4 sm:$0xff]  }
  0x9c   :  { %6344 = vmatpush1.bf16.msra.mxu1 %v16481_v53  ;;  %6304 = vmatprep.subr.bf16.mxu0 %v16486_v54  ;;  %v16564_v53 = vld [vmem:[%s24752_s1 + $0xc3c] ss:$52 sps:$4 sm:$0xff]   ;;  %v16567_v54 = vld [vmem:[%s24752_s1 + $0xe44] ss:$52 sps:$4 sm:$0xff]  }
  0x9d   :  { %6345 = vmatprep.subr.bf16.mxu1 %v16489_v55  ;;  %v16562_v55 = vld [vmem:[%s24752_s1 + $0xc38] ss:$52 sps:$4 sm:$0xff]  }
  0x9f   :  { %6305 = vmatpush1.bf16.msra.mxu0 %v16484_v56  ;;  %v16565_v56 = vld [vmem:[%s24752_s1 + $0xe40] ss:$52 sps:$4 sm:$0xff]  }
  0xa0   :  { %6346 = vmatpush1.bf16.msra.mxu1 %v16487_v57  ;;  %6316 = vmatprep.subr.bf16.mxu0 %v16492_v58  ;;  %v16570_v57 = vld [vmem:[%s24752_s1 + $0xbd4] ss:$52 sps:$4 sm:$0xff]   ;;  %v16573_v58 = vld [vmem:[%s24752_s1 + $0xddc] ss:$52 sps:$4 sm:$0xff]  }
  0xa1   :  { %6347 = vmatprep.subr.bf16.mxu1 %v16495_v59  ;;  %v16568_v59 = vld [vmem:[%s24752_s1 + $0xbd0] ss:$52 sps:$4 sm:$0xff]  }
  0xa3   :  { %6317 = vmatpush2.bf16.msra.mxu0 %v16490_v60  ;;  %v16571_v60 = vld [vmem:[%s24752_s1 + $0xdd8] ss:$52 sps:$4 sm:$0xff]  }
  0xa4   :  { %6348 = vmatpush2.bf16.msra.mxu1 %v16493_v61  ;;  %6318 = vmatprep.subr.bf16.mxu0 %v16498_v62  ;;  %v16576_v61 = vld [vmem:[%s24752_s1 + $0xb6c] ss:$52 sps:$4 sm:$0xff]   ;;  %v16579_v62 = vld [vmem:[%s24752_s1 + $0xd74] ss:$52 sps:$4 sm:$0xff]  }
  0xa5   :  { %6349 = vmatprep.subr.bf16.mxu1 %v16501_v63  ;;  %v16574_v63 = vld [vmem:[%s24752_s1 + $0xb68] ss:$52 sps:$4 sm:$0xff]  }
  0xa7   :  { %6319 = vmatpush2.bf16.msra.mxu0 %v16496_v0  ;;  %v16577_v0 = vld [vmem:[%s24752_s1 + $0xd70] ss:$52 sps:$4 sm:$0xff]  }
  0xa8   :  { %6350 = vmatpush2.bf16.msra.mxu1 %v16499_v1  ;;  %6320 = vmatprep.subr.bf16.mxu0 %v16504_v2  ;;  %v16582_v1 = vld [vmem:[%s24752_s1 + $0xb04] ss:$52 sps:$4 sm:$0xff]   ;;  %v16585_v2 = vld [vmem:[%s24752_s1 + $0xd0c] ss:$52 sps:$4 sm:$0xff]  }
  0xa9   :  { %6351 = vmatprep.subr.bf16.mxu1 %v16507_v3  ;;  %v16580_v3 = vld [vmem:[%s24752_s1 + $0xb00] ss:$52 sps:$4 sm:$0xff]  }
  0xab   :  { %6321 = vmatpush2.bf16.msra.mxu0 %v16502_v4  ;;  %v16583_v4 = vld [vmem:[%s24752_s1 + $0xd08] ss:$52 sps:$4 sm:$0xff]  }
  0xac   :  { %6352 = vmatpush2.bf16.msra.mxu1 %v16505_v5  ;;  %6372 = vmatprep.subr.bf16.mxu0 %v16513_v9  ;;  %v16588_v5 = vld [vmem:[%s24752_s1 + $0xa9c] ss:$52 sps:$4 sm:$0xff]   ;;  %v16589_v9 = vld [vmem:[%s24752_s1 + $0x1320] ss:$52 sps:$4 sm:$0xff]  }
  0xad   :  { %6353 = vmatprep.subr.bf16.mxu1 %v16510_v7  ;;  %v16586_v7 = vld [vmem:[%s24752_s1 + $0xa98] ss:$52 sps:$4 sm:$0xff]  }
  0xae   :  { %6323 = vmatmul.mubr.bf16.vlgmr.msra.gmra.mxu0 %v19376_v10 }
  0xaf   :  { %6373 = vmatpush1.bf16.msra.mxu0 %v16511_v13  ;;  %6404 = vmatprep.mubr.bf16.mxu0 %v18950_v52  ;;  %v16597_v13 = vld [vmem:[%s24752_s1 + $0x12bc] ss:$52 sps:$4 sm:$0xff]  }
  0xb0   :  { %6354 = vmatpush2.bf16.msra.mxu1 %v16508_v12  ;;  %6374 = vmatprep.subr.bf16.mxu0 %v16519_v15  ;;  %v16594_v12 = vld [vmem:[%s24752_s1 + $0xa34] ss:$52 sps:$4 sm:$0xff]   ;;  %v16595_v15 = vld [vmem:[%s24752_s1 + $0x12b8] ss:$52 sps:$4 sm:$0xff]  }
  0xb1   :  { %6355 = vmatprep.subr.bf16.mxu1 %v16516_v14  ;;  %v16592_v14 = vld [vmem:[%s24752_s1 + $0xa30] ss:$52 sps:$4 sm:$0xff]  }
  0xb3   :  { %6375 = vmatpush1.bf16.msra.mxu0 %v16517_v17  ;;  %v16603_v17 = vld [vmem:[%s24752_s1 + $0x1254] ss:$52 sps:$4 sm:$0xff]  }
  0xb4   :  { %6356 = vmatpush2.bf16.msra.mxu1 %v16514_v16  ;;  %6376 = vmatprep.subr.bf16.mxu0 %v16525_v19  ;;  %v16600_v16 = vld [vmem:[%s24752_s1 + $0x9cc] ss:$52 sps:$4 sm:$0xff]   ;;  %v16601_v19 = vld [vmem:[%s24752_s1 + $0x1250] ss:$52 sps:$4 sm:$0xff]  }
  0xb5   :  { %6357 = vmatprep.subr.bf16.mxu1 %v16522_v18  ;;  %v16598_v18 = vld [vmem:[%s24752_s1 + $0x9c8] ss:$52 sps:$4 sm:$0xff]  }
  0xb7   :  { %6377 = vmatpush1.bf16.msra.mxu0 %v16523_v23  ;;  %v16609_v23 = vld [vmem:[%s24752_s1 + $0x1664] ss:$52 sps:$4 sm:$0xff]  }
  0xb8   :  { %6358 = vmatpush2.bf16.msra.mxu1 %v16520_v22  ;;  %6378 = vmatprep.subr.bf16.mxu0 %v16531_v25  ;;  %v16606_v22 = vld [vmem:[%s24752_s1 + $0x11ec] ss:$52 sps:$4 sm:$0xff]  }
  0xb9   :  { %6359 = vmatprep.subr.bf16.mxu1 %v16528_v24  ;;  %v16604_v24 = vld [vmem:[%s24752_s1 + $0x11e8] ss:$52 sps:$4 sm:$0xff]   ;;  %v16607_v25 = vld [vmem:[%s24752_s1 + $0x1660] ss:$52 sps:$4 sm:$0xff]  }
  0xbb   :  { %6379 = vmatpush1.bf16.msra.mxu0 %v16529_v28  ;;  %v16615_v28 = vld [vmem:[%s24752_s1 + $0x15fc] ss:$52 sps:$4 sm:$0xff]  }
  0xbc   :  { %6360 = vmatpush2.bf16.msra.mxu1 %v16526_v26  ;;  %6380 = vmatprep.subr.bf16.mxu0 %v16537_v30  ;;  %v16612_v26 = vld [vmem:[%s24752_s1 + $0x1184] ss:$52 sps:$4 sm:$0xff]  }
  0xbd   :  { %6361 = vmatprep.subr.bf16.mxu1 %v16534_v29  ;;  %v16610_v29 = vld [vmem:[%s24752_s1 + $0x1180] ss:$52 sps:$4 sm:$0xff]   ;;  %v16613_v30 = vld [vmem:[%s24752_s1 + $0x15f8] ss:$52 sps:$4 sm:$0xff]  }
  0xbf   :  { %6381 = vmatpush1.bf16.msra.mxu0 %v16535_v32  ;;  %v16621_v32 = vld [vmem:[%s24752_s1 + $0x1594] ss:$52 sps:$4 sm:$0xff]  }
  0xc0   :  { %6362 = vmatpush2.bf16.msra.mxu1 %v16532_v31  ;;  %6382 = vmatprep.subr.bf16.mxu0 %v16540_v33  ;;  %v16618_v31 = vld [vmem:[%s24752_s1 + $0x111c] ss:$52 sps:$4 sm:$0xff]   ;;  %v16616_v33 = vld [vmem:[%s24752_s1 + $0x1118] ss:$52 sps:$4 sm:$0xff]  }
  0xc1   :  { %6413 = vmatprep.subr.bf16.mxu1 %v16543_v34  ;;  %v16619_v34 = vld [vmem:[%s24752_s1 + $0x1590] ss:$52 sps:$4 sm:$0xff]  }
  0xc3   :  { %6364 = vmatmul.mubr.bf16.vlgmr.msra.gmra.mxu1 %v19011_v8  ;;  %6383 = vmatpush1.bf16.msra.mxu0 %v16538_v35  ;;  %v16624_v35 = vld [vmem:[%s24752_s1 + $0x10b4] ss:$52 sps:$4 sm:$0xff]  }
  0xc4   :  { %6414 = vmatpush1.bf16.msra.mxu1 %v16541_v37  ;;  %6384 = vmatprep.subr.bf16.mxu0 %v16546_v38  ;;  %v1107_v37 = vlaneseq  ;;  %v16627_v38 = vld [vmem:[%s24752_s1 + $0x152c] ss:$52 sps:$4 sm:$0xff]  }
  0xc5   :  { %6415 = vmatprep.subr.bf16.mxu1 %v16549_v39  ;;  %6445 = vmatprep.mubr.bf16.mxu1 %v19095_v36  ;;  %v16622_v39 = vld [vmem:[%s24752_s1 + $0x10b0] ss:$52 sps:$4 sm:$0xff]  }
  0xc7   :  { %6385 = vmatpush1.bf16.msra.mxu0 %v16544_v41  ;;  %v16625_v41 = vld [vmem:[%s24752_s1 + $0x1528] ss:$52 sps:$4 sm:$0xff]  }
  0xc8   :  { %6416 = vmatpush1.bf16.msra.mxu1 %v16547_v42  ;;  %6386 = vmatprep.subr.bf16.mxu0 %v16552_v43  ;;  %v16630_v42 = vld [vmem:[%s24752_s1 + $0x104c] ss:$52 sps:$4 sm:$0xff]   ;;  %v19621_v43 = vshrl.u32 %v1107_v37, 7  ;;  %v16678_v37 = vld [vmem:[%s24752_s1 + $0x1804] ss:$52 sps:$4 sm:$0xff]  }
  0xc9   :  { %6417 = vmatprep.subr.bf16.mxu1 %v16555_v44  ;;  %v16633_v44 = vld [vmem:[%s24752_s1 + $0x14c4] ss:$52 sps:$4 sm:$0xff]  }
  0xcb   :  { %6387 = vmatpush1.bf16.msra.mxu0 %v16550_v45  ;;  %v16628_v45 = vld [vmem:[%s24752_s1 + $0x1048] ss:$52 sps:$4 sm:$0xff]  }
  0xcc   :  { %6418 = vmatpush1.bf16.msra.mxu1 %v16553_v46  ;;  %6388 = vmatprep.subr.bf16.mxu0 %v16558_v47  ;;  %v16631_v46 = vld [vmem:[%s24752_s1 + $0x14c0] ss:$52 sps:$4 sm:$0xff]  }
  0xcd   :  { %6419 = vmatprep.subr.bf16.mxu1 %v16561_v49  ;;  %v1103_v47 = vld [vmem:[%s24754_s2] sm:$0xff]  ;;  %v19636_v49 = vsub.s32 0, %v19621_v43 }
  0xcf   :  { %6389 = vmatpush2.bf16.msra.mxu0 %v16556_v50  ;;  %v16636_v50 = vld [vmem:[%s24752_s1 + $0x145c] ss:$52 sps:$4 sm:$0xff]  }
  0xd0   :  { %6420 = vmatpush1.bf16.msra.mxu1 %v16559_v51  ;;  %6390 = vmatprep.subr.bf16.mxu0 %v16564_v53  ;;  %v16639_v51 = vld [vmem:[%s24752_s1 + $0x1ce4] ss:$52 sps:$4 sm:$0xff]   ;;  %v19645_v53 = vsub.s32 1, %v19621_v43 }
  0xd1   :  { %6421 = vmatprep.subr.bf16.mxu1 %v16567_v54  ;;  %v16634_v54 = vld [vmem:[%s24752_s1 + $0x1458] ss:$52 sps:$4 sm:$0xff]  }
  0xd3   :  { %6391 = vmatpush2.bf16.msra.mxu0 %v16562_v55  ;;  %v1110_v55 = vrot.slane %v1103_v47, %v19636_v49 }
  0xd4   :  { %6422 = vmatpush1.bf16.msra.mxu1 %v16565_v56  ;;  %6392 = vmatprep.subr.bf16.mxu0 %v16570_v57  ;;  %v16637_v56 = vld [vmem:[%s24752_s1 + $0x1ce0] ss:$52 sps:$4 sm:$0xff]  }
  0xd5   :  { %6423 = vmatprep.subr.bf16.mxu1 %v16573_v58  ;;  %v16642_v57 = vld [vmem:[%s24752_s1 + $0x13f4] ss:$52 sps:$4 sm:$0xff]   ;;  %v16645_v58 = vld [vmem:[%s24752_s1 + $0x1c7c] ss:$52 sps:$4 sm:$0xff]  }
  0xd7   :  { %6393 = vmatpush2.bf16.msra.mxu0 %v16568_v59  ;;  %v1114_v59 = vrot.slane %v1103_v47, %v19645_v53  ;;  %v16690_v47 = vld [vmem:[%s24752_s1 + $0x1734] ss:$52 sps:$4 sm:$0xff]  }
  0xd8   :  { %6424 = vmatpush1.bf16.msra.mxu1 %v16571_v60  ;;  %6394 = vmatprep.subr.bf16.mxu0 %v16576_v61 }
  0xd9   :  { %6425 = vmatprep.subr.bf16.mxu1 %v16579_v62  ;;  %v16640_v62 = vld [vmem:[%s24752_s1 + $0x13f0] ss:$52 sps:$4 sm:$0xff]  }
  0xdb   :  { %6395 = vmatpush2.bf16.msra.mxu0 %v16574_v63 }
  0xdc   :  { %6426 = vmatpush1.bf16.msra.mxu1 %v16577_v0  ;;  %6396 = vmatprep.subr.bf16.mxu0 %v16582_v1  ;;  %v16643_v0 = vld [vmem:[%s24752_s1 + $0x1c78] ss:$52 sps:$4 sm:$0xff]  }
  0xdd   :  { %6427 = vmatprep.subr.bf16.mxu1 %v16585_v2  ;;  %v16648_v1 = vld [vmem:[%s24752_s1 + $0x138c] ss:$52 sps:$4 sm:$0xff]  }
  0xdf   :  { %6397 = vmatpush2.bf16.msra.mxu0 %v16580_v3 }
  0xe0   :  { %6428 = vmatpush1.bf16.msra.mxu1 %v16583_v4  ;;  %6398 = vmatprep.subr.bf16.mxu0 %v16588_v5  ;;  %v16651_v4 = vld [vmem:[%s24752_s1 + $0x1c14] ss:$52 sps:$4 sm:$0xff]  }
  0xe1   :  { %6429 = vmatprep.subr.bf16.mxu1 %v16591_v6 }
  0xe3   :  { %6399 = vmatpush2.bf16.msra.mxu0 %v16586_v7 }
  0xe4   :  { %6430 = vmatpush2.bf16.msra.mxu1 %v16589_v9  ;;  %6400 = vmatprep.subr.bf16.mxu0 %v16594_v12  ;;  %v16646_v9 = vld [vmem:[%s24752_s1 + $0x1388] ss:$52 sps:$4 sm:$0xff]  }
  0xe5   :  { %6431 = vmatprep.subr.bf16.mxu1 %v16597_v13 }
  0xe7   :  { %6401 = vmatpush2.bf16.msra.mxu0 %v16592_v14  ;;  %v16649_v14 = vld [vmem:[%s24752_s1 + $0x1c10] ss:$52 sps:$4 sm:$0xff]  }
  0xe8   :  { %6432 = vmatpush2.bf16.msra.mxu1 %v16595_v15  ;;  %6402 = vmatprep.subr.bf16.mxu0 %v16600_v16  ;;  %v16654_v15 = vld [vmem:[%s24752_s1 + $0x19a4] ss:$52 sps:$4 sm:$0xff]  }
  0xe9   :  { %6433 = vmatprep.subr.bf16.mxu1 %v16603_v17  ;;  %v16657_v17 = vld [vmem:[%s24752_s1 + $0x1bac] ss:$52 sps:$4 sm:$0xff]  }
  0xeb   :  { %6403 = vmatpush2.bf16.msra.mxu0 %v16598_v18 }
  0xec   :  { %6434 = vmatpush2.bf16.msra.mxu1 %v16601_v19  ;;  %6454 = vmatprep.subr.bf16.mxu0 %v16609_v23  ;;  %v16652_v19 = vld [vmem:[%s24752_s1 + $0x19a0] ss:$52 sps:$4 sm:$0xff]   ;;  %v16660_v23 = vld [vmem:[%s24752_s1 + $0x193c] ss:$52 sps:$4 sm:$0xff]  }
  0xed   :  { %6435 = vmatprep.subr.bf16.mxu1 %v16606_v22  ;;  %v16655_v22 = vld [vmem:[%s24752_s1 + $0x1ba8] ss:$52 sps:$4 sm:$0xff]  }
  0xee   :  { %6405 = vmatmul.mubr.bf16.vlgmr.msra.gmra.mxu0 %v19019_v11 }
  0xef   :  { %6455 = vmatpush1.bf16.msra.mxu0 %v16607_v25  ;;  %6486 = vmatprep.mubr.bf16.mxu0 %v19106_v40  ;;  %v16658_v25 = vld [vmem:[%s24752_s1 + $0x1938] ss:$52 sps:$4 sm:$0xff]  }
  0xf0   :  { %6436 = vmatpush2.bf16.msra.mxu1 %v16604_v24  ;;  %6456 = vmatprep.subr.bf16.mxu0 %v16615_v28  ;;  %v16663_v24 = vld [vmem:[%s24752_s1 + $0x1b44] ss:$52 sps:$4 sm:$0xff]   ;;  %v16666_v28 = vld [vmem:[%s24752_s1 + $0x18d4] ss:$52 sps:$4 sm:$0xff]  }
  0xf1   :  { %6437 = vmatprep.subr.bf16.mxu1 %v16612_v26  ;;  %v16661_v26 = vld [vmem:[%s24752_s1 + $0x1b40] ss:$52 sps:$4 sm:$0xff]  }
  0xf3   :  { %6457 = vmatpush1.bf16.msra.mxu0 %v16613_v30  ;;  %v16664_v30 = vld [vmem:[%s24752_s1 + $0x18d0] ss:$52 sps:$4 sm:$0xff]  }
  0xf4   :  { %6438 = vmatpush2.bf16.msra.mxu1 %v16610_v29  ;;  %6458 = vmatprep.subr.bf16.mxu0 %v16621_v32  ;;  %v16669_v29 = vld [vmem:[%s24752_s1 + $0x1adc] ss:$52 sps:$4 sm:$0xff]   ;;  %v16672_v32 = vld [vmem:[%s24752_s1 + $0x186c] ss:$52 sps:$4 sm:$0xff]  }
  0xf5   :  { %6439 = vmatprep.subr.bf16.mxu1 %v16618_v31  ;;  %v16667_v31 = vld [vmem:[%s24752_s1 + $0x1ad8] ss:$52 sps:$4 sm:$0xff]  }
  0xf7   :  { %6459 = vmatpush1.bf16.msra.mxu0 %v16619_v34  ;;  %v16670_v34 = vld [vmem:[%s24752_s1 + $0x1868] ss:$52 sps:$4 sm:$0xff]  }
  0xf8   :  { %6440 = vmatpush2.bf16.msra.mxu1 %v16616_v33  ;;  %6460 = vmatprep.subr.bf16.mxu0 %v16627_v38  ;;  %v16675_v33 = vld [vmem:[%s24752_s1 + $0x1a74] ss:$52 sps:$4 sm:$0xff]   ;;  %v16681_v38 = vld [vmem:[%s24752_s1 + $0x1a0c] ss:$52 sps:$4 sm:$0xff]  }
  0xf9   :  { %6441 = vmatprep.subr.bf16.mxu1 %v16624_v35  ;;  %v16673_v35 = vld [vmem:[%s24752_s1 + $0x1a70] ss:$52 sps:$4 sm:$0xff]  }
  0xfb   :  { %6461 = vmatpush1.bf16.msra.mxu0 %v16625_v41  ;;  %v16679_v41 = vld [vmem:[%s24752_s1 + $0x1a08] ss:$52 sps:$4 sm:$0xff]  }
  0xfc   :  { %6442 = vmatpush2.bf16.msra.mxu1 %v16622_v39  ;;  %6462 = vmatprep.subr.bf16.mxu0 %v16633_v44  ;;  %v16676_v39 = vld [vmem:[%s24752_s1 + $0x1800] ss:$52 sps:$4 sm:$0xff]   ;;  %v16687_v44 = vld [vmem:[%s24752_s1 + $0x1e1c] ss:$52 sps:$4 sm:$0xff]  }
  0xfd   :  { %6443 = vmatprep.subr.bf16.mxu1 %v16630_v42  ;;  %v16684_v42 = vld [vmem:[%s24752_s1 + $0x179c] ss:$52 sps:$4 sm:$0xff]  }
  0xff   :  { %6463 = vmatpush1.bf16.msra.mxu0 %v16631_v46  ;;  %v16685_v46 = vld [vmem:[%s24752_s1 + $0x1e18] ss:$52 sps:$4 sm:$0xff]  }
 0x100   :  { %6444 = vmatpush2.bf16.msra.mxu1 %v16628_v45  ;;  %6464 = vmatprep.subr.bf16.mxu0 %v16636_v50  ;;  %v16682_v45 = vld [vmem:[%s24752_s1 + $0x1798] ss:$52 sps:$4 sm:$0xff]   ;;  %v16693_v50 = vld [vmem:[%s24752_s1 + $0x1db4] ss:$52 sps:$4 sm:$0xff]  }
 0x101   :  { %6495 = vmatprep.subr.bf16.mxu1 %v16639_v51  ;;  %v16688_v51 = vld [vmem:[%s24752_s1 + $0x1730] ss:$52 sps:$4 sm:$0xff]  }
 0x102   :  { %v6160_v60 = vpop.f32.mrf.mxu0 }
 0x103   :  { %6446 = vmatmul.mubr.bf16.vlgmr.msra.gmra.mxu1 %v19227_v20  ;;  %v6201_v61 = vpop.f32.mrf.mxu1  ;;  %v6161_v63 = vadd.f32 %v6160_v60, %v1110_v55  ;;  %6465 = vmatpush1.bf16.msra.mxu0 %v16634_v54  ;;  %v16691_v54 = vld [vmem:[%s24752_s1 + $0x1db0] ss:$52 sps:$4 sm:$0xff]   ;;  %v16696_v55 = vld [vmem:[%s24752_s1 + $0x16cc] ss:$52 sps:$4 sm:$0xff]  }
 0x104   :  { %6496 = vmatpush1.bf16.msra.mxu1 %v16637_v56  ;;  %v6162_v2 = vpop.f32.mrf.mxu0  ;;  %6466 = vmatprep.subr.bf16.mxu0 %v16642_v57  ;;  %v16699_v56 = vld [vmem:[%s24752_s1 + $0x1d4c] ss:$52 sps:$4 sm:$0xff]   ;;  %v16694_v57 = vld [vmem:[%s24752_s1 + $0x16c8] ss:$52 sps:$4 sm:$0xff]  }
 0x105   :  { %v6203_v3 = vpop.f32.mrf.mxu1  ;;  %6497 = vmatprep.subr.bf16.mxu1 %v16645_v58  ;;  %v6163_v5 = vadd.f32 %v6162_v2, %v1114_v59  ;;  %v19674_v6 = vadd.f32 %v6201_v61, %v6161_v63  ;;  %15072 = vmatprep.mubr.msk.bf16.mxu1 %vm6122_vm0, %v19246_v27  ;;  %v16697_v58 = vld [vmem:[%s24752_s1 + $0x1d48] ss:$52 sps:$4 sm:$0xff]   ;;  %v16702_v59 = vld [vmem:[%s24752_s1 + $0x2ec] ss:$52 sps:$4 sm:$0xff]   ;;  %v16708_v63 = vld [vmem:[%s24752_s1 + $0x284] ss:$52 sps:$4 sm:$0xff]  }
 0x106   :  { %v6164_v7 = vpop.f32.mrf.mxu0  ;;  %v16705_v60 = vld [vmem:[%s24752_s1 + $0x96c] ss:$52 sps:$4 sm:$0xff]   ;;  %v16700_v61 = vld [vmem:[%s24752_s1 + $0x2e8] ss:$52 sps:$4 sm:$0xff]  }
 0x107   :  { %v6205_v12 = vpop.f32.mrf.mxu1  ;;  %v19681_v13 = vadd.f32 %v6203_v3, %v6163_v5  ;;  %6467 = vmatpush1.bf16.msra.mxu0 %v16640_v62  ;;  %v16703_v62 = vld [vmem:[%s24752_s1 + $0x968] ss:$52 sps:$4 sm:$0xff]   ;;  %v16709_v2 = vld [vmem:[%s24752_s1 + $0x900] ss:$52 sps:$4 sm:$0xff]   ;;  %v16712_v5 = vld [vmem:[%s24752_s1 + $0x218] ss:$52 sps:$4 sm:$0xff]  }
 0x108   :  { %6498 = vmatpush1.bf16.msra.mxu1 %v16643_v0  ;;  %v6165_v16 = vpop.f32.mrf.mxu0  ;;  %6468 = vmatprep.subr.bf16.mxu0 %v16648_v1  ;;  %v16711_v0 = vld [vmem:[%s24752_s1 + $0x904] ss:$52 sps:$4 sm:$0xff]   ;;  %v16706_v1 = vld [vmem:[%s24752_s1 + $0x280] ss:$52 sps:$4 sm:$0xff]   ;;  %v16714_v3 = vld [vmem:[%s24752_s1 + $0x21c] ss:$52 sps:$4 sm:$0xff]  }
 0x109   :  { %6499 = vmatprep.subr.bf16.mxu1 %v16651_v4  ;;  %v6206_v18 = vpop.f32.mrf.mxu1  ;;  %v16717_v4 = vld [vmem:[%s24752_s1 + $0x89c] ss:$52 sps:$4 sm:$0xff]   ;;  %v16715_v7 = vld [vmem:[%s24752_s1 + $0x898] ss:$52 sps:$4 sm:$0xff]   ;;  %v16723_v12 = vld [vmem:[%s24752_s1 + $0x834] ss:$52 sps:$4 sm:$0xff]  }
 0x10a   :  { %v16726_v16 = vld [vmem:[%s24752_s1 + $0x14c] ss:$52 sps:$4 sm:$0xff]   ;;  %v16724_v18 = vld [vmem:[%s24752_s1 + $0x148] ss:$52 sps:$4 sm:$0xff]  }
 0x10b   :  { %6469 = vmatpush1.bf16.msra.mxu0 %v16646_v9  ;;  %v16720_v9 = vld [vmem:[%s24752_s1 + $0x1b4] ss:$52 sps:$4 sm:$0xff]  }
 0x10c   :  { %6500 = vmatpush1.bf16.msra.mxu1 %v16649_v14  ;;  %6470 = vmatprep.subr.bf16.mxu0 %v16654_v15  ;;  %v16718_v14 = vld [vmem:[%s24752_s1 + $0x1b0] ss:$52 sps:$4 sm:$0xff]  }
 0x10d   :  { %6501 = vmatprep.subr.bf16.mxu1 %v16657_v17  ;;  %v16721_v15 = vld [vmem:[%s24752_s1 + $0x830] ss:$52 sps:$4 sm:$0xff]   ;;  %v16729_v17 = vld [vmem:[%s24752_s1 + $0x7cc] ss:$52 sps:$4 sm:$0xff]  }
 0x10f   :  { %6471 = vmatpush2.bf16.msra.mxu0 %v16652_v19  ;;  %v16727_v19 = vld [vmem:[%s24752_s1 + $0x7c8] ss:$52 sps:$4 sm:$0xff]  }
 0x110   :  { %6502 = vmatpush1.bf16.msra.mxu1 %v16655_v22  ;;  %6472 = vmatprep.subr.bf16.mxu0 %v16660_v23  ;;  %v16732_v22 = vld [vmem:[%s24752_s1 + $0xe4] ss:$52 sps:$4 sm:$0xff]  }
 0x111   :  { %6503 = vmatprep.subr.bf16.mxu1 %v16663_v24  ;;  %v16735_v23 = vld [vmem:[%s24752_s1 + $0x764] ss:$52 sps:$4 sm:$0xff]   ;;  %v16730_v24 = vld [vmem:[%s24752_s1 + $0xe0] ss:$52 sps:$4 sm:$0xff]  }
 0x113   :  { %6473 = vmatpush2.bf16.msra.mxu0 %v16658_v25  ;;  %v16733_v25 = vld [vmem:[%s24752_s1 + $0x760] ss:$52 sps:$4 sm:$0xff]  }
 0x114   :  { %6504 = vmatpush1.bf16.msra.mxu1 %v16661_v26  ;;  %6474 = vmatprep.subr.bf16.mxu0 %v16666_v28  ;;  %v16738_v26 = vld [vmem:[%s24752_s1 + $0x7c] ss:$52 sps:$4 sm:$0xff]  }
 0x115   :  { %6505 = vmatprep.subr.bf16.mxu1 %v16669_v29  ;;  %v16741_v28 = vld [vmem:[%s24752_s1 + $0x6fc] ss:$52 sps:$4 sm:$0xff]   ;;  %v16736_v29 = vld [vmem:[%s24752_s1 + $0x78] ss:$52 sps:$4 sm:$0xff]  }
 0x117   :  { %6475 = vmatpush2.bf16.msra.mxu0 %v16664_v30  ;;  %v16739_v30 = vld [vmem:[%s24752_s1 + $0x6f8] ss:$52 sps:$4 sm:$0xff]  }
 0x118   :  { %6506 = vmatpush1.bf16.msra.mxu1 %v16667_v31  ;;  %6476 = vmatprep.subr.bf16.mxu0 %v16672_v32 }
 0x119   :  { %6507 = vmatprep.subr.bf16.mxu1 %v16675_v33 }
 0x11b   :  { %6477 = vmatpush2.bf16.msra.mxu0 %v16670_v34 }
 0x11c   :  { %6508 = vmatpush1.bf16.msra.mxu1 %v16673_v35  ;;  %6478 = vmatprep.subr.bf16.mxu0 %v16678_v37  ;;  %v16744_v35 = vld [vmem:[%s24752_s1 + $0x14] ss:$52 sps:$4 sm:$0xff]  }
 0x11d   :  { %6509 = vmatprep.subr.bf16.mxu1 %v16681_v38  ;;  %v16747_v37 = vld [vmem:[%s24752_s1 + $0x694] ss:$52 sps:$4 sm:$0xff]  }
 0x11f   :  { %6479 = vmatpush2.bf16.msra.mxu0 %v16676_v39 }
 0x120   :  { %6510 = vmatpush1.bf16.msra.mxu1 %v16679_v41  ;;  %6480 = vmatprep.subr.bf16.mxu0 %v16684_v42  ;;  %v16742_v41 = vld [vmem:[%s24752_s1 + $0x10] ss:$52 sps:$4 sm:$0xff]  }
 0x121   :  { %6521 = vmatprep.subr.bf16.mxu1 %v16687_v44  ;;  %v16745_v42 = vld [vmem:[%s24752_s1 + $0x690] ss:$52 sps:$4 sm:$0xff]  }
 0x123   :  { %6481 = vmatpush2.bf16.msra.mxu0 %v16682_v45  ;;  %v16750_v45 = vld [vmem:[%s24752_s1 + $0x62c] ss:$52 sps:$4 sm:$0xff]  }
 0x124   :  { %6522 = vmatpush2.bf16.msra.mxu1 %v16685_v46  ;;  %6482 = vmatprep.subr.bf16.mxu0 %v16690_v47  ;;  %v16753_v46 = vld [vmem:[%s24752_s1 + $0xcac] ss:$52 sps:$4 sm:$0xff]  }
 0x125   :  { %6523 = vmatprep.subr.bf16.mxu1 %v16693_v50  ;;  %v16748_v50 = vld [vmem:[%s24752_s1 + $0x628] ss:$52 sps:$4 sm:$0xff]  }
 0x127   :  { %6483 = vmatpush2.bf16.msra.mxu0 %v16688_v51  ;;  %v16751_v51 = vld [vmem:[%s24752_s1 + $0xca8] ss:$52 sps:$4 sm:$0xff]  }
 0x128   :  { %6524 = vmatpush2.bf16.msra.mxu1 %v16691_v54  ;;  %6484 = vmatprep.subr.bf16.mxu0 %v16696_v55  ;;  %v16756_v54 = vld [vmem:[%s24752_s1 + $0x5c4] ss:$52 sps:$4 sm:$0xff]  }
 0x129   :  { %6525 = vmatprep.subr.bf16.mxu1 %v16699_v56  ;;  %v16759_v55 = vld [vmem:[%s24752_s1 + $0xc44] ss:$52 sps:$4 sm:$0xff]   ;;  %v16754_v56 = vld [vmem:[%s24752_s1 + $0x5c0] ss:$52 sps:$4 sm:$0xff]  }
 0x12b   :  { %6485 = vmatpush2.bf16.msra.mxu0 %v16694_v57  ;;  %v16757_v57 = vld [vmem:[%s24752_s1 + $0xc40] ss:$52 sps:$4 sm:$0xff]  }
 0x12c   :  { %6526 = vmatpush2.bf16.msra.mxu1 %v16697_v58  ;;  %6536 = vmatprep.subr.bf16.mxu0 %v16702_v59  ;;  %v16762_v58 = vld [vmem:[%s24752_s1 + $0x55c] ss:$52 sps:$4 sm:$0xff]  }
 0x12d   :  { %6577 = vmatprep.subr.bf16.mxu1 %v16705_v60  ;;  %v16765_v59 = vld [vmem:[%s24752_s1 + $0xbdc] ss:$52 sps:$4 sm:$0xff]   ;;  %v16760_v60 = vld [vmem:[%s24752_s1 + $0x558] ss:$52 sps:$4 sm:$0xff]  }
 0x12e   :  { %6487 = vmatmul.mubr.bf16.vlgmr.msra.gmra.mxu0 %v19229_v21 }
 0x12f   :  { %6528 = vmatmul.mubr.bf16.vlgmr.msra.gmra.mxu1 %v19376_v10  ;;  %6537 = vmatpush1.bf16.msra.mxu0 %v16700_v61  ;;  %v16763_v61 = vld [vmem:[%s24752_s1 + $0xbd8] ss:$52 sps:$4 sm:$0xff]  }
 0x130   :  { %6578 = vmatpush1.bf16.msra.mxu1 %v16703_v62  ;;  %6538 = vmatprep.subr.bf16.mxu0 %v16708_v63  ;;  %v16768_v62 = vld [vmem:[%s24752_s1 + $0x4f4] ss:$52 sps:$4 sm:$0xff]  }
 0x131   :  { %6579 = vmatprep.subr.bf16.mxu1 %v16711_v0  ;;  %6568 = vmatprep.mubr.bf16.mxu0 %v18939_v48  ;;  %v16771_v63 = vld [vmem:[%s24752_s1 + $0xb74] ss:$52 sps:$4 sm:$0xff]   ;;  %v16766_v0 = vld [vmem:[%s24752_s1 + $0x4f0] ss:$52 sps:$4 sm:$0xff]  }
 0x132   :  { %6609 = vmatprep.mubr.bf16.mxu1 %v18950_v52 }
 0x133   :  { %6539 = vmatpush1.bf16.msra.mxu0 %v16706_v1  ;;  %v16769_v1 = vld [vmem:[%s24752_s1 + $0xb70] ss:$52 sps:$4 sm:$0xff]  }
 0x134   :  { %6580 = vmatpush1.bf16.msra.mxu1 %v16709_v2  ;;  %6540 = vmatprep.subr.bf16.mxu0 %v16714_v3  ;;  %v16774_v2 = vld [vmem:[%s24752_s1 + $0x48c] ss:$52 sps:$4 sm:$0xff]  }
 0x135   :  { %6581 = vmatprep.subr.bf16.mxu1 %v16717_v4  ;;  %v16777_v3 = vld [vmem:[%s24752_s1 + $0xb0c] ss:$52 sps:$4 sm:$0xff]   ;;  %v16772_v4 = vld [vmem:[%s24752_s1 + $0x488] ss:$52 sps:$4 sm:$0xff]  }
 0x137   :  { %6541 = vmatpush1.bf16.msra.mxu0 %v16712_v5  ;;  %v16775_v5 = vld [vmem:[%s24752_s1 + $0xb08] ss:$52 sps:$4 sm:$0xff]  }
 0x138   :  { %6582 = vmatpush1.bf16.msra.mxu1 %v16715_v7  ;;  %6542 = vmatprep.subr.bf16.mxu0 %v16720_v9  ;;  %v16780_v7 = vld [vmem:[%s24752_s1 + $0x424] ss:$52 sps:$4 sm:$0xff]  }
 0x139   :  { %6583 = vmatprep.subr.bf16.mxu1 %v16723_v12  ;;  %v16783_v9 = vld [vmem:[%s24752_s1 + $0xaa4] ss:$52 sps:$4 sm:$0xff]   ;;  %v16778_v12 = vld [vmem:[%s24752_s1 + $0x420] ss:$52 sps:$4 sm:$0xff]  }
 0x13b   :  { %6543 = vmatpush1.bf16.msra.mxu0 %v16718_v14  ;;  %v16781_v14 = vld [vmem:[%s24752_s1 + $0xaa0] ss:$52 sps:$4 sm:$0xff]  }
 0x13c   :  { %6584 = vmatpush1.bf16.msra.mxu1 %v16721_v15  ;;  %6544 = vmatprep.subr.bf16.mxu0 %v16726_v16  ;;  %v16786_v15 = vld [vmem:[%s24752_s1 + $0x3bc] ss:$52 sps:$4 sm:$0xff]  }
 0x13d   :  { %6585 = vmatprep.subr.bf16.mxu1 %v16729_v17  ;;  %v16789_v16 = vld [vmem:[%s24752_s1 + $0xa3c] ss:$52 sps:$4 sm:$0xff]   ;;  %v16784_v17 = vld [vmem:[%s24752_s1 + $0x3b8] ss:$52 sps:$4 sm:$0xff]  }
 0x13f   :  { %6545 = vmatpush1.bf16.msra.mxu0 %v16724_v18  ;;  %v16787_v18 = vld [vmem:[%s24752_s1 + $0xa38] ss:$52 sps:$4 sm:$0xff]  }
 0x140   :  { %6586 = vmatpush1.bf16.msra.mxu1 %v16727_v19  ;;  %6546 = vmatprep.subr.bf16.mxu0 %v16732_v22  ;;  %v16792_v19 = vld [vmem:[%s24752_s1 + $0x354] ss:$52 sps:$4 sm:$0xff]  }
 0x141   :  { %6587 = vmatprep.subr.bf16.mxu1 %v16735_v23  ;;  %v16795_v22 = vld [vmem:[%s24752_s1 + $0x9d4] ss:$52 sps:$4 sm:$0xff]   ;;  %v16790_v23 = vld [vmem:[%s24752_s1 + $0x350] ss:$52 sps:$4 sm:$0xff]  }
 0x142   :  { %v19870_v31 = vpop.f32.mrf.mxu0 }
 0x143   :  { %v19872_v32 = vpop.f32.mrf.mxu1  ;;  %6547 = vmatpush1.bf16.msra.mxu0 %v16730_v24  ;;  %v16793_v24 = vld [vmem:[%s24752_s1 + $0x9d0] ss:$52 sps:$4 sm:$0xff]  }
 0x144   :  { %6588 = vmatpush1.bf16.msra.mxu1 %v16733_v25  ;;  %v19874_v33 = vpop.f32.mrf.mxu0  ;;  %6548 = vmatprep.subr.bf16.mxu0 %v16738_v26  ;;  %v16798_v25 = vld [vmem:[%s24752_s1 + $0xfec] ss:$52 sps:$4 sm:$0xff]  }
 0x145   :  { %v19876_v34 = vpop.f32.mrf.mxu1  ;;  %6589 = vmatprep.subr.bf16.mxu1 %v16741_v28  ;;  %v16801_v26 = vld [vmem:[%s24752_s1 + $0x166c] ss:$52 sps:$4 sm:$0xff]   ;;  %v6243_v28 = vadd.f32 %v19870_v31, %v19674_v6  ;;  %v16807_v6 = vld [vmem:[%s24752_s1 + $0x1604] ss:$52 sps:$4 sm:$0xff]  }
 0x146   :  { %v6246_v38 = vpop.f32.mrf.mxu0 }
 0x147   :  { %v6287_v39 = vpop.f32.mrf.mxu1  ;;  %6549 = vmatpush1.bf16.msra.mxu0 %v16736_v29  ;;  %v16796_v29 = vld [vmem:[%s24752_s1 + $0xfe8] ss:$52 sps:$4 sm:$0xff]   ;;  %v6284_v31 = vadd.f32 %v19872_v32, %v6243_v28  ;;  %v16802_v38 = vld [vmem:[%s24752_s1 + $0xf80] ss:$52 sps:$4 sm:$0xff]   ;;  %v16855_v28 = vld [vmem:[%s24752_s1 + $0x1944] ss:$52 sps:$4 sm:$0xff]  }
 0x148   :  { %6590 = vmatpush1.bf16.msra.mxu1 %v16739_v30  ;;  %v6247_v44 = vpop.f32.mrf.mxu0  ;;  %6550 = vmatprep.subr.bf16.mxu0 %v16744_v35  ;;  %v16799_v30 = vld [vmem:[%s24752_s1 + $0x1668] ss:$52 sps:$4 sm:$0xff]   ;;  %v6245_v35 = vadd.f32 %v19874_v33, %v19681_v13  ;;  %v16805_v13 = vld [vmem:[%s24752_s1 + $0x1600] ss:$52 sps:$4 sm:$0xff]  }
 0x149   :  { %6591 = vmatprep.subr.bf16.mxu1 %v16747_v37  ;;  %v6288_v47 = vpop.f32.mrf.mxu1  ;;  %v16804_v37 = vld [vmem:[%s24752_s1 + $0xf84] ss:$52 sps:$4 sm:$0xff]   ;;  %v16810_v32 = vld [vmem:[%s24752_s1 + $0xf1c] ss:$52 sps:$4 sm:$0xff]  }
 0x14a   :  { %v6286_v39 = vadd.f32 %v19876_v34, %v6245_v35  ;;  %v16813_v44 = vld [vmem:[%s24752_s1 + $0x159c] ss:$52 sps:$4 sm:$0xff]   ;;  %v16808_v34 = vld [vmem:[%s24752_s1 + $0xf18] ss:$52 sps:$4 sm:$0xff]  }
 0x14b   :  { %6551 = vmatpush1.bf16.msra.mxu0 %v16742_v41  ;;  %v16811_v47 = vld [vmem:[%s24752_s1 + $0x1598] ss:$52 sps:$4 sm:$0xff]   ;;  %v16858_v35 = vld [vmem:[%s24752_s1 + $0x125c] ss:$52 sps:$4 sm:$0xff]  }
 0x14c   :  { %6592 = vmatpush1.bf16.msra.mxu1 %v16745_v42  ;;  %6552 = vmatprep.subr.bf16.mxu0 %v16750_v45 }
 0x14d   :  { %6593 = vmatprep.subr.bf16.mxu1 %v16753_v46 }
 0x14f   :  { %6553 = vmatpush2.bf16.msra.mxu0 %v16748_v50 }
 0x150   :  { %6594 = vmatpush2.bf16.msra.mxu1 %v16751_v51  ;;  %6554 = vmatprep.subr.bf16.mxu0 %v16756_v54 }
 0x151   :  { %6595 = vmatprep.subr.bf16.mxu1 %v16759_v55  ;;  %v16816_v55 = vld [vmem:[%s24752_s1 + $0xeb4] ss:$52 sps:$4 sm:$0xff]  }
 0x153   :  { %6555 = vmatpush2.bf16.msra.mxu0 %v16754_v56  ;;  %v16819_v56 = vld [vmem:[%s24752_s1 + $0x1534] ss:$52 sps:$4 sm:$0xff]  }
 0x154   :  { %6596 = vmatpush2.bf16.msra.mxu1 %v16757_v57  ;;  %6556 = vmatprep.subr.bf16.mxu0 %v16762_v58  ;;  %v16814_v57 = vld [vmem:[%s24752_s1 + $0xeb0] ss:$52 sps:$4 sm:$0xff]  }
 0x155   :  { %6597 = vmatprep.subr.bf16.mxu1 %v16765_v59  ;;  %v16817_v58 = vld [vmem:[%s24752_s1 + $0x1530] ss:$52 sps:$4 sm:$0xff]   ;;  %v16822_v59 = vld [vmem:[%s24752_s1 + $0xe4c] ss:$52 sps:$4 sm:$0xff]  }
 0x157   :  { %6557 = vmatpush2.bf16.msra.mxu0 %v16760_v60  ;;  %v16825_v60 = vld [vmem:[%s24752_s1 + $0x14cc] ss:$52 sps:$4 sm:$0xff]  }
 0x158   :  { %6598 = vmatpush2.bf16.msra.mxu1 %v16763_v61  ;;  %6558 = vmatprep.subr.bf16.mxu0 %v16768_v62  ;;  %v16820_v61 = vld [vmem:[%s24752_s1 + $0xe48] ss:$52 sps:$4 sm:$0xff]  }
 0x159   :  { %6599 = vmatprep.subr.bf16.mxu1 %v16771_v63  ;;  %v16823_v62 = vld [vmem:[%s24752_s1 + $0x14c8] ss:$52 sps:$4 sm:$0xff]   ;;  %v16828_v63 = vld [vmem:[%s24752_s1 + $0xde4] ss:$52 sps:$4 sm:$0xff]  }
 0x15b   :  { %6559 = vmatpush2.bf16.msra.mxu0 %v16766_v0  ;;  %v16831_v0 = vld [vmem:[%s24752_s1 + $0x1464] ss:$52 sps:$4 sm:$0xff]  }
 0x15c   :  { %6600 = vmatpush2.bf16.msra.mxu1 %v16769_v1  ;;  %6560 = vmatprep.subr.bf16.mxu0 %v16774_v2  ;;  %v16826_v1 = vld [vmem:[%s24752_s1 + $0xde0] ss:$52 sps:$4 sm:$0xff]  }
 0x15d   :  { %6601 = vmatprep.subr.bf16.mxu1 %v16777_v3  ;;  %v16829_v2 = vld [vmem:[%s24752_s1 + $0x1460] ss:$52 sps:$4 sm:$0xff]   ;;  %v16834_v3 = vld [vmem:[%s24752_s1 + $0xd7c] ss:$52 sps:$4 sm:$0xff]  }
 0x15f   :  { %6561 = vmatpush2.bf16.msra.mxu0 %v16772_v4  ;;  %v16837_v4 = vld [vmem:[%s24752_s1 + $0x13fc] ss:$52 sps:$4 sm:$0xff]  }
 0x160   :  { %6602 = vmatpush2.bf16.msra.mxu1 %v16775_v5  ;;  %6562 = vmatprep.subr.bf16.mxu0 %v16780_v7  ;;  %v16832_v7 = vld [vmem:[%s24752_s1 + $0xd78] ss:$52 sps:$4 sm:$0xff]  }
 0x161   :  { %6603 = vmatprep.subr.bf16.mxu1 %v16783_v9  ;;  %v16835_v9 = vld [vmem:[%s24752_s1 + $0x13f8] ss:$52 sps:$4 sm:$0xff]  }
 0x163   :  { %6563 = vmatpush2.bf16.msra.mxu0 %v16778_v12  ;;  %v16840_v12 = vld [vmem:[%s24752_s1 + $0xd14] ss:$52 sps:$4 sm:$0xff]  }
 0x164   :  { %6604 = vmatpush2.bf16.msra.mxu1 %v16781_v14  ;;  %6564 = vmatprep.subr.bf16.mxu0 %v16786_v15  ;;  %v16843_v14 = vld [vmem:[%s24752_s1 + $0x1394] ss:$52 sps:$4 sm:$0xff]  }
 0x165   :  { %6605 = vmatprep.subr.bf16.mxu1 %v16789_v16 }
 0x167   :  { %6565 = vmatpush2.bf16.msra.mxu0 %v16784_v17  ;;  %v16838_v17 = vld [vmem:[%s24752_s1 + $0xd10] ss:$52 sps:$4 sm:$0xff]  }
 0x168   :  { %6606 = vmatpush2.bf16.msra.mxu1 %v16787_v18  ;;  %6566 = vmatprep.subr.bf16.mxu0 %v16792_v19  ;;  %v16841_v18 = vld [vmem:[%s24752_s1 + $0x1390] ss:$52 sps:$4 sm:$0xff]   ;;  %v16846_v19 = vld [vmem:[%s24752_s1 + $0x132c] ss:$52 sps:$4 sm:$0xff]  }
 0x169   :  { %6607 = vmatprep.subr.bf16.mxu1 %v16795_v22  ;;  %v16849_v22 = vld [vmem:[%s24752_s1 + $0x19ac] ss:$52 sps:$4 sm:$0xff]  }
 0x16b   :  { %6567 = vmatpush2.bf16.msra.mxu0 %v16790_v23 }
 0x16c   :  { %6608 = vmatpush2.bf16.msra.mxu1 %v16793_v24  ;;  %6618 = vmatprep.subr.bf16.mxu0 %v16798_v25  ;;  %v16844_v24 = vld [vmem:[%s24752_s1 + $0x1328] ss:$52 sps:$4 sm:$0xff]  }
 0x16d   :  { %6659 = vmatprep.subr.bf16.mxu1 %v16801_v26  ;;  %v16847_v25 = vld [vmem:[%s24752_s1 + $0x19a8] ss:$52 sps:$4 sm:$0xff]   ;;  %v16852_v26 = vld [vmem:[%s24752_s1 + $0x12c4] ss:$52 sps:$4 sm:$0xff]  }
 0x16e   :  { %v6324_v33 = vpop.f32.mrf.mxu0  ;;  %6569 = vmatmul.mubr.bf16.vlgmr.msra.gmra.mxu0 %v19011_v8 }
 0x16f   :  { %6610 = vmatmul.mubr.bf16.vlgmr.msra.gmra.mxu1 %v19019_v11  ;;  %v6325_v41 = vadd.f32 %v6324_v33, %v6284_v31  ;;  %6619 = vmatpush1.bf16.msra.mxu0 %v16796_v29  ;;  %v16850_v29 = vld [vmem:[%s24752_s1 + $0x12c0] ss:$52 sps:$4 sm:$0xff]   ;;  %v16859_v31 = vld [vmem:[%s24752_s1 + $0x18d8] ss:$52 sps:$4 sm:$0xff]   ;;  %v16862_v33 = vld [vmem:[%s24752_s1 + $0x11f0] ss:$52 sps:$4 sm:$0xff]  }
 0x170   :  { %6660 = vmatpush1.bf16.msra.mxu1 %v16799_v30  ;;  %v6326_v42 = vpop.f32.mrf.mxu0  ;;  %6620 = vmatprep.subr.bf16.mxu0 %v16804_v37  ;;  %v16853_v30 = vld [vmem:[%s24752_s1 + $0x1940] ss:$52 sps:$4 sm:$0xff]   ;;  %v16861_v37 = vld [vmem:[%s24752_s1 + $0x18dc] ss:$52 sps:$4 sm:$0xff]  }
 0x171   :  { %6661 = vmatprep.subr.bf16.mxu1 %v16807_v6  ;;  %v7556_v45 = vmax.f32 %v6325_v41, 0.0  ;;  %v6327_v46 = vadd.f32 %v6326_v42, %v6286_v39  ;;  %6650 = vmatprep.mubr.bf16.mxu0 %v19095_v36  ;;  %v16856_v6 = vld [vmem:[%s24752_s1 + $0x1258] ss:$52 sps:$4 sm:$0xff]   ;;  %v16865_v39 = vld [vmem:[%s24752_s1 + $0x1870] ss:$52 sps:$4 sm:$0xff]  }
 0x172   :  { %6691 = vmatprep.mubr.bf16.mxu1 %v19106_v40  ;;  %v6328_v50 = vpop.f32.mrf.mxu0  ;;  %v16870_v41 = vld [vmem:[%s24752_s1 + $0x118c] ss:$52 sps:$4 sm:$0xff]  }
 0x173   :  { %7569 = vst [vmem:[#allocation2] sm:$0xff] %v7556_v45  ;;  %v7557_v51 = vmax.f32 %v6327_v46, 0.0  ;;  %6621 = vmatpush1.bf16.msra.mxu0 %v16802_v38  ;;  %v16864_v38 = vld [vmem:[%s24752_s1 + $0x11f4] ss:$52 sps:$4 sm:$0xff]   ;;  %v16873_v42 = vld [vmem:[%s24752_s1 + $0x180c] ss:$52 sps:$4 sm:$0xff]  }
 0x174   :  { %6662 = vmatpush1.bf16.msra.mxu1 %v16805_v13  ;;  %v6329_v54 = vpop.f32.mrf.mxu0  ;;  %6622 = vmatprep.subr.bf16.mxu0 %v16810_v32  ;;  %v16867_v13 = vld [vmem:[%s24752_s1 + $0x1874] ss:$52 sps:$4 sm:$0xff]   ;;  %v16876_v45 = vld [vmem:[%s24752_s1 + $0x1124] ss:$52 sps:$4 sm:$0xff]   ;;  %v16882_v50 = vld [vmem:[%s24752_s1 + $0x10bc] ss:$52 sps:$4 sm:$0xff]  }
 0x175   :  { %6663 = vmatprep.subr.bf16.mxu1 %v16813_v44  ;;  %7570 = vst [vmem:[#allocation2 + $0x8] sm:$0xff] %v7557_v51  ;;  %v16868_v32 = vld [vmem:[%s24752_s1 + $0x1188] ss:$52 sps:$4 sm:$0xff]   ;;  %v16879_v46 = vld [vmem:[%s24752_s1 + $0x17a4] ss:$52 sps:$4 sm:$0xff]  }
 0x176   :  { %v16871_v44 = vld [vmem:[%s24752_s1 + $0x1808] ss:$52 sps:$4 sm:$0xff]   ;;  %v16880_v54 = vld [vmem:[%s24752_s1 + $0x10b8] ss:$52 sps:$4 sm:$0xff]  }
 0x177   :  { %6623 = vmatpush1.bf16.msra.mxu0 %v16808_v34  ;;  %v16874_v34 = vld [vmem:[%s24752_s1 + $0x1120] ss:$52 sps:$4 sm:$0xff]   ;;  %v16885_v51 = vld [vmem:[%s24752_s1 + $0x173c] ss:$52 sps:$4 sm:$0xff]  }
 0x178   :  { %6664 = vmatpush1.bf16.msra.mxu1 %v16811_v47  ;;  %6624 = vmatprep.subr.bf16.mxu0 %v16816_v55  ;;  %v16877_v47 = vld [vmem:[%s24752_s1 + $0x17a0] ss:$52 sps:$4 sm:$0xff]   ;;  %v16883_v55 = vld [vmem:[%s24752_s1 + $0x1738] ss:$52 sps:$4 sm:$0xff]  }
 0x179   :  { %6665 = vmatprep.subr.bf16.mxu1 %v16819_v56  ;;  %v16888_v56 = vld [vmem:[%s24752_s1 + $0x1054] ss:$52 sps:$4 sm:$0xff]  }
 0x17b   :  { %6625 = vmatpush1.bf16.msra.mxu0 %v16814_v57  ;;  %v16891_v57 = vld [vmem:[%s24752_s1 + $0x16d4] ss:$52 sps:$4 sm:$0xff]  }
 0x17c   :  { %6666 = vmatpush1.bf16.msra.mxu1 %v16817_v58  ;;  %6626 = vmatprep.subr.bf16.mxu0 %v16822_v59  ;;  %v16886_v58 = vld [vmem:[%s24752_s1 + $0x1050] ss:$52 sps:$4 sm:$0xff]  }
 0x17d   :  { %6667 = vmatprep.subr.bf16.mxu1 %v16825_v60  ;;  %v16889_v59 = vld [vmem:[%s24752_s1 + $0x16d0] ss:$52 sps:$4 sm:$0xff]   ;;  %v16894_v60 = vld [vmem:[%s24752_s1 + $0x1cec] ss:$52 sps:$4 sm:$0xff]  }
 0x17f   :  { %6627 = vmatpush1.bf16.msra.mxu0 %v16820_v61  ;;  %v16897_v61 = vld [vmem:[%s24752_s1 + $0x2f4] ss:$52 sps:$4 sm:$0xff]  }
 0x180   :  { %6668 = vmatpush1.bf16.msra.mxu1 %v16823_v62  ;;  %6628 = vmatprep.subr.bf16.mxu0 %v16828_v63  ;;  %v16892_v62 = vld [vmem:[%s24752_s1 + $0x1ce8] ss:$52 sps:$4 sm:$0xff]   ;;  %v16895_v63 = vld [vmem:[%s24752_s1 + $0x2f0] ss:$52 sps:$4 sm:$0xff]  }
 0x181   :  { %6669 = vmatprep.subr.bf16.mxu1 %v16831_v0  ;;  %v16900_v0 = vld [vmem:[%s24752_s1 + $0x1c84] ss:$52 sps:$4 sm:$0xff]  }
 0x183   :  { %v20074_v5 = vpop.f32.mrf.mxu1  ;;  %6629 = vmatpush1.bf16.msra.mxu0 %v16826_v1  ;;  %v16903_v1 = vld [vmem:[%s24752_s1 + $0x28c] ss:$52 sps:$4 sm:$0xff]  }
 0x184   :  { %6670 = vmatpush1.bf16.msra.mxu1 %v16829_v2  ;;  %6630 = vmatprep.subr.bf16.mxu0 %v16834_v3  ;;  %v16898_v3 = vld [vmem:[%s24752_s1 + $0x1c80] ss:$52 sps:$4 sm:$0xff]  }
 0x185   :  { %6671 = vmatprep.subr.bf16.mxu1 %v16837_v4  ;;  %v20088_v15 = vpop.f32.mrf.mxu1  ;;  %v16901_v4 = vld [vmem:[%s24752_s1 + $0x288] ss:$52 sps:$4 sm:$0xff]  }
 0x187   :  { %v6369_v16 = vpop.f32.mrf.mxu1  ;;  %6631 = vmatpush1.bf16.msra.mxu0 %v16832_v7  ;;  %v16906_v7 = vld [vmem:[%s24752_s1 + $0x1c1c] ss:$52 sps:$4 sm:$0xff]  }
 0x188   :  { %6672 = vmatpush1.bf16.msra.mxu1 %v16835_v9  ;;  %6632 = vmatprep.subr.bf16.mxu0 %v16840_v12  ;;  %v16909_v9 = vld [vmem:[%s24752_s1 + $0x224] ss:$52 sps:$4 sm:$0xff]  }
 0x189   :  { %6673 = vmatprep.subr.bf16.mxu1 %v16843_v14  ;;  %v6370_v23 = vpop.f32.mrf.mxu1  ;;  %v16904_v16 = vld [vmem:[%s24752_s1 + $0x1c18] ss:$52 sps:$4 sm:$0xff]  }
 0x18a   :  { %v16910_v23 = vld [vmem:[%s24752_s1 + $0x1bb0] ss:$52 sps:$4 sm:$0xff]  }
 0x18b   :  { %6633 = vmatpush1.bf16.msra.mxu0 %v16838_v17  ;;  %v16907_v17 = vld [vmem:[%s24752_s1 + $0x220] ss:$52 sps:$4 sm:$0xff]  }
 0x18c   :  { %6674 = vmatpush1.bf16.msra.mxu1 %v16841_v18  ;;  %6634 = vmatprep.subr.bf16.mxu0 %v16846_v19  ;;  %v16912_v19 = vld [vmem:[%s24752_s1 + $0x1bb4] ss:$52 sps:$4 sm:$0xff]  }
 0x18d   :  { %6675 = vmatprep.subr.bf16.mxu1 %v16849_v22  ;;  %v16915_v22 = vld [vmem:[%s24752_s1 + $0x1bc] ss:$52 sps:$4 sm:$0xff]  }
 0x18f   :  { %6635 = vmatpush2.bf16.msra.mxu0 %v16844_v24  ;;  %v16913_v24 = vld [vmem:[%s24752_s1 + $0x1b8] ss:$52 sps:$4 sm:$0xff]  }
 0x190   :  { %6676 = vmatpush2.bf16.msra.mxu1 %v16847_v25  ;;  %6636 = vmatprep.subr.bf16.mxu0 %v16852_v26  ;;  %v16918_v25 = vld [vmem:[%s24752_s1 + $0x1b4c] ss:$52 sps:$4 sm:$0xff]   ;;  %v16921_v26 = vld [vmem:[%s24752_s1 + $0x154] ss:$52 sps:$4 sm:$0xff]  }
 0x191   :  { %6677 = vmatprep.subr.bf16.mxu1 %v16855_v28  ;;  %v16916_v28 = vld [vmem:[%s24752_s1 + $0x1b48] ss:$52 sps:$4 sm:$0xff]  }
 0x193   :  { %6637 = vmatpush2.bf16.msra.mxu0 %v16850_v29  ;;  %v16919_v29 = vld [vmem:[%s24752_s1 + $0x150] ss:$52 sps:$4 sm:$0xff]  }
 0x194   :  { %6678 = vmatpush2.bf16.msra.mxu1 %v16853_v30  ;;  %6638 = vmatprep.subr.bf16.mxu0 %v16858_v35  ;;  %v16924_v30 = vld [vmem:[%s24752_s1 + $0x1ae4] ss:$52 sps:$4 sm:$0xff]   ;;  %v16927_v35 = vld [vmem:[%s24752_s1 + $0xec] ss:$52 sps:$4 sm:$0xff]  }
 0x195   :  { %6679 = vmatprep.subr.bf16.mxu1 %v16861_v37  ;;  %v16922_v37 = vld [vmem:[%s24752_s1 + $0x1ae0] ss:$52 sps:$4 sm:$0xff]  }
 0x197   :  { %6639 = vmatpush2.bf16.msra.mxu0 %v16856_v6  ;;  %v16925_v6 = vld [vmem:[%s24752_s1 + $0xe8] ss:$52 sps:$4 sm:$0xff]  }
 0x198   :  { %6680 = vmatpush2.bf16.msra.mxu1 %v16859_v31  ;;  %6640 = vmatprep.subr.bf16.mxu0 %v16864_v38  ;;  %v16930_v31 = vld [vmem:[%s24752_s1 + $0x1a7c] ss:$52 sps:$4 sm:$0xff]   ;;  %v16933_v38 = vld [vmem:[%s24752_s1 + $0x84] ss:$52 sps:$4 sm:$0xff]  }
 0x199   :  { %6681 = vmatprep.subr.bf16.mxu1 %v16867_v13 }
 0x19b   :  { %6641 = vmatpush2.bf16.msra.mxu0 %v16862_v33  ;;  %v16928_v33 = vld [vmem:[%s24752_s1 + $0x1a78] ss:$52 sps:$4 sm:$0xff]  }
 0x19c   :  { %6682 = vmatpush2.bf16.msra.mxu1 %v16865_v39  ;;  %6642 = vmatprep.subr.bf16.mxu0 %v16870_v41  ;;  %v16931_v39 = vld [vmem:[%s24752_s1 + $0x80] ss:$52 sps:$4 sm:$0xff]  }
 0x19d   :  { %6683 = vmatprep.subr.bf16.mxu1 %v16873_v42  ;;  %v16936_v42 = vld [vmem:[%s24752_s1 + $0x1a14] ss:$52 sps:$4 sm:$0xff]  }
 0x19f   :  { %6643 = vmatpush2.bf16.msra.mxu0 %v16868_v32  ;;  %v16939_v32 = vld [vmem:[%s24752_s1 + $0x1c] ss:$52 sps:$4 sm:$0xff]  }
 0x1a0   :  { %6684 = vmatpush2.bf16.msra.mxu1 %v16871_v44  ;;  %6644 = vmatprep.subr.bf16.mxu0 %v16876_v45  ;;  %v16934_v45 = vld [vmem:[%s24752_s1 + $0x1a10] ss:$52 sps:$4 sm:$0xff]  }
 0x1a1   :  { %6685 = vmatprep.subr.bf16.mxu1 %v16879_v46  ;;  %v16937_v46 = vld [vmem:[%s24752_s1 + $0x18] ss:$52 sps:$4 sm:$0xff]  }
 0x1a3   :  { %6645 = vmatpush2.bf16.msra.mxu0 %v16874_v34  ;;  %v16942_v34 = vld [vmem:[%s24752_s1 + $0x1e24] ss:$52 sps:$4 sm:$0xff]  }
 0x1a4   :  { %6686 = vmatpush2.bf16.msra.mxu1 %v16877_v47  ;;  %6646 = vmatprep.subr.bf16.mxu0 %v16882_v50  ;;  %v16945_v47 = vld [vmem:[%s24752_s1 + $0x634] ss:$52 sps:$4 sm:$0xff]  }
 0x1a5   :  { %6687 = vmatprep.subr.bf16.mxu1 %v16885_v51  ;;  %v16940_v51 = vld [vmem:[%s24752_s1 + $0x1e20] ss:$52 sps:$4 sm:$0xff]  }
 0x1a7   :  { %6647 = vmatpush2.bf16.msra.mxu0 %v16880_v54  ;;  %v16943_v54 = vld [vmem:[%s24752_s1 + $0x630] ss:$52 sps:$4 sm:$0xff]  }
 0x1a8   :  { %6688 = vmatpush2.bf16.msra.mxu1 %v16883_v55  ;;  %6648 = vmatprep.subr.bf16.mxu0 %v16888_v56  ;;  %v16948_v55 = vld [vmem:[%s24752_s1 + $0x1dbc] ss:$52 sps:$4 sm:$0xff]   ;;  %v16951_v56 = vld [vmem:[%s24752_s1 + $0x5cc] ss:$52 sps:$4 sm:$0xff]  }
 0x1a9   :  { %6689 = vmatprep.subr.bf16.mxu1 %v16891_v57  ;;  %v16946_v57 = vld [vmem:[%s24752_s1 + $0x1db8] ss:$52 sps:$4 sm:$0xff]  }
 0x1ab   :  { %6649 = vmatpush2.bf16.msra.mxu0 %v16886_v58  ;;  %v16949_v58 = vld [vmem:[%s24752_s1 + $0x5c8] ss:$52 sps:$4 sm:$0xff]  }
 0x1ac   :  { %6690 = vmatpush2.bf16.msra.mxu1 %v16889_v59  ;;  %6700 = vmatprep.subr.bf16.mxu0 %v16894_v60  ;;  %v16954_v59 = vld [vmem:[%s24752_s1 + $0x1d54] ss:$52 sps:$4 sm:$0xff]   ;;  %v16957_v60 = vld [vmem:[%s24752_s1 + $0x564] ss:$52 sps:$4 sm:$0xff]  }
 0x1ad   :  { %6741 = vmatprep.subr.bf16.mxu1 %v16897_v61  ;;  %v16952_v61 = vld [vmem:[%s24752_s1 + $0x1d50] ss:$52 sps:$4 sm:$0xff]  }
 0x1ae   :  { %v20210_v2 = vpop.f32.mrf.mxu0  ;;  %6651 = vmatmul.mubr.bf16.vlgmr.msra.gmra.mxu0 %v19227_v20 }
 0x1af   :  { %6692 = vmatmul.mubr.bf16.vlgmr.msra.gmra.mxu1 %v19229_v21  ;;  %6701 = vmatpush1.bf16.msra.mxu0 %v16892_v62  ;;  %v16955_v62 = vld [vmem:[%s24752_s1 + $0x560] ss:$52 sps:$4 sm:$0xff]  }
 0x1b0   :  { %6742 = vmatpush1.bf16.msra.mxu1 %v16895_v63  ;;  %v20226_v12 = vpop.f32.mrf.mxu0  ;;  %6702 = vmatprep.subr.bf16.mxu0 %v16900_v0  ;;  %v16960_v63 = vld [vmem:[%s24752_s1 + $0x4fc] ss:$52 sps:$4 sm:$0xff]   ;;  %v16963_v0 = vld [vmem:[%s24752_s1 + $0x974] ss:$52 sps:$4 sm:$0xff]  }
 0x1b1   :  { %6743 = vmatprep.subr.bf16.mxu1 %v16903_v1  ;;  %15073 = vmatprep.mubr.msk.bf16.mxu0 %vm6122_vm0, %v19246_v27  ;;  %v16958_v1 = vld [vmem:[%s24752_s1 + $0x4f8] ss:$52 sps:$4 sm:$0xff]  }
 0x1b2   :  { %6773 = vmatprep.mubr.bf16.mxu1 %v18939_v48  ;;  %v6410_v14 = vpop.f32.mrf.mxu0 }
 0x1b3   :  { %6703 = vmatpush1.bf16.msra.mxu0 %v16898_v3  ;;  %v16961_v3 = vld [vmem:[%s24752_s1 + $0x970] ss:$52 sps:$4 sm:$0xff]   ;;  %v16967_v14 = vld [vmem:[%s24752_s1 + $0x908] ss:$52 sps:$4 sm:$0xff]  }
 0x1b4   :  { %6744 = vmatpush1.bf16.msra.mxu1 %v16901_v4  ;;  %v6411_v18 = vpop.f32.mrf.mxu0  ;;  %6704 = vmatprep.subr.bf16.mxu0 %v16906_v7  ;;  %v16966_v4 = vld [vmem:[%s24752_s1 + $0x494] ss:$52 sps:$4 sm:$0xff]   ;;  %v16969_v7 = vld [vmem:[%s24752_s1 + $0x90c] ss:$52 sps:$4 sm:$0xff]  }
 0x1b5   :  { %6745 = vmatprep.subr.bf16.mxu1 %v16909_v9  ;;  %v16964_v9 = vld [vmem:[%s24752_s1 + $0x490] ss:$52 sps:$4 sm:$0xff]   ;;  %v16970_v18 = vld [vmem:[%s24752_s1 + $0x428] ss:$52 sps:$4 sm:$0xff]  }
 0x1b7   :  { %6705 = vmatpush1.bf16.msra.mxu0 %v16904_v16  ;;  %v16972_v16 = vld [vmem:[%s24752_s1 + $0x42c] ss:$52 sps:$4 sm:$0xff]  }
 0x1b8   :  { %6746 = vmatpush1.bf16.msra.mxu1 %v16907_v17  ;;  %6706 = vmatprep.subr.bf16.mxu0 %v16912_v19  ;;  %v16975_v17 = vld [vmem:[%s24752_s1 + $0x8a4] ss:$52 sps:$4 sm:$0xff]   ;;  %v16973_v19 = vld [vmem:[%s24752_s1 + $0x8a0] ss:$52 sps:$4 sm:$0xff]  }
 0x1b9   :  { %6747 = vmatprep.subr.bf16.mxu1 %v16915_v22  ;;  %v16978_v22 = vld [vmem:[%s24752_s1 + $0x3c4] ss:$52 sps:$4 sm:$0xff]  }
 0x1bb   :  { %6707 = vmatpush1.bf16.msra.mxu0 %v16910_v23  ;;  %v16981_v23 = vld [vmem:[%s24752_s1 + $0x83c] ss:$52 sps:$4 sm:$0xff]  }
 0x1bc   :  { %6748 = vmatpush1.bf16.msra.mxu1 %v16913_v24  ;;  %6708 = vmatprep.subr.bf16.mxu0 %v16918_v25  ;;  %v20382_v24 = vsub.s32 2, %v19621_v43  ;;  %v20385_v25 = vsub.s32 3, %v19621_v43 }
 0x1bd   :  { %6749 = vmatprep.subr.bf16.mxu1 %v16921_v26  ;;  %v16976_v26 = vld [vmem:[%s24752_s1 + $0x3c0] ss:$52 sps:$4 sm:$0xff]  }
 0x1bf   :  { %6709 = vmatpush1.bf16.msra.mxu0 %v16916_v28  ;;  %v16979_v28 = vld [vmem:[%s24752_s1 + $0x838] ss:$52 sps:$4 sm:$0xff]  }
 0x1c0   :  { %6750 = vmatpush1.bf16.msra.mxu1 %v16919_v29  ;;  %6710 = vmatprep.subr.bf16.mxu0 %v16924_v30  ;;  %v16984_v29 = vld [vmem:[%s24752_s1 + $0x35c] ss:$52 sps:$4 sm:$0xff]   ;;  %v16987_v30 = vld [vmem:[%s24752_s1 + $0x7d4] ss:$52 sps:$4 sm:$0xff]  }
 0x1c1   :  { %6751 = vmatprep.subr.bf16.mxu1 %v16927_v35  ;;  %v20402_v35 = vld [vmem:[%s24754_s2] sm:$0xff] }
 0x1c3   :  { %v20279_v13 = vpop.f32.mrf.mxu1  ;;  %6711 = vmatpush1.bf16.msra.mxu0 %v16922_v37  ;;  %v1118_v37 = vrot.slane %v20402_v35, %v20382_v24 }
 0x1c4   :  { %6752 = vmatpush1.bf16.msra.mxu1 %v16925_v6  ;;  %6712 = vmatprep.subr.bf16.mxu0 %v16930_v31  ;;  %v1122_v6 = vrot.slane %v20402_v35, %v20385_v25  ;;  %v16982_v31 = vld [vmem:[%s24752_s1 + $0x358] ss:$52 sps:$4 sm:$0xff]  }
 0x1c5   :  { %v20287_v41 = vpop.f32.mrf.mxu1  ;;  %6753 = vmatprep.subr.bf16.mxu1 %v16933_v38  ;;  %v16985_v38 = vld [vmem:[%s24752_s1 + $0x7d0] ss:$52 sps:$4 sm:$0xff]  }
 0x1c7   :  { %v6451_v44 = vpop.f32.mrf.mxu1  ;;  %6713 = vmatpush1.bf16.msra.mxu0 %v16928_v33  ;;  %v16990_v33 = vld [vmem:[%s24752_s1 + $0x76c] ss:$52 sps:$4 sm:$0xff]  }
 0x1c8   :  { %6754 = vmatpush1.bf16.msra.mxu1 %v16931_v39  ;;  %6714 = vmatprep.subr.bf16.mxu0 %v16936_v42  ;;  %v16993_v39 = vld [vmem:[%s24752_s1 + $0xff4] ss:$52 sps:$4 sm:$0xff]   ;;  %v6366_v42 = vadd.f32 %v20074_v5, %v1118_v37  ;;  %v16991_v44 = vld [vmem:[%s24752_s1 + $0xff0] ss:$52 sps:$4 sm:$0xff]  }
 0x1c9   :  { %6755 = vmatprep.subr.bf16.mxu1 %v16939_v32  ;;  %v6452_v50 = vpop.f32.mrf.mxu1  ;;  %v16988_v32 = vld [vmem:[%s24752_s1 + $0x768] ss:$52 sps:$4 sm:$0xff]   ;;  %v17020_v37 = vld [vmem:[%s24752_s1 + $0xbe4] ss:$52 sps:$4 sm:$0xff]  }
 0x1ca   :  { %v6407_v5 = vadd.f32 %v20210_v2, %v6366_v42  ;;  %v17024_v42 = vld [vmem:[%s24752_s1 + $0xb78] ss:$52 sps:$4 sm:$0xff]  }
 0x1cb   :  { %6715 = vmatpush1.bf16.msra.mxu0 %v16934_v45  ;;  %v16996_v45 = vld [vmem:[%s24752_s1 + $0x704] ss:$52 sps:$4 sm:$0xff]  }
 0x1cc   :  { %6756 = vmatpush1.bf16.msra.mxu1 %v16937_v46  ;;  %6726 = vmatprep.subr.bf16.mxu0 %v16942_v34  ;;  %v16999_v46 = vld [vmem:[%s24752_s1 + $0xf8c] ss:$52 sps:$4 sm:$0xff]   ;;  %v6368_v34 = vadd.f32 %v20088_v15, %v1122_v6  ;;  %v6448_v50 = vadd.f32 %v20279_v13, %v6407_v5  ;;  %v16997_v15 = vld [vmem:[%s24752_s1 + $0xf88] ss:$52 sps:$4 sm:$0xff]   ;;  %v17005_v13 = vld [vmem:[%s24752_s1 + $0xf24] ss:$52 sps:$4 sm:$0xff]  }
 0x1cd   :  { %6757 = vmatprep.subr.bf16.mxu1 %v16945_v47  ;;  %v17023_v6 = vld [vmem:[%s24752_s1 + $0xdec] ss:$52 sps:$4 sm:$0xff]  }
 0x1ce   :  { %v6409_v47 = vadd.f32 %v20226_v12, %v6368_v34  ;;  %v17002_v12 = vld [vmem:[%s24752_s1 + $0x69c] ss:$52 sps:$4 sm:$0xff]   ;;  %v17033_v34 = vld [vmem:[%s24752_s1 + $0xd18] ss:$52 sps:$4 sm:$0xff]  }
 0x1cf   :  { %6727 = vmatpush2.bf16.msra.mxu0 %v16940_v51  ;;  %v17038_v5 = vld [vmem:[%s24752_s1 + $0xaac] ss:$52 sps:$4 sm:$0xff]  }
 0x1d0   :  { %6758 = vmatpush2.bf16.msra.mxu1 %v16943_v54  ;;  %6728 = vmatprep.subr.bf16.mxu0 %v16948_v55  ;;  %v16994_v55 = vld [vmem:[%s24752_s1 + $0x700] ss:$52 sps:$4 sm:$0xff]   ;;  %v6450_v2 = vadd.f32 %v20287_v41, %v6409_v47 }
 0x1d1   :  { %6759 = vmatprep.subr.bf16.mxu1 %v16951_v56  ;;  %v17041_v47 = vld [vmem:[%s24752_s1 + $0x1334] ss:$52 sps:$4 sm:$0xff]  }
 0x1d3   :  { %6729 = vmatpush2.bf16.msra.mxu0 %v16946_v57 }
 0x1d4   :  { %6760 = vmatpush2.bf16.msra.mxu1 %v16949_v58  ;;  %6730 = vmatprep.subr.bf16.mxu0 %v16954_v59 }
 0x1d5   :  { %6761 = vmatprep.subr.bf16.mxu1 %v16957_v60 }
 0x1d7   :  { %6731 = vmatpush2.bf16.msra.mxu0 %v16952_v61 }
 0x1d8   :  { %6762 = vmatpush2.bf16.msra.mxu1 %v16955_v62  ;;  %6782 = vmatprep.subr.bf16.mxu0 %v16963_v0  ;;  %v17000_v0 = vld [vmem:[%s24752_s1 + $0x698] ss:$52 sps:$4 sm:$0xff]  }
 0x1d9   :  { %6763 = vmatprep.subr.bf16.mxu1 %v16960_v63 }
 0x1da   :  { %6733 = vmatmul.mubr.bf16.vlgmr.msra.gmra.mxu0 %v19376_v10 }
 0x1db   :  { %6783 = vmatpush1.bf16.msra.mxu0 %v16961_v3  ;;  %6814 = vmatprep.mubr.bf16.mxu0 %v18950_v52 }
 0x1dc   :  { %6764 = vmatpush2.bf16.msra.mxu1 %v16958_v1  ;;  %6784 = vmatprep.subr.bf16.mxu0 %v16969_v7  ;;  %v17003_v1 = vld [vmem:[%s24752_s1 + $0xf20] ss:$52 sps:$4 sm:$0xff]   ;;  %v17011_v7 = vld [vmem:[%s24752_s1 + $0xebc] ss:$52 sps:$4 sm:$0xff]  }
 0x1dd   :  { %6765 = vmatprep.subr.bf16.mxu1 %v16966_v4  ;;  %v17008_v4 = vld [vmem:[%s24752_s1 + $0xcb4] ss:$52 sps:$4 sm:$0xff]  }
 0x1df   :  { %6785 = vmatpush1.bf16.msra.mxu0 %v16967_v14 }
 0x1e0   :  { %6766 = vmatpush2.bf16.msra.mxu1 %v16964_v9  ;;  %6786 = vmatprep.subr.bf16.mxu0 %v16975_v17 }
 0x1e1   :  { %6767 = vmatprep.subr.bf16.mxu1 %v16972_v16  ;;  %v18727_v16 = vld [vmem:[#allocation2 + $0x8] sm:$0xff] }
 0x1e3   :  { %6787 = vmatpush1.bf16.msra.mxu0 %v16973_v19  ;;  %v17009_v19 = vld [vmem:[%s24752_s1 + $0xeb8] ss:$52 sps:$4 sm:$0xff]  }
 0x1e4   :  { %6768 = vmatpush2.bf16.msra.mxu1 %v16970_v18  ;;  %6788 = vmatprep.subr.bf16.mxu0 %v16981_v23  ;;  %v17006_v18 = vld [vmem:[%s24752_s1 + $0xcb0] ss:$52 sps:$4 sm:$0xff]   ;;  %v17017_v23 = vld [vmem:[%s24752_s1 + $0xe54] ss:$52 sps:$4 sm:$0xff]  }
 0x1e5   :  { %6769 = vmatprep.subr.bf16.mxu1 %v16978_v22  ;;  %v17014_v22 = vld [vmem:[%s24752_s1 + $0xc4c] ss:$52 sps:$4 sm:$0xff]  }
 0x1e7   :  { %6789 = vmatpush1.bf16.msra.mxu0 %v16979_v28  ;;  %v17012_v28 = vld [vmem:[%s24752_s1 + $0xc48] ss:$52 sps:$4 sm:$0xff]  }
 0x1e8   :  { %6770 = vmatpush2.bf16.msra.mxu1 %v16976_v26  ;;  %6790 = vmatprep.subr.bf16.mxu0 %v16987_v30  ;;  %v20476_v26 = vld [vmem:[#allocation2] sm:$0xff] }
 0x1e9   :  { %6771 = vmatprep.subr.bf16.mxu1 %v16984_v29  ;;  %v17015_v29 = vld [vmem:[%s24752_s1 + $0xe50] ss:$52 sps:$4 sm:$0xff]  }
 0x1eb   :  { %6791 = vmatpush1.bf16.msra.mxu0 %v16985_v38  ;;  %v17021_v38 = vld [vmem:[%s24752_s1 + $0xde8] ss:$52 sps:$4 sm:$0xff]  }
 0x1ec   :  { %6772 = vmatpush2.bf16.msra.mxu1 %v16982_v31  ;;  %6792 = vmatprep.subr.bf16.mxu0 %v16990_v33  ;;  %v17018_v31 = vld [vmem:[%s24752_s1 + $0xbe0] ss:$52 sps:$4 sm:$0xff]   ;;  %v17026_v33 = vld [vmem:[%s24752_s1 + $0xb7c] ss:$52 sps:$4 sm:$0xff]  }
 0x1ed   :  { %6823 = vmatprep.subr.bf16.mxu1 %v16993_v39  ;;  %v17029_v39 = vld [vmem:[%s24752_s1 + $0xd84] ss:$52 sps:$4 sm:$0xff]  }
 0x1ee   :  { %v6488_v51 = vpop.f32.mrf.mxu0 }
 0x1ef   :  { %6774 = vmatmul.mubr.bf16.vlgmr.msra.gmra.mxu1 %v19011_v8  ;;  %v6529_v54 = vpop.f32.mrf.mxu1  ;;  %v6489_v56 = vadd.f32 %v6488_v51, %v6448_v50  ;;  %6793 = vmatpush1.bf16.msra.mxu0 %v16988_v32  ;;  %v17027_v32 = vld [vmem:[%s24752_s1 + $0xd80] ss:$52 sps:$4 sm:$0xff]   ;;  %v17036_v50 = vld [vmem:[%s24752_s1 + $0xaa8] ss:$52 sps:$4 sm:$0xff]   ;;  %v17039_v51 = vld [vmem:[%s24752_s1 + $0x1330] ss:$52 sps:$4 sm:$0xff]  }
 0x1f0   :  { %6824 = vmatpush1.bf16.msra.mxu1 %v16991_v44  ;;  %v6490_v57 = vpop.f32.mrf.mxu0  ;;  %6794 = vmatprep.subr.bf16.mxu0 %v16996_v45  ;;  %v17032_v44 = vld [vmem:[%s24752_s1 + $0xb14] ss:$52 sps:$4 sm:$0xff]   ;;  %v17035_v45 = vld [vmem:[%s24752_s1 + $0xd1c] ss:$52 sps:$4 sm:$0xff]  }
 0x1f1   :  { %v6531_v58 = vpop.f32.mrf.mxu1  ;;  %6825 = vmatprep.subr.bf16.mxu1 %v16999_v46  ;;  %v6491_v59 = vadd.f32 %v6490_v57, %v6450_v2  ;;  %v6530_v60 = vadd.f32 %v6529_v54, %v6489_v56  ;;  %6855 = vmatprep.mubr.bf16.mxu1 %v19095_v36  ;;  %v17030_v46 = vld [vmem:[%s24752_s1 + $0xb10] ss:$52 sps:$4 sm:$0xff]   ;;  %v17045_v2 = vld [vmem:[%s24752_s1 + $0x12c8] ss:$52 sps:$4 sm:$0xff]   ;;  %v17051_v57 = vld [vmem:[%s24752_s1 + $0x1260] ss:$52 sps:$4 sm:$0xff]  }
 0x1f2   :  { %v6492_v41 = vpop.f32.mrf.mxu0  ;;  %v17044_v54 = vld [vmem:[%s24752_s1 + $0xa44] ss:$52 sps:$4 sm:$0xff]   ;;  %v17050_v56 = vld [vmem:[%s24752_s1 + $0x9dc] ss:$52 sps:$4 sm:$0xff]  }
 0x1f3   :  { %v6533_v61 = vpop.f32.mrf.mxu1  ;;  %v7558_v62 = vmax.f32 %v6530_v60, 0.0  ;;  %v6532_v63 = vadd.f32 %v6531_v58, %v6491_v59  ;;  %6795 = vmatpush1.bf16.msra.mxu0 %v16994_v55  ;;  %v17047_v55 = vld [vmem:[%s24752_s1 + $0x12cc] ss:$52 sps:$4 sm:$0xff]   ;;  %v17056_v58 = vld [vmem:[%s24752_s1 + $0x11fc] ss:$52 sps:$4 sm:$0xff]  }
 0x1f4   :  { %6826 = vmatpush1.bf16.msra.mxu1 %v16997_v15  ;;  %v6493_v3 = vpop.f32.mrf.mxu0  ;;  %6796 = vmatprep.subr.bf16.mxu0 %v17002_v12  ;;  %v17042_v15 = vld [vmem:[%s24752_s1 + $0xa40] ss:$52 sps:$4 sm:$0xff]   ;;  %v17053_v12 = vld [vmem:[%s24752_s1 + $0x1264] ss:$52 sps:$4 sm:$0xff]  }
 0x1f5   :  { %6827 = vmatprep.subr.bf16.mxu1 %v17005_v13  ;;  %v6534_v9 = vpop.f32.mrf.mxu1  ;;  %7571 = vst [vmem:[#allocation2 + $0x10] sm:$0xff] %v7558_v62  ;;  %v7559_v14 = vmax.f32 %v6532_v63, 0.0  ;;  %v16165_v17 = vpack.i.bf16 %v7558_v62, %v18727_v16  ;;  %v17048_v13 = vld [vmem:[%s24752_s1 + $0x9d8] ss:$52 sps:$4 sm:$0xff]   ;;  %v17059_v59 = vld [vmem:[%s24752_s1 + $0x1674] ss:$52 sps:$4 sm:$0xff]  }
 0x1f6   :  { %v17054_v60 = vld [vmem:[%s24752_s1 + $0x11f8] ss:$52 sps:$4 sm:$0xff]   ;;  %v17057_v41 = vld [vmem:[%s24752_s1 + $0x1670] ss:$52 sps:$4 sm:$0xff]   ;;  %v17062_v61 = vld [vmem:[%s24752_s1 + $0x1194] ss:$52 sps:$4 sm:$0xff]  }
 0x1f7   :  { %7572 = vst [vmem:[#allocation2 + $0x18] sm:$0xff] %v7559_v14  ;;  %6797 = vmatpush1.bf16.msra.mxu0 %v17000_v0  ;;  %16166 = vrot.lane.b32.xlu0 %v16165_v17, %s18739_s14  ;;  %v16170_v30 = vpack.i.bf16 %v20476_v26, %v7559_v14  ;;  %v17065_v62 = vld [vmem:[%s24752_s1 + $0x160c] ss:$52 sps:$4 sm:$0xff]   ;;  %v17060_v63 = vld [vmem:[%s24752_s1 + $0x1190] ss:$52 sps:$4 sm:$0xff]  }
 0x1f8   :  { %6828 = vmatpush1.bf16.msra.mxu1 %v17003_v1  ;;  %6798 = vmatprep.subr.bf16.mxu0 %v17008_v4  ;;  %v17063_v0 = vld [vmem:[%s24752_s1 + $0x1608] ss:$52 sps:$4 sm:$0xff]   ;;  %v17068_v1 = vld [vmem:[%s24752_s1 + $0x112c] ss:$52 sps:$4 sm:$0xff]   ;;  %v17071_v3 = vld [vmem:[%s24752_s1 + $0x15a4] ss:$52 sps:$4 sm:$0xff]  }
 0x1f9   :  { %6829 = vmatprep.subr.bf16.mxu1 %v17011_v7  ;;  %v17066_v4 = vld [vmem:[%s24752_s1 + $0x1128] ss:$52 sps:$4 sm:$0xff]   ;;  %v17069_v7 = vld [vmem:[%s24752_s1 + $0x15a0] ss:$52 sps:$4 sm:$0xff]   ;;  %v17074_v9 = vld [vmem:[%s24752_s1 + $0x10c4] ss:$52 sps:$4 sm:$0xff]  }
 0x1fa   :  { %v17077_v14 = vld [vmem:[%s24752_s1 + $0x153c] ss:$52 sps:$4 sm:$0xff]   ;;  %v17072_v16 = vld [vmem:[%s24752_s1 + $0x10c0] ss:$52 sps:$4 sm:$0xff]   ;;  %v17075_v17 = vld [vmem:[%s24752_s1 + $0x1538] ss:$52 sps:$4 sm:$0xff]  }
 0x1fb   :  { %6799 = vmatpush2.bf16.msra.mxu0 %v17006_v18  ;;  %16171 = vrot.lane.b32.xlu0 %v16170_v30, %s18739_s14  ;;  %v17080_v18 = vld [vmem:[%s24752_s1 + $0x105c] ss:$52 sps:$4 sm:$0xff]   ;;  %v17089_v30 = vld [vmem:[%s24752_s1 + $0x1cf4] ss:$52 sps:$4 sm:$0xff]  }
 0x1fc   :  { %6830 = vmatpush1.bf16.msra.mxu1 %v17009_v19  ;;  %6800 = vmatprep.subr.bf16.mxu0 %v17014_v22  ;;  %v17083_v19 = vld [vmem:[%s24752_s1 + $0x14d4] ss:$52 sps:$4 sm:$0xff]   ;;  %v17078_v22 = vld [vmem:[%s24752_s1 + $0x1058] ss:$52 sps:$4 sm:$0xff]  }
 0x1fd   :  { %6831 = vmatprep.subr.bf16.mxu1 %v17017_v23  ;;  %v17081_v23 = vld [vmem:[%s24752_s1 + $0x14d0] ss:$52 sps:$4 sm:$0xff]  }
 0x1ff   :  { %6801 = vmatpush2.bf16.msra.mxu0 %v17012_v28  ;;  %v20622_v28 = vsub.s32 4, %v19621_v43 }
 0x200   :  { %6832 = vmatpush1.bf16.msra.mxu1 %v17015_v29  ;;  %6802 = vmatprep.subr.bf16.mxu0 %v17020_v37  ;;  %v17086_v29 = vld [vmem:[%s24752_s1 + $0x146c] ss:$52 sps:$4 sm:$0xff]   ;;  %v1129_v37 = vsub.s32 5, %v19621_v43 }
 0x201   :  { %6833 = vmatprep.subr.bf16.mxu1 %v17023_v6  ;;  %v1126_v6 = vrot.slane %v20402_v35, %v20622_v28 }
 0x203   :  { %6803 = vmatpush2.bf16.msra.mxu0 %v17018_v31  ;;  %v17084_v31 = vld [vmem:[%s24752_s1 + $0x1468] ss:$52 sps:$4 sm:$0xff]  }
 0x204   :  { %6834 = vmatpush1.bf16.msra.mxu1 %v17021_v38  ;;  %6804 = vmatprep.subr.bf16.mxu0 %v17026_v33  ;;  %v17087_v38 = vld [vmem:[%s24752_s1 + $0x1cf0] ss:$52 sps:$4 sm:$0xff]  }
 0x205   :  { %6835 = vmatprep.subr.bf16.mxu1 %v17029_v39  ;;  %v17092_v33 = vld [vmem:[%s24752_s1 + $0x1404] ss:$52 sps:$4 sm:$0xff]   ;;  %v17095_v39 = vld [vmem:[%s24752_s1 + $0x1c8c] ss:$52 sps:$4 sm:$0xff]  }
 0x207   :  { %6805 = vmatpush2.bf16.msra.mxu0 %v17024_v42  ;;  %v1130_v42 = vrot.slane %v20402_v35, %v1129_v37  ;;  %v17098_v35 = vld [vmem:[%s24752_s1 + $0x139c] ss:$52 sps:$4 sm:$0xff]  }
 0x208   :  { %6836 = vmatpush1.bf16.msra.mxu1 %v17027_v32  ;;  %6806 = vmatprep.subr.bf16.mxu0 %v17032_v44 }
 0x209   :  { %6837 = vmatprep.subr.bf16.mxu1 %v17035_v45 }
 0x20b   :  { %6807 = vmatpush2.bf16.msra.mxu0 %v17030_v46  ;;  %v17090_v46 = vld [vmem:[%s24752_s1 + $0x1400] ss:$52 sps:$4 sm:$0xff]  }
 0x20c   :  { %6838 = vmatpush1.bf16.msra.mxu1 %v17033_v34  ;;  %6808 = vmatprep.subr.bf16.mxu0 %v17038_v5  ;;  %v17093_v34 = vld [vmem:[%s24752_s1 + $0x1c88] ss:$52 sps:$4 sm:$0xff]  }
 0x20d   :  { %6839 = vmatprep.subr.bf16.mxu1 %v17041_v47 }
 0x20f   :  { %6809 = vmatpush2.bf16.msra.mxu0 %v17036_v50  ;;  %v17101_v50 = vld [vmem:[%s24752_s1 + $0x1c24] ss:$52 sps:$4 sm:$0xff]  }
 0x210   :  { %6840 = vmatpush2.bf16.msra.mxu1 %v17039_v51  ;;  %6810 = vmatprep.subr.bf16.mxu0 %v17044_v54 }
 0x211   :  { %6841 = vmatprep.subr.bf16.mxu1 %v17047_v55 }
 0x213   :  { %6811 = vmatpush2.bf16.msra.mxu0 %v17042_v15 }
 0x214   :  { %6842 = vmatpush2.bf16.msra.mxu1 %v17045_v2  ;;  %6812 = vmatprep.subr.bf16.mxu0 %v17050_v56  ;;  %v17096_v56 = vld [vmem:[%s24752_s1 + $0x1398] ss:$52 sps:$4 sm:$0xff]  }
 0x215   :  { %6843 = vmatprep.subr.bf16.mxu1 %v17053_v12  ;;  %v17099_v12 = vld [vmem:[%s24752_s1 + $0x1c20] ss:$52 sps:$4 sm:$0xff]  }
 0x217   :  { %6813 = vmatpush2.bf16.msra.mxu0 %v17048_v13 }
 0x218   :  { %6844 = vmatpush2.bf16.msra.mxu1 %v17051_v57  ;;  %6864 = vmatprep.subr.bf16.mxu0 %v17059_v59  ;;  %v17104_v57 = vld [vmem:[%s24752_s1 + $0x19b4] ss:$52 sps:$4 sm:$0xff]  }
 0x219   :  { %6845 = vmatprep.subr.bf16.mxu1 %v17056_v58  ;;  %v17107_v58 = vld [vmem:[%s24752_s1 + $0x1bbc] ss:$52 sps:$4 sm:$0xff]  }
 0x21a   :  { %6815 = vmatmul.mubr.bf16.vlgmr.msra.gmra.mxu0 %v19019_v11 }
 0x21b   :  { %6865 = vmatpush1.bf16.msra.mxu0 %v17057_v41  ;;  %6896 = vmatprep.mubr.bf16.mxu0 %v19106_v40  ;;  %v17105_v41 = vld [vmem:[%s24752_s1 + $0x1bb8] ss:$52 sps:$4 sm:$0xff]  }
 0x21c   :  { %6846 = vmatpush2.bf16.msra.mxu1 %v17054_v60  ;;  %6866 = vmatprep.subr.bf16.mxu0 %v17065_v62  ;;  %v17102_v60 = vld [vmem:[%s24752_s1 + $0x19b0] ss:$52 sps:$4 sm:$0xff]   ;;  %v17113_v62 = vld [vmem:[%s24752_s1 + $0x1b54] ss:$52 sps:$4 sm:$0xff]  }
 0x21d   :  { %6847 = vmatprep.subr.bf16.mxu1 %v17062_v61  ;;  %v17110_v61 = vld [vmem:[%s24752_s1 + $0x194c] ss:$52 sps:$4 sm:$0xff]  }
 0x21f   :  { %6867 = vmatpush1.bf16.msra.mxu0 %v17063_v0  ;;  %v17111_v0 = vld [vmem:[%s24752_s1 + $0x1b50] ss:$52 sps:$4 sm:$0xff]  }
 0x220   :  { %6848 = vmatpush2.bf16.msra.mxu1 %v17060_v63  ;;  %6868 = vmatprep.subr.bf16.mxu0 %v17071_v3  ;;  %v17108_v63 = vld [vmem:[%s24752_s1 + $0x1948] ss:$52 sps:$4 sm:$0xff]   ;;  %v17119_v3 = vld [vmem:[%s24752_s1 + $0x1aec] ss:$52 sps:$4 sm:$0xff]  }
 0x221   :  { %6849 = vmatprep.subr.bf16.mxu1 %v17068_v1  ;;  %v17116_v1 = vld [vmem:[%s24752_s1 + $0x18e4] ss:$52 sps:$4 sm:$0xff]  }
 0x223   :  { %6869 = vmatpush1.bf16.msra.mxu0 %v17069_v7  ;;  %v17117_v7 = vld [vmem:[%s24752_s1 + $0x1ae8] ss:$52 sps:$4 sm:$0xff]  }
 0x224   :  { %6850 = vmatpush2.bf16.msra.mxu1 %v17066_v4  ;;  %6870 = vmatprep.subr.bf16.mxu0 %v17077_v14  ;;  %v17114_v4 = vld [vmem:[%s24752_s1 + $0x18e0] ss:$52 sps:$4 sm:$0xff]   ;;  %v17125_v14 = vld [vmem:[%s24752_s1 + $0x1a84] ss:$52 sps:$4 sm:$0xff]  }
 0x225   :  { %6851 = vmatprep.subr.bf16.mxu1 %v17074_v9  ;;  %v17122_v9 = vld [vmem:[%s24752_s1 + $0x187c] ss:$52 sps:$4 sm:$0xff]  }
 0x227   :  { %6871 = vmatpush1.bf16.msra.mxu0 %v17075_v17  ;;  %v17123_v17 = vld [vmem:[%s24752_s1 + $0x1a80] ss:$52 sps:$4 sm:$0xff]  }
 0x228   :  { %6852 = vmatpush2.bf16.msra.mxu1 %v17072_v16  ;;  %6872 = vmatprep.subr.bf16.mxu0 %v17083_v19  ;;  %v17120_v16 = vld [vmem:[%s24752_s1 + $0x1878] ss:$52 sps:$4 sm:$0xff]   ;;  %v17131_v19 = vld [vmem:[%s24752_s1 + $0x1a1c] ss:$52 sps:$4 sm:$0xff]  }
 0x229   :  { %6853 = vmatprep.subr.bf16.mxu1 %v17080_v18  ;;  %v17128_v18 = vld [vmem:[%s24752_s1 + $0x1814] ss:$52 sps:$4 sm:$0xff]  }
 0x22b   :  { %6873 = vmatpush1.bf16.msra.mxu0 %v17081_v23  ;;  %v17129_v23 = vld [vmem:[%s24752_s1 + $0x1a18] ss:$52 sps:$4 sm:$0xff]  }
 0x22c   :  { %6854 = vmatpush2.bf16.msra.mxu1 %v17078_v22  ;;  %6874 = vmatprep.subr.bf16.mxu0 %v17086_v29  ;;  %v17126_v22 = vld [vmem:[%s24752_s1 + $0x1810] ss:$52 sps:$4 sm:$0xff]   ;;  %v17134_v29 = vld [vmem:[%s24752_s1 + $0x17ac] ss:$52 sps:$4 sm:$0xff]  }
 0x22d   :  { %6905 = vmatprep.subr.bf16.mxu1 %v17089_v30  ;;  %v17137_v30 = vld [vmem:[%s24752_s1 + $0x1e2c] ss:$52 sps:$4 sm:$0xff]  }
 0x22e   :  { %v6570_v32 = vpop.f32.mrf.mxu0 }
 0x22f   :  { %6856 = vmatmul.mubr.bf16.vlgmr.msra.gmra.mxu1 %v19227_v20  ;;  %v6611_v44 = vpop.f32.mrf.mxu1  ;;  %v6571_v45 = vadd.f32 %v6570_v32, %v1126_v6  ;;  %6875 = vmatpush1.bf16.msra.mxu0 %v17084_v31  ;;  %v17132_v6 = vld [vmem:[%s24752_s1 + $0x17a8] ss:$52 sps:$4 sm:$0xff]  }
 0x230   :  { %6906 = vmatpush1.bf16.msra.mxu1 %v17087_v38  ;;  %v6572_v5 = vpop.f32.mrf.mxu0  ;;  %6876 = vmatprep.subr.bf16.mxu0 %v17092_v33  ;;  %v17135_v31 = vld [vmem:[%s24752_s1 + $0x1e28] ss:$52 sps:$4 sm:$0xff]   ;;  %v17140_v38 = vld [vmem:[%s24752_s1 + $0x1744] ss:$52 sps:$4 sm:$0xff]  }
 0x231   :  { %v6613_v47 = vpop.f32.mrf.mxu1  ;;  %6907 = vmatprep.subr.bf16.mxu1 %v17095_v39  ;;  %v6573_v51 = vadd.f32 %v6572_v5, %v1130_v42  ;;  %v20661_v54 = vadd.f32 %v6611_v44, %v6571_v45  ;;  %15074 = vmatprep.mubr.msk.bf16.mxu1 %vm6122_vm0, %v19246_v27  ;;  %v17143_v33 = vld [vmem:[%s24752_s1 + $0x1dc4] ss:$52 sps:$4 sm:$0xff]   ;;  %v17138_v39 = vld [vmem:[%s24752_s1 + $0x1740] ss:$52 sps:$4 sm:$0xff]   ;;  %v17146_v32 = vld [vmem:[%s24752_s1 + $0x16dc] ss:$52 sps:$4 sm:$0xff]  }
 0x232   :  { %v6574_v55 = vpop.f32.mrf.mxu0  ;;  %v17141_v42 = vld [vmem:[%s24752_s1 + $0x1dc0] ss:$52 sps:$4 sm:$0xff]   ;;  %v17149_v44 = vld [vmem:[%s24752_s1 + $0x1d5c] ss:$52 sps:$4 sm:$0xff]   ;;  %v17144_v45 = vld [vmem:[%s24752_s1 + $0x16d8] ss:$52 sps:$4 sm:$0xff]  }
 0x233   :  { %v6615_v15 = vpop.f32.mrf.mxu1  ;;  %v20665_v2 = vadd.f32 %v6613_v47, %v6573_v51  ;;  %6877 = vmatpush1.bf16.msra.mxu0 %v17090_v46  ;;  %v17147_v46 = vld [vmem:[%s24752_s1 + $0x1d58] ss:$52 sps:$4 sm:$0xff]   ;;  %v17155_v5 = vld [vmem:[%s24752_s1 + $0x97c] ss:$52 sps:$4 sm:$0xff]   ;;  %v17161_v51 = vld [vmem:[%s24752_s1 + $0x914] ss:$52 sps:$4 sm:$0xff]  }
 0x234   :  { %6908 = vmatpush1.bf16.msra.mxu1 %v17093_v34  ;;  %v6575_v13 = vpop.f32.mrf.mxu0  ;;  %6878 = vmatprep.subr.bf16.mxu0 %v17098_v35  ;;  %v17152_v34 = vld [vmem:[%s24752_s1 + $0x2fc] ss:$52 sps:$4 sm:$0xff]   ;;  %v17150_v47 = vld [vmem:[%s24752_s1 + $0x2f8] ss:$52 sps:$4 sm:$0xff]  }
 0x235   :  { %6909 = vmatprep.subr.bf16.mxu1 %v17101_v50  ;;  %v6616_v59 = vpop.f32.mrf.mxu1  ;;  %v17153_v35 = vld [vmem:[%s24752_s1 + $0x978] ss:$52 sps:$4 sm:$0xff]   ;;  %v17158_v50 = vld [vmem:[%s24752_s1 + $0x294] ss:$52 sps:$4 sm:$0xff]   ;;  %v17156_v55 = vld [vmem:[%s24752_s1 + $0x290] ss:$52 sps:$4 sm:$0xff]  }
 0x236   :  { %v17159_v15 = vld [vmem:[%s24752_s1 + $0x910] ss:$52 sps:$4 sm:$0xff]   ;;  %v17162_v13 = vld [vmem:[%s24752_s1 + $0x228] ss:$52 sps:$4 sm:$0xff]  }
 0x237   :  { %6879 = vmatpush1.bf16.msra.mxu0 %v17096_v56  ;;  %v17164_v56 = vld [vmem:[%s24752_s1 + $0x22c] ss:$52 sps:$4 sm:$0xff]   ;;  %v17173_v59 = vld [vmem:[%s24752_s1 + $0x844] ss:$52 sps:$4 sm:$0xff]  }
 0x238   :  { %6910 = vmatpush1.bf16.msra.mxu1 %v17099_v12  ;;  %6880 = vmatprep.subr.bf16.mxu0 %v17104_v57  ;;  %v17167_v12 = vld [vmem:[%s24752_s1 + $0x8ac] ss:$52 sps:$4 sm:$0xff]   ;;  %v17165_v57 = vld [vmem:[%s24752_s1 + $0x8a8] ss:$52 sps:$4 sm:$0xff]  }
 0x239   :  { %6911 = vmatprep.subr.bf16.mxu1 %v17107_v58  ;;  %v17170_v58 = vld [vmem:[%s24752_s1 + $0x1c4] ss:$52 sps:$4 sm:$0xff]  }
 0x23b   :  { %6881 = vmatpush2.bf16.msra.mxu0 %v17102_v60  ;;  %v17168_v60 = vld [vmem:[%s24752_s1 + $0x1c0] ss:$52 sps:$4 sm:$0xff]  }
 0x23c   :  { %6912 = vmatpush1.bf16.msra.mxu1 %v17105_v41  ;;  %6882 = vmatprep.subr.bf16.mxu0 %v17110_v61  ;;  %v17171_v41 = vld [vmem:[%s24752_s1 + $0x840] ss:$52 sps:$4 sm:$0xff]   ;;  %v17176_v61 = vld [vmem:[%s24752_s1 + $0x15c] ss:$52 sps:$4 sm:$0xff]  }
 0x23d   :  { %6913 = vmatprep.subr.bf16.mxu1 %v17113_v62  ;;  %v17179_v62 = vld [vmem:[%s24752_s1 + $0x7dc] ss:$52 sps:$4 sm:$0xff]  }
 0x23f   :  { %6883 = vmatpush2.bf16.msra.mxu0 %v17108_v63  ;;  %v17174_v63 = vld [vmem:[%s24752_s1 + $0x158] ss:$52 sps:$4 sm:$0xff]  }
 0x240   :  { %6914 = vmatpush1.bf16.msra.mxu1 %v17111_v0  ;;  %6884 = vmatprep.subr.bf16.mxu0 %v17116_v1  ;;  %v17177_v0 = vld [vmem:[%s24752_s1 + $0x7d8] ss:$52 sps:$4 sm:$0xff]   ;;  %v17182_v1 = vld [vmem:[%s24752_s1 + $0xf4] ss:$52 sps:$4 sm:$0xff]  }
 0x241   :  { %6915 = vmatprep.subr.bf16.mxu1 %v17119_v3  ;;  %v17185_v3 = vld [vmem:[%s24752_s1 + $0x774] ss:$52 sps:$4 sm:$0xff]  }
 0x243   :  { %6885 = vmatpush2.bf16.msra.mxu0 %v17114_v4  ;;  %v17180_v4 = vld [vmem:[%s24752_s1 + $0xf0] ss:$52 sps:$4 sm:$0xff]  }
 0x244   :  { %6916 = vmatpush1.bf16.msra.mxu1 %v17117_v7  ;;  %6886 = vmatprep.subr.bf16.mxu0 %v17122_v9  ;;  %v17183_v7 = vld [vmem:[%s24752_s1 + $0x770] ss:$52 sps:$4 sm:$0xff]  }
 0x245   :  { %6917 = vmatprep.subr.bf16.mxu1 %v17125_v14  ;;  %v17188_v14 = vld [vmem:[%s24752_s1 + $0x8c] ss:$52 sps:$4 sm:$0xff]  }
 0x247   :  { %6887 = vmatpush2.bf16.msra.mxu0 %v17120_v16  ;;  %v17191_v16 = vld [vmem:[%s24752_s1 + $0x70c] ss:$52 sps:$4 sm:$0xff]  }
 0x248   :  { %6918 = vmatpush1.bf16.msra.mxu1 %v17123_v17  ;;  %6888 = vmatprep.subr.bf16.mxu0 %v17128_v18 }
 0x249   :  { %6919 = vmatprep.subr.bf16.mxu1 %v17131_v19  ;;  %v17186_v19 = vld [vmem:[%s24752_s1 + $0x88] ss:$52 sps:$4 sm:$0xff]  }
 0x24b   :  { %6889 = vmatpush2.bf16.msra.mxu0 %v17126_v22  ;;  %v17189_v22 = vld [vmem:[%s24752_s1 + $0x708] ss:$52 sps:$4 sm:$0xff]  }
 0x24c   :  { %6920 = vmatpush1.bf16.msra.mxu1 %v17129_v23  ;;  %6890 = vmatprep.subr.bf16.mxu0 %v17134_v29 }
 0x24d   :  { %6931 = vmatprep.subr.bf16.mxu1 %v17137_v30 }
 0x24f   :  { %6891 = vmatpush2.bf16.msra.mxu0 %v17132_v6 }
 0x250   :  { %6932 = vmatpush2.bf16.msra.mxu1 %v17135_v31  ;;  %6892 = vmatprep.subr.bf16.mxu0 %v17140_v38  ;;  %v17194_v38 = vld [vmem:[%s24752_s1 + $0x24] ss:$52 sps:$4 sm:$0xff]  }
 0x251   :  { %6933 = vmatprep.subr.bf16.mxu1 %v17143_v33  ;;  %v17197_v33 = vld [vmem:[%s24752_s1 + $0x6a4] ss:$52 sps:$4 sm:$0xff]  }
 0x253   :  { %6893 = vmatpush2.bf16.msra.mxu0 %v17138_v39 }
 0x254   :  { %6934 = vmatpush2.bf16.msra.mxu1 %v17141_v42  ;;  %6894 = vmatprep.subr.bf16.mxu0 %v17146_v32 }
 0x255   :  { %6935 = vmatprep.subr.bf16.mxu1 %v17149_v44  ;;  %v17192_v44 = vld [vmem:[%s24752_s1 + $0x20] ss:$52 sps:$4 sm:$0xff]  }
 0x257   :  { %6895 = vmatpush2.bf16.msra.mxu0 %v17144_v45  ;;  %v17195_v45 = vld [vmem:[%s24752_s1 + $0x6a0] ss:$52 sps:$4 sm:$0xff]  }
 0x258   :  { %6936 = vmatpush2.bf16.msra.mxu1 %v17147_v46  ;;  %6946 = vmatprep.subr.bf16.mxu0 %v17152_v34 }
 0x259   :  { %6987 = vmatprep.subr.bf16.mxu1 %v17155_v5  ;;  %v17200_v5 = vld [vmem:[%s24752_s1 + $0x63c] ss:$52 sps:$4 sm:$0xff]  }
 0x25a   :  { %6897 = vmatmul.mubr.bf16.vlgmr.msra.gmra.mxu0 %v19229_v21 }
 0x25b   :  { %6938 = vmatmul.mubr.bf16.vlgmr.msra.gmra.mxu1 %v19376_v10  ;;  %6947 = vmatpush1.bf16.msra.mxu0 %v17150_v47  ;;  %v17203_v47 = vld [vmem:[%s24752_s1 + $0xcbc] ss:$52 sps:$4 sm:$0xff]  }
 0x25c   :  { %6988 = vmatpush1.bf16.msra.mxu1 %v17153_v35  ;;  %6948 = vmatprep.subr.bf16.mxu0 %v17158_v50  ;;  %v17201_v50 = vld [vmem:[%s24752_s1 + $0xcb8] ss:$52 sps:$4 sm:$0xff]  }
 0x25d   :  { %6989 = vmatprep.subr.bf16.mxu1 %v17161_v51  ;;  %6978 = vmatprep.mubr.bf16.mxu0 %v18939_v48  ;;  %v17206_v51 = vld [vmem:[%s24752_s1 + $0x5d4] ss:$52 sps:$4 sm:$0xff]  }
 0x25e   :  { %7019 = vmatprep.mubr.bf16.mxu1 %v18950_v52 }
 0x25f   :  { %6949 = vmatpush1.bf16.msra.mxu0 %v17156_v55  ;;  %v17209_v55 = vld [vmem:[%s24752_s1 + $0xc54] ss:$52 sps:$4 sm:$0xff]  }
 0x260   :  { %6990 = vmatpush1.bf16.msra.mxu1 %v17159_v15  ;;  %6950 = vmatprep.subr.bf16.mxu0 %v17164_v56  ;;  %v17204_v15 = vld [vmem:[%s24752_s1 + $0x5d0] ss:$52 sps:$4 sm:$0xff]  }
 0x261   :  { %6991 = vmatprep.subr.bf16.mxu1 %v17167_v12  ;;  %v17207_v56 = vld [vmem:[%s24752_s1 + $0xc50] ss:$52 sps:$4 sm:$0xff]   ;;  %v17212_v12 = vld [vmem:[%s24752_s1 + $0x56c] ss:$52 sps:$4 sm:$0xff]  }
 0x263   :  { %6951 = vmatpush1.bf16.msra.mxu0 %v17162_v13  ;;  %v17215_v13 = vld [vmem:[%s24752_s1 + $0xbec] ss:$52 sps:$4 sm:$0xff]  }
 0x264   :  { %6992 = vmatpush1.bf16.msra.mxu1 %v17165_v57  ;;  %6952 = vmatprep.subr.bf16.mxu0 %v17170_v58  ;;  %v17210_v57 = vld [vmem:[%s24752_s1 + $0x568] ss:$52 sps:$4 sm:$0xff]  }
 0x265   :  { %6993 = vmatprep.subr.bf16.mxu1 %v17173_v59  ;;  %v17213_v58 = vld [vmem:[%s24752_s1 + $0xbe8] ss:$52 sps:$4 sm:$0xff]   ;;  %v17218_v59 = vld [vmem:[%s24752_s1 + $0x504] ss:$52 sps:$4 sm:$0xff]  }
 0x267   :  { %6953 = vmatpush1.bf16.msra.mxu0 %v17168_v60  ;;  %v17221_v60 = vld [vmem:[%s24752_s1 + $0xb84] ss:$52 sps:$4 sm:$0xff]  }
 0x268   :  { %6994 = vmatpush1.bf16.msra.mxu1 %v17171_v41  ;;  %6954 = vmatprep.subr.bf16.mxu0 %v17176_v61  ;;  %v17216_v41 = vld [vmem:[%s24752_s1 + $0x500] ss:$52 sps:$4 sm:$0xff]  }
 0x269   :  { %6995 = vmatprep.subr.bf16.mxu1 %v17179_v62  ;;  %v20845_v9 = vpop.permute.xlu0 %16166  ;;  %v17219_v61 = vld [vmem:[%s24752_s1 + $0xb80] ss:$52 sps:$4 sm:$0xff]   ;;  %v17224_v62 = vld [vmem:[%s24752_s1 + $0x49c] ss:$52 sps:$4 sm:$0xff]  }
 0x26a   :  { %v16168_v30 = vunpack.i.l.bf16 %v20845_v9 }
 0x26b   :  { %6955 = vmatpush1.bf16.msra.mxu0 %v17174_v63  ;;  %v17227_v63 = vld [vmem:[%s24752_s1 + $0xb1c] ss:$52 sps:$4 sm:$0xff]  }
 0x26c   :  { %6996 = vmatpush1.bf16.msra.mxu1 %v17177_v0  ;;  %6956 = vmatprep.subr.bf16.mxu0 %v17182_v1  ;;  %v17222_v0 = vld [vmem:[%s24752_s1 + $0x498] ss:$52 sps:$4 sm:$0xff]  }
 0x26d   :  { %6997 = vmatprep.subr.bf16.mxu1 %v17185_v3  ;;  %v20863_v23 = vpop.permute.xlu0 %16171  ;;  %v17225_v1 = vld [vmem:[%s24752_s1 + $0xb18] ss:$52 sps:$4 sm:$0xff]   ;;  %v17230_v3 = vld [vmem:[%s24752_s1 + $0x434] ss:$52 sps:$4 sm:$0xff]  }
 0x26e   :  { %v20853_v17 = vpop.f32.mrf.mxu0  ;;  %v16174_v31 = vunpack.i.h.bf16 %v20863_v23 }
 0x26f   :  { %v20855_v18 = vpop.f32.mrf.mxu1  ;;  %6957 = vmatpush1.bf16.msra.mxu0 %v17180_v4  ;;  %v17233_v4 = vld [vmem:[%s24752_s1 + $0xab4] ss:$52 sps:$4 sm:$0xff]  }
 0x270   :  { %6998 = vmatpush1.bf16.msra.mxu1 %v17183_v7  ;;  %v20865_v29 = vpop.f32.mrf.mxu0  ;;  %6958 = vmatprep.subr.bf16.mxu0 %v17188_v14  ;;  %v7636_v42 = vsel %vm7635_vm1, %v16174_v31, %v16168_v30  ;;  %v17228_v7 = vld [vmem:[%s24752_s1 + $0x430] ss:$52 sps:$4 sm:$0xff]   ;;  %v17237_v31 = vld [vmem:[%s24752_s1 + $0xa48] ss:$52 sps:$4 sm:$0xff]  }
 0x271   :  { %v20868_v6 = vpop.f32.mrf.mxu1  ;;  %6999 = vmatprep.subr.bf16.mxu1 %v17191_v16  ;;  %v20887_v46 = vmax.f32 %v20476_v26, %v7636_v42  ;;  %v17198_v26 = vld [vmem:[%s24752_s1 + $0x638] ss:$52 sps:$4 sm:$0xff]   ;;  %v17231_v14 = vld [vmem:[%s24752_s1 + $0xab0] ss:$52 sps:$4 sm:$0xff]   ;;  %v17243_v42 = vld [vmem:[%s24752_s1 + $0x9e0] ss:$52 sps:$4 sm:$0xff]  }
 0x272   :  { %v6656_v39 = vpop.f32.mrf.mxu0  ;;  %v17236_v16 = vld [vmem:[%s24752_s1 + $0x3cc] ss:$52 sps:$4 sm:$0xff]  }
 0x273   :  { %v6697_v32 = vpop.f32.mrf.mxu1  ;;  %6959 = vmatpush1.bf16.msra.mxu0 %v17186_v19  ;;  %7687 = vrot.lane.b32.xlu0 %v20887_v46, %s18740_s10  ;;  %v17239_v19 = vld [vmem:[%s24752_s1 + $0xa4c] ss:$52 sps:$4 sm:$0xff]  }
 0x274   :  { %7000 = vmatpush1.bf16.msra.mxu1 %v17189_v22  ;;  %v6657_v34 = vpop.f32.mrf.mxu0  ;;  %6960 = vmatprep.subr.bf16.mxu0 %v17194_v38  ;;  %v17234_v22 = vld [vmem:[%s24752_s1 + $0x3c8] ss:$52 sps:$4 sm:$0xff]   ;;  %v17242_v38 = vld [vmem:[%s24752_s1 + $0x364] ss:$52 sps:$4 sm:$0xff]   ;;  %v17240_v39 = vld [vmem:[%s24752_s1 + $0x360] ss:$52 sps:$4 sm:$0xff]  }
 0x275   :  { %7001 = vmatprep.subr.bf16.mxu1 %v17197_v33  ;;  %v6698_v35 = vpop.f32.mrf.mxu1  ;;  %v17245_v33 = vld [vmem:[%s24752_s1 + $0x9e4] ss:$52 sps:$4 sm:$0xff]   ;;  %v17248_v32 = vld [vmem:[%s24752_s1 + $0xffc] ss:$52 sps:$4 sm:$0xff]   ;;  %v6655_v34 = vadd.f32 %v20865_v29, %v20665_v2 }
 0x276   :  { %v17254_v35 = vld [vmem:[%s24752_s1 + $0xf94] ss:$52 sps:$4 sm:$0xff]  }
 0x277   :  { %6961 = vmatpush1.bf16.msra.mxu0 %v17192_v44  ;;  %v17251_v44 = vld [vmem:[%s24752_s1 + $0x167c] ss:$52 sps:$4 sm:$0xff]   ;;  %v6696_v29 = vadd.f32 %v20868_v6, %v6655_v34  ;;  %v17260_v6 = vld [vmem:[%s24752_s1 + $0xf2c] ss:$52 sps:$4 sm:$0xff]  }
 0x278   :  { %7002 = vmatpush1.bf16.msra.mxu1 %v17195_v45  ;;  %6962 = vmatprep.subr.bf16.mxu0 %v17200_v5  ;;  %v6653_v45 = vadd.f32 %v20853_v17, %v20661_v54  ;;  %v17246_v5 = vld [vmem:[%s24752_s1 + $0xff8] ss:$52 sps:$4 sm:$0xff]   ;;  %v17257_v54 = vld [vmem:[%s24752_s1 + $0x1614] ss:$52 sps:$4 sm:$0xff]  }
 0x279   :  { %7003 = vmatprep.subr.bf16.mxu1 %v17203_v47  ;;  %v17249_v47 = vld [vmem:[%s24752_s1 + $0x1678] ss:$52 sps:$4 sm:$0xff]  }
 0x27a   :  { %v6694_v2 = vadd.f32 %v20855_v18, %v6653_v45  ;;  %v16173_v18 = vunpack.i.l.bf16 %v20863_v23  ;;  %v17287_v45 = vld [vmem:[%s24752_s1 + $0x140c] ss:$52 sps:$4 sm:$0xff]  }
 0x27b   :  { %6963 = vmatpush2.bf16.msra.mxu0 %v17198_v26 }
 0x27c   :  { %7004 = vmatpush2.bf16.msra.mxu1 %v17201_v50  ;;  %6964 = vmatprep.subr.bf16.mxu0 %v17206_v51  ;;  %v17252_v50 = vld [vmem:[%s24752_s1 + $0xf90] ss:$52 sps:$4 sm:$0xff]  }
 0x27d   :  { %7005 = vmatprep.subr.bf16.mxu1 %v17209_v55  ;;  %v17255_v51 = vld [vmem:[%s24752_s1 + $0x1610] ss:$52 sps:$4 sm:$0xff]  }
 0x27f   :  { %6965 = vmatpush2.bf16.msra.mxu0 %v17204_v15  ;;  %v17263_v15 = vld [vmem:[%s24752_s1 + $0x15ac] ss:$52 sps:$4 sm:$0xff]  }
 0x280   :  { %7006 = vmatpush2.bf16.msra.mxu1 %v17207_v56  ;;  %6966 = vmatprep.subr.bf16.mxu0 %v17212_v12 }
 0x281   :  { %7007 = vmatprep.subr.bf16.mxu1 %v17215_v13  ;;  %v16169_v13 = vunpack.i.h.bf16 %v20845_v9  ;;  %v17272_v9 = vld [vmem:[%s24752_s1 + $0xe5c] ss:$52 sps:$4 sm:$0xff]  }
 0x283   :  { %6967 = vmatpush2.bf16.msra.mxu0 %v17210_v57 }
 0x284   :  { %7008 = vmatpush2.bf16.msra.mxu1 %v17213_v58  ;;  %6968 = vmatprep.subr.bf16.mxu0 %v17218_v59  ;;  %v17258_v59 = vld [vmem:[%s24752_s1 + $0xf28] ss:$52 sps:$4 sm:$0xff]  }
 0x285   :  { %7009 = vmatprep.subr.bf16.mxu1 %v17221_v60  ;;  %v17261_v60 = vld [vmem:[%s24752_s1 + $0x15a8] ss:$52 sps:$4 sm:$0xff]  }
 0x287   :  { %6969 = vmatpush2.bf16.msra.mxu0 %v17216_v41  ;;  %v7638_v41 = vsel %vm7635_vm1, %v16169_v13, %v16173_v18 }
 0x288   :  { %7010 = vmatpush2.bf16.msra.mxu1 %v17219_v61  ;;  %6970 = vmatprep.subr.bf16.mxu0 %v17224_v62  ;;  %v17266_v62 = vld [vmem:[%s24752_s1 + $0xec4] ss:$52 sps:$4 sm:$0xff]  }
 0x289   :  { %7011 = vmatprep.subr.bf16.mxu1 %v17227_v63  ;;  %v17269_v63 = vld [vmem:[%s24752_s1 + $0x1544] ss:$52 sps:$4 sm:$0xff]  }
 0x28b   :  { %6971 = vmatpush2.bf16.msra.mxu0 %v17222_v0 }
 0x28c   :  { %7012 = vmatpush2.bf16.msra.mxu1 %v17225_v1  ;;  %6972 = vmatprep.subr.bf16.mxu0 %v17230_v3  ;;  %v7637_v1 = vsel %vm7635_vm1, %v16168_v30, %v16169_v13  ;;  %v17264_v3 = vld [vmem:[%s24752_s1 + $0xec0] ss:$52 sps:$4 sm:$0xff]   ;;  %v17275_v30 = vld [vmem:[%s24752_s1 + $0x14dc] ss:$52 sps:$4 sm:$0xff]  }
 0x28d   :  { %7013 = vmatprep.subr.bf16.mxu1 %v17233_v4  ;;  %v17267_v4 = vld [vmem:[%s24752_s1 + $0x1540] ss:$52 sps:$4 sm:$0xff]  }
 0x28e   :  { %v17302_v13 = vld [vmem:[%s24752_s1 + $0x12d4] ss:$52 sps:$4 sm:$0xff]  }
 0x28f   :  { %6973 = vmatpush2.bf16.msra.mxu0 %v17228_v7  ;;  %v18728_v7 = vld [vmem:[#allocation2 + $0x10] sm:$0xff] }
 0x290   :  { %7014 = vmatpush2.bf16.msra.mxu1 %v17231_v14  ;;  %6974 = vmatprep.subr.bf16.mxu0 %v17236_v16  ;;  %v21058_v14 = vmax.f32 %v18728_v7, %v7638_v41  ;;  %v18729_v16 = vld [vmem:[#allocation2 + $0x8] sm:$0xff]  ;;  %v17323_v7 = vld [vmem:[%s24752_s1 + $0x181c] ss:$52 sps:$4 sm:$0xff]  }
 0x291   :  { %7015 = vmatprep.subr.bf16.mxu1 %v17239_v19  ;;  %v21067_v19 = vmax.f32 %v18729_v16, %v7637_v1  ;;  %v17311_v41 = vld [vmem:[%s24752_s1 + $0x18ec] ss:$52 sps:$4 sm:$0xff]   ;;  %v17326_v16 = vld [vmem:[%s24752_s1 + $0x1134] ss:$52 sps:$4 sm:$0xff]  }
 0x292   :  { %v17312_v1 = vld [vmem:[%s24752_s1 + $0x1200] ss:$52 sps:$4 sm:$0xff]  }
 0x293   :  { %6975 = vmatpush2.bf16.msra.mxu0 %v17234_v22  ;;  %v17270_v22 = vld [vmem:[%s24752_s1 + $0xe58] ss:$52 sps:$4 sm:$0xff]  }
 0x294   :  { %7016 = vmatpush2.bf16.msra.mxu1 %v17237_v31  ;;  %6976 = vmatprep.subr.bf16.mxu0 %v17242_v38  ;;  %v17273_v31 = vld [vmem:[%s24752_s1 + $0x14d8] ss:$52 sps:$4 sm:$0xff]   ;;  %v16180_v38 = vpack.i.bf16 %v21058_v14, %v21067_v19 }
 0x295   :  { %7017 = vmatprep.subr.bf16.mxu1 %v17245_v33  ;;  %v17278_v33 = vld [vmem:[%s24752_s1 + $0xdf4] ss:$52 sps:$4 sm:$0xff]  }
 0x297   :  { %6977 = vmatpush2.bf16.msra.mxu0 %v17240_v39  ;;  %v17281_v39 = vld [vmem:[%s24752_s1 + $0x1474] ss:$52 sps:$4 sm:$0xff]  }
 0x298   :  { %7018 = vmatpush2.bf16.msra.mxu1 %v17243_v42  ;;  %7028 = vmatprep.subr.bf16.mxu0 %v17248_v32  ;;  %v17276_v42 = vld [vmem:[%s24752_s1 + $0xdf0] ss:$52 sps:$4 sm:$0xff]  }
 0x299   :  { %7069 = vmatprep.subr.bf16.mxu1 %v17251_v44  ;;  %v17279_v32 = vld [vmem:[%s24752_s1 + $0x1470] ss:$52 sps:$4 sm:$0xff]   ;;  %v17284_v44 = vld [vmem:[%s24752_s1 + $0xd8c] ss:$52 sps:$4 sm:$0xff]  }
 0x29a   :  { %v6734_v17 = vpop.f32.mrf.mxu0  ;;  %6979 = vmatmul.mubr.bf16.vlgmr.msra.gmra.mxu0 %v19011_v8 }
 0x29b   :  { %7020 = vmatmul.mubr.bf16.vlgmr.msra.gmra.mxu1 %v19019_v11  ;;  %v21013_v26 = vadd.f32 %v6734_v17, %v6694_v2  ;;  %7029 = vmatpush1.bf16.msra.mxu0 %v17246_v5  ;;  %v17282_v5 = vld [vmem:[%s24752_s1 + $0xd88] ss:$52 sps:$4 sm:$0xff]  }
 0x29c   :  { %7070 = vmatpush1.bf16.msra.mxu1 %v17249_v47  ;;  %v6736_v55 = vpop.f32.mrf.mxu0  ;;  %7030 = vmatprep.subr.bf16.mxu0 %v17254_v35  ;;  %v17285_v47 = vld [vmem:[%s24752_s1 + $0x1408] ss:$52 sps:$4 sm:$0xff]   ;;  %v17290_v35 = vld [vmem:[%s24752_s1 + $0xd24] ss:$52 sps:$4 sm:$0xff]  }
 0x29d   :  { %7071 = vmatprep.subr.bf16.mxu1 %v17257_v54  ;;  %v7560_v56 = vmax.f32 %v21013_v26, 0.0  ;;  %v6737_v12 = vadd.f32 %v6736_v55, %v6696_v29  ;;  %7060 = vmatprep.mubr.bf16.mxu0 %v19095_v36  ;;  %v17293_v54 = vld [vmem:[%s24752_s1 + $0x13a4] ss:$52 sps:$4 sm:$0xff]   ;;  %v17288_v29 = vld [vmem:[%s24752_s1 + $0xd20] ss:$52 sps:$4 sm:$0xff]  }
 0x29e   :  { %7101 = vmatprep.mubr.bf16.mxu1 %v19106_v40  ;;  %v6738_v57 = vpop.f32.mrf.mxu0  ;;  %v17299_v55 = vld [vmem:[%s24752_s1 + $0x19bc] ss:$52 sps:$4 sm:$0xff]  }
 0x29f   :  { %v7561_v58 = vmax.f32 %v6737_v12, 0.0  ;;  %7031 = vmatpush1.bf16.msra.mxu0 %v17252_v50  ;;  %v17291_v50 = vld [vmem:[%s24752_s1 + $0x13a0] ss:$52 sps:$4 sm:$0xff]   ;;  %v17297_v12 = vld [vmem:[%s24752_s1 + $0x19b8] ss:$52 sps:$4 sm:$0xff]  }
 0x2a0   :  { %7072 = vmatpush1.bf16.msra.mxu1 %v17255_v51  ;;  %v6739_v61 = vpop.f32.mrf.mxu0  ;;  %7032 = vmatprep.subr.bf16.mxu0 %v17260_v6  ;;  %v17296_v51 = vld [vmem:[%s24752_s1 + $0x133c] ss:$52 sps:$4 sm:$0xff]   ;;  %v17305_v57 = vld [vmem:[%s24752_s1 + $0x1954] ss:$52 sps:$4 sm:$0xff]  }
 0x2a1   :  { %7073 = vmatprep.subr.bf16.mxu1 %v17263_v15  ;;  %7574 = vst [vmem:[#allocation2 + $0x28] sm:$0xff] %v7561_v58  ;;  %v16175_v0 = vpack.i.bf16 %v7561_v58, %v7560_v56  ;;  %v17294_v15 = vld [vmem:[%s24752_s1 + $0x1338] ss:$52 sps:$4 sm:$0xff]   ;;  %v17300_v58 = vld [vmem:[%s24752_s1 + $0x12d0] ss:$52 sps:$4 sm:$0xff]  }
 0x2a2   :  { %v17306_v61 = vld [vmem:[%s24752_s1 + $0x1268] ss:$52 sps:$4 sm:$0xff]  }
 0x2a3   :  { %7033 = vmatpush1.bf16.msra.mxu0 %v17258_v59  ;;  %16176 = vrot.lane.b32.xlu1 %v16175_v0, %s18739_s14  ;;  %v17303_v59 = vld [vmem:[%s24752_s1 + $0x1950] ss:$52 sps:$4 sm:$0xff]  }
 0x2a4   :  { %7074 = vmatpush1.bf16.msra.mxu1 %v17261_v60  ;;  %7034 = vmatprep.subr.bf16.mxu0 %v17266_v62  ;;  %v17308_v60 = vld [vmem:[%s24752_s1 + $0x126c] ss:$52 sps:$4 sm:$0xff]   ;;  %v17309_v62 = vld [vmem:[%s24752_s1 + $0x18e8] ss:$52 sps:$4 sm:$0xff]   ;;  %v17317_v0 = vld [vmem:[%s24752_s1 + $0x1884] ss:$52 sps:$4 sm:$0xff]  }
 0x2a5   :  { %7075 = vmatprep.subr.bf16.mxu1 %v17269_v63  ;;  %v17314_v63 = vld [vmem:[%s24752_s1 + $0x1204] ss:$52 sps:$4 sm:$0xff]  }
 0x2a7   :  { %7035 = vmatpush1.bf16.msra.mxu0 %v17264_v3  ;;  %16181 = vrot.lane.b32.xlu1 %v16180_v38, %s18740_s10  ;;  %v17315_v3 = vld [vmem:[%s24752_s1 + $0x1880] ss:$52 sps:$4 sm:$0xff]   ;;  %v17327_v38 = vld [vmem:[%s24752_s1 + $0x17b0] ss:$52 sps:$4 sm:$0xff]  }
 0x2a8   :  { %7076 = vmatpush1.bf16.msra.mxu1 %v17267_v4  ;;  %7036 = vmatprep.subr.bf16.mxu0 %v17272_v9  ;;  %v17320_v4 = vld [vmem:[%s24752_s1 + $0x119c] ss:$52 sps:$4 sm:$0xff]   ;;  %v17318_v9 = vld [vmem:[%s24752_s1 + $0x1198] ss:$52 sps:$4 sm:$0xff]  }
 0x2a9   :  { %7077 = vmatprep.subr.bf16.mxu1 %v17275_v30  ;;  %v17321_v30 = vld [vmem:[%s24752_s1 + $0x1818] ss:$52 sps:$4 sm:$0xff]  }
 0x2ab   :  { %7037 = vmatpush1.bf16.msra.mxu0 %v17270_v22  ;;  %v17329_v22 = vld [vmem:[%s24752_s1 + $0x17b4] ss:$52 sps:$4 sm:$0xff]  }
 0x2ac   :  { %7078 = vmatpush1.bf16.msra.mxu1 %v17273_v31  ;;  %7038 = vmatprep.subr.bf16.mxu0 %v17278_v33  ;;  %v17324_v31 = vld [vmem:[%s24752_s1 + $0x1130] ss:$52 sps:$4 sm:$0xff]   ;;  %v17332_v33 = vld [vmem:[%s24752_s1 + $0x10cc] ss:$52 sps:$4 sm:$0xff]  }
 0x2ad   :  { %7079 = vmatprep.subr.bf16.mxu1 %v17281_v39  ;;  %v17335_v39 = vld [vmem:[%s24752_s1 + $0x174c] ss:$52 sps:$4 sm:$0xff]  }
 0x2af   :  { %v21096_v34 = vpop.f32.mrf.mxu1  ;;  %7039 = vmatpush1.bf16.msra.mxu0 %v17276_v42  ;;  %v17330_v42 = vld [vmem:[%s24752_s1 + $0x10c8] ss:$52 sps:$4 sm:$0xff]  }
 0x2b0   :  { %7080 = vmatpush1.bf16.msra.mxu1 %v17279_v32  ;;  %7040 = vmatprep.subr.bf16.mxu0 %v17284_v44  ;;  %v17333_v32 = vld [vmem:[%s24752_s1 + $0x1748] ss:$52 sps:$4 sm:$0xff]   ;;  %v17338_v44 = vld [vmem:[%s24752_s1 + $0x1064] ss:$52 sps:$4 sm:$0xff]  }
 0x2b1   :  { %7081 = vmatprep.subr.bf16.mxu1 %v17287_v45  ;;  %v21110_v2 = vpop.f32.mrf.mxu1  ;;  %v17341_v45 = vld [vmem:[%s24752_s1 + $0x16e4] ss:$52 sps:$4 sm:$0xff]  }
 0x2b3   :  { %v6779_v17 = vpop.f32.mrf.mxu1  ;;  %7041 = vmatpush1.bf16.msra.mxu0 %v17282_v5  ;;  %v17336_v5 = vld [vmem:[%s24752_s1 + $0x1060] ss:$52 sps:$4 sm:$0xff]  }
 0x2b4   :  { %7082 = vmatpush1.bf16.msra.mxu1 %v17285_v47  ;;  %7042 = vmatprep.subr.bf16.mxu0 %v17290_v35  ;;  %v17339_v47 = vld [vmem:[%s24752_s1 + $0x16e0] ss:$52 sps:$4 sm:$0xff]   ;;  %v17344_v35 = vld [vmem:[%s24752_s1 + $0x1cfc] ss:$52 sps:$4 sm:$0xff]   ;;  %v17342_v17 = vld [vmem:[%s24752_s1 + $0x1cf8] ss:$52 sps:$4 sm:$0xff]  }
 0x2b5   :  { %7083 = vmatprep.subr.bf16.mxu1 %v17293_v54  ;;  %v6780_v6 = vpop.f32.mrf.mxu1  ;;  %v17347_v54 = vld [vmem:[%s24752_s1 + $0x304] ss:$52 sps:$4 sm:$0xff]  }
 0x2b6   :  { %v17348_v6 = vld [vmem:[%s24752_s1 + $0x1c90] ss:$52 sps:$4 sm:$0xff]  }
 0x2b7   :  { %7043 = vmatpush1.bf16.msra.mxu0 %v17288_v29  ;;  %v17345_v29 = vld [vmem:[%s24752_s1 + $0x300] ss:$52 sps:$4 sm:$0xff]  }
 0x2b8   :  { %7084 = vmatpush1.bf16.msra.mxu1 %v17291_v50  ;;  %7044 = vmatprep.subr.bf16.mxu0 %v17296_v51  ;;  %v17350_v50 = vld [vmem:[%s24752_s1 + $0x1c94] ss:$52 sps:$4 sm:$0xff]   ;;  %v17353_v51 = vld [vmem:[%s24752_s1 + $0x29c] ss:$52 sps:$4 sm:$0xff]  }
 0x2b9   :  { %7085 = vmatprep.subr.bf16.mxu1 %v17299_v55 }
 0x2bb   :  { %7045 = vmatpush2.bf16.msra.mxu0 %v17294_v15  ;;  %v17351_v15 = vld [vmem:[%s24752_s1 + $0x298] ss:$52 sps:$4 sm:$0xff]  }
 0x2bc   :  { %7086 = vmatpush2.bf16.msra.mxu1 %v17297_v12  ;;  %7046 = vmatprep.subr.bf16.mxu0 %v17302_v13  ;;  %v17356_v13 = vld [vmem:[%s24752_s1 + $0x1c2c] ss:$52 sps:$4 sm:$0xff]  }
 0x2bd   :  { %7087 = vmatprep.subr.bf16.mxu1 %v17305_v57  ;;  %v17359_v57 = vld [vmem:[%s24752_s1 + $0x234] ss:$52 sps:$4 sm:$0xff]  }
 0x2bf   :  { %7047 = vmatpush2.bf16.msra.mxu0 %v17300_v58 }
 0x2c0   :  { %7088 = vmatpush2.bf16.msra.mxu1 %v17303_v59  ;;  %7048 = vmatprep.subr.bf16.mxu0 %v17308_v60  ;;  %v17354_v59 = vld [vmem:[%s24752_s1 + $0x1c28] ss:$52 sps:$4 sm:$0xff]   ;;  %v17357_v60 = vld [vmem:[%s24752_s1 + $0x230] ss:$52 sps:$4 sm:$0xff]  }
 0x2c1   :  { %7089 = vmatprep.subr.bf16.mxu1 %v17311_v41 }
 0x2c3   :  { %7049 = vmatpush2.bf16.msra.mxu0 %v17306_v61  ;;  %v17362_v61 = vld [vmem:[%s24752_s1 + $0x1bc4] ss:$52 sps:$4 sm:$0xff]  }
 0x2c4   :  { %7090 = vmatpush2.bf16.msra.mxu1 %v17309_v62  ;;  %7050 = vmatprep.subr.bf16.mxu0 %v17314_v63  ;;  %v17365_v62 = vld [vmem:[%s24752_s1 + $0x1cc] ss:$52 sps:$4 sm:$0xff]  }
 0x2c5   :  { %7091 = vmatprep.subr.bf16.mxu1 %v17317_v0  ;;  %v17360_v63 = vld [vmem:[%s24752_s1 + $0x1bc0] ss:$52 sps:$4 sm:$0xff]   ;;  %v17363_v0 = vld [vmem:[%s24752_s1 + $0x1c8] ss:$52 sps:$4 sm:$0xff]  }
 0x2c7   :  { %7051 = vmatpush2.bf16.msra.mxu0 %v17312_v1  ;;  %v17368_v1 = vld [vmem:[%s24752_s1 + $0x1b5c] ss:$52 sps:$4 sm:$0xff]  }
 0x2c8   :  { %7092 = vmatpush2.bf16.msra.mxu1 %v17315_v3  ;;  %7052 = vmatprep.subr.bf16.mxu0 %v17320_v4  ;;  %v17371_v3 = vld [vmem:[%s24752_s1 + $0x164] ss:$52 sps:$4 sm:$0xff]  }
 0x2c9   :  { %7093 = vmatprep.subr.bf16.mxu1 %v17323_v7  ;;  %v17366_v4 = vld [vmem:[%s24752_s1 + $0x1b58] ss:$52 sps:$4 sm:$0xff]   ;;  %v17369_v7 = vld [vmem:[%s24752_s1 + $0x160] ss:$52 sps:$4 sm:$0xff]  }
 0x2cb   :  { %7053 = vmatpush2.bf16.msra.mxu0 %v17318_v9  ;;  %v17374_v9 = vld [vmem:[%s24752_s1 + $0x1af4] ss:$52 sps:$4 sm:$0xff]  }
 0x2cc   :  { %7094 = vmatpush2.bf16.msra.mxu1 %v17321_v30  ;;  %7054 = vmatprep.subr.bf16.mxu0 %v17326_v16  ;;  %v17377_v30 = vld [vmem:[%s24752_s1 + $0xfc] ss:$52 sps:$4 sm:$0xff]  }
 0x2cd   :  { %7095 = vmatprep.subr.bf16.mxu1 %v17329_v22  ;;  %v17372_v16 = vld [vmem:[%s24752_s1 + $0x1af0] ss:$52 sps:$4 sm:$0xff]   ;;  %v17375_v22 = vld [vmem:[%s24752_s1 + $0xf8] ss:$52 sps:$4 sm:$0xff]  }
 0x2cf   :  { %7055 = vmatpush2.bf16.msra.mxu0 %v17324_v31  ;;  %v17380_v31 = vld [vmem:[%s24752_s1 + $0x1a8c] ss:$52 sps:$4 sm:$0xff]  }
 0x2d0   :  { %7096 = vmatpush2.bf16.msra.mxu1 %v17327_v38  ;;  %7056 = vmatprep.subr.bf16.mxu0 %v17332_v33  ;;  %v17383_v38 = vld [vmem:[%s24752_s1 + $0x94] ss:$52 sps:$4 sm:$0xff]  }
 0x2d1   :  { %7097 = vmatprep.subr.bf16.mxu1 %v17335_v39  ;;  %v17378_v39 = vld [vmem:[%s24752_s1 + $0x1a88] ss:$52 sps:$4 sm:$0xff]  }
 0x2d3   :  { %7057 = vmatpush2.bf16.msra.mxu0 %v17330_v42  ;;  %v17381_v42 = vld [vmem:[%s24752_s1 + $0x90] ss:$52 sps:$4 sm:$0xff]  }
 0x2d4   :  { %7098 = vmatpush2.bf16.msra.mxu1 %v17333_v32  ;;  %7058 = vmatprep.subr.bf16.mxu0 %v17338_v44  ;;  %v17386_v44 = vld [vmem:[%s24752_s1 + $0x1a24] ss:$52 sps:$4 sm:$0xff]  }
 0x2d5   :  { %7099 = vmatprep.subr.bf16.mxu1 %v17341_v45  ;;  %v17389_v45 = vld [vmem:[%s24752_s1 + $0x2c] ss:$52 sps:$4 sm:$0xff]  }
 0x2d7   :  { %7059 = vmatpush2.bf16.msra.mxu0 %v17336_v5 }
 0x2d8   :  { %7100 = vmatpush2.bf16.msra.mxu1 %v17339_v47  ;;  %7110 = vmatprep.subr.bf16.mxu0 %v17344_v35  ;;  %v17384_v47 = vld [vmem:[%s24752_s1 + $0x1a20] ss:$52 sps:$4 sm:$0xff]   ;;  %v17387_v35 = vld [vmem:[%s24752_s1 + $0x28] ss:$52 sps:$4 sm:$0xff]  }
 0x2d9   :  { %7151 = vmatprep.subr.bf16.mxu1 %v17347_v54  ;;  %v17392_v54 = vld [vmem:[%s24752_s1 + $0x1e34] ss:$52 sps:$4 sm:$0xff]  }
 0x2da   :  { %v21232_v55 = vpop.f32.mrf.mxu0  ;;  %7061 = vmatmul.mubr.bf16.vlgmr.msra.gmra.mxu0 %v19227_v20 }
 0x2db   :  { %7102 = vmatmul.mubr.bf16.vlgmr.msra.gmra.mxu1 %v19229_v21  ;;  %7111 = vmatpush1.bf16.msra.mxu0 %v17342_v17  ;;  %v17395_v17 = vld [vmem:[%s24752_s1 + $0x644] ss:$52 sps:$4 sm:$0xff]  }
 0x2dc   :  { %7152 = vmatpush1.bf16.msra.mxu1 %v17345_v29  ;;  %v21242_v12 = vpop.f32.mrf.mxu0  ;;  %7112 = vmatprep.subr.bf16.mxu0 %v17350_v50  ;;  %v17390_v50 = vld [vmem:[%s24752_s1 + $0x1e30] ss:$52 sps:$4 sm:$0xff]  }
 0x2dd   :  { %7153 = vmatprep.subr.bf16.mxu1 %v17353_v51  ;;  %15075 = vmatprep.mubr.msk.bf16.mxu0 %vm6122_vm0, %v19246_v27  ;;  %v17393_v51 = vld [vmem:[%s24752_s1 + $0x640] ss:$52 sps:$4 sm:$0xff]  }
 0x2de   :  { %7183 = vmatprep.mubr.bf16.mxu1 %v18939_v48  ;;  %v6820_v58 = vpop.f32.mrf.mxu0 }
 0x2df   :  { %7113 = vmatpush1.bf16.msra.mxu0 %v17348_v6  ;;  %v17398_v6 = vld [vmem:[%s24752_s1 + $0x1dcc] ss:$52 sps:$4 sm:$0xff]   ;;  %v17404_v58 = vld [vmem:[%s24752_s1 + $0x1d64] ss:$52 sps:$4 sm:$0xff]  }
 0x2e0   :  { %7154 = vmatpush1.bf16.msra.mxu1 %v17351_v15  ;;  %v6821_v41 = vpop.f32.mrf.mxu0  ;;  %7114 = vmatprep.subr.bf16.mxu0 %v17356_v13  ;;  %v17401_v15 = vld [vmem:[%s24752_s1 + $0x5dc] ss:$52 sps:$4 sm:$0xff]  }
 0x2e1   :  { %7155 = vmatprep.subr.bf16.mxu1 %v17359_v57  ;;  %v17396_v13 = vld [vmem:[%s24752_s1 + $0x1dc8] ss:$52 sps:$4 sm:$0xff]   ;;  %v17399_v57 = vld [vmem:[%s24752_s1 + $0x5d8] ss:$52 sps:$4 sm:$0xff]   ;;  %v17405_v41 = vld [vmem:[%s24752_s1 + $0x570] ss:$52 sps:$4 sm:$0xff]  }
 0x2e3   :  { %7115 = vmatpush1.bf16.msra.mxu0 %v17354_v59  ;;  %v17407_v59 = vld [vmem:[%s24752_s1 + $0x574] ss:$52 sps:$4 sm:$0xff]  }
 0x2e4   :  { %7156 = vmatpush1.bf16.msra.mxu1 %v17357_v60  ;;  %7116 = vmatprep.subr.bf16.mxu0 %v17362_v61  ;;  %v17402_v60 = vld [vmem:[%s24752_s1 + $0x1d60] ss:$52 sps:$4 sm:$0xff]  }
 0x2e5   :  { %7157 = vmatprep.subr.bf16.mxu1 %v17365_v62  ;;  %v17410_v61 = vld [vmem:[%s24752_s1 + $0x50c] ss:$52 sps:$4 sm:$0xff]   ;;  %v17413_v62 = vld [vmem:[%s24752_s1 + $0x984] ss:$52 sps:$4 sm:$0xff]  }
 0x2e7   :  { %7117 = vmatpush1.bf16.msra.mxu0 %v17360_v63  ;;  %v17408_v63 = vld [vmem:[%s24752_s1 + $0x508] ss:$52 sps:$4 sm:$0xff]  }
 0x2e8   :  { %7158 = vmatpush1.bf16.msra.mxu1 %v17363_v0  ;;  %7118 = vmatprep.subr.bf16.mxu0 %v17368_v1  ;;  %v17411_v0 = vld [vmem:[%s24752_s1 + $0x980] ss:$52 sps:$4 sm:$0xff]   ;;  %v17416_v1 = vld [vmem:[%s24752_s1 + $0x4a4] ss:$52 sps:$4 sm:$0xff]  }
 0x2e9   :  { %7159 = vmatprep.subr.bf16.mxu1 %v17371_v3  ;;  %v17419_v3 = vld [vmem:[%s24752_s1 + $0x91c] ss:$52 sps:$4 sm:$0xff]  }
 0x2eb   :  { %7119 = vmatpush1.bf16.msra.mxu0 %v17366_v4  ;;  %v17414_v4 = vld [vmem:[%s24752_s1 + $0x4a0] ss:$52 sps:$4 sm:$0xff]  }
 0x2ec   :  { %7160 = vmatpush1.bf16.msra.mxu1 %v17369_v7  ;;  %7120 = vmatprep.subr.bf16.mxu0 %v17374_v9  ;;  %v17417_v7 = vld [vmem:[%s24752_s1 + $0x918] ss:$52 sps:$4 sm:$0xff]   ;;  %v17422_v9 = vld [vmem:[%s24752_s1 + $0x43c] ss:$52 sps:$4 sm:$0xff]  }
 0x2ed   :  { %7161 = vmatprep.subr.bf16.mxu1 %v17377_v30  ;;  %v17425_v30 = vld [vmem:[%s24752_s1 + $0x8b4] ss:$52 sps:$4 sm:$0xff]  }
 0x2ef   :  { %v21301_v33 = vpop.f32.mrf.mxu1  ;;  %7121 = vmatpush1.bf16.msra.mxu0 %v17372_v16  ;;  %v17420_v16 = vld [vmem:[%s24752_s1 + $0x438] ss:$52 sps:$4 sm:$0xff]  }
 0x2f0   :  { %7162 = vmatpush1.bf16.msra.mxu1 %v17375_v22  ;;  %7122 = vmatprep.subr.bf16.mxu0 %v17380_v31  ;;  %v17423_v22 = vld [vmem:[%s24752_s1 + $0x8b0] ss:$52 sps:$4 sm:$0xff]   ;;  %v17428_v31 = vld [vmem:[%s24752_s1 + $0x3d4] ss:$52 sps:$4 sm:$0xff]  }
 0x2f1   :  { %v21309_v32 = vpop.f32.mrf.mxu1  ;;  %7163 = vmatprep.subr.bf16.mxu1 %v17383_v38  ;;  %v17431_v38 = vld [vmem:[%s24752_s1 + $0x84c] ss:$52 sps:$4 sm:$0xff]  }
 0x2f3   :  { %v6861_v5 = vpop.f32.mrf.mxu1  ;;  %7123 = vmatpush1.bf16.msra.mxu0 %v17378_v39  ;;  %v1133_v39 = vsub.s32 6, %v19621_v43 }
 0x2f4   :  { %7164 = vmatpush1.bf16.msra.mxu1 %v17381_v42  ;;  %7124 = vmatprep.subr.bf16.mxu0 %v17386_v44  ;;  %v1137_v42 = vsub.s32 7, %v19621_v43  ;;  %v17426_v44 = vld [vmem:[%s24752_s1 + $0x3d0] ss:$52 sps:$4 sm:$0xff]   ;;  %v17434_v5 = vld [vmem:[%s24752_s1 + $0x36c] ss:$52 sps:$4 sm:$0xff]   ;;  %v18689_v43 = vld [vmem:[%s24757_s5 + $0xb8] sm:$0xff]  }
 0x2f5   :  { %7165 = vmatprep.subr.bf16.mxu1 %v17389_v45  ;;  %v6862_v29 = vpop.f32.mrf.mxu1  ;;  %v17429_v45 = vld [vmem:[%s24752_s1 + $0x848] ss:$52 sps:$4 sm:$0xff]  }
 0x2f6   :  { %v17432_v29 = vld [vmem:[%s24752_s1 + $0x368] ss:$52 sps:$4 sm:$0xff]  }
 0x2f7   :  { %7125 = vmatpush1.bf16.msra.mxu0 %v17384_v47  ;;  %v17437_v47 = vld [vmem:[%s24752_s1 + $0x7e4] ss:$52 sps:$4 sm:$0xff]  }
 0x2f8   :  { %7166 = vmatpush1.bf16.msra.mxu1 %v17387_v35  ;;  %7136 = vmatprep.subr.bf16.mxu0 %v17392_v54  ;;  %v18730_v35 = vld [vmem:[%s24754_s2] sm:$0xff] }
 0x2f9   :  { %7167 = vmatprep.subr.bf16.mxu1 %v17395_v17  ;;  %v1134_v54 = vrot.slane %v18730_v35, %v1133_v39  ;;  %v1138_v17 = vrot.slane %v18730_v35, %v1137_v42 }
 0x2fb   :  { %7137 = vmatpush2.bf16.msra.mxu0 %v17390_v50  ;;  %v17435_v50 = vld [vmem:[%s24752_s1 + $0x7e0] ss:$52 sps:$4 sm:$0xff]  }
 0x2fc   :  { %7168 = vmatpush2.bf16.msra.mxu1 %v17393_v51  ;;  %7138 = vmatprep.subr.bf16.mxu0 %v17398_v6  ;;  %v17440_v51 = vld [vmem:[%s24752_s1 + $0x77c] ss:$52 sps:$4 sm:$0xff]   ;;  %v17443_v6 = vld [vmem:[%s24752_s1 + $0x1004] ss:$52 sps:$4 sm:$0xff]  }
 0x2fd   :  { %7169 = vmatprep.subr.bf16.mxu1 %v17401_v15  ;;  %v6776_v15 = vadd.f32 %v21096_v34, %v1134_v54  ;;  %v17458_v54 = vld [vmem:[%s24752_s1 + $0xcc4] ss:$52 sps:$4 sm:$0xff]  }
 0x2ff   :  { %7139 = vmatpush2.bf16.msra.mxu0 %v17396_v13  ;;  %v6778_v13 = vadd.f32 %v21110_v2, %v1138_v17  ;;  %v17461_v17 = vld [vmem:[%s24752_s1 + $0xecc] ss:$52 sps:$4 sm:$0xff]  }
 0x300   :  { %7170 = vmatpush2.bf16.msra.mxu1 %v17399_v57  ;;  %7140 = vmatprep.subr.bf16.mxu0 %v17404_v58  ;;  %v6817_v57 = vadd.f32 %v21232_v55, %v6776_v15  ;;  %v17438_v58 = vld [vmem:[%s24752_s1 + $0x778] ss:$52 sps:$4 sm:$0xff]   ;;  %v17446_v55 = vld [vmem:[%s24752_s1 + $0x714] ss:$52 sps:$4 sm:$0xff]  }
 0x301   :  { %7171 = vmatprep.subr.bf16.mxu1 %v17407_v59  ;;  %v17441_v59 = vld [vmem:[%s24752_s1 + $0x1000] ss:$52 sps:$4 sm:$0xff]  }
 0x303   :  { %7141 = vmatpush2.bf16.msra.mxu0 %v17402_v60 }
 0x304   :  { %7172 = vmatpush2.bf16.msra.mxu1 %v17405_v41  ;;  %7192 = vmatprep.subr.bf16.mxu0 %v17413_v62  ;;  %v6819_v41 = vadd.f32 %v21242_v12, %v6778_v13  ;;  %v6858_v62 = vadd.f32 %v21301_v33, %v6817_v57  ;;  %v17444_v33 = vld [vmem:[%s24752_s1 + $0x710] ss:$52 sps:$4 sm:$0xff]  }
 0x305   :  { %7173 = vmatprep.subr.bf16.mxu1 %v17410_v61  ;;  %v17449_v61 = vld [vmem:[%s24752_s1 + $0xf9c] ss:$52 sps:$4 sm:$0xff]   ;;  %v17467_v57 = vld [vmem:[%s24752_s1 + $0xe64] ss:$52 sps:$4 sm:$0xff]  }
 0x306   :  { %7143 = vmatmul.mubr.bf16.vlgmr.msra.gmra.mxu0 %v19376_v10  ;;  %v17464_v13 = vld [vmem:[%s24752_s1 + $0xc5c] ss:$52 sps:$4 sm:$0xff]  }
 0x307   :  { %7193 = vmatpush1.bf16.msra.mxu0 %v17411_v0  ;;  %7224 = vmatprep.mubr.bf16.mxu0 %v18950_v52 }
 0x308   :  { %7174 = vmatpush2.bf16.msra.mxu1 %v17408_v63  ;;  %7194 = vmatprep.subr.bf16.mxu0 %v17419_v3  ;;  %v6860_v63 = vadd.f32 %v21309_v32, %v6819_v41  ;;  %v17447_v32 = vld [vmem:[%s24752_s1 + $0xf98] ss:$52 sps:$4 sm:$0xff]   ;;  %v17470_v41 = vld [vmem:[%s24752_s1 + $0xbf4] ss:$52 sps:$4 sm:$0xff]  }
 0x309   :  { %7175 = vmatprep.subr.bf16.mxu1 %v17416_v1 }
 0x30b   :  { %7195 = vmatpush1.bf16.msra.mxu0 %v17417_v7  ;;  %v18731_v7 = vld [vmem:[#allocation2 + $0x18] sm:$0xff] }
 0x30c   :  { %7176 = vmatpush2.bf16.msra.mxu1 %v17414_v4  ;;  %7196 = vmatprep.subr.bf16.mxu0 %v17425_v30 }
 0x30d   :  { %7177 = vmatprep.subr.bf16.mxu1 %v17422_v9 }
 0x30f   :  { %7197 = vmatpush1.bf16.msra.mxu0 %v17423_v22  ;;  %v17455_v22 = vld [vmem:[%s24752_s1 + $0xf34] ss:$52 sps:$4 sm:$0xff]  }
 0x310   :  { %7178 = vmatpush2.bf16.msra.mxu1 %v17420_v16  ;;  %7198 = vmatprep.subr.bf16.mxu0 %v17431_v38  ;;  %v17452_v16 = vld [vmem:[%s24752_s1 + $0x6ac] ss:$52 sps:$4 sm:$0xff]  }
 0x311   :  { %7179 = vmatprep.subr.bf16.mxu1 %v17428_v31 }
 0x313   :  { %7199 = vmatpush1.bf16.msra.mxu0 %v17429_v45 }
 0x314   :  { %7180 = vmatpush2.bf16.msra.mxu1 %v17426_v44  ;;  %7200 = vmatprep.subr.bf16.mxu0 %v17437_v47  ;;  %v17453_v47 = vld [vmem:[%s24752_s1 + $0xf30] ss:$52 sps:$4 sm:$0xff]  }
 0x315   :  { %7181 = vmatprep.subr.bf16.mxu1 %v17434_v5  ;;  %v21443_v60 = vpop.permute.xlu1 %16176  ;;  %v17450_v5 = vld [vmem:[%s24752_s1 + $0x6a8] ss:$52 sps:$4 sm:$0xff]  }
 0x316   :  { %v16179_v34 = vunpack.i.h.bf16 %v21443_v60  ;;  %v16178_v2 = vunpack.i.l.bf16 %v21443_v60  ;;  %v17628_v60 = vld [vmem:[%s24752_s1 + $0x370] ss:$52 sps:$4 sm:$0xff]  }
 0x317   :  { %7201 = vmatpush1.bf16.msra.mxu0 %v17435_v50 }
 0x318   :  { %7182 = vmatpush2.bf16.msra.mxu1 %v17432_v29  ;;  %7202 = vmatprep.subr.bf16.mxu0 %v17440_v51  ;;  %v7639_v1 = vsel %vm7635_vm1, %v16173_v18, %v16178_v2  ;;  %v7640_v3 = vsel %vm7635_vm1, %v16178_v2, %v16179_v34  ;;  %v17456_v51 = vld [vmem:[%s24752_s1 + $0xcc0] ss:$52 sps:$4 sm:$0xff]   ;;  %v17473_v2 = vld [vmem:[%s24752_s1 + $0xdfc] ss:$52 sps:$4 sm:$0xff]  }
 0x319   :  { %7233 = vmatprep.subr.bf16.mxu1 %v17443_v6  ;;  %v21469_v9 = vmax.f32 %v18731_v7, %v7639_v1  ;;  %v21473_v23 = vmax.f32 %v7560_v56, %v7640_v3  ;;  %v17459_v6 = vld [vmem:[%s24752_s1 + $0xec8] ss:$52 sps:$4 sm:$0xff]   ;;  %v17482_v1 = vld [vmem:[%s24752_s1 + $0xb24] ss:$52 sps:$4 sm:$0xff]   ;;  %v17485_v3 = vld [vmem:[%s24752_s1 + $0xd2c] ss:$52 sps:$4 sm:$0xff]  }
 0x31a   :  { %v6898_v0 = vpop.f32.mrf.mxu0  ;;  %v17491_v7 = vld [vmem:[%s24752_s1 + $0x1344] ss:$52 sps:$4 sm:$0xff]  }
 0x31b   :  { %7184 = vmatmul.mubr.bf16.vlgmr.msra.gmra.mxu1 %v19011_v8  ;;  %v6939_v12 = vpop.f32.mrf.mxu1  ;;  %v6899_v4 = vadd.f32 %v6898_v0, %v6858_v62  ;;  %7203 = vmatpush1.bf16.msra.mxu0 %v17438_v58  ;;  %v16190_v26 = vpack.i.bf16 %v21473_v23, %v21469_v9  ;;  %v17462_v58 = vld [vmem:[%s24752_s1 + $0xc58] ss:$52 sps:$4 sm:$0xff]   ;;  %v17474_v0 = vld [vmem:[%s24752_s1 + $0xb88] ss:$52 sps:$4 sm:$0xff]  }
 0x31c   :  { %7234 = vmatpush1.bf16.msra.mxu1 %v17441_v59  ;;  %v6900_v18 = vpop.f32.mrf.mxu0  ;;  %7204 = vmatprep.subr.bf16.mxu0 %v17446_v55  ;;  %v17465_v59 = vld [vmem:[%s24752_s1 + $0xe60] ss:$52 sps:$4 sm:$0xff]   ;;  %v17468_v55 = vld [vmem:[%s24752_s1 + $0xbf0] ss:$52 sps:$4 sm:$0xff]  }
 0x31d   :  { %v6941_v30 = vpop.f32.mrf.mxu1  ;;  %7235 = vmatprep.subr.bf16.mxu1 %v17449_v61  ;;  %v6901_v31 = vadd.f32 %v6900_v18, %v6860_v63  ;;  %v21481_v38 = vadd.f32 %v6939_v12, %v6899_v4  ;;  %7265 = vmatprep.mubr.bf16.mxu1 %v19095_v36  ;;  %v17471_v61 = vld [vmem:[%s24752_s1 + $0xdf8] ss:$52 sps:$4 sm:$0xff]   ;;  %v17479_v63 = vld [vmem:[%s24752_s1 + $0xd94] ss:$52 sps:$4 sm:$0xff]   ;;  %v17477_v12 = vld [vmem:[%s24752_s1 + $0xd90] ss:$52 sps:$4 sm:$0xff]  }
 0x31e   :  { %v6902_v56 = vpop.f32.mrf.mxu0  ;;  %16191 = vrot.lane.b32.xlu0 %v16190_v26, %s18740_s10  ;;  %v17476_v62 = vld [vmem:[%s24752_s1 + $0xb8c] ss:$52 sps:$4 sm:$0xff]  }
 0x31f   :  { %v6943_v42 = vpop.f32.mrf.mxu1  ;;  %v7562_v44 = vmax.f32 %v21481_v38, 0.0  ;;  %v6942_v45 = vadd.f32 %v6941_v30, %v6901_v31  ;;  %7205 = vmatpush1.bf16.msra.mxu0 %v17444_v33  ;;  %v17480_v4 = vld [vmem:[%s24752_s1 + $0xb20] ss:$52 sps:$4 sm:$0xff]   ;;  %v17483_v33 = vld [vmem:[%s24752_s1 + $0xd28] ss:$52 sps:$4 sm:$0xff]  }
 0x320   :  { %7236 = vmatpush1.bf16.msra.mxu1 %v17447_v32  ;;  %v6903_v35 = vpop.f32.mrf.mxu0  ;;  %7206 = vmatprep.subr.bf16.mxu0 %v17452_v16  ;;  %v17488_v32 = vld [vmem:[%s24752_s1 + $0xabc] ss:$52 sps:$4 sm:$0xff]   ;;  %v17486_v18 = vld [vmem:[%s24752_s1 + $0xab8] ss:$52 sps:$4 sm:$0xff]   ;;  %v17489_v30 = vld [vmem:[%s24752_s1 + $0x1340] ss:$52 sps:$4 sm:$0xff]  }
 0x321   :  { %7237 = vmatprep.subr.bf16.mxu1 %v17455_v22  ;;  %v6944_v29 = vpop.f32.mrf.mxu1  ;;  %v7563_v50 = vmax.f32 %v6942_v45, 0.0  ;;  %v17494_v16 = vld [vmem:[%s24752_s1 + $0xa54] ss:$52 sps:$4 sm:$0xff]   ;;  %v17497_v22 = vld [vmem:[%s24752_s1 + $0x12dc] ss:$52 sps:$4 sm:$0xff]  }
 0x322   :  { %v17492_v31 = vld [vmem:[%s24752_s1 + $0xa50] ss:$52 sps:$4 sm:$0xff]   ;;  %v17495_v26 = vld [vmem:[%s24752_s1 + $0x12d8] ss:$52 sps:$4 sm:$0xff]   ;;  %v17503_v42 = vld [vmem:[%s24752_s1 + $0x1274] ss:$52 sps:$4 sm:$0xff]  }
 0x323   :  { %7576 = vst [vmem:[#allocation2 + $0x38] sm:$0xff] %v7563_v50  ;;  %7207 = vmatpush1.bf16.msra.mxu0 %v17450_v5  ;;  %v16185_v15 = vpack.i.bf16 %v7563_v50, %v7562_v44  ;;  %v17500_v56 = vld [vmem:[%s24752_s1 + $0x9ec] ss:$52 sps:$4 sm:$0xff]   ;;  %v17498_v45 = vld [vmem:[%s24752_s1 + $0x9e8] ss:$52 sps:$4 sm:$0xff]  }
 0x324   :  { %7238 = vmatpush1.bf16.msra.mxu1 %v17453_v47  ;;  %7208 = vmatprep.subr.bf16.mxu0 %v17458_v54  ;;  %v17501_v5 = vld [vmem:[%s24752_s1 + $0x1270] ss:$52 sps:$4 sm:$0xff]   ;;  %v17506_v47 = vld [vmem:[%s24752_s1 + $0x120c] ss:$52 sps:$4 sm:$0xff]   ;;  %v17504_v54 = vld [vmem:[%s24752_s1 + $0x1208] ss:$52 sps:$4 sm:$0xff]  }
 0x325   :  { %7239 = vmatprep.subr.bf16.mxu1 %v17461_v17  ;;  %16186 = vrot.lane.b32.xlu1 %v16185_v15, %s18739_s14  ;;  %v17509_v35 = vld [vmem:[%s24752_s1 + $0x1684] ss:$52 sps:$4 sm:$0xff]   ;;  %v17507_v17 = vld [vmem:[%s24752_s1 + $0x1680] ss:$52 sps:$4 sm:$0xff]   ;;  %v17515_v50 = vld [vmem:[%s24752_s1 + $0x161c] ss:$52 sps:$4 sm:$0xff]  }
 0x326   :  { %v17512_v29 = vld [vmem:[%s24752_s1 + $0x11a4] ss:$52 sps:$4 sm:$0xff]   ;;  %v17518_v15 = vld [vmem:[%s24752_s1 + $0x113c] ss:$52 sps:$4 sm:$0xff]  }
 0x327   :  { %7209 = vmatpush2.bf16.msra.mxu0 %v17456_v51  ;;  %v17510_v51 = vld [vmem:[%s24752_s1 + $0x11a0] ss:$52 sps:$4 sm:$0xff]   ;;  %v17630_v38 = vld [vmem:[%s24752_s1 + $0x30] ss:$52 sps:$4 sm:$0xff]  }
 0x328   :  { %7240 = vmatpush1.bf16.msra.mxu1 %v17459_v6  ;;  %7210 = vmatprep.subr.bf16.mxu0 %v17464_v13  ;;  %v17513_v6 = vld [vmem:[%s24752_s1 + $0x1618] ss:$52 sps:$4 sm:$0xff]   ;;  %v17521_v13 = vld [vmem:[%s24752_s1 + $0x15b4] ss:$52 sps:$4 sm:$0xff]  }
 0x329   :  { %7241 = vmatprep.subr.bf16.mxu1 %v17467_v57  ;;  %v17516_v57 = vld [vmem:[%s24752_s1 + $0x1138] ss:$52 sps:$4 sm:$0xff]  }
 0x32b   :  { %7211 = vmatpush2.bf16.msra.mxu0 %v17462_v58  ;;  %v17519_v58 = vld [vmem:[%s24752_s1 + $0x15b0] ss:$52 sps:$4 sm:$0xff]  }
 0x32c   :  { %7242 = vmatpush1.bf16.msra.mxu1 %v17465_v59  ;;  %7212 = vmatprep.subr.bf16.mxu0 %v17470_v41  ;;  %v17524_v59 = vld [vmem:[%s24752_s1 + $0x10d4] ss:$52 sps:$4 sm:$0xff]   ;;  %v17527_v41 = vld [vmem:[%s24752_s1 + $0x154c] ss:$52 sps:$4 sm:$0xff]  }
 0x32d   :  { %7243 = vmatprep.subr.bf16.mxu1 %v17473_v2  ;;  %v17522_v2 = vld [vmem:[%s24752_s1 + $0x10d0] ss:$52 sps:$4 sm:$0xff]  }
 0x32f   :  { %7213 = vmatpush2.bf16.msra.mxu0 %v17468_v55  ;;  %v17525_v55 = vld [vmem:[%s24752_s1 + $0x1548] ss:$52 sps:$4 sm:$0xff]  }
 0x330   :  { %7244 = vmatpush1.bf16.msra.mxu1 %v17471_v61  ;;  %7214 = vmatprep.subr.bf16.mxu0 %v17476_v62  ;;  %v17530_v61 = vld [vmem:[%s24752_s1 + $0x106c] ss:$52 sps:$4 sm:$0xff]   ;;  %v17533_v62 = vld [vmem:[%s24752_s1 + $0x14e4] ss:$52 sps:$4 sm:$0xff]  }
 0x331   :  { %7245 = vmatprep.subr.bf16.mxu1 %v17479_v63  ;;  %v17528_v63 = vld [vmem:[%s24752_s1 + $0x1068] ss:$52 sps:$4 sm:$0xff]  }
 0x333   :  { %7215 = vmatpush2.bf16.msra.mxu0 %v17474_v0  ;;  %v17531_v0 = vld [vmem:[%s24752_s1 + $0x14e0] ss:$52 sps:$4 sm:$0xff]  }
 0x334   :  { %7246 = vmatpush1.bf16.msra.mxu1 %v17477_v12  ;;  %7216 = vmatprep.subr.bf16.mxu0 %v17482_v1  ;;  %v1104_v12 = vld [vmem:[%s24754_s2 + $0x8] sm:$0x1f]  ;;  %v17536_v1 = vld [vmem:[%s24752_s1 + $0x147c] ss:$52 sps:$4 sm:$0xff]  }
 0x335   :  { %7247 = vmatprep.subr.bf16.mxu1 %v17485_v3  ;;  %v17539_v3 = vld [vmem:[%s24752_s1 + $0x1d04] ss:$52 sps:$4 sm:$0xff]  }
 0x337   :  { %7217 = vmatpush2.bf16.msra.mxu0 %v17480_v4  ;;  %v17534_v4 = vld [vmem:[%s24752_s1 + $0x1478] ss:$52 sps:$4 sm:$0xff]  }
 0x338   :  { %7248 = vmatpush1.bf16.msra.mxu1 %v17483_v33  ;;  %7218 = vmatprep.subr.bf16.mxu0 %v17488_v32  ;;  %v17537_v33 = vld [vmem:[%s24752_s1 + $0x1d00] ss:$52 sps:$4 sm:$0xff]   ;;  %v1142_v32 = vrot.slane %v1104_v12, %v19636_v49 }
 0x339   :  { %7249 = vmatprep.subr.bf16.mxu1 %v17491_v7  ;;  %v17542_v7 = vld [vmem:[%s24752_s1 + $0x1414] ss:$52 sps:$4 sm:$0xff]  }
 0x33b   :  { %7219 = vmatpush2.bf16.msra.mxu0 %v17486_v18  ;;  %v17545_v18 = vld [vmem:[%s24752_s1 + $0x1c9c] ss:$52 sps:$4 sm:$0xff]  }
 0x33c   :  { %7250 = vmatpush2.bf16.msra.mxu1 %v17489_v30  ;;  %7220 = vmatprep.subr.bf16.mxu0 %v17494_v16  ;;  %v1146_v30 = vrot.slane %v1104_v12, %v19645_v53  ;;  %v17540_v16 = vld [vmem:[%s24752_s1 + $0x1410] ss:$52 sps:$4 sm:$0xff]  }
 0x33d   :  { %7251 = vmatprep.subr.bf16.mxu1 %v17497_v22  ;;  %v17543_v22 = vld [vmem:[%s24752_s1 + $0x1c98] ss:$52 sps:$4 sm:$0xff]   ;;  %v17564_v12 = vld [vmem:[%s24752_s1 + $0x18f0] ss:$52 sps:$4 sm:$0xff]  }
 0x33f   :  { %7221 = vmatpush2.bf16.msra.mxu0 %v17492_v31 }
 0x340   :  { %7252 = vmatpush2.bf16.msra.mxu1 %v17495_v26  ;;  %7222 = vmatprep.subr.bf16.mxu0 %v17500_v56 }
 0x341   :  { %7253 = vmatprep.subr.bf16.mxu1 %v17503_v42 }
 0x343   :  { %7223 = vmatpush2.bf16.msra.mxu0 %v17498_v45 }
 0x344   :  { %7254 = vmatpush2.bf16.msra.mxu1 %v17501_v5  ;;  %7274 = vmatprep.subr.bf16.mxu0 %v17509_v35  ;;  %v17548_v5 = vld [vmem:[%s24752_s1 + $0x13ac] ss:$52 sps:$4 sm:$0xff]  }
 0x345   :  { %7255 = vmatprep.subr.bf16.mxu1 %v17506_v47  ;;  %v17551_v47 = vld [vmem:[%s24752_s1 + $0x1c34] ss:$52 sps:$4 sm:$0xff]  }
 0x346   :  { %7225 = vmatmul.mubr.bf16.vlgmr.msra.gmra.mxu0 %v19019_v11 }
 0x347   :  { %7275 = vmatpush1.bf16.msra.mxu0 %v17507_v17  ;;  %7306 = vmatprep.mubr.bf16.mxu0 %v19106_v40  ;;  %v17546_v17 = vld [vmem:[%s24752_s1 + $0x13a8] ss:$52 sps:$4 sm:$0xff]  }
 0x348   :  { %7256 = vmatpush2.bf16.msra.mxu1 %v17504_v54  ;;  %7276 = vmatprep.subr.bf16.mxu0 %v17515_v50 }
 0x349   :  { %7257 = vmatprep.subr.bf16.mxu1 %v17512_v29  ;;  %v17549_v29 = vld [vmem:[%s24752_s1 + $0x1c30] ss:$52 sps:$4 sm:$0xff]  }
 0x34b   :  { %7277 = vmatpush1.bf16.msra.mxu0 %v17513_v6 }
 0x34c   :  { %7258 = vmatpush2.bf16.msra.mxu1 %v17510_v51  ;;  %7278 = vmatprep.subr.bf16.mxu0 %v17521_v13  ;;  %v17554_v13 = vld [vmem:[%s24752_s1 + $0x19c4] ss:$52 sps:$4 sm:$0xff]  }
 0x34d   :  { %7259 = vmatprep.subr.bf16.mxu1 %v17518_v15 }
 0x34f   :  { %7279 = vmatpush1.bf16.msra.mxu0 %v17519_v58 }
 0x350   :  { %7260 = vmatpush2.bf16.msra.mxu1 %v17516_v57  ;;  %7280 = vmatprep.subr.bf16.mxu0 %v17527_v41  ;;  %v17557_v57 = vld [vmem:[%s24752_s1 + $0x1bcc] ss:$52 sps:$4 sm:$0xff]   ;;  %v17555_v41 = vld [vmem:[%s24752_s1 + $0x1bc8] ss:$52 sps:$4 sm:$0xff]  }
 0x351   :  { %7261 = vmatprep.subr.bf16.mxu1 %v17524_v59  ;;  %v17552_v59 = vld [vmem:[%s24752_s1 + $0x19c0] ss:$52 sps:$4 sm:$0xff]  }
 0x353   :  { %7281 = vmatpush1.bf16.msra.mxu0 %v17525_v55  ;;  %v17563_v55 = vld [vmem:[%s24752_s1 + $0x1b64] ss:$52 sps:$4 sm:$0xff]  }
 0x354   :  { %7262 = vmatpush2.bf16.msra.mxu1 %v17522_v2  ;;  %7282 = vmatprep.subr.bf16.mxu0 %v17533_v62  ;;  %v17560_v2 = vld [vmem:[%s24752_s1 + $0x195c] ss:$52 sps:$4 sm:$0xff]   ;;  %v17561_v62 = vld [vmem:[%s24752_s1 + $0x1b60] ss:$52 sps:$4 sm:$0xff]  }
 0x355   :  { %7263 = vmatprep.subr.bf16.mxu1 %v17530_v61  ;;  %v17558_v61 = vld [vmem:[%s24752_s1 + $0x1958] ss:$52 sps:$4 sm:$0xff]  }
 0x357   :  { %7283 = vmatpush1.bf16.msra.mxu0 %v17531_v0  ;;  %v17569_v0 = vld [vmem:[%s24752_s1 + $0x1afc] ss:$52 sps:$4 sm:$0xff]  }
 0x358   :  { %7264 = vmatpush2.bf16.msra.mxu1 %v17528_v63  ;;  %7284 = vmatprep.subr.bf16.mxu0 %v17536_v1  ;;  %v17566_v63 = vld [vmem:[%s24752_s1 + $0x18f4] ss:$52 sps:$4 sm:$0xff]   ;;  %v17567_v1 = vld [vmem:[%s24752_s1 + $0x1af8] ss:$52 sps:$4 sm:$0xff]  }
 0x359   :  { %7315 = vmatprep.subr.bf16.mxu1 %v17539_v3  ;;  %v17572_v3 = vld [vmem:[%s24752_s1 + $0x188c] ss:$52 sps:$4 sm:$0xff]  }
 0x35a   :  { %v6980_v31 = vpop.f32.mrf.mxu0 }
 0x35b   :  { %7266 = vmatmul.mubr.bf16.vlgmr.msra.gmra.mxu1 %v19227_v20  ;;  %v7021_v26 = vpop.f32.mrf.mxu1  ;;  %v6981_v56 = vadd.f32 %v6980_v31, %v1142_v32  ;;  %7285 = vmatpush1.bf16.msra.mxu0 %v17534_v4  ;;  %v17575_v4 = vld [vmem:[%s24752_s1 + $0x1a94] ss:$52 sps:$4 sm:$0xff]   ;;  %v17573_v32 = vld [vmem:[%s24752_s1 + $0x1a90] ss:$52 sps:$4 sm:$0xff]  }
 0x35c   :  { %7316 = vmatpush1.bf16.msra.mxu1 %v17537_v33  ;;  %v6982_v42 = vpop.f32.mrf.mxu0  ;;  %7286 = vmatprep.subr.bf16.mxu0 %v17542_v7  ;;  %v17570_v33 = vld [vmem:[%s24752_s1 + $0x1888] ss:$52 sps:$4 sm:$0xff]   ;;  %v17578_v7 = vld [vmem:[%s24752_s1 + $0x1824] ss:$52 sps:$4 sm:$0xff]  }
 0x35d   :  { %v7023_v45 = vpop.f32.mrf.mxu1  ;;  %7317 = vmatprep.subr.bf16.mxu1 %v17545_v18  ;;  %v6983_v35 = vadd.f32 %v6982_v42, %v1146_v30  ;;  %v21691_v54 = vadd.f32 %v7021_v26, %v6981_v56  ;;  %15076 = vmatprep.mubr.msk.bf16.mxu1 %vm6122_vm0, %v19246_v27  ;;  %v17581_v18 = vld [vmem:[%s24752_s1 + $0x1a2c] ss:$52 sps:$4 sm:$0xff]   ;;  %v17587_v31 = vld [vmem:[%s24752_s1 + $0x1e3c] ss:$52 sps:$4 sm:$0xff]   ;;  %v17590_v42 = vld [vmem:[%s24752_s1 + $0x1754] ss:$52 sps:$4 sm:$0xff]  }
 0x35e   :  { %v6984_v50 = vpop.f32.mrf.mxu0  ;;  %v17576_v30 = vld [vmem:[%s24752_s1 + $0x1820] ss:$52 sps:$4 sm:$0xff]   ;;  %v17582_v26 = vld [vmem:[%s24752_s1 + $0x17b8] ss:$52 sps:$4 sm:$0xff]  }
 0x35f   :  { %v7025_v51 = vpop.f32.mrf.mxu1  ;;  %v21701_v6 = vadd.f32 %v7023_v45, %v6983_v35  ;;  %7287 = vmatpush1.bf16.msra.mxu0 %v17540_v16  ;;  %v17579_v16 = vld [vmem:[%s24752_s1 + $0x1a28] ss:$52 sps:$4 sm:$0xff]   ;;  %v17585_v56 = vld [vmem:[%s24752_s1 + $0x1e38] ss:$52 sps:$4 sm:$0xff]  }
 0x360   :  { %7318 = vmatpush1.bf16.msra.mxu1 %v17543_v22  ;;  %v6985_v15 = vpop.f32.mrf.mxu0  ;;  %7288 = vmatprep.subr.bf16.mxu0 %v17548_v5  ;;  %v17584_v22 = vld [vmem:[%s24752_s1 + $0x17bc] ss:$52 sps:$4 sm:$0xff]   ;;  %v17593_v45 = vld [vmem:[%s24752_s1 + $0x1dd4] ss:$52 sps:$4 sm:$0xff]   ;;  %v17596_v35 = vld [vmem:[%s24752_s1 + $0x16ec] ss:$52 sps:$4 sm:$0xff]  }
 0x361   :  { %7319 = vmatprep.subr.bf16.mxu1 %v17551_v47  ;;  %v7026_v58 = vpop.f32.mrf.mxu1  ;;  %v17588_v5 = vld [vmem:[%s24752_s1 + $0x1750] ss:$52 sps:$4 sm:$0xff]   ;;  %v17597_v50 = vld [vmem:[%s24752_s1 + $0x1d68] ss:$52 sps:$4 sm:$0xff]  }
 0x362   :  { %v17591_v47 = vld [vmem:[%s24752_s1 + $0x1dd0] ss:$52 sps:$4 sm:$0xff]   ;;  %v17600_v51 = vld [vmem:[%s24752_s1 + $0x648] ss:$52 sps:$4 sm:$0xff]   ;;  %v17604_v58 = vld [vmem:[%s24752_s1 + $0x5e0] ss:$52 sps:$4 sm:$0xff]  }
 0x363   :  { %7289 = vmatpush1.bf16.msra.mxu0 %v17546_v17  ;;  %v17599_v17 = vld [vmem:[%s24752_s1 + $0x1d6c] ss:$52 sps:$4 sm:$0xff]   ;;  %v17601_v15 = vld [vmem:[%s24752_s1 + $0xcc8] ss:$52 sps:$4 sm:$0xff]  }
 0x364   :  { %7320 = vmatpush1.bf16.msra.mxu1 %v17549_v29  ;;  %7290 = vmatprep.subr.bf16.mxu0 %v17554_v13  ;;  %v17594_v29 = vld [vmem:[%s24752_s1 + $0x16e8] ss:$52 sps:$4 sm:$0xff]  }
 0x365   :  { %7321 = vmatprep.subr.bf16.mxu1 %v17557_v57  ;;  %v17602_v13 = vld [vmem:[%s24752_s1 + $0x308] ss:$52 sps:$4 sm:$0xff]  }
 0x366   :  { %v17603_v57 = vld [vmem:[%s24752_s1 + $0x988] ss:$52 sps:$4 sm:$0xff]  }
 0x367   :  { %7291 = vmatpush2.bf16.msra.mxu0 %v17552_v59  ;;  %v17605_v59 = vld [vmem:[%s24752_s1 + $0xc60] ss:$52 sps:$4 sm:$0xff]  }
 0x368   :  { %7322 = vmatpush1.bf16.msra.mxu1 %v17555_v41  ;;  %7292 = vmatprep.subr.bf16.mxu0 %v17560_v2  ;;  %v17606_v41 = vld [vmem:[%s24752_s1 + $0x2a0] ss:$52 sps:$4 sm:$0xff]  }
 0x369   :  { %7323 = vmatprep.subr.bf16.mxu1 %v17563_v55  ;;  %v17607_v2 = vld [vmem:[%s24752_s1 + $0x920] ss:$52 sps:$4 sm:$0xff]   ;;  %v17608_v55 = vld [vmem:[%s24752_s1 + $0x578] ss:$52 sps:$4 sm:$0xff]  }
 0x36b   :  { %7293 = vmatpush2.bf16.msra.mxu0 %v17558_v61  ;;  %v17609_v61 = vld [vmem:[%s24752_s1 + $0xbf8] ss:$52 sps:$4 sm:$0xff]  }
 0x36c   :  { %7324 = vmatpush1.bf16.msra.mxu1 %v17561_v62  ;;  %7294 = vmatprep.subr.bf16.mxu0 %v17566_v63  ;;  %v17610_v62 = vld [vmem:[%s24752_s1 + $0x238] ss:$52 sps:$4 sm:$0xff]  }
 0x36d   :  { %7325 = vmatprep.subr.bf16.mxu1 %v17569_v0  ;;  %v17611_v63 = vld [vmem:[%s24752_s1 + $0x8b8] ss:$52 sps:$4 sm:$0xff]   ;;  %v17612_v0 = vld [vmem:[%s24752_s1 + $0x510] ss:$52 sps:$4 sm:$0xff]  }
 0x36f   :  { %7295 = vmatpush2.bf16.msra.mxu0 %v17564_v12  ;;  %v17615_v12 = vld [vmem:[%s24752_s1 + $0x850] ss:$52 sps:$4 sm:$0xff]  }
 0x370   :  { %7326 = vmatpush1.bf16.msra.mxu1 %v17567_v1  ;;  %7296 = vmatprep.subr.bf16.mxu0 %v17572_v3  ;;  %v17616_v1 = vld [vmem:[%s24752_s1 + $0x4a8] ss:$52 sps:$4 sm:$0xff]  }
 0x371   :  { %7327 = vmatprep.subr.bf16.mxu1 %v17575_v4  ;;  %v17617_v3 = vld [vmem:[%s24752_s1 + $0xb28] ss:$52 sps:$4 sm:$0xff]   ;;  %v21857_v4 = vpop.permute.xlu1 %16181 }
 0x373   :  { %7297 = vmatpush2.bf16.msra.mxu0 %v17570_v33  ;;  %v17618_v33 = vld [vmem:[%s24752_s1 + $0x168] ss:$52 sps:$4 sm:$0xff]  }
 0x374   :  { %7328 = vmatpush1.bf16.msra.mxu1 %v17573_v32  ;;  %7298 = vmatprep.subr.bf16.mxu0 %v17578_v7  ;;  %v17619_v32 = vld [vmem:[%s24752_s1 + $0x7e8] ss:$52 sps:$4 sm:$0xff]   ;;  %v17620_v7 = vld [vmem:[%s24752_s1 + $0x440] ss:$52 sps:$4 sm:$0xff]  }
 0x375   :  { %7329 = vmatprep.subr.bf16.mxu1 %v17581_v18  ;;  %v17621_v18 = vld [vmem:[%s24752_s1 + $0xac0] ss:$52 sps:$4 sm:$0xff]  }
 0x377   :  { %7299 = vmatpush2.bf16.msra.mxu0 %v17576_v30  ;;  %v17622_v30 = vld [vmem:[%s24752_s1 + $0x100] ss:$52 sps:$4 sm:$0xff]  }
 0x378   :  { %7330 = vmatpush1.bf16.msra.mxu1 %v17579_v16  ;;  %7300 = vmatprep.subr.bf16.mxu0 %v17584_v22  ;;  %v17623_v16 = vld [vmem:[%s24752_s1 + $0x780] ss:$52 sps:$4 sm:$0xff]   ;;  %v17624_v22 = vld [vmem:[%s24752_s1 + $0x3d8] ss:$52 sps:$4 sm:$0xff]  }
 0x379   :  { %7341 = vmatprep.subr.bf16.mxu1 %v17587_v31  ;;  %v17625_v31 = vld [vmem:[%s24752_s1 + $0xa58] ss:$52 sps:$4 sm:$0xff]  }
 0x37b   :  { %7301 = vmatpush2.bf16.msra.mxu0 %v17582_v26 }
 0x37c   :  { %7342 = vmatpush2.bf16.msra.mxu1 %v17585_v56  ;;  %7302 = vmatprep.subr.bf16.mxu0 %v17590_v42 }
 0x37d   :  { %7343 = vmatprep.subr.bf16.mxu1 %v17593_v45 }
 0x37f   :  { %7303 = vmatpush2.bf16.msra.mxu0 %v17588_v5 }
 0x380   :  { %7344 = vmatpush2.bf16.msra.mxu1 %v17591_v47  ;;  %7304 = vmatprep.subr.bf16.mxu0 %v17596_v35 }
 0x381   :  { %7345 = vmatprep.subr.bf16.mxu1 %v17599_v17  ;;  %v17626_v17 = vld [vmem:[%s24752_s1 + $0x98] ss:$52 sps:$4 sm:$0xff]  }
 0x383   :  { %7305 = vmatpush2.bf16.msra.mxu0 %v17594_v29  ;;  %v17627_v29 = vld [vmem:[%s24752_s1 + $0x718] ss:$52 sps:$4 sm:$0xff]  }
 0x384   :  { %7346 = vmatpush2.bf16.msra.mxu1 %v17597_v50  ;;  %15837 = vmatprep.subr.bf16.mxu0 %v17600_v51  ;;  %v18732_v50 = vld [vmem:[#allocation2 + $0x28] sm:$0xff] }
 0x385   :  { %15859 = vmatprep.subr.bf16.mxu1 %v17601_v15 }
 0x386   :  { %7307 = vmatmul.mubr.bf16.vlgmr.msra.gmra.mxu0 %v19229_v21 }
 0x387   :  { %7348 = vmatmul.mubr.bf16.vlgmr.msra.gmra.mxu1 %v19376_v10  ;;  %15838 = vmatpush3.bf16.msra.mxu0 %v17602_v13 }
 0x388   :  { %15860 = vmatpush3.bf16.msra.mxu1 %v17603_v57  ;;  %15839 = vmatprep.subr.bf16.mxu0 %v17604_v58  ;;  %v17629_v57 = vld [vmem:[%s24752_s1 + $0x9f0] ss:$52 sps:$4 sm:$0xff]  }
 0x389   :  { %15861 = vmatprep.subr.bf16.mxu1 %v17605_v59  ;;  %7388 = vmatprep.mubr.bf16.mxu0 %v18939_v48  ;;  %v17613_v48 = vld [vmem:[%s24752_s1 + $0xb90] ss:$52 sps:$4 sm:$0xff]  }
 0x38a   :  { %7428 = vmatprep.mubr.bf16.mxu1 %v18950_v52  ;;  %v17614_v52 = vld [vmem:[%s24752_s1 + $0x1d0] ss:$52 sps:$4 sm:$0xff]  }
 0x38b   :  { %15840 = vmatpush3.bf16.msra.mxu0 %v17606_v41 }
 0x38c   :  { %15862 = vmatpush3.bf16.msra.mxu1 %v17607_v2  ;;  %15841 = vmatprep.subr.bf16.mxu0 %v17608_v55  ;;  %v17632_v55 = vld [vmem:[%s24752_s1 + $0x1348] ss:$52 sps:$4 sm:$0xff]  }
 0x38d   :  { %15863 = vmatprep.subr.bf16.mxu1 %v17609_v61  ;;  %v17633_v61 = vld [vmem:[%s24752_s1 + $0x19c8] ss:$52 sps:$4 sm:$0xff]  }
 0x38f   :  { %15842 = vmatpush3.bf16.msra.mxu0 %v17610_v62 }
 0x390   :  { %15864 = vmatpush3.bf16.msra.mxu1 %v17611_v63  ;;  %15843 = vmatprep.subr.bf16.mxu0 %v17612_v0  ;;  %v17634_v63 = vld [vmem:[%s24752_s1 + $0x1008] ss:$52 sps:$4 sm:$0xff]  }
 0x391   :  { %15865 = vmatprep.subr.bf16.mxu1 %v17613_v48  ;;  %v17635_v0 = vld [vmem:[%s24752_s1 + $0x1688] ss:$52 sps:$4 sm:$0xff]   ;;  %v17636_v48 = vld [vmem:[%s24752_s1 + $0x12e0] ss:$52 sps:$4 sm:$0xff]  }
 0x393   :  { %15844 = vmatpush3.bf16.msra.mxu0 %v17614_v52  ;;  %v17637_v52 = vld [vmem:[%s24752_s1 + $0x1960] ss:$52 sps:$4 sm:$0xff]  }
 0x394   :  { %15866 = vmatpush3.bf16.msra.mxu1 %v17615_v12  ;;  %15845 = vmatprep.subr.bf16.mxu0 %v17616_v1  ;;  %v17638_v12 = vld [vmem:[%s24752_s1 + $0xfa0] ss:$52 sps:$4 sm:$0xff]  }
 0x395   :  { %15867 = vmatprep.subr.bf16.mxu1 %v17617_v3  ;;  %v17639_v1 = vld [vmem:[%s24752_s1 + $0x1620] ss:$52 sps:$4 sm:$0xff]   ;;  %v17640_v3 = vld [vmem:[%s24752_s1 + $0x1278] ss:$52 sps:$4 sm:$0xff]  }
 0x397   :  { %15846 = vmatpush3.bf16.msra.mxu0 %v17618_v33  ;;  %v21883_v26 = vpop.permute.xlu1 %16186  ;;  %v17643_v33 = vld [vmem:[%s24752_s1 + $0x15b8] ss:$52 sps:$4 sm:$0xff]  }
 0x398   :  { %15868 = vmatpush3.bf16.msra.mxu1 %v17619_v32  ;;  %15847 = vmatprep.subr.bf16.mxu0 %v17620_v7  ;;  %v16189_v56 = vunpack.i.h.bf16 %v21883_v26  ;;  %v16188_v42 = vunpack.i.l.bf16 %v21883_v26  ;;  %v17644_v32 = vld [vmem:[%s24752_s1 + $0x1210] ss:$52 sps:$4 sm:$0xff]  }
 0x399   :  { %15869 = vmatprep.subr.bf16.mxu1 %v17621_v18  ;;  %v17647_v7 = vld [vmem:[%s24752_s1 + $0x1550] ss:$52 sps:$4 sm:$0xff]   ;;  %v17648_v18 = vld [vmem:[%s24752_s1 + $0x11a8] ss:$52 sps:$4 sm:$0xff]  }
 0x39a   :  { %v21887_v45 = vpop.f32.mrf.mxu0  ;;  %v7641_v47 = vsel %vm7635_vm1, %v16179_v34, %v16188_v42  ;;  %v7642_v35 = vsel %vm7635_vm1, %v16188_v42, %v16189_v56  ;;  %v17653_v42 = vld [vmem:[%s24752_s1 + $0x17c0] ss:$52 sps:$4 sm:$0xff]  }
 0x39b   :  { %v21889_v5 = vpop.f32.mrf.mxu1  ;;  %15848 = vmatpush3.bf16.msra.mxu0 %v17622_v30  ;;  %v21906_v34 = vmax.f32 %v18732_v50, %v7641_v47  ;;  %v21910_v51 = vmax.f32 %v7562_v44, %v7642_v35  ;;  %v17631_v44 = vld [vmem:[%s24752_s1 + $0x6b0] ss:$52 sps:$4 sm:$0xff]   ;;  %v17649_v30 = vld [vmem:[%s24752_s1 + $0x1828] ss:$52 sps:$4 sm:$0xff]   ;;  %v17654_v47 = vld [vmem:[%s24752_s1 + $0xe00] ss:$52 sps:$4 sm:$0xff]  }
 0x39c   :  { %15870 = vmatpush3.bf16.msra.mxu1 %v17623_v16  ;;  %v21912_v15 = vpop.f32.mrf.mxu0  ;;  %15849 = vmatprep.subr.bf16.mxu0 %v17624_v22  ;;  %v17650_v16 = vld [vmem:[%s24752_s1 + $0xe68] ss:$52 sps:$4 sm:$0xff]   ;;  %v17655_v35 = vld [vmem:[%s24752_s1 + $0x1480] ss:$52 sps:$4 sm:$0xff]   ;;  %v17659_v50 = vld [vmem:[%s24752_s1 + $0x1418] ss:$52 sps:$4 sm:$0xff]  }
 0x39d   :  { %v21914_v13 = vpop.f32.mrf.mxu1  ;;  %15871 = vmatprep.subr.bf16.mxu1 %v17625_v31  ;;  %v16200_v58 = vpack.i.bf16 %v21910_v51, %v21906_v34  ;;  %v17651_v22 = vld [vmem:[%s24752_s1 + $0x14e8] ss:$52 sps:$4 sm:$0xff]   ;;  %v17652_v31 = vld [vmem:[%s24752_s1 + $0x1140] ss:$52 sps:$4 sm:$0xff]  }
 0x39e   :  { %v7066_v59 = vpop.f32.mrf.mxu0  ;;  %v17848_v26 = vld [vmem:[%s24755_s3 + $0xd94] ss:$28 sps:$4 sm:$0xff]  }
 0x39f   :  { %v7107_v41 = vpop.f32.mrf.mxu1  ;;  %15850 = vmatpush3.bf16.msra.mxu0 %v17626_v17  ;;  %16201 = vrot.lane.b32.xlu0 %v16200_v58, %s18740_s10  ;;  %v17656_v17 = vld [vmem:[%s24752_s1 + $0x10d8] ss:$52 sps:$4 sm:$0xff]   ;;  %v16183_v58 = vunpack.i.l.bf16 %v21857_v4  ;;  %v17660_v59 = vld [vmem:[%s24752_s1 + $0x1070] ss:$52 sps:$4 sm:$0xff]  }
 0x3a0   :  { %15872 = vmatpush3.bf16.msra.mxu1 %v17627_v29  ;;  %v7067_v2 = vpop.f32.mrf.mxu0  ;;  %15851 = vmatprep.subr.bf16.mxu0 %v17628_v60  ;;  %v17657_v29 = vld [vmem:[%s24752_s1 + $0x1758] ss:$52 sps:$4 sm:$0xff]   ;;  %v17661_v41 = vld [vmem:[%s24752_s1 + $0x16f0] ss:$52 sps:$4 sm:$0xff]  }
 0x3a1   :  { %15873 = vmatprep.subr.bf16.mxu1 %v17629_v57  ;;  %v7108_v62 = vpop.f32.mrf.mxu1  ;;  %v17658_v60 = vld [vmem:[%s24752_s1 + $0xd98] ss:$52 sps:$4 sm:$0xff]   ;;  %v16184_v57 = vunpack.i.h.bf16 %v21857_v4  ;;  %v17663_v2 = vld [vmem:[%s24752_s1 + $0x13b0] ss:$52 sps:$4 sm:$0xff]  }
 0x3a2   :  { %v17664_v62 = vld [vmem:[%s24755_s3 + $0x188] ss:$28 sps:$4 sm:$0xff]  }
 0x3a3   :  { %15852 = vmatpush3.bf16.msra.mxu0 %v17630_v38  ;;  %v17662_v38 = vld [vmem:[%s24752_s1 + $0xd30] ss:$52 sps:$4 sm:$0xff]  }
 0x3a4   :  { %15874 = vmatpush3.bf16.msra.mxu1 %v17631_v44  ;;  %15881 = vmatprep.subr.bf16.mxu0 %v17632_v55  ;;  %v7715_v44 = vsel %vm7713_vm2, %v16183_v58, %v16184_v57  ;;  %v17666_v55 = vld [vmem:[%s24755_s3 + $0x18c] ss:$28 sps:$4 sm:$0xff]  }
 0x3a5   :  { %15903 = vmatprep.subr.bf16.mxu1 %v17633_v61  ;;  %v7063_v61 = vadd.f32 %v21887_v45, %v21691_v54  ;;  %v18741_v54 = vmov 0  }
 0x3a6   :  { %7389 = vmatmul.mubr.bf16.vlgmr.msra.gmra.mxu0 %v19011_v8  ;;  %v17641_v8 = vld [vmem:[%s24752_s1 + $0x18f8] ss:$52 sps:$4 sm:$0xff]  }
 0x3a7   :  { %7429 = vmatmul.mubr.bf16.vlgmr.msra.gmra.mxu1 %v19019_v11  ;;  %15882 = vmatpush3.bf16.msra.mxu0 %v17634_v63  ;;  %v17642_v11 = vld [vmem:[%s24752_s1 + $0xf38] ss:$52 sps:$4 sm:$0xff]   ;;  %v17667_v63 = vld [vmem:[%s24752_s1 + $0x1d08] ss:$52 sps:$4 sm:$0xff]   ;;  %v7104_v45 = vadd.f32 %v21889_v5, %v7063_v61 }
 0x3a8   :  { %15904 = vmatpush3.bf16.msra.mxu1 %v17635_v0  ;;  %15883 = vmatprep.subr.bf16.mxu0 %v17636_v48  ;;  %v7740_v0 = vmax.f32 %v21067_v19, %v7715_v44  ;;  %v7065_v48 = vadd.f32 %v21912_v15, %v21701_v6  ;;  %v17671_v19 = vld [vmem:[%s24752_s1 + $0x1ca0] ss:$52 sps:$4 sm:$0xff]   ;;  %v17698_v44 = vld [vmem:[%s24755_s3 + $0x34c] ss:$28 sps:$4 sm:$0xff]  }
 0x3a9   :  { %15905 = vmatprep.subr.bf16.mxu1 %v17637_v52  ;;  %7468 = vmatprep.mubr.bf16.mxu0 %v19095_v36  ;;  %v17645_v36 = vld [vmem:[%s24752_s1 + $0x1890] ss:$52 sps:$4 sm:$0xff]  }
 0x3aa   :  { %7508 = vmatprep.mubr.bf16.mxu1 %v19106_v40  ;;  %v17646_v40 = vld [vmem:[%s24752_s1 + $0xed0] ss:$52 sps:$4 sm:$0xff]   ;;  %v22062_v15 = vpack.c.bf16 %v7740_v0, %v7740_v0  ;;  %v7106_v5 = vadd.f32 %v21914_v13, %v7065_v48 }
 0x3ab   :  { %15884 = vmatpush3.bf16.msra.mxu0 %v17638_v12  ;;  %v17670_v52 = vld [vmem:[%s24755_s3 + $0x154] ss:$28 sps:$4 sm:$0xff]  }
 0x3ac   :  { %15906 = vmatpush3.bf16.msra.mxu1 %v17639_v1  ;;  %15885 = vmatprep.subr.bf16.mxu0 %v17640_v3  ;;  %v17668_v12 = vld [vmem:[%s24755_s3 + $0x150] ss:$28 sps:$4 sm:$0xff]   ;;  %v17674_v1 = vld [vmem:[%s24755_s3 + $0x11c] ss:$28 sps:$4 sm:$0xff]  }
 0x3ad   :  { %15907 = vmatprep.subr.bf16.mxu1 %v17641_v8  ;;  %v17702_v0 = vld [vmem:[%s24755_s3 + $0x314] ss:$28 sps:$4 sm:$0xff]  }
 0x3af   :  { %15886 = vmatpush3.bf16.msra.mxu0 %v17642_v11 }
 0x3b0   :  { %15908 = vmatpush3.bf16.msra.mxu1 %v17643_v33  ;;  %15887 = vmatprep.subr.bf16.mxu0 %v17644_v32  ;;  %v17675_v33 = vld [vmem:[%s24752_s1 + $0x1c38] ss:$52 sps:$4 sm:$0xff]   ;;  %v17678_v32 = vld [vmem:[%s24755_s3 + $0xe4] ss:$28 sps:$4 sm:$0xff]  }
 0x3b1   :  { %15909 = vmatprep.subr.bf16.mxu1 %v17645_v36 }
 0x3b3   :  { %15888 = vmatpush3.bf16.msra.mxu0 %v17646_v40 }
 0x3b4   :  { %15910 = vmatpush3.bf16.msra.mxu1 %v17647_v7  ;;  %15889 = vmatprep.subr.bf16.mxu0 %v17648_v18  ;;  %v17676_v7 = vld [vmem:[%s24755_s3 + $0xe0] ss:$28 sps:$4 sm:$0xff]  }
 0x3b5   :  { %15911 = vmatprep.subr.bf16.mxu1 %v17649_v30  ;;  %v17682_v30 = vld [vmem:[%s24755_s3 + $0xac] ss:$28 sps:$4 sm:$0xff]  }
 0x3b7   :  { %15890 = vmatpush3.bf16.msra.mxu0 %v17650_v16  ;;  %v17680_v16 = vld [vmem:[%s24755_s3 + $0xa8] ss:$28 sps:$4 sm:$0xff]  }
 0x3b8   :  { %15912 = vmatpush3.bf16.msra.mxu1 %v17651_v22  ;;  %15891 = vmatprep.subr.bf16.mxu0 %v17652_v31  ;;  %v17683_v22 = vld [vmem:[%s24752_s1 + $0x1b68] ss:$52 sps:$4 sm:$0xff]   ;;  %v17686_v31 = vld [vmem:[%s24755_s3 + $0x74] ss:$28 sps:$4 sm:$0xff]  }
 0x3b9   :  { %15913 = vmatprep.subr.bf16.mxu1 %v17653_v42  ;;  %v17684_v42 = vld [vmem:[%s24755_s3 + $0x70] ss:$28 sps:$4 sm:$0xff]  }
 0x3bb   :  { %15892 = vmatpush3.bf16.msra.mxu0 %v17654_v47  ;;  %v17687_v47 = vld [vmem:[%s24752_s1 + $0x1b00] ss:$52 sps:$4 sm:$0xff]  }
 0x3bc   :  { %15914 = vmatpush3.bf16.msra.mxu1 %v17655_v35  ;;  %15893 = vmatprep.subr.bf16.mxu0 %v17656_v17  ;;  %v17690_v35 = vld [vmem:[%s24755_s3 + $0x3c] ss:$28 sps:$4 sm:$0xff]  }
 0x3bd   :  { %15915 = vmatprep.subr.bf16.mxu1 %v17657_v29  ;;  %v17688_v17 = vld [vmem:[%s24755_s3 + $0x38] ss:$28 sps:$4 sm:$0xff]  }
 0x3be   :  { %v17691_v29 = vld [vmem:[%s24752_s1 + $0x1a98] ss:$52 sps:$4 sm:$0xff]  }
 0x3bf   :  { %15894 = vmatpush3.bf16.msra.mxu0 %v17658_v60  ;;  %v17694_v60 = vld [vmem:[%s24755_s3 + $0x4] ss:$28 sps:$4 sm:$0xff]  }
 0x3c0   :  { %15916 = vmatpush3.bf16.msra.mxu1 %v17659_v50  ;;  %15895 = vmatprep.subr.bf16.mxu0 %v17660_v59 }
 0x3c1   :  { %15917 = vmatprep.subr.bf16.mxu1 %v17661_v41  ;;  %v17692_v41 = vld [vmem:[%s24755_s3] ss:$28 sps:$4 sm:$0xff]  }
 0x3c3   :  { %15896 = vmatpush3.bf16.msra.mxu0 %v17662_v38  ;;  %v17695_v38 = vld [vmem:[%s24752_s1 + $0x1a30] ss:$52 sps:$4 sm:$0xff]  }
 0x3c4   :  { %15918 = vmatpush3.bf16.msra.mxu1 %v17663_v2  ;;  %7516 = vmatprep.subr.bf16.mxu0 %v18741_v54 }
 0x3c5   :  { %12206 = vmatprep.subr.bf16.mxu1 %v17666_v55  ;;  %v22136_v55 = vpop.permute.xlu0 %7687 }
 0x3c6   :  { %v7144_v6 = vpop.f32.mrf.mxu0  ;;  %7469 = vmatmul.mubr.bf16.vlgmr.msra.gmra.mxu0 %v19227_v20 }
 0x3c7   :  { %7509 = vmatmul.mubr.bf16.vlgmr.msra.gmra.mxu1 %v19229_v21  ;;  %v7145_v3 = vadd.f32 %v7144_v6, %v7104_v45  ;;  %7517 = vmatpush1.bf16.msra.mxu0 %v17667_v63  ;;  %v17672_v21 = vld [vmem:[%s24755_s3 + $0x118] ss:$28 sps:$4 sm:$0xff]  }
 0x3c8   :  { %12207 = vmatpush1.bf16.msra.mxu1 %v17664_v62  ;;  %12238 = vmatprep.mubr.bf16.mxu1 %v22062_v15  ;;  %v7146_v8 = vpop.f32.mrf.mxu0  ;;  %v17696_v62 = vld [vmem:[%s24755_s3 + $0x348] ss:$28 sps:$4 sm:$0xff]   ;;  %v17699_v63 = vld [vmem:[%s24752_s1 + $0x1e40] ss:$52 sps:$4 sm:$0xff]   ;;  %v17703_v45 = vld [vmem:[%s24752_s1 + $0x1dd8] ss:$52 sps:$4 sm:$0xff]  }
 0x3c9   :  { %7518 = vmatprep.subr.bf16.mxu0 %v18741_v54  ;;  %v7564_v11 = vmax.f32 %v7145_v3, 0.0  ;;  %v7147_v20 = vadd.f32 %v7146_v8, %v7106_v5  ;;  %12208 = vmatprep.subr.bf16.mxu1 %v17670_v52  ;;  %v22148_v48 = vpop.permute.xlu0 %16191  ;;  %v17700_v52 = vld [vmem:[%s24755_s3 + $0x310] ss:$28 sps:$4 sm:$0xff]   ;;  %v17710_v3 = vld [vmem:[%s24755_s3 + $0x2a4] ss:$28 sps:$4 sm:$0xff]  }
 0x3ca   :  { %15077 = vmatprep.mubr.msk.bf16.mxu0 %vm6122_vm0, %v19246_v27  ;;  %v7148_v13 = vpop.f32.mrf.mxu0  ;;  %v17679_v27 = vld [vmem:[%s24752_s1 + $0x1bd0] ss:$52 sps:$4 sm:$0xff]   ;;  %v16193_v6 = vunpack.i.l.bf16 %v22148_v48  ;;  %v17713_v8 = vld [vmem:[%s24755_s3 + $0x50c] ss:$28 sps:$4 sm:$0xff]  }
 0x3cb   :  { %7577 = vst [vmem:[#allocation2 + $0x40] sm:$0xff] %v7564_v11  ;;  %v7565_v36 = vmax.f32 %v7147_v20, 0.0  ;;  %7519 = vmatpush1.bf16.msra.mxu0 %v17671_v19  ;;  %v16194_v19 = vunpack.i.h.bf16 %v22148_v48  ;;  %v17707_v5 = vld [vmem:[%s24752_s1 + $0x1d70] ss:$52 sps:$4 sm:$0xff]   ;;  %v17708_v20 = vld [vmem:[%s24755_s3 + $0x2a0] ss:$28 sps:$4 sm:$0xff]  }
 0x3cc   :  { %12209 = vmatpush1.bf16.msra.mxu1 %v17668_v12  ;;  %v7149_v40 = vpop.f32.mrf.mxu0  ;;  %7520 = vmatprep.subr.bf16.mxu0 %v18741_v54  ;;  %v17706_v12 = vld [vmem:[%s24755_s3 + $0x2dc] ss:$28 sps:$4 sm:$0xff]   ;;  %v17716_v13 = vld [vmem:[%s24755_s3 + $0x26c] ss:$28 sps:$4 sm:$0xff]   ;;  %v17836_v48 = vld [vmem:[%s24755_s3 + $0xaf4] ss:$28 sps:$4 sm:$0xff]  }
 0x3cd   :  { %12210 = vmatprep.subr.bf16.mxu1 %v17674_v1  ;;  %7578 = vst [vmem:[#allocation2 + $0x48] sm:$0xff] %v7565_v36  ;;  %v16195_v18 = vpack.i.bf16 %v7565_v36, %v7564_v11  ;;  %v17704_v1 = vld [vmem:[%s24755_s3 + $0x2d8] ss:$28 sps:$4 sm:$0xff]   ;;  %v7717_v11 = vsel %vm7713_vm2, %v16193_v6, %v16194_v19  ;;  %v17714_v36 = vld [vmem:[%s24755_s3 + $0x268] ss:$28 sps:$4 sm:$0xff]  }
 0x3cf   :  { %7521 = vmatpush1.bf16.msra.mxu0 %v17675_v33  ;;  %16196 = vrot.lane.b32.xlu1 %v16195_v18, %s18739_s14  ;;  %v7742_v33 = vmax.f32 %v21469_v9, %v7717_v11  ;;  %v17717_v9 = vld [vmem:[%s24755_s3 + $0x4d0] ss:$28 sps:$4 sm:$0xff]   ;;  %v17723_v18 = vld [vmem:[%s24755_s3 + $0x498] ss:$28 sps:$4 sm:$0xff]   ;;  %v17761_v11 = vld [vmem:[%s24755_s3 + $0x7e4] ss:$28 sps:$4 sm:$0xff]  }
 0x3d0   :  { %12211 = vmatpush1.bf16.msra.mxu1 %v17672_v21  ;;  %7522 = vmatprep.subr.bf16.mxu0 %v18741_v54  ;;  %v17711_v21 = vld [vmem:[%s24755_s3 + $0x508] ss:$28 sps:$4 sm:$0xff]  }
 0x3d1   :  { %12212 = vmatprep.subr.bf16.mxu1 %v17678_v32  ;;  %v17719_v32 = vld [vmem:[%s24755_s3 + $0x4d4] ss:$28 sps:$4 sm:$0xff]   ;;  %v22201_v40 = vpack.c.bf16 %v7742_v33, %v7742_v33 }
 0x3d2   :  { %v17764_v33 = vld [vmem:[%s24755_s3 + $0x694] ss:$28 sps:$4 sm:$0xff]  }
 0x3d3   :  { %7523 = vmatpush1.bf16.msra.mxu0 %v17679_v27  ;;  %v17725_v27 = vld [vmem:[%s24755_s3 + $0x49c] ss:$28 sps:$4 sm:$0xff]  }
 0x3d4   :  { %12213 = vmatpush1.bf16.msra.mxu1 %v17676_v7  ;;  %7524 = vmatprep.subr.bf16.mxu0 %v18741_v54  ;;  %v17722_v7 = vld [vmem:[%s24755_s3 + $0x234] ss:$28 sps:$4 sm:$0xff]  }
 0x3d5   :  { %12214 = vmatprep.subr.bf16.mxu1 %v17682_v30  ;;  %v17728_v30 = vld [vmem:[%s24755_s3 + $0x1fc] ss:$28 sps:$4 sm:$0xff]  }
 0x3d7   :  { %7525 = vmatpush1.bf16.msra.mxu0 %v17683_v22  ;;  %v17726_v22 = vld [vmem:[%s24755_s3 + $0x1f8] ss:$28 sps:$4 sm:$0xff]  }
 0x3d8   :  { %12215 = vmatpush1.bf16.msra.mxu1 %v17680_v16  ;;  %7526 = vmatprep.subr.bf16.mxu0 %v18741_v54  ;;  %v17731_v16 = vld [vmem:[%s24755_s3 + $0x464] ss:$28 sps:$4 sm:$0xff]  }
 0x3d9   :  { %12216 = vmatprep.subr.bf16.mxu1 %v17686_v31  ;;  %v17729_v31 = vld [vmem:[%s24755_s3 + $0x460] ss:$28 sps:$4 sm:$0xff]  }
 0x3db   :  { %v22122_v50 = vpop.f32.mrf.mxu1  ;;  %7527 = vmatpush1.bf16.msra.mxu0 %v17687_v47  ;;  %v17737_v47 = vld [vmem:[%s24755_s3 + $0x42c] ss:$28 sps:$4 sm:$0xff]  }
 0x3dc   :  { %12217 = vmatpush1.bf16.msra.mxu1 %v17684_v42  ;;  %7528 = vmatprep.subr.bf16.mxu0 %v18741_v54  ;;  %v17734_v42 = vld [vmem:[%s24755_s3 + $0x1c4] ss:$28 sps:$4 sm:$0xff]  }
 0x3dd   :  { %12218 = vmatprep.subr.bf16.mxu1 %v17690_v35  ;;  %v22125_v59 = vpop.f32.mrf.mxu1  ;;  %v7714_v35 = vsel %vm7713_vm2, %v22136_v55, %v16183_v58  ;;  %v17749_v55 = vld [vmem:[%s24755_s3 + $0x854] ss:$28 sps:$4 sm:$0xff]  }
 0x3de   :  { %v7739_v58 = vmax.f32 %v20887_v46, %v7714_v35  ;;  %v17774_v35 = vld [vmem:[%s24755_s3 + $0x620] ss:$28 sps:$4 sm:$0xff]  }
 0x3df   :  { %v7189_v2 = vpop.f32.mrf.mxu1  ;;  %7529 = vmatpush1.bf16.msra.mxu0 %v17691_v29  ;;  %v17735_v29 = vld [vmem:[%s24755_s3 + $0x428] ss:$28 sps:$4 sm:$0xff]  }
 0x3e0   :  { %12219 = vmatpush1.bf16.msra.mxu1 %v17688_v17  ;;  %7530 = vmatprep.subr.bf16.mxu0 %v18741_v54  ;;  %v17732_v17 = vld [vmem:[%s24755_s3 + $0x1c0] ss:$28 sps:$4 sm:$0xff]   ;;  %v22263_v46 = vpack.c.bf16 %v7739_v58, %v7739_v58 }
 0x3e1   :  { %12220 = vmatprep.subr.bf16.mxu1 %v17694_v60  ;;  %v7190_v61 = vpop.f32.mrf.mxu1  ;;  %v17740_v60 = vld [vmem:[%s24755_s3 + $0x3f4] ss:$28 sps:$4 sm:$0xff]   ;;  %v17746_v2 = vld [vmem:[%s24755_s3 + $0x3bc] ss:$28 sps:$4 sm:$0xff]  }
 0x3e2   :  { %v17744_v61 = vld [vmem:[%s24755_s3 + $0x3b8] ss:$28 sps:$4 sm:$0xff]  }
 0x3e3   :  { %7531 = vmatpush1.bf16.msra.mxu0 %v17695_v38  ;;  %v17738_v38 = vld [vmem:[%s24755_s3 + $0x3f0] ss:$28 sps:$4 sm:$0xff]  }
 0x3e4   :  { %12221 = vmatpush1.bf16.msra.mxu1 %v17692_v41  ;;  %7542 = vmatprep.subr.bf16.mxu0 %v18741_v54  ;;  %v17743_v41 = vld [vmem:[%s24755_s3 + $0x88c] ss:$28 sps:$4 sm:$0xff]  }
 0x3e5   :  { %12222 = vmatprep.subr.bf16.mxu1 %v17698_v44  ;;  %v17741_v44 = vld [vmem:[%s24755_s3 + $0x888] ss:$28 sps:$4 sm:$0xff]  }
 0x3e7   :  { %7543 = vmatpush2.bf16.msra.mxu0 %v17699_v63 }
 0x3e8   :  { %12223 = vmatpush2.bf16.msra.mxu1 %v17696_v62  ;;  %7544 = vmatprep.subr.bf16.mxu0 %v18741_v54  ;;  %v17747_v62 = vld [vmem:[%s24755_s3 + $0x850] ss:$28 sps:$4 sm:$0xff]  }
 0x3e9   :  { %12224 = vmatprep.subr.bf16.mxu1 %v17702_v0  ;;  %v17752_v0 = vld [vmem:[%s24755_s3 + $0x384] ss:$28 sps:$4 sm:$0xff]  }
 0x3eb   :  { %7545 = vmatpush2.bf16.msra.mxu0 %v17703_v45 }
 0x3ec   :  { %12225 = vmatpush2.bf16.msra.mxu1 %v17700_v52  ;;  %7546 = vmatprep.subr.bf16.mxu0 %v18741_v54  ;;  %v17755_v52 = vld [vmem:[%s24755_s3 + $0x81c] ss:$28 sps:$4 sm:$0xff]  }
 0x3ed   :  { %12226 = vmatprep.subr.bf16.mxu1 %v17706_v12  ;;  %v17750_v12 = vld [vmem:[%s24755_s3 + $0x380] ss:$28 sps:$4 sm:$0xff]  }
 0x3ef   :  { %7547 = vmatpush2.bf16.msra.mxu0 %v17707_v5 }
 0x3f0   :  { %12227 = vmatpush2.bf16.msra.mxu1 %v17704_v1  ;;  %12247 = vmatprep.subr.bf16.mxu0 %v17713_v8  ;;  %v17753_v1 = vld [vmem:[%s24755_s3 + $0x818] ss:$28 sps:$4 sm:$0xff]   ;;  %v17758_v8 = vld [vmem:[%s24755_s3 + $0x6cc] ss:$28 sps:$4 sm:$0xff]  }
 0x3f1   :  { %12228 = vmatprep.subr.bf16.mxu1 %v17710_v3 }
 0x3f2   :  { %7549 = vmatmul.mubr.bf16.vlgmr.msra.gmra.mxu0 %v19376_v10  ;;  %v17720_v10 = vld [vmem:[%s24755_s3 + $0x230] ss:$28 sps:$4 sm:$0xff]  }
 0x3f3   :  { %12248 = vmatpush1.bf16.msra.mxu0 %v17711_v21  ;;  %12279 = vmatprep.mubr.bf16.mxu0 %v22201_v40  ;;  %v17759_v21 = vld [vmem:[%s24755_s3 + $0x7e0] ss:$28 sps:$4 sm:$0xff]  }
 0x3f4   :  { %12229 = vmatpush2.bf16.msra.mxu1 %v17708_v20  ;;  %12249 = vmatprep.subr.bf16.mxu0 %v17719_v32  ;;  %v17756_v20 = vld [vmem:[%s24755_s3 + $0x6c8] ss:$28 sps:$4 sm:$0xff]   ;;  %v17762_v32 = vld [vmem:[%s24755_s3 + $0x690] ss:$28 sps:$4 sm:$0xff]  }
 0x3f5   :  { %12230 = vmatprep.subr.bf16.mxu1 %v17716_v13  ;;  %v17767_v13 = vld [vmem:[%s24755_s3 + $0x7ac] ss:$28 sps:$4 sm:$0xff]  }
 0x3f7   :  { %12250 = vmatpush1.bf16.msra.mxu0 %v17717_v9  ;;  %v17770_v9 = vld [vmem:[%s24755_s3 + $0x65c] ss:$28 sps:$4 sm:$0xff]  }
 0x3f8   :  { %12231 = vmatpush2.bf16.msra.mxu1 %v17714_v36  ;;  %12251 = vmatprep.subr.bf16.mxu0 %v17725_v27  ;;  %v17765_v36 = vld [vmem:[%s24755_s3 + $0x7a8] ss:$28 sps:$4 sm:$0xff]  }
 0x3f9   :  { %12232 = vmatprep.subr.bf16.mxu1 %v17722_v7  ;;  %v17773_v7 = vld [vmem:[%s24755_s3 + $0x774] ss:$28 sps:$4 sm:$0xff]  }
 0x3fb   :  { %12252 = vmatpush1.bf16.msra.mxu0 %v17723_v18 }
 0x3fc   :  { %12233 = vmatpush2.bf16.msra.mxu1 %v17720_v10  ;;  %12253 = vmatprep.subr.bf16.mxu0 %v17731_v16  ;;  %v17771_v16 = vld [vmem:[%s24755_s3 + $0x770] ss:$28 sps:$4 sm:$0xff]  }
 0x3fd   :  { %12234 = vmatprep.subr.bf16.mxu1 %v17728_v30  ;;  %v17768_v30 = vld [vmem:[%s24755_s3 + $0x658] ss:$28 sps:$4 sm:$0xff]  }
 0x3ff   :  { %12254 = vmatpush1.bf16.msra.mxu0 %v17729_v31  ;;  %v17776_v31 = vld [vmem:[%s24755_s3 + $0x624] ss:$28 sps:$4 sm:$0xff]  }
 0x400   :  { %12235 = vmatpush2.bf16.msra.mxu1 %v17726_v22  ;;  %12255 = vmatprep.subr.bf16.mxu0 %v17737_v47 }
 0x401   :  { %12236 = vmatprep.subr.bf16.mxu1 %v17734_v42  ;;  %v17779_v42 = vld [vmem:[%s24755_s3 + $0x73c] ss:$28 sps:$4 sm:$0xff]  }
 0x403   :  { %12256 = vmatpush1.bf16.msra.mxu0 %v17735_v29 }
 0x404   :  { %12237 = vmatpush2.bf16.msra.mxu1 %v17732_v17  ;;  %12257 = vmatprep.subr.bf16.mxu0 %v17740_v60  ;;  %v17777_v17 = vld [vmem:[%s24755_s3 + $0x738] ss:$28 sps:$4 sm:$0xff]  }
 0x405   :  { %12288 = vmatprep.subr.bf16.mxu1 %v17743_v41  ;;  %v17782_v41 = vld [vmem:[%s24755_s3 + $0x5ec] ss:$28 sps:$4 sm:$0xff]  }
 0x406   :  { %v22271_v63 = vpop.f32.mrf.mxu0 }
 0x407   :  { %12239 = vmatmul.mubr.bf16.vlgmr.msra.gmra.mxu1 %v22263_v46  ;;  %12258 = vmatpush1.bf16.msra.mxu0 %v17738_v38  ;;  %v17780_v38 = vld [vmem:[%s24755_s3 + $0x5e8] ss:$28 sps:$4 sm:$0xff]  }
 0x408   :  { %12289 = vmatpush1.bf16.msra.mxu1 %v17741_v44  ;;  %v22280_v45 = vpop.f32.mrf.mxu0  ;;  %12259 = vmatprep.subr.bf16.mxu0 %v17746_v2  ;;  %v17783_v44 = vld [vmem:[%s24755_s3 + $0x700] ss:$28 sps:$4 sm:$0xff]   ;;  %v17788_v2 = vld [vmem:[%s24755_s3 + $0x5b4] ss:$28 sps:$4 sm:$0xff]  }
 0x409   :  { %12290 = vmatprep.subr.bf16.mxu1 %v17749_v55  ;;  %v17791_v55 = vld [vmem:[%s24755_s3 + $0xa4c] ss:$28 sps:$4 sm:$0xff]  }
 0x40a   :  { %v7230_v5 = vpop.f32.mrf.mxu0 }
 0x40b   :  { %12260 = vmatpush1.bf16.msra.mxu0 %v17744_v61  ;;  %v17792_v5 = vld [vmem:[%s24755_s3 + $0x578] ss:$28 sps:$4 sm:$0xff]  }
 0x40c   :  { %12291 = vmatpush1.bf16.msra.mxu1 %v17747_v62  ;;  %v7231_v3 = vpop.f32.mrf.mxu0  ;;  %12261 = vmatprep.subr.bf16.mxu0 %v17752_v0  ;;  %v17786_v0 = vld [vmem:[%s24755_s3 + $0x5b0] ss:$28 sps:$4 sm:$0xff]  }
 0x40d   :  { %12292 = vmatprep.subr.bf16.mxu1 %v17755_v52  ;;  %v17789_v52 = vld [vmem:[%s24755_s3 + $0xa48] ss:$28 sps:$4 sm:$0xff]   ;;  %v17795_v3 = vld [vmem:[%s24755_s3 + $0xa10] ss:$28 sps:$4 sm:$0xff]  }
 0x40f   :  { %12262 = vmatpush1.bf16.msra.mxu0 %v17750_v12  ;;  %v17794_v12 = vld [vmem:[%s24755_s3 + $0x57c] ss:$28 sps:$4 sm:$0xff]  }
 0x410   :  { %12293 = vmatpush1.bf16.msra.mxu1 %v17753_v1  ;;  %12263 = vmatprep.subr.bf16.mxu0 %v17758_v8  ;;  %v17797_v1 = vld [vmem:[%s24755_s3 + $0xa14] ss:$28 sps:$4 sm:$0xff]   ;;  %v17800_v8 = vld [vmem:[%s24755_s3 + $0x544] ss:$28 sps:$4 sm:$0xff]  }
 0x411   :  { %12294 = vmatprep.subr.bf16.mxu1 %v17761_v11  ;;  %v22318_v27 = vpop.permute.xlu0 %16201  ;;  %v17803_v11 = vld [vmem:[%s24755_s3 + $0x9dc] ss:$28 sps:$4 sm:$0xff]  }
 0x412   :  { %v16204_v10 = vunpack.i.h.bf16 %v22318_v27  ;;  %v16203_v18 = vunpack.i.l.bf16 %v22318_v27  ;;  %v17915_v27 = vld [vmem:[%s24755_s3 + $0x1308] ss:$28 sps:$4 sm:$0xff]  }
 0x413   :  { %12264 = vmatpush2.bf16.msra.mxu0 %v17756_v20  ;;  %v7716_v20 = vsel %vm7713_vm2, %v16184_v57, %v16193_v6  ;;  %v17804_v57 = vld [vmem:[%s24755_s3 + $0x9a0] ss:$28 sps:$4 sm:$0xff]   ;;  %v17809_v6 = vld [vmem:[%s24755_s3 + $0x96c] ss:$28 sps:$4 sm:$0xff]  }
 0x414   :  { %12295 = vmatpush1.bf16.msra.mxu1 %v17759_v21  ;;  %12265 = vmatprep.subr.bf16.mxu0 %v17764_v33  ;;  %v7719_v22 = vsel %vm7713_vm2, %v16203_v18, %v16204_v10  ;;  %v17798_v21 = vld [vmem:[%s24755_s3 + $0x540] ss:$28 sps:$4 sm:$0xff]   ;;  %v17801_v33 = vld [vmem:[%s24755_s3 + $0x9d8] ss:$28 sps:$4 sm:$0xff]   ;;  %v7741_v4 = vmax.f32 %v21058_v14, %v7716_v20 }
 0x415   :  { %12296 = vmatprep.subr.bf16.mxu1 %v17767_v13  ;;  %v7744_v47 = vmax.f32 %v21906_v34, %v7719_v22  ;;  %v17785_v34 = vld [vmem:[%s24755_s3 + $0x704] ss:$28 sps:$4 sm:$0xff]   ;;  %v17824_v14 = vld [vmem:[%s24755_s3 + $0xbd4] ss:$28 sps:$4 sm:$0xff]   ;;  %v17827_v22 = vld [vmem:[%s24755_s3 + $0xb9c] ss:$28 sps:$4 sm:$0xff]  }
 0x416   :  { %v17806_v13 = vld [vmem:[%s24755_s3 + $0x9a4] ss:$28 sps:$4 sm:$0xff]  }
 0x417   :  { %12266 = vmatpush2.bf16.msra.mxu0 %v17762_v32  ;;  %v22346_v29 = vpack.c.bf16 %v7744_v47, %v7744_v47  ;;  %v17821_v32 = vld [vmem:[%s24755_s3 + $0xc0c] ss:$28 sps:$4 sm:$0xff]   ;;  %v17825_v47 = vld [vmem:[%s24755_s3 + $0xb98] ss:$28 sps:$4 sm:$0xff]  }
 0x418   :  { %12297 = vmatpush1.bf16.msra.mxu1 %v17765_v36  ;;  %12267 = vmatprep.subr.bf16.mxu0 %v17770_v9  ;;  %v17819_v36 = vld [vmem:[%s24755_s3 + $0xc08] ss:$28 sps:$4 sm:$0xff]   ;;  %v22425_v9 = vpack.c.bf16 %v7741_v4, %v7741_v4 }
 0x419   :  { %12298 = vmatprep.subr.bf16.mxu1 %v17773_v7  ;;  %12320 = vmatprep.mubr.bf16.mxu1 %v22346_v29  ;;  %v17807_v7 = vld [vmem:[%s24755_s3 + $0x968] ss:$28 sps:$4 sm:$0xff]  }
 0x41b   :  { %v22348_v60 = vpop.f32.mrf.mxu1  ;;  %12268 = vmatpush2.bf16.msra.mxu0 %v17768_v30  ;;  %v17812_v30 = vld [vmem:[%s24755_s3 + $0x934] ss:$28 sps:$4 sm:$0xff]  }
 0x41c   :  { %12299 = vmatpush1.bf16.msra.mxu1 %v17771_v16  ;;  %12269 = vmatprep.subr.bf16.mxu0 %v17776_v31  ;;  %v17822_v16 = vld [vmem:[%s24755_s3 + $0xbd0] ss:$28 sps:$4 sm:$0xff]  }
 0x41d   :  { %v22356_v58 = vpop.f32.mrf.mxu1  ;;  %12300 = vmatprep.subr.bf16.mxu1 %v17779_v42  ;;  %v17810_v31 = vld [vmem:[%s24755_s3 + $0x930] ss:$28 sps:$4 sm:$0xff]   ;;  %v17815_v42 = vld [vmem:[%s24755_s3 + $0x8fc] ss:$28 sps:$4 sm:$0xff]  }
 0x41f   :  { %v7271_v61 = vpop.f32.mrf.mxu1  ;;  %12270 = vmatpush2.bf16.msra.mxu0 %v17774_v35  ;;  %v17830_v35 = vld [vmem:[%s24755_s3 + $0xb64] ss:$28 sps:$4 sm:$0xff]  }
 0x420   :  { %12301 = vmatpush1.bf16.msra.mxu1 %v17777_v17  ;;  %12271 = vmatprep.subr.bf16.mxu0 %v17782_v41  ;;  %v17813_v17 = vld [vmem:[%s24755_s3 + $0x8f8] ss:$28 sps:$4 sm:$0xff]   ;;  %v17818_v41 = vld [vmem:[%s24755_s3 + $0x8c4] ss:$28 sps:$4 sm:$0xff]  }
 0x421   :  { %12302 = vmatprep.subr.bf16.mxu1 %v17785_v34  ;;  %v7272_v62 = vpop.f32.mrf.mxu1  ;;  %v17828_v34 = vld [vmem:[%s24755_s3 + $0xb60] ss:$28 sps:$4 sm:$0xff]  }
 0x422   :  { %v17816_v61 = vld [vmem:[%s24755_s3 + $0x8c0] ss:$28 sps:$4 sm:$0xff]  }
 0x423   :  { %12272 = vmatpush2.bf16.msra.mxu0 %v17780_v38  ;;  %v17833_v38 = vld [vmem:[%s24755_s3 + $0xb2c] ss:$28 sps:$4 sm:$0xff]  }
 0x424   :  { %12303 = vmatpush1.bf16.msra.mxu1 %v17783_v44  ;;  %12273 = vmatprep.subr.bf16.mxu0 %v17788_v2  ;;  %v22467_v44 = vld [vmem:[%s24754_s2 + $0x8] sm:$0x1f] }
 0x425   :  { %12304 = vmatprep.subr.bf16.mxu1 %v17791_v55  ;;  %v1150_v2 = vrot.slane %v22467_v44, %v20382_v24  ;;  %v7718_v55 = vsel %vm7713_vm2, %v16194_v19, %v16203_v18  ;;  %v1154_v62 = vrot.slane %v22467_v44, %v20385_v25  ;;  %v17834_v18 = vld [vmem:[%s24755_s3 + $0xaf0] ss:$28 sps:$4 sm:$0xff]  }
 0x427   :  { %12274 = vmatpush2.bf16.msra.mxu0 %v17786_v0  ;;  %v17831_v0 = vld [vmem:[%s24755_s3 + $0xb28] ss:$28 sps:$4 sm:$0xff]   ;;  %v7186_v19 = vadd.f32 %v22122_v50, %v1150_v2  ;;  %v17846_v2 = vld [vmem:[%s24755_s3 + $0xd90] ss:$28 sps:$4 sm:$0xff]  }
 0x428   :  { %12305 = vmatpush2.bf16.msra.mxu1 %v17789_v52  ;;  %12275 = vmatprep.subr.bf16.mxu0 %v17794_v12  ;;  %v7743_v52 = vmax.f32 %v21473_v23, %v7718_v55  ;;  %v7188_v12 = vadd.f32 %v22125_v59, %v1154_v62  ;;  %v17839_v23 = vld [vmem:[%s24755_s3 + $0xabc] ss:$28 sps:$4 sm:$0xff]  }
 0x429   :  { %12306 = vmatprep.subr.bf16.mxu1 %v17797_v1  ;;  %v7227_v1 = vadd.f32 %v22271_v63, %v7186_v19  ;;  %v17837_v63 = vld [vmem:[%s24755_s3 + $0xab8] ss:$28 sps:$4 sm:$0xff]   ;;  %v17855_v19 = vld [vmem:[%s24755_s3 + $0xce8] ss:$28 sps:$4 sm:$0xff]  }
 0x42a   :  { %v17851_v55 = vld [vmem:[%s24755_s3 + $0xd5c] ss:$28 sps:$4 sm:$0xff]  }
 0x42b   :  { %12276 = vmatpush2.bf16.msra.mxu0 %v17792_v5  ;;  %v22497_v5 = vpack.c.bf16 %v7743_v52, %v7743_v52  ;;  %v7268_v50 = vadd.f32 %v22348_v60, %v7227_v1  ;;  %v17849_v62 = vld [vmem:[%s24755_s3 + $0xd58] ss:$28 sps:$4 sm:$0xff]   ;;  %v17852_v52 = vld [vmem:[%s24755_s3 + $0xd20] ss:$28 sps:$4 sm:$0xff]  }
 0x42c   :  { %12307 = vmatpush2.bf16.msra.mxu1 %v17795_v3  ;;  %12277 = vmatprep.subr.bf16.mxu0 %v17800_v8  ;;  %v7229_v3 = vadd.f32 %v22280_v45, %v7188_v12  ;;  %v17842_v45 = vld [vmem:[%s24755_s3 + $0xa84] ss:$28 sps:$4 sm:$0xff]   ;;  %v17858_v12 = vld [vmem:[%s24755_s3 + $0xcb0] ss:$28 sps:$4 sm:$0xff]   ;;  %v17863_v1 = vld [vmem:[%s24755_s3 + $0xc7c] ss:$28 sps:$4 sm:$0xff]  }
 0x42d   :  { %12308 = vmatprep.subr.bf16.mxu1 %v17803_v11 }
 0x42e   :  { %v7270_v20 = vadd.f32 %v22356_v58, %v7229_v3 }
 0x42f   :  { %12278 = vmatpush2.bf16.msra.mxu0 %v17798_v21 }
 0x430   :  { %12309 = vmatpush2.bf16.msra.mxu1 %v17801_v33  ;;  %12329 = vmatprep.subr.bf16.mxu0 %v17821_v32 }
 0x431   :  { %12310 = vmatprep.subr.bf16.mxu1 %v17806_v13 }
 0x432   :  { %12280 = vmatmul.mubr.bf16.vlgmr.msra.gmra.mxu0 %v22425_v9 }
 0x433   :  { %12330 = vmatpush1.bf16.msra.mxu0 %v17819_v36 }
 0x434   :  { %12311 = vmatpush2.bf16.msra.mxu1 %v17804_v57  ;;  %12331 = vmatprep.subr.bf16.mxu0 %v17824_v14 }
 0x435   :  { %12312 = vmatprep.subr.bf16.mxu1 %v17809_v6 }
 0x437   :  { %12332 = vmatpush1.bf16.msra.mxu0 %v17822_v16 }
 0x438   :  { %12313 = vmatpush2.bf16.msra.mxu1 %v17807_v7  ;;  %12333 = vmatprep.subr.bf16.mxu0 %v17827_v22  ;;  %v17840_v7 = vld [vmem:[%s24755_s3 + $0xa80] ss:$28 sps:$4 sm:$0xff]  }
 0x439   :  { %12314 = vmatprep.subr.bf16.mxu1 %v17812_v30 }
 0x43b   :  { %12334 = vmatpush1.bf16.msra.mxu0 %v17825_v47 }
 0x43c   :  { %12315 = vmatpush2.bf16.msra.mxu1 %v17810_v31  ;;  %12335 = vmatprep.subr.bf16.mxu0 %v17830_v35  ;;  %v17843_v35 = vld [vmem:[%s24755_s3 + $0xdc8] ss:$28 sps:$4 sm:$0xff]  }
 0x43d   :  { %12316 = vmatprep.subr.bf16.mxu1 %v17815_v42  ;;  %v17845_v42 = vld [vmem:[%s24755_s3 + $0xdcc] ss:$28 sps:$4 sm:$0xff]  }
 0x43f   :  { %12336 = vmatpush1.bf16.msra.mxu0 %v17828_v34  ;;  %v18735_v34 = vld [vmem:[#allocation2 + $0x40] sm:$0xff] }
 0x440   :  { %12317 = vmatpush2.bf16.msra.mxu1 %v17813_v17  ;;  %12337 = vmatprep.subr.bf16.mxu0 %v17833_v38  ;;  %v18734_v17 = vld [vmem:[#allocation2 + $0x38] sm:$0xff] }
 0x441   :  { %12318 = vmatprep.subr.bf16.mxu1 %v17818_v41  ;;  %v22501_v8 = vpop.permute.xlu1 %16196 }
 0x442   :  { %v16199_v60 = vunpack.i.h.bf16 %v22501_v8  ;;  %v16198_v13 = vunpack.i.l.bf16 %v22501_v8 }
 0x443   :  { %12338 = vmatpush1.bf16.msra.mxu0 %v17831_v0  ;;  %v17854_v0 = vld [vmem:[%s24755_s3 + $0xd24] ss:$28 sps:$4 sm:$0xff]  }
 0x444   :  { %12319 = vmatpush2.bf16.msra.mxu1 %v17816_v61  ;;  %12339 = vmatprep.subr.bf16.mxu0 %v17836_v48  ;;  %v7643_v30 = vsel %vm7635_vm1, %v16189_v56, %v16198_v13  ;;  %v7644_v16 = vsel %vm7635_vm1, %v16198_v13, %v16199_v60  ;;  %v17857_v48 = vld [vmem:[%s24755_s3 + $0xcec] ss:$28 sps:$4 sm:$0xff]  }
 0x445   :  { %v22541_v41 = vmax.f32 %v18734_v17, %v7643_v30  ;;  %v22543_v38 = vmax.f32 %v18735_v34, %v7644_v16  ;;  %v17870_v34 = vld [vmem:[%s24755_s3 + $0xf50] ss:$28 sps:$4 sm:$0xff]  }
 0x446   :  { %v7308_v11 = vpop.f32.mrf.mxu0 }
 0x447   :  { %12321 = vmatmul.mubr.bf16.vlgmr.msra.gmra.mxu1 %v22497_v5  ;;  %v7349_v59 = vpop.f32.mrf.mxu1  ;;  %v7309_v21 = vadd.f32 %v7308_v11, %v7268_v50  ;;  %12340 = vmatpush1.bf16.msra.mxu0 %v17834_v18  ;;  %v16210_v61 = vpack.i.bf16 %v22543_v38, %v22541_v41  ;;  %v17860_v18 = vld [vmem:[%s24755_s3 + $0xcb4] ss:$28 sps:$4 sm:$0xff]   ;;  %v17866_v11 = vld [vmem:[%s24755_s3 + $0xc44] ss:$28 sps:$4 sm:$0xff]  }
 0x448   :  { %v7310_v33 = vpop.f32.mrf.mxu0  ;;  %12341 = vmatprep.subr.bf16.mxu0 %v17839_v23  ;;  %v17861_v23 = vld [vmem:[%s24755_s3 + $0xc78] ss:$28 sps:$4 sm:$0xff]  }
 0x449   :  { %v7351_v32 = vpop.f32.mrf.mxu1  ;;  %v7311_v4 = vadd.f32 %v7310_v33, %v7270_v20  ;;  %v22513_v57 = vadd.f32 %v7349_v59, %v7309_v21  ;;  %v1158_v59 = vrot.slane %v22467_v44, %v20622_v28  ;;  %v17864_v33 = vld [vmem:[%s24755_s3 + $0xc40] ss:$28 sps:$4 sm:$0xff]  }
 0x44a   :  { %v7312_v6 = vpop.f32.mrf.mxu0 }
 0x44b   :  { %v7353_v36 = vpop.f32.mrf.mxu1  ;;  %v7566_v58 = vmax.f32 %v22513_v57, 0.0  ;;  %v22516_v14 = vadd.f32 %v7351_v32, %v7311_v4  ;;  %12342 = vmatpush1.bf16.msra.mxu0 %v17837_v63 }
 0x44c   :  { %v7313_v22 = vpop.f32.mrf.mxu0  ;;  %12343 = vmatprep.subr.bf16.mxu0 %v17842_v45 }
 0x44d   :  { %v7354_v31 = vpop.f32.mrf.mxu1  ;;  %v7567_v47 = vmax.f32 %v22516_v14, 0.0 }
 0x44e   :  { %v17869_v31 = vld [vmem:[%s24755_s3 + $0xf8c] ss:$28 sps:$4 sm:$0xff]  }
 0x44f   :  { %v16205_v56 = vpack.i.bf16 %v7567_v47, %v7566_v58  ;;  %12344 = vmatpush1.bf16.msra.mxu0 %v17840_v7  ;;  %12370 = vmatprep.subr.bf16.mxu1 %v17869_v31  ;;  %v17903_v31 = vld [vmem:[%s24755_s3 + $0x1068] ss:$28 sps:$4 sm:$0xff]  }
 0x450   :  { %12345 = vmatprep.subr.bf16.mxu0 %v17845_v42  ;;  %v17867_v42 = vld [vmem:[%s24755_s3 + $0xf88] ss:$28 sps:$4 sm:$0xff]  }
 0x451   :  { %16206 = vrot.lane.b32.xlu1 %v16205_v56, %s18739_s14  ;;  %12371 = vmatpush1.bf16.msra.mxu1 %v17867_v42 }
 0x453   :  { %12346 = vmatpush2.bf16.msra.mxu0 %v17843_v35 }
 0x454   :  { %12347 = vmatprep.subr.bf16.mxu0 %v17848_v26 }
 0x455   :  { %16211 = vrot.lane.b32.xlu1 %v16210_v61, %s18740_s10  ;;  %v17873_v61 = vld [vmem:[%s24755_s3 + $0xf18] ss:$28 sps:$4 sm:$0xff]  }
 0x457   :  { %12348 = vmatpush2.bf16.msra.mxu0 %v17846_v2  ;;  %v17872_v2 = vld [vmem:[%s24755_s3 + $0xf54] ss:$28 sps:$4 sm:$0xff]  }
 0x458   :  { %12349 = vmatprep.subr.bf16.mxu0 %v17851_v55  ;;  %v17875_v55 = vld [vmem:[%s24755_s3 + $0xf1c] ss:$28 sps:$4 sm:$0xff]   ;;  %12372 = vmatprep.subr.bf16.mxu1 %v17872_v2  ;;  %v17914_v2 = vld [vmem:[%s24755_s3 + $0xfc4] ss:$28 sps:$4 sm:$0xff]  }
 0x459   :  { %12373 = vmatpush1.bf16.msra.mxu1 %v17870_v34  ;;  %v17909_v34 = vld [vmem:[%s24755_s3 + $0xff8] ss:$28 sps:$4 sm:$0xff]  }
 0x45a   :  { %12374 = vmatprep.subr.bf16.mxu1 %v17875_v55 }
 0x45b   :  { %12350 = vmatpush2.bf16.msra.mxu0 %v17849_v62  ;;  %v17878_v62 = vld [vmem:[%s24755_s3 + $0xee4] ss:$28 sps:$4 sm:$0xff]  }
 0x45c   :  { %12351 = vmatprep.subr.bf16.mxu0 %v17854_v0  ;;  %v17876_v0 = vld [vmem:[%s24755_s3 + $0xee0] ss:$28 sps:$4 sm:$0xff]  }
 0x45d   :  { %12375 = vmatpush1.bf16.msra.mxu1 %v17873_v61  ;;  %v17912_v61 = vld [vmem:[%s24755_s3 + $0xfc0] ss:$28 sps:$4 sm:$0xff]  }
 0x45e   :  { %12376 = vmatprep.subr.bf16.mxu1 %v17878_v62 }
 0x45f   :  { %12352 = vmatpush2.bf16.msra.mxu0 %v17852_v52  ;;  %v17881_v52 = vld [vmem:[%s24755_s3 + $0xeac] ss:$28 sps:$4 sm:$0xff]  }
 0x460   :  { %12353 = vmatprep.subr.bf16.mxu0 %v17857_v48  ;;  %v17879_v48 = vld [vmem:[%s24755_s3 + $0xea8] ss:$28 sps:$4 sm:$0xff]  }
 0x461   :  { %12377 = vmatpush1.bf16.msra.mxu1 %v17876_v0 }
 0x462   :  { %12378 = vmatprep.subr.bf16.mxu1 %v17881_v52 }
 0x463   :  { %12354 = vmatpush2.bf16.msra.mxu0 %v17855_v19  ;;  %v17884_v19 = vld [vmem:[%s24755_s3 + $0xe74] ss:$28 sps:$4 sm:$0xff]  }
 0x464   :  { %12355 = vmatprep.subr.bf16.mxu0 %v17860_v18  ;;  %v17882_v18 = vld [vmem:[%s24755_s3 + $0xe70] ss:$28 sps:$4 sm:$0xff]  }
 0x465   :  { %12379 = vmatpush1.bf16.msra.mxu1 %v17879_v48 }
 0x466   :  { %v15853_v3 = vpop.f32.mrf.mxu0  ;;  %12380 = vmatprep.subr.bf16.mxu1 %v17884_v19 }
 0x467   :  { %v15875_v50 = vpop.f32.mrf.mxu1  ;;  %12356 = vmatpush2.bf16.msra.mxu0 %v17858_v12  ;;  %v17887_v12 = vld [vmem:[%s24755_s3 + $0xe3c] ss:$28 sps:$4 sm:$0xff]  }
 0x468   :  { %v15854_v63 = vpop.f32.mrf.mxu0  ;;  %12357 = vmatprep.subr.bf16.mxu0 %v17863_v1  ;;  %v17885_v1 = vld [vmem:[%s24755_s3 + $0xe38] ss:$28 sps:$4 sm:$0xff]  }
 0x469   :  { %v15876_v20 = vpop.f32.mrf.mxu1  ;;  %v15855_v21 = vadd.f32 %v15854_v63, %v15853_v3  ;;  %12381 = vmatpush1.bf16.msra.mxu1 %v17882_v18  ;;  %v17888_v3 = vld [vmem:[%s24755_s3 + $0xe00] ss:$28 sps:$4 sm:$0xff]   ;;  %v17896_v63 = vld [vmem:[%s24755_s3 + $0x1114] ss:$28 sps:$4 sm:$0xff]   ;;  %v17917_v18 = vld [vmem:[%s24755_s3 + $0x130c] ss:$28 sps:$4 sm:$0xff]  }
 0x46a   :  { %v15877_v45 = vadd.f32 %v15876_v20, %v15875_v50  ;;  %v15856_v13 = vpop.f32.mrf.mxu0  ;;  %12382 = vmatprep.subr.bf16.mxu1 %v17887_v12  ;;  %v17893_v50 = vld [vmem:[%s24755_s3 + $0x114c] ss:$28 sps:$4 sm:$0xff]  }
 0x46b   :  { %v15878_v32 = vpop.f32.mrf.mxu1  ;;  %v7391_v4 = vadd.f32 %v15855_v21, %v1158_v59  ;;  %12358 = vmatpush2.bf16.msra.mxu0 %v17861_v23  ;;  %v17890_v23 = vld [vmem:[%s24755_s3 + $0xe04] ss:$28 sps:$4 sm:$0xff]  }
 0x46c   :  { %v15857_v6 = vpop.f32.mrf.mxu0  ;;  %12359 = vmatprep.subr.bf16.mxu0 %v17866_v11  ;;  %v17891_v11 = vld [vmem:[%s24755_s3 + $0x1148] ss:$28 sps:$4 sm:$0xff]   ;;  %v17897_v32 = vld [vmem:[%s24755_s3 + $0x10d8] ss:$28 sps:$4 sm:$0xff]  }
 0x46d   :  { %v15879_v36 = vpop.f32.mrf.mxu1  ;;  %v7431_v7 = vadd.f32 %v15877_v45, %v7391_v4  ;;  %12383 = vmatpush1.bf16.msra.mxu1 %v17885_v1  ;;  %v17894_v45 = vld [vmem:[%s24755_s3 + $0x1110] ss:$28 sps:$4 sm:$0xff]  }
 0x46e   :  { %12384 = vmatprep.subr.bf16.mxu1 %v17890_v23  ;;  %v18736_v1 = vld [vmem:[#allocation2 + $0x48] sm:$0xff] }
 0x46f   :  { %12360 = vmatpush2.bf16.msra.mxu0 %v17864_v33  ;;  %v17899_v33 = vld [vmem:[%s24755_s3 + $0x10dc] ss:$28 sps:$4 sm:$0xff]  }
 0x470   :  { %12411 = vmatprep.subr.bf16.mxu0 %v17917_v18 }
 0x471   :  { %12385 = vmatpush1.bf16.msra.mxu1 %v17888_v3 }
 0x472   :  { %12386 = vmatprep.subr.bf16.mxu1 %v17893_v50 }
 0x475   :  { %12387 = vmatpush2.bf16.msra.mxu1 %v17891_v11 }
 0x476   :  { %12388 = vmatprep.subr.bf16.mxu1 %v17896_v63 }
 0x479   :  { %12389 = vmatpush2.bf16.msra.mxu1 %v17894_v45 }
 0x47a   :  { %12390 = vmatprep.subr.bf16.mxu1 %v17899_v33 }
 0x47d   :  { %12391 = vmatpush2.bf16.msra.mxu1 %v17897_v32  ;;  %v17926_v32 = vld [vmem:[%s24755_s3 + $0x1264] ss:$28 sps:$4 sm:$0xff]  }
 0x486   :  { %v15897_v44 = vpop.f32.mrf.mxu0 }
 0x487   :  { %v15919_v30 = vpop.f32.mrf.mxu1 }
 0x488   :  { %v15898_v16 = vpop.f32.mrf.mxu0 }
 0x489   :  { %v15920_v22 = vpop.f32.mrf.mxu1  ;;  %v15899_v59 = vadd.f32 %v15898_v16, %v15897_v44 }
 0x48a   :  { %v15900_v35 = vpop.f32.mrf.mxu0  ;;  %v15921_v21 = vadd.f32 %v15920_v22, %v15919_v30  ;;  %v17900_v30 = vld [vmem:[%s24755_s3 + $0x10a0] ss:$28 sps:$4 sm:$0xff]   ;;  %v17905_v22 = vld [vmem:[%s24755_s3 + $0x106c] ss:$28 sps:$4 sm:$0xff]  }
 0x48b   :  { %v15922_v26 = vpop.f32.mrf.mxu1  ;;  %v7471_v20 = vadd.f32 %v15899_v59, %v7431_v7  ;;  %v17902_v7 = vld [vmem:[%s24755_s3 + $0x10a4] ss:$28 sps:$4 sm:$0xff]   ;;  %v17908_v35 = vld [vmem:[%s24755_s3 + $0x1034] ss:$28 sps:$4 sm:$0xff]  }
 0x48c   :  { %v15901_v56 = vpop.f32.mrf.mxu0  ;;  %12392 = vmatprep.subr.bf16.mxu1 %v17902_v7  ;;  %v17906_v26 = vld [vmem:[%s24755_s3 + $0x1030] ss:$28 sps:$4 sm:$0xff]  }
 0x48d   :  { %v15923_v17 = vpop.f32.mrf.mxu1  ;;  %v7511_v13 = vadd.f32 %v15921_v21, %v7471_v20  ;;  %12393 = vmatpush2.bf16.msra.mxu1 %v17900_v30  ;;  %v17932_v7 = vld [vmem:[%s24755_s3 + $0x11f4] ss:$28 sps:$4 sm:$0xff]   ;;  %v17935_v30 = vld [vmem:[%s24755_s3 + $0x11bc] ss:$28 sps:$4 sm:$0xff]  }
 0x48e   :  { %12394 = vmatprep.subr.bf16.mxu1 %v17905_v22  ;;  %v17911_v17 = vld [vmem:[%s24755_s3 + $0xffc] ss:$28 sps:$4 sm:$0xff]   ;;  %v17938_v22 = vld [vmem:[%s24755_s3 + $0x1184] ss:$28 sps:$4 sm:$0xff]  }
 0x491   :  { %12395 = vmatpush2.bf16.msra.mxu1 %v17903_v31  ;;  %v17936_v31 = vld [vmem:[%s24755_s3 + $0x1180] ss:$28 sps:$4 sm:$0xff]  }
 0x492   :  { %12396 = vmatprep.subr.bf16.mxu1 %v17908_v35  ;;  %v17941_v35 = vld [vmem:[%s24755_s3 + $0x14cc] ss:$28 sps:$4 sm:$0xff]  }
 0x495   :  { %12397 = vmatpush2.bf16.msra.mxu1 %v17906_v26 }
 0x496   :  { %12398 = vmatprep.subr.bf16.mxu1 %v17911_v17  ;;  %v17939_v17 = vld [vmem:[%s24755_s3 + $0x14c8] ss:$28 sps:$4 sm:$0xff]  }
 0x499   :  { %12399 = vmatpush2.bf16.msra.mxu1 %v17909_v34  ;;  %v17944_v34 = vld [vmem:[%s24755_s3 + $0x1494] ss:$28 sps:$4 sm:$0xff]  }
 0x49a   :  { %12400 = vmatprep.subr.bf16.mxu1 %v17914_v2 }
 0x49d   :  { %12401 = vmatpush2.bf16.msra.mxu1 %v17912_v61 }
 0x4b2   :  { %v7550_v4 = vpop.f32.mrf.mxu0 }
 0x4b3   :  { %v7551_v6 = vadd.f32 %v7550_v4, %v7511_v13  ;;  %v17921_v13 = vld [vmem:[%s24755_s3 + $0x1298] ss:$28 sps:$4 sm:$0xff]   ;;  %v17924_v4 = vld [vmem:[%s24755_s3 + $0x1260] ss:$28 sps:$4 sm:$0xff]  }
 0x4b4   :  { %v7552_v36 = vpop.f32.mrf.mxu0 }
 0x4b5   :  { %v7568_v44 = vmax.f32 %v7551_v6, 0.0  ;;  %v17929_v6 = vld [vmem:[%s24755_s3 + $0x122c] ss:$28 sps:$4 sm:$0xff]  }
 0x4b6   :  { %v7553_v16 = vpop.f32.mrf.mxu0  ;;  %v17927_v36 = vld [vmem:[%s24755_s3 + $0x1228] ss:$28 sps:$4 sm:$0xff]  }
 0x4b7   :  { %7582 = vst.msk [vmem:[#allocation2 + $0x60] sm:$0xff] %vm7581_vm3, %v7568_v44  ;;  %v17930_v44 = vld [vmem:[%s24755_s3 + $0x11f0] ss:$28 sps:$4 sm:$0xff]   ;;  %v17933_v16 = vld [vmem:[%s24755_s3 + $0x11b8] ss:$28 sps:$4 sm:$0xff]  }
 0x4b8   :  { %v7554_v42 = vpop.f32.mrf.mxu0 }
 0x4b9   :  { %v8565_v42 = vld [vmem:[%s24756_s4] sm:$0x7f] }
 0x4ba   :  { %v8570_v26 = vrot.slane %v8565_v42, %v19636_v49  ;;  %v8574_v2 = vrot.slane %v8565_v42, %v19645_v53  ;;  %v17945_v53 = vld [vmem:[%s24755_s3 + $0x1458] ss:$28 sps:$4 sm:$0xff]  }
 0x4be   :  { %v22674_v56 = vld [vmem:[#allocation2 + $0x60] sm:$0xff] }
 0x4bf   :  { %7633 = vrot.lane.b32.xlu0 %v22674_v56, %s18739_s14 }
 0x4c3   :  { %v22687_v55 = vpop.permute.xlu1 %16206 }
 0x4c4   :  { %v16209_v62 = vunpack.i.h.bf16 %v22687_v55  ;;  %v16208_v0 = vunpack.i.l.bf16 %v22687_v55 }
 0x4c6   :  { %v7645_v48 = vsel %vm7635_vm1, %v16199_v60, %v16208_v0  ;;  %v7646_v19 = vsel %vm7635_vm1, %v16208_v0, %v16209_v62  ;;  %v17942_v0 = vld [vmem:[%s24755_s3 + $0x1490] ss:$28 sps:$4 sm:$0xff]  }
 0x4c7   :  { %v22694_v52 = vpop.f32.mrf.mxu1  ;;  %v22705_v12 = vpop.permute.xlu1 %16211  ;;  %v22707_v23 = vmax.f32 %v18736_v1, %v7645_v48  ;;  %v22711_v3 = vmax.f32 %v7566_v58, %v7646_v19  ;;  %v17947_v48 = vld [vmem:[%s24755_s3 + $0x145c] ss:$28 sps:$4 sm:$0xff]  }
 0x4c8   :  { %v16214_v60 = vunpack.i.h.bf16 %v22705_v12  ;;  %v16213_v50 = vunpack.i.l.bf16 %v22705_v12  ;;  %v12241_v61 = vadd.f32 %v22694_v52, %v8570_v26  ;;  %v17959_v12 = vld [vmem:[%s24755_s3 + $0x1574] ss:$28 sps:$4 sm:$0xff]  }
 0x4c9   :  { %v12242_v8 = vpop.f32.mrf.mxu1  ;;  %v16215_v11 = vpack.i.bf16 %v22711_v3, %v22707_v23 }
 0x4ca   :  { %v7720_v63 = vsel %vm7713_vm2, %v16204_v10, %v16213_v50  ;;  %v7721_v57 = vsel %vm7713_vm2, %v16213_v50, %v16214_v60  ;;  %v17920_v10 = vld [vmem:[%s24755_s3 + $0x12d4] ss:$28 sps:$4 sm:$0xff]   ;;  %v12243_v19 = vadd.f32 %v12242_v8, %v8574_v2  ;;  %v17971_v2 = vld [vmem:[%s24755_s3 + $0x1504] ss:$28 sps:$4 sm:$0xff]  }
 0x4cb   :  { %v12244_v59 = vpop.f32.mrf.mxu1  ;;  %v7745_v58 = vmax.f32 %v21910_v51, %v7720_v63  ;;  %v7746_v20 = vmax.f32 %v22541_v41, %v7721_v57  ;;  %16216 = vrot.lane.b32.xlu0 %v16215_v11, %s18740_s10  ;;  %v17918_v51 = vld [vmem:[%s24755_s3 + $0x12d0] ss:$28 sps:$4 sm:$0xff]   ;;  %v17923_v41 = vld [vmem:[%s24755_s3 + $0x129c] ss:$28 sps:$4 sm:$0xff]  }
 0x4cd   :  { %v12245_v21 = vpop.f32.mrf.mxu1  ;;  %v22726_v45 = vpack.c.bf16 %v7746_v20, %v7746_v20  ;;  %v22728_v33 = vpack.c.bf16 %v7745_v58, %v7745_v58 }
 0x4ce   :  { %v17948_v21 = vld [vmem:[%s24755_s3 + $0x1420] ss:$28 sps:$4 sm:$0xff]  }
 0x4cf   :  { %12361 = vmatprep.mubr.bf16.mxu0 %v22726_v45 }
 0x4d0   :  { %12362 = vmatmul.mubr.bf16.vlgmr.msra.gmra.mxu0 %v22728_v33 }
 0x4d1   :  { %12412 = vmatpush1.bf16.msra.mxu0 %v17915_v27  ;;  %v17950_v27 = vld [vmem:[%s24755_s3 + $0x1424] ss:$28 sps:$4 sm:$0xff]  }
 0x4d2   :  { %12413 = vmatprep.subr.bf16.mxu0 %v17920_v10  ;;  %v17953_v10 = vld [vmem:[%s24755_s3 + $0x15ac] ss:$28 sps:$4 sm:$0xff]  }
 0x4d3   :  { %12460 = vmatprep.subr.bf16.mxu1 %v17953_v10 }
 0x4d5   :  { %12414 = vmatpush1.bf16.msra.mxu0 %v17918_v51  ;;  %v17954_v51 = vld [vmem:[%s24755_s3 + $0x13e8] ss:$28 sps:$4 sm:$0xff]  }
 0x4d6   :  { %12415 = vmatprep.subr.bf16.mxu0 %v17923_v41  ;;  %v17956_v41 = vld [vmem:[%s24755_s3 + $0x13ec] ss:$28 sps:$4 sm:$0xff]  }
 0x4d9   :  { %12416 = vmatpush1.bf16.msra.mxu0 %v17921_v13  ;;  %v17962_v13 = vld [vmem:[%s24755_s3 + $0x13b4] ss:$28 sps:$4 sm:$0xff]  }
 0x4da   :  { %12417 = vmatprep.subr.bf16.mxu0 %v17926_v32  ;;  %v17960_v32 = vld [vmem:[%s24755_s3 + $0x13b0] ss:$28 sps:$4 sm:$0xff]  }
 0x4dd   :  { %12418 = vmatpush1.bf16.msra.mxu0 %v17924_v4  ;;  %v17968_v4 = vld [vmem:[%s24755_s3 + $0x137c] ss:$28 sps:$4 sm:$0xff]  }
 0x4de   :  { %12419 = vmatprep.subr.bf16.mxu0 %v17929_v6  ;;  %v17966_v6 = vld [vmem:[%s24755_s3 + $0x1378] ss:$28 sps:$4 sm:$0xff]  }
 0x4e1   :  { %12420 = vmatpush1.bf16.msra.mxu0 %v17927_v36  ;;  %v17972_v36 = vld [vmem:[%s24755_s3 + $0x1340] ss:$28 sps:$4 sm:$0xff]  }
 0x4e2   :  { %12421 = vmatprep.subr.bf16.mxu0 %v17932_v7  ;;  %v17974_v7 = vld [vmem:[%s24755_s3 + $0x1344] ss:$28 sps:$4 sm:$0xff]  }
 0x4e5   :  { %12422 = vmatpush1.bf16.msra.mxu0 %v17930_v44  ;;  %v17980_v44 = vld [vmem:[%s24755_s3 + $0x514] ss:$28 sps:$4 sm:$0xff]  }
 0x4e6   :  { %12423 = vmatprep.subr.bf16.mxu0 %v17935_v30 }
 0x4e9   :  { %12424 = vmatpush1.bf16.msra.mxu0 %v17933_v16 }
 0x4ea   :  { %12425 = vmatprep.subr.bf16.mxu0 %v17938_v22 }
 0x4ed   :  { %12426 = vmatpush1.bf16.msra.mxu0 %v17936_v31 }
 0x4ee   :  { %12427 = vmatprep.subr.bf16.mxu0 %v17941_v35 }
 0x4f1   :  { %12428 = vmatpush2.bf16.msra.mxu0 %v17939_v17 }
 0x4f2   :  { %v12281_v49 = vpop.f32.mrf.mxu0  ;;  %12429 = vmatprep.subr.bf16.mxu0 %v17944_v34 }
 0x4f3   :  { %v12282_v18 = vadd.f32 %v12281_v49, %v12241_v61  ;;  %v17969_v61 = vld [vmem:[%s24755_s3 + $0x1500] ss:$28 sps:$4 sm:$0xff]  }
 0x4f4   :  { %v12283_v1 = vpop.f32.mrf.mxu0 }
 0x4f5   :  { %v12284_v50 = vadd.f32 %v12283_v1, %v12243_v19  ;;  %12430 = vmatpush2.bf16.msra.mxu0 %v17942_v0  ;;  %v17977_v0 = vld [vmem:[%s24755_s3 + $0x194] ss:$28 sps:$4 sm:$0xff]  }
 0x4f6   :  { %v12285_v52 = vpop.f32.mrf.mxu0  ;;  %12431 = vmatprep.subr.bf16.mxu0 %v17947_v48 }
 0x4f8   :  { %v12286_v11 = vpop.f32.mrf.mxu0 }
 0x4f9   :  { %12432 = vmatpush2.bf16.msra.mxu0 %v17945_v53 }
 0x4fa   :  { %12433 = vmatprep.subr.bf16.mxu0 %v17950_v27 }
 0x4fd   :  { %12434 = vmatpush2.bf16.msra.mxu0 %v17948_v21  ;;  %v17983_v21 = vld [vmem:[%s24755_s3 + $0x15c] ss:$28 sps:$4 sm:$0xff]  }
 0x4fe   :  { %12435 = vmatprep.subr.bf16.mxu0 %v17956_v41  ;;  %v17986_v41 = vld [vmem:[%s24755_s3 + $0x4dc] ss:$28 sps:$4 sm:$0xff]  }
 0x501   :  { %12436 = vmatpush2.bf16.msra.mxu0 %v17954_v51  ;;  %v17978_v51 = vld [vmem:[%s24755_s3 + $0x510] ss:$28 sps:$4 sm:$0xff]  }
 0x502   :  { %12437 = vmatprep.subr.bf16.mxu0 %v17962_v13  ;;  %v17989_v13 = vld [vmem:[%s24755_s3 + $0x124] ss:$28 sps:$4 sm:$0xff]  }
 0x505   :  { %12438 = vmatpush2.bf16.msra.mxu0 %v17960_v32  ;;  %v17984_v32 = vld [vmem:[%s24755_s3 + $0x4d8] ss:$28 sps:$4 sm:$0xff]  }
 0x506   :  { %12439 = vmatprep.subr.bf16.mxu0 %v17968_v4  ;;  %v17987_v4 = vld [vmem:[%s24755_s3 + $0x120] ss:$28 sps:$4 sm:$0xff]  }
 0x507   :  { %v12322_v59 = vpop.f32.mrf.mxu1 }
 0x508   :  { %v22801_v63 = vadd.f32 %v12322_v59, %v12282_v18 }
 0x509   :  { %v12324_v57 = vpop.f32.mrf.mxu1  ;;  %12440 = vmatpush2.bf16.msra.mxu0 %v17966_v6  ;;  %v17992_v6 = vld [vmem:[%s24755_s3 + $0x4a4] ss:$28 sps:$4 sm:$0xff]  }
 0x50a   :  { %v22803_v58 = vadd.f32 %v12324_v57, %v12284_v50  ;;  %12441 = vmatprep.subr.bf16.mxu0 %v17974_v7  ;;  %v17990_v7 = vld [vmem:[%s24755_s3 + $0x4a0] ss:$28 sps:$4 sm:$0xff]  }
 0x50b   :  { %v12326_v20 = vpop.f32.mrf.mxu1 }
 0x50c   :  { %v17975_v20 = vld [vmem:[%s24755_s3 + $0x190] ss:$28 sps:$4 sm:$0xff]  }
 0x50d   :  { %v12327_v8 = vpop.f32.mrf.mxu1  ;;  %12442 = vmatpush2.bf16.msra.mxu0 %v17972_v36  ;;  %v17995_v36 = vld [vmem:[%s24755_s3 + $0xec] ss:$28 sps:$4 sm:$0xff]  }
 0x50e   :  { %12534 = vmatprep.subr.bf16.mxu0 %v17980_v44  ;;  %v17993_v44 = vld [vmem:[%s24755_s3 + $0xe8] ss:$28 sps:$4 sm:$0xff]  }
 0x531   :  { %v7634_v30 = vpop.permute.xlu0 %7633 }
 0x532   :  { %v7647_v16 = vsel %vm7635_vm1, %v16209_v62, %v7634_v30  ;;  %v7673_v22 = vmax.f32 %v22674_v56, %v7634_v30  ;;  %v17998_v30 = vld [vmem:[%s24755_s3 + $0x46c] ss:$28 sps:$4 sm:$0xff]  }
 0x533   :  { %v7672_v31 = vmax.f32 %v7567_v47, %v7647_v16  ;;  %v17951_v47 = vld [vmem:[%s24755_s3 + $0x15a8] ss:$28 sps:$4 sm:$0xff]   ;;  %v18001_v16 = vld [vmem:[%s24755_s3 + $0xb4] ss:$28 sps:$4 sm:$0xff]  }
 0x534   :  { %7711 = vrot.lane.b32.xlu1 %v7673_v22, %s18740_s10 }
 0x535   :  { %7709 = vrot.lane.b32.xlu0 %v7672_v31, %s18740_s10 }
 0x53d   :  { %v16217_v42 = vpop.permute.xlu0 %16216 }
 0x53e   :  { %v16219_v35 = vunpack.i.h.bf16 %v16217_v42  ;;  %v16218_v26 = vunpack.i.l.bf16 %v16217_v42  ;;  %v18004_v42 = vld [vmem:[%s24755_s3 + $0x434] ss:$28 sps:$4 sm:$0xff]  }
 0x540   :  { %v7722_v17 = vsel %vm7713_vm2, %v16214_v60, %v16218_v26  ;;  %v7723_v55 = vsel %vm7713_vm2, %v16218_v26, %v16219_v35  ;;  %v17963_v60 = vld [vmem:[%s24755_s3 + $0x1538] ss:$28 sps:$4 sm:$0xff]   ;;  %v18002_v26 = vld [vmem:[%s24755_s3 + $0x430] ss:$28 sps:$4 sm:$0xff]  }
 0x541   :  { %v7747_v62 = vmax.f32 %v22543_v38, %v7722_v17  ;;  %v7748_v56 = vmax.f32 %v22707_v23, %v7723_v55  ;;  %v17957_v38 = vld [vmem:[%s24755_s3 + $0x1570] ss:$28 sps:$4 sm:$0xff]   ;;  %v17965_v23 = vld [vmem:[%s24755_s3 + $0x153c] ss:$28 sps:$4 sm:$0xff]  }
 0x542   :  { %v18005_v17 = vld [vmem:[%s24755_s3 + $0x78] ss:$28 sps:$4 sm:$0xff]  }
 0x543   :  { %v22855_v34 = vpack.c.bf16 %v7748_v56, %v7748_v56  ;;  %v22857_v14 = vpack.c.bf16 %v7747_v62, %v7747_v62  ;;  %v18010_v55 = vld [vmem:[%s24755_s3 + $0x3fc] ss:$28 sps:$4 sm:$0xff]   ;;  %v18013_v62 = vld [vmem:[%s24755_s3 + $0x44] ss:$28 sps:$4 sm:$0xff]  }
 0x544   :  { %v18008_v56 = vld [vmem:[%s24755_s3 + $0x3f8] ss:$28 sps:$4 sm:$0xff]  }
 0x545   :  { %12402 = vmatprep.mubr.bf16.mxu1 %v22855_v34 }
 0x546   :  { %12403 = vmatmul.mubr.bf16.vlgmr.msra.gmra.mxu1 %v22857_v14 }
 0x547   :  { %12461 = vmatpush1.bf16.msra.mxu1 %v17951_v47  ;;  %12484 = vmatprep.mubr.bf16.mxu1 %v18741_v54  ;;  %v18011_v47 = vld [vmem:[%s24755_s3 + $0x40] ss:$28 sps:$4 sm:$0xff]  }
 0x548   :  { %12462 = vmatprep.subr.bf16.mxu1 %v17959_v12  ;;  %v18016_v12 = vld [vmem:[%s24755_s3 + $0x3c4] ss:$28 sps:$4 sm:$0xff]  }
 0x54b   :  { %12463 = vmatpush1.bf16.msra.mxu1 %v17957_v38  ;;  %v18019_v38 = vld [vmem:[%s24755_s3 + $0xc] ss:$28 sps:$4 sm:$0xff]  }
 0x54c   :  { %12464 = vmatprep.subr.bf16.mxu1 %v17965_v23  ;;  %v18014_v23 = vld [vmem:[%s24755_s3 + $0x3c0] ss:$28 sps:$4 sm:$0xff]  }
 0x54f   :  { %12465 = vmatpush1.bf16.msra.mxu1 %v17963_v60  ;;  %v18017_v60 = vld [vmem:[%s24755_s3 + $0x8] ss:$28 sps:$4 sm:$0xff]  }
 0x550   :  { %12466 = vmatprep.subr.bf16.mxu1 %v17971_v2  ;;  %v18022_v2 = vld [vmem:[%s24755_s3 + $0x38c] ss:$28 sps:$4 sm:$0xff]  }
 0x553   :  { %12467 = vmatpush1.bf16.msra.mxu1 %v17969_v61  ;;  %v18025_v61 = vld [vmem:[%s24755_s3 + $0x354] ss:$28 sps:$4 sm:$0xff]  }
 0x554   :  { %12493 = vmatprep.subr.bf16.mxu1 %v17977_v0  ;;  %v18020_v0 = vld [vmem:[%s24755_s3 + $0x388] ss:$28 sps:$4 sm:$0xff]  }
 0x590   :  { %v12363_v49 = vpop.f32.mrf.mxu0 }
 0x591   :  { %v22887_v48 = vadd.f32 %v12363_v49, %v22801_v63  ;;  %v18023_v49 = vld [vmem:[%s24755_s3 + $0x350] ss:$28 sps:$4 sm:$0xff]  }
 0x592   :  { %v12365_v19 = vpop.f32.mrf.mxu0 }
 0x593   :  { %v22890_v18 = vadd.f32 %v12365_v19, %v22803_v58  ;;  %v18028_v19 = vld [vmem:[%s24755_s3 + $0x6d4] ss:$28 sps:$4 sm:$0xff]  }
 0x594   :  { %v12367_v1 = vpop.f32.mrf.mxu0 }
 0x595   :  { %v18031_v1 = vld [vmem:[%s24755_s3 + $0x31c] ss:$28 sps:$4 sm:$0xff]  }
 0x596   :  { %v12368_v50 = vpop.f32.mrf.mxu0 }
 0x597   :  { %v18026_v50 = vld [vmem:[%s24755_s3 + $0x6d0] ss:$28 sps:$4 sm:$0xff]  }
 0x5a6   :  { %v7712_v53 = vpop.permute.xlu1 %7711 }
 0x5a7   :  { %v7751_v52 = vmax.f32 %v7673_v22, %v7712_v53  ;;  %v7710_v11 = vpop.permute.xlu0 %7709  ;;  %v17996_v22 = vld [vmem:[%s24755_s3 + $0x468] ss:$28 sps:$4 sm:$0xff]  }
 0x5a8   :  { %v7724_v59 = vsel %vm7713_vm2, %v16219_v35, %v7710_v11  ;;  %v7725_v57 = vsel %vm7713_vm2, %v7710_v11, %v7712_v53  ;;  %v18007_v35 = vld [vmem:[%s24755_s3 + $0x7c] ss:$28 sps:$4 sm:$0xff]   ;;  %v18037_v11 = vld [vmem:[%s24755_s3 + $0x2e4] ss:$28 sps:$4 sm:$0xff]  }
 0x5a9   :  { %v22897_v63 = vpack.c.bf16 %v7751_v52, %v7751_v52  ;;  %v7749_v8 = vmax.f32 %v22711_v3, %v7724_v59  ;;  %v7750_v58 = vmax.f32 %v7672_v31, %v7725_v57  ;;  %v17981_v3 = vld [vmem:[%s24755_s3 + $0x158] ss:$28 sps:$4 sm:$0xff]   ;;  %v17999_v31 = vld [vmem:[%s24755_s3 + $0xb0] ss:$28 sps:$4 sm:$0xff]   ;;  %v18035_v57 = vld [vmem:[%s24755_s3 + $0x2e0] ss:$28 sps:$4 sm:$0xff]  }
 0x5aa   :  { %v18029_v53 = vld [vmem:[%s24755_s3 + $0x318] ss:$28 sps:$4 sm:$0xff]  }
 0x5ab   :  { %v22903_v27 = vpack.c.bf16 %v7749_v8, %v7749_v8  ;;  %v22905_v10 = vpack.c.bf16 %v7750_v58, %v7750_v58  ;;  %15778 = vmatmul.mubr.msk.bf16.vlgmr.msra.gmra.mxu1 %vm12202_vm4, %v22897_v63  ;;  %v18034_v52 = vld [vmem:[%s24755_s3 + $0x69c] ss:$28 sps:$4 sm:$0xff]   ;;  %v18043_v8 = vld [vmem:[%s24755_s3 + $0x2ac] ss:$28 sps:$4 sm:$0xff]  }
 0x5ac   :  { %12494 = vmatpush1.bf16.msra.mxu1 %v17975_v20  ;;  %12525 = vmatprep.mubr.bf16.mxu1 %v22062_v15  ;;  %v18032_v59 = vld [vmem:[%s24755_s3 + $0x698] ss:$28 sps:$4 sm:$0xff]   ;;  %v18040_v20 = vld [vmem:[%s24755_s3 + $0x664] ss:$28 sps:$4 sm:$0xff]  }
 0x5ad   :  { %12443 = vmatprep.mubr.bf16.mxu0 %v22905_v10  ;;  %12495 = vmatprep.subr.bf16.mxu1 %v17983_v21  ;;  %v18038_v58 = vld [vmem:[%s24755_s3 + $0x660] ss:$28 sps:$4 sm:$0xff]   ;;  %v18041_v21 = vld [vmem:[%s24755_s3 + $0x2a8] ss:$28 sps:$4 sm:$0xff]  }
 0x5ae   :  { %12444 = vmatmul.mubr.bf16.vlgmr.msra.gmra.mxu0 %v22903_v27 }
 0x5af   :  { %12535 = vmatpush1.bf16.msra.mxu0 %v17978_v51  ;;  %12566 = vmatprep.mubr.bf16.mxu0 %v22201_v40  ;;  %v18046_v51 = vld [vmem:[%s24755_s3 + $0x62c] ss:$28 sps:$4 sm:$0xff]  }
 0x5b0   :  { %12496 = vmatpush1.bf16.msra.mxu1 %v17981_v3  ;;  %12536 = vmatprep.subr.bf16.mxu0 %v17986_v41  ;;  %v18049_v3 = vld [vmem:[%s24755_s3 + $0x274] ss:$28 sps:$4 sm:$0xff]   ;;  %v18044_v41 = vld [vmem:[%s24755_s3 + $0x628] ss:$28 sps:$4 sm:$0xff]  }
 0x5b1   :  { %12497 = vmatprep.subr.bf16.mxu1 %v17989_v13  ;;  %v18047_v13 = vld [vmem:[%s24755_s3 + $0x270] ss:$28 sps:$4 sm:$0xff]  }
 0x5b3   :  { %12537 = vmatpush1.bf16.msra.mxu0 %v17984_v32  ;;  %v18052_v32 = vld [vmem:[%s24755_s3 + $0x5f4] ss:$28 sps:$4 sm:$0xff]  }
 0x5b4   :  { %12498 = vmatpush1.bf16.msra.mxu1 %v17987_v4  ;;  %12538 = vmatprep.subr.bf16.mxu0 %v17992_v6  ;;  %v18055_v4 = vld [vmem:[%s24755_s3 + $0x23c] ss:$28 sps:$4 sm:$0xff]   ;;  %v18050_v6 = vld [vmem:[%s24755_s3 + $0x5f0] ss:$28 sps:$4 sm:$0xff]  }
 0x5b5   :  { %12499 = vmatprep.subr.bf16.mxu1 %v17995_v36  ;;  %v18053_v36 = vld [vmem:[%s24755_s3 + $0x238] ss:$28 sps:$4 sm:$0xff]  }
 0x5b7   :  { %12539 = vmatpush1.bf16.msra.mxu0 %v17990_v7  ;;  %v18058_v7 = vld [vmem:[%s24755_s3 + $0x5bc] ss:$28 sps:$4 sm:$0xff]  }
 0x5b8   :  { %12500 = vmatpush1.bf16.msra.mxu1 %v17993_v44  ;;  %12540 = vmatprep.subr.bf16.mxu0 %v17998_v30  ;;  %v18061_v44 = vld [vmem:[%s24755_s3 + $0x204] ss:$28 sps:$4 sm:$0xff]   ;;  %v18056_v30 = vld [vmem:[%s24755_s3 + $0x5b8] ss:$28 sps:$4 sm:$0xff]  }
 0x5b9   :  { %12501 = vmatprep.subr.bf16.mxu1 %v18001_v16  ;;  %v18059_v16 = vld [vmem:[%s24755_s3 + $0x200] ss:$28 sps:$4 sm:$0xff]  }
 0x5bb   :  { %12541 = vmatpush1.bf16.msra.mxu0 %v17996_v22  ;;  %v18064_v22 = vld [vmem:[%s24755_s3 + $0x584] ss:$28 sps:$4 sm:$0xff]  }
 0x5bc   :  { %12502 = vmatpush1.bf16.msra.mxu1 %v17999_v31  ;;  %12542 = vmatprep.subr.bf16.mxu0 %v18004_v42  ;;  %v18067_v31 = vld [vmem:[%s24755_s3 + $0x1cc] ss:$28 sps:$4 sm:$0xff]   ;;  %v18062_v42 = vld [vmem:[%s24755_s3 + $0x580] ss:$28 sps:$4 sm:$0xff]  }
 0x5bd   :  { %12503 = vmatprep.subr.bf16.mxu1 %v18007_v35  ;;  %v18065_v35 = vld [vmem:[%s24755_s3 + $0x1c8] ss:$28 sps:$4 sm:$0xff]  }
 0x5bf   :  { %12543 = vmatpush1.bf16.msra.mxu0 %v18002_v26  ;;  %v18070_v26 = vld [vmem:[%s24755_s3 + $0x54c] ss:$28 sps:$4 sm:$0xff]  }
 0x5c0   :  { %12504 = vmatpush1.bf16.msra.mxu1 %v18005_v17  ;;  %12544 = vmatprep.subr.bf16.mxu0 %v18010_v55  ;;  %v18073_v17 = vld [vmem:[%s24755_s3 + $0x894] ss:$28 sps:$4 sm:$0xff]   ;;  %v18068_v55 = vld [vmem:[%s24755_s3 + $0x548] ss:$28 sps:$4 sm:$0xff]  }
 0x5c1   :  { %12505 = vmatprep.subr.bf16.mxu1 %v18013_v62  ;;  %v18071_v62 = vld [vmem:[%s24755_s3 + $0x890] ss:$28 sps:$4 sm:$0xff]  }
 0x5c3   :  { %12545 = vmatpush1.bf16.msra.mxu0 %v18008_v56  ;;  %v18076_v56 = vld [vmem:[%s24755_s3 + $0xc14] ss:$28 sps:$4 sm:$0xff]  }
 0x5c4   :  { %12506 = vmatpush1.bf16.msra.mxu1 %v18011_v47  ;;  %12546 = vmatprep.subr.bf16.mxu0 %v18016_v12  ;;  %v18079_v47 = vld [vmem:[%s24755_s3 + $0x85c] ss:$28 sps:$4 sm:$0xff]   ;;  %v18074_v12 = vld [vmem:[%s24755_s3 + $0xc10] ss:$28 sps:$4 sm:$0xff]  }
 0x5c5   :  { %12507 = vmatprep.subr.bf16.mxu1 %v18019_v38  ;;  %v18077_v38 = vld [vmem:[%s24755_s3 + $0x858] ss:$28 sps:$4 sm:$0xff]  }
 0x5c7   :  { %12547 = vmatpush1.bf16.msra.mxu0 %v18014_v23  ;;  %v18082_v23 = vld [vmem:[%s24755_s3 + $0xbdc] ss:$28 sps:$4 sm:$0xff]  }
 0x5c8   :  { %12508 = vmatpush1.bf16.msra.mxu1 %v18017_v60  ;;  %12548 = vmatprep.subr.bf16.mxu0 %v18022_v2  ;;  %v18085_v60 = vld [vmem:[%s24755_s3 + $0x824] ss:$28 sps:$4 sm:$0xff]   ;;  %v18080_v2 = vld [vmem:[%s24755_s3 + $0xbd8] ss:$28 sps:$4 sm:$0xff]  }
 0x5c9   :  { %12509 = vmatprep.subr.bf16.mxu1 %v18025_v61  ;;  %v18083_v61 = vld [vmem:[%s24755_s3 + $0x820] ss:$28 sps:$4 sm:$0xff]  }
 0x5cb   :  { %12549 = vmatpush1.bf16.msra.mxu0 %v18020_v0  ;;  %v18088_v0 = vld [vmem:[%s24755_s3 + $0xba4] ss:$28 sps:$4 sm:$0xff]  }
 0x5cc   :  { %12510 = vmatpush2.bf16.msra.mxu1 %v18023_v49  ;;  %12550 = vmatprep.subr.bf16.mxu0 %v18028_v19  ;;  %v18091_v49 = vld [vmem:[%s24755_s3 + $0x7ec] ss:$28 sps:$4 sm:$0xff]   ;;  %v18086_v19 = vld [vmem:[%s24755_s3 + $0xba0] ss:$28 sps:$4 sm:$0xff]  }
 0x5cd   :  { %12511 = vmatprep.subr.bf16.mxu1 %v18031_v1  ;;  %v18089_v1 = vld [vmem:[%s24755_s3 + $0x7e8] ss:$28 sps:$4 sm:$0xff]  }
 0x5cf   :  { %12551 = vmatpush2.bf16.msra.mxu0 %v18026_v50  ;;  %v18094_v50 = vld [vmem:[%s24755_s3 + $0xb6c] ss:$28 sps:$4 sm:$0xff]  }
 0x5d0   :  { %12512 = vmatpush2.bf16.msra.mxu1 %v18029_v53  ;;  %12552 = vmatprep.subr.bf16.mxu0 %v18034_v52  ;;  %v18097_v53 = vld [vmem:[%s24755_s3 + $0x7b4] ss:$28 sps:$4 sm:$0xff]   ;;  %v18092_v52 = vld [vmem:[%s24755_s3 + $0xb68] ss:$28 sps:$4 sm:$0xff]  }
 0x5d1   :  { %12513 = vmatprep.subr.bf16.mxu1 %v18037_v11  ;;  %v18095_v11 = vld [vmem:[%s24755_s3 + $0x7b0] ss:$28 sps:$4 sm:$0xff]  }
 0x5d3   :  { %12553 = vmatpush2.bf16.msra.mxu0 %v18032_v59  ;;  %v18100_v59 = vld [vmem:[%s24755_s3 + $0xb34] ss:$28 sps:$4 sm:$0xff]  }
 0x5d4   :  { %12514 = vmatpush2.bf16.msra.mxu1 %v18035_v57  ;;  %12554 = vmatprep.subr.bf16.mxu0 %v18040_v20  ;;  %v18103_v57 = vld [vmem:[%s24755_s3 + $0x77c] ss:$28 sps:$4 sm:$0xff]   ;;  %v18098_v20 = vld [vmem:[%s24755_s3 + $0xb30] ss:$28 sps:$4 sm:$0xff]  }
 0x5d5   :  { %12515 = vmatprep.subr.bf16.mxu1 %v18043_v8  ;;  %v18101_v8 = vld [vmem:[%s24755_s3 + $0x778] ss:$28 sps:$4 sm:$0xff]  }
 0x5d7   :  { %12555 = vmatpush2.bf16.msra.mxu0 %v18038_v58  ;;  %v18106_v58 = vld [vmem:[%s24755_s3 + $0xafc] ss:$28 sps:$4 sm:$0xff]  }
 0x5d8   :  { %12516 = vmatpush2.bf16.msra.mxu1 %v18041_v21  ;;  %12556 = vmatprep.subr.bf16.mxu0 %v18046_v51  ;;  %v18109_v21 = vld [vmem:[%s24755_s3 + $0x744] ss:$28 sps:$4 sm:$0xff]   ;;  %v18104_v51 = vld [vmem:[%s24755_s3 + $0xaf8] ss:$28 sps:$4 sm:$0xff]  }
 0x5d9   :  { %12517 = vmatprep.subr.bf16.mxu1 %v18049_v3  ;;  %v18107_v3 = vld [vmem:[%s24755_s3 + $0x740] ss:$28 sps:$4 sm:$0xff]  }
 0x5db   :  { %12557 = vmatpush2.bf16.msra.mxu0 %v18044_v41  ;;  %v18112_v41 = vld [vmem:[%s24755_s3 + $0xac4] ss:$28 sps:$4 sm:$0xff]  }
 0x5dc   :  { %12518 = vmatpush2.bf16.msra.mxu1 %v18047_v13  ;;  %12558 = vmatprep.subr.bf16.mxu0 %v18052_v32  ;;  %v18115_v13 = vld [vmem:[%s24755_s3 + $0x70c] ss:$28 sps:$4 sm:$0xff]   ;;  %v18110_v32 = vld [vmem:[%s24755_s3 + $0xac0] ss:$28 sps:$4 sm:$0xff]  }
 0x5dd   :  { %12519 = vmatprep.subr.bf16.mxu1 %v18055_v4  ;;  %v18113_v4 = vld [vmem:[%s24755_s3 + $0x708] ss:$28 sps:$4 sm:$0xff]  }
 0x5df   :  { %12559 = vmatpush2.bf16.msra.mxu0 %v18050_v6  ;;  %v18118_v6 = vld [vmem:[%s24755_s3 + $0xa8c] ss:$28 sps:$4 sm:$0xff]  }
 0x5e0   :  { %12520 = vmatpush2.bf16.msra.mxu1 %v18053_v36  ;;  %12560 = vmatprep.subr.bf16.mxu0 %v18058_v7  ;;  %v18121_v36 = vld [vmem:[%s24755_s3 + $0xa54] ss:$28 sps:$4 sm:$0xff]  }
 0x5e1   :  { %12521 = vmatprep.subr.bf16.mxu1 %v18061_v44  ;;  %v18116_v44 = vld [vmem:[%s24755_s3 + $0xa88] ss:$28 sps:$4 sm:$0xff]  }
 0x5e3   :  { %12561 = vmatpush2.bf16.msra.mxu0 %v18056_v30 }
 0x5e4   :  { %12522 = vmatpush2.bf16.msra.mxu1 %v18059_v16  ;;  %12562 = vmatprep.subr.bf16.mxu0 %v18064_v22  ;;  %v18119_v16 = vld [vmem:[%s24755_s3 + $0xa50] ss:$28 sps:$4 sm:$0xff]  }
 0x5e5   :  { %12523 = vmatprep.subr.bf16.mxu1 %v18067_v31  ;;  %v18124_v22 = vld [vmem:[%s24755_s3 + $0xdd4] ss:$28 sps:$4 sm:$0xff]  }
 0x5e7   :  { %12563 = vmatpush2.bf16.msra.mxu0 %v18062_v42  ;;  %v18127_v42 = vld [vmem:[%s24755_s3 + $0xa1c] ss:$28 sps:$4 sm:$0xff]  }
 0x5e8   :  { %12524 = vmatpush2.bf16.msra.mxu1 %v18065_v35  ;;  %12564 = vmatprep.subr.bf16.mxu0 %v18070_v26  ;;  %v18122_v26 = vld [vmem:[%s24755_s3 + $0xdd0] ss:$28 sps:$4 sm:$0xff]  }
 0x5e9   :  { %12575 = vmatprep.subr.bf16.mxu1 %v18073_v17  ;;  %v18125_v17 = vld [vmem:[%s24755_s3 + $0xa18] ss:$28 sps:$4 sm:$0xff]  }
 0x5eb   :  { %12526 = vmatmul.mubr.bf16.vlgmr.msra.gmra.mxu1 %v22263_v46  ;;  %12565 = vmatpush2.bf16.msra.mxu0 %v18068_v55  ;;  %v18130_v55 = vld [vmem:[%s24755_s3 + $0xd9c] ss:$28 sps:$4 sm:$0xff]  }
 0x5ec   :  { %12576 = vmatpush1.bf16.msra.mxu1 %v18071_v62  ;;  %12607 = vmatprep.mubr.bf16.mxu1 %v22346_v29 }
 0x5ed   :  { %12616 = vmatprep.subr.bf16.mxu0 %v18076_v56  ;;  %12577 = vmatprep.subr.bf16.mxu1 %v18079_v47  ;;  %v18128_v56 = vld [vmem:[%s24755_s3 + $0xd98] ss:$28 sps:$4 sm:$0xff]   ;;  %v18131_v47 = vld [vmem:[%s24755_s3 + $0x9e0] ss:$28 sps:$4 sm:$0xff]  }
 0x5ee   :  { %12567 = vmatmul.mubr.bf16.vlgmr.msra.gmra.mxu0 %v22425_v9 }
 0x5ef   :  { %12617 = vmatpush1.bf16.msra.mxu0 %v18074_v12  ;;  %12648 = vmatprep.mubr.bf16.mxu0 %v22726_v45  ;;  %v18136_v12 = vld [vmem:[%s24755_s3 + $0xd64] ss:$28 sps:$4 sm:$0xff]  }
 0x5f0   :  { %12578 = vmatpush1.bf16.msra.mxu1 %v18077_v38  ;;  %12618 = vmatprep.subr.bf16.mxu0 %v18082_v23  ;;  %v18139_v38 = vld [vmem:[%s24755_s3 + $0x9ac] ss:$28 sps:$4 sm:$0xff]   ;;  %v18134_v23 = vld [vmem:[%s24755_s3 + $0xd60] ss:$28 sps:$4 sm:$0xff]  }
 0x5f1   :  { %12579 = vmatprep.subr.bf16.mxu1 %v18085_v60  ;;  %v18137_v60 = vld [vmem:[%s24755_s3 + $0x9a8] ss:$28 sps:$4 sm:$0xff]  }
 0x5f3   :  { %12619 = vmatpush1.bf16.msra.mxu0 %v18080_v2  ;;  %v18142_v2 = vld [vmem:[%s24755_s3 + $0xd2c] ss:$28 sps:$4 sm:$0xff]  }
 0x5f4   :  { %12580 = vmatpush1.bf16.msra.mxu1 %v18083_v61  ;;  %12620 = vmatprep.subr.bf16.mxu0 %v18088_v0  ;;  %v18145_v61 = vld [vmem:[%s24755_s3 + $0x974] ss:$28 sps:$4 sm:$0xff]   ;;  %v18140_v0 = vld [vmem:[%s24755_s3 + $0xd28] ss:$28 sps:$4 sm:$0xff]  }
 0x5f5   :  { %12581 = vmatprep.subr.bf16.mxu1 %v18091_v49  ;;  %v18143_v49 = vld [vmem:[%s24755_s3 + $0x970] ss:$28 sps:$4 sm:$0xff]  }
 0x5f7   :  { %12621 = vmatpush1.bf16.msra.mxu0 %v18086_v19  ;;  %v18148_v19 = vld [vmem:[%s24755_s3 + $0xcf4] ss:$28 sps:$4 sm:$0xff]  }
 0x5f8   :  { %12582 = vmatpush1.bf16.msra.mxu1 %v18089_v1  ;;  %12622 = vmatprep.subr.bf16.mxu0 %v18094_v50  ;;  %v18151_v1 = vld [vmem:[%s24755_s3 + $0x93c] ss:$28 sps:$4 sm:$0xff]   ;;  %v18146_v50 = vld [vmem:[%s24755_s3 + $0xcf0] ss:$28 sps:$4 sm:$0xff]  }
 0x5f9   :  { %12583 = vmatprep.subr.bf16.mxu1 %v18097_v53  ;;  %v18149_v53 = vld [vmem:[%s24755_s3 + $0x938] ss:$28 sps:$4 sm:$0xff]  }
 0x5fb   :  { %12623 = vmatpush1.bf16.msra.mxu0 %v18092_v52  ;;  %v18154_v52 = vld [vmem:[%s24755_s3 + $0xcbc] ss:$28 sps:$4 sm:$0xff]  }
 0x5fc   :  { %12584 = vmatpush1.bf16.msra.mxu1 %v18095_v11  ;;  %12624 = vmatprep.subr.bf16.mxu0 %v18100_v59  ;;  %v18157_v11 = vld [vmem:[%s24755_s3 + $0x904] ss:$28 sps:$4 sm:$0xff]   ;;  %v18152_v59 = vld [vmem:[%s24755_s3 + $0xcb8] ss:$28 sps:$4 sm:$0xff]  }
 0x5fd   :  { %12585 = vmatprep.subr.bf16.mxu1 %v18103_v57  ;;  %v18155_v57 = vld [vmem:[%s24755_s3 + $0x900] ss:$28 sps:$4 sm:$0xff]  }
 0x5ff   :  { %12625 = vmatpush1.bf16.msra.mxu0 %v18098_v20  ;;  %v18160_v20 = vld [vmem:[%s24755_s3 + $0xc84] ss:$28 sps:$4 sm:$0xff]  }
 0x600   :  { %12586 = vmatpush1.bf16.msra.mxu1 %v18101_v8  ;;  %12626 = vmatprep.subr.bf16.mxu0 %v18106_v58  ;;  %v18163_v8 = vld [vmem:[%s24755_s3 + $0x8cc] ss:$28 sps:$4 sm:$0xff]   ;;  %v18158_v58 = vld [vmem:[%s24755_s3 + $0xc80] ss:$28 sps:$4 sm:$0xff]  }
 0x601   :  { %12587 = vmatprep.subr.bf16.mxu1 %v18109_v21  ;;  %v18161_v21 = vld [vmem:[%s24755_s3 + $0x8c8] ss:$28 sps:$4 sm:$0xff]  }
 0x603   :  { %12627 = vmatpush1.bf16.msra.mxu0 %v18104_v51  ;;  %v18166_v51 = vld [vmem:[%s24755_s3 + $0xc4c] ss:$28 sps:$4 sm:$0xff]  }
 0x604   :  { %12588 = vmatpush1.bf16.msra.mxu1 %v18107_v3  ;;  %12628 = vmatprep.subr.bf16.mxu0 %v18112_v41  ;;  %v18169_v3 = vld [vmem:[%s24755_s3 + $0xf94] ss:$28 sps:$4 sm:$0xff]   ;;  %v18164_v41 = vld [vmem:[%s24755_s3 + $0xc48] ss:$28 sps:$4 sm:$0xff]  }
 0x605   :  { %12589 = vmatprep.subr.bf16.mxu1 %v18115_v13  ;;  %v18167_v13 = vld [vmem:[%s24755_s3 + $0xf90] ss:$28 sps:$4 sm:$0xff]  }
 0x606   :  { %v12404_v7 = vpop.f32.mrf.mxu1 }
 0x607   :  { %12629 = vmatpush1.bf16.msra.mxu0 %v18110_v32  ;;  %v23197_v30 = vadd.f32 %v12404_v7, %v22887_v48  ;;  %v18172_v32 = vld [vmem:[%s24755_s3 + $0x1314] ss:$28 sps:$4 sm:$0xff]   ;;  %v18178_v7 = vld [vmem:[%s24755_s3 + $0x12dc] ss:$28 sps:$4 sm:$0xff]  }
 0x608   :  { %12590 = vmatpush1.bf16.msra.mxu1 %v18113_v4  ;;  %12630 = vmatprep.subr.bf16.mxu0 %v18118_v6  ;;  %v12406_v31 = vpop.f32.mrf.mxu1  ;;  %v18175_v4 = vld [vmem:[%s24755_s3 + $0xf5c] ss:$28 sps:$4 sm:$0xff]   ;;  %v18170_v6 = vld [vmem:[%s24755_s3 + $0x1310] ss:$28 sps:$4 sm:$0xff]  }
 0x609   :  { %12591 = vmatprep.subr.bf16.mxu1 %v18121_v36  ;;  %v23209_v35 = vadd.f32 %v12406_v31, %v22890_v18  ;;  %v18133_v18 = vld [vmem:[%s24755_s3 + $0x9e4] ss:$28 sps:$4 sm:$0xff]   ;;  %v18173_v36 = vld [vmem:[%s24755_s3 + $0xf58] ss:$28 sps:$4 sm:$0xff]  }
 0x60a   :  { %v12408_v48 = vpop.f32.mrf.mxu1  ;;  %v18184_v31 = vld [vmem:[%s24755_s3 + $0x12a4] ss:$28 sps:$4 sm:$0xff]  }
 0x60b   :  { %12631 = vmatpush1.bf16.msra.mxu0 %v18116_v44  ;;  %v18181_v44 = vld [vmem:[%s24755_s3 + $0xf24] ss:$28 sps:$4 sm:$0xff]  }
 0x60c   :  { %12592 = vmatpush2.bf16.msra.mxu1 %v18119_v16  ;;  %12632 = vmatprep.subr.bf16.mxu0 %v18124_v22  ;;  %v12409_v62 = vpop.f32.mrf.mxu1  ;;  %v18176_v16 = vld [vmem:[%s24755_s3 + $0x12d8] ss:$28 sps:$4 sm:$0xff]   ;;  %v18179_v22 = vld [vmem:[%s24755_s3 + $0xf20] ss:$28 sps:$4 sm:$0xff]  }
 0x60d   :  { %12593 = vmatprep.subr.bf16.mxu1 %v18127_v42  ;;  %v18187_v42 = vld [vmem:[%s24755_s3 + $0xeec] ss:$28 sps:$4 sm:$0xff]   ;;  %v18182_v48 = vld [vmem:[%s24755_s3 + $0x12a0] ss:$28 sps:$4 sm:$0xff]  }
 0x60e   :  { %v18188_v62 = vld [vmem:[%s24755_s3 + $0x1268] ss:$28 sps:$4 sm:$0xff]  }
 0x60f   :  { %12633 = vmatpush2.bf16.msra.mxu0 %v18122_v26  ;;  %v18185_v26 = vld [vmem:[%s24755_s3 + $0xee8] ss:$28 sps:$4 sm:$0xff]  }
 0x610   :  { %12594 = vmatpush2.bf16.msra.mxu1 %v18125_v17  ;;  %12634 = vmatprep.subr.bf16.mxu0 %v18130_v55  ;;  %v18190_v17 = vld [vmem:[%s24755_s3 + $0x126c] ss:$28 sps:$4 sm:$0xff]   ;;  %v18193_v55 = vld [vmem:[%s24755_s3 + $0xeb4] ss:$28 sps:$4 sm:$0xff]  }
 0x611   :  { %12595 = vmatprep.subr.bf16.mxu1 %v18133_v18  ;;  %v18191_v18 = vld [vmem:[%s24755_s3 + $0xeb0] ss:$28 sps:$4 sm:$0xff]  }
 0x613   :  { %12635 = vmatpush2.bf16.msra.mxu0 %v18128_v56  ;;  %v18196_v56 = vld [vmem:[%s24755_s3 + $0x1234] ss:$28 sps:$4 sm:$0xff]  }
 0x614   :  { %12596 = vmatpush2.bf16.msra.mxu1 %v18131_v47  ;;  %12636 = vmatprep.subr.bf16.mxu0 %v18136_v12  ;;  %v18199_v47 = vld [vmem:[%s24755_s3 + $0xe7c] ss:$28 sps:$4 sm:$0xff]   ;;  %v18194_v12 = vld [vmem:[%s24755_s3 + $0x1230] ss:$28 sps:$4 sm:$0xff]  }
 0x615   :  { %12597 = vmatprep.subr.bf16.mxu1 %v18139_v38  ;;  %v18197_v38 = vld [vmem:[%s24755_s3 + $0xe78] ss:$28 sps:$4 sm:$0xff]  }
 0x617   :  { %12637 = vmatpush2.bf16.msra.mxu0 %v18134_v23  ;;  %v18202_v23 = vld [vmem:[%s24755_s3 + $0x11fc] ss:$28 sps:$4 sm:$0xff]  }
 0x618   :  { %12598 = vmatpush2.bf16.msra.mxu1 %v18137_v60  ;;  %12638 = vmatprep.subr.bf16.mxu0 %v18142_v2  ;;  %v18205_v60 = vld [vmem:[%s24755_s3 + $0xe44] ss:$28 sps:$4 sm:$0xff]   ;;  %v18200_v2 = vld [vmem:[%s24755_s3 + $0x11f8] ss:$28 sps:$4 sm:$0xff]  }
 0x619   :  { %12599 = vmatprep.subr.bf16.mxu1 %v18145_v61  ;;  %v18203_v61 = vld [vmem:[%s24755_s3 + $0xe40] ss:$28 sps:$4 sm:$0xff]  }
 0x61b   :  { %12639 = vmatpush2.bf16.msra.mxu0 %v18140_v0  ;;  %v18208_v0 = vld [vmem:[%s24755_s3 + $0x11c4] ss:$28 sps:$4 sm:$0xff]  }
 0x61c   :  { %12600 = vmatpush2.bf16.msra.mxu1 %v18143_v49  ;;  %12640 = vmatprep.subr.bf16.mxu0 %v18148_v19  ;;  %v18211_v49 = vld [vmem:[%s24755_s3 + $0xe0c] ss:$28 sps:$4 sm:$0xff]   ;;  %v18206_v19 = vld [vmem:[%s24755_s3 + $0x11c0] ss:$28 sps:$4 sm:$0xff]  }
 0x61d   :  { %12601 = vmatprep.subr.bf16.mxu1 %v18151_v1  ;;  %v18209_v1 = vld [vmem:[%s24755_s3 + $0xe08] ss:$28 sps:$4 sm:$0xff]  }
 0x61f   :  { %12641 = vmatpush2.bf16.msra.mxu0 %v18146_v50  ;;  %v18214_v50 = vld [vmem:[%s24755_s3 + $0x118c] ss:$28 sps:$4 sm:$0xff]  }
 0x620   :  { %12602 = vmatpush2.bf16.msra.mxu1 %v18149_v53  ;;  %12642 = vmatprep.subr.bf16.mxu0 %v18154_v52  ;;  %v18217_v53 = vld [vmem:[%s24755_s3 + $0x1154] ss:$28 sps:$4 sm:$0xff]   ;;  %v18212_v52 = vld [vmem:[%s24755_s3 + $0x1188] ss:$28 sps:$4 sm:$0xff]  }
 0x621   :  { %12603 = vmatprep.subr.bf16.mxu1 %v18157_v11  ;;  %v18215_v11 = vld [vmem:[%s24755_s3 + $0x1150] ss:$28 sps:$4 sm:$0xff]  }
 0x623   :  { %12643 = vmatpush2.bf16.msra.mxu0 %v18152_v59  ;;  %v18220_v59 = vld [vmem:[%s24755_s3 + $0x14d4] ss:$28 sps:$4 sm:$0xff]  }
 0x624   :  { %12604 = vmatpush2.bf16.msra.mxu1 %v18155_v57  ;;  %12644 = vmatprep.subr.bf16.mxu0 %v18160_v20  ;;  %v18223_v57 = vld [vmem:[%s24755_s3 + $0x111c] ss:$28 sps:$4 sm:$0xff]   ;;  %v18218_v20 = vld [vmem:[%s24755_s3 + $0x14d0] ss:$28 sps:$4 sm:$0xff]  }
 0x625   :  { %12605 = vmatprep.subr.bf16.mxu1 %v18163_v8  ;;  %v18221_v8 = vld [vmem:[%s24755_s3 + $0x1118] ss:$28 sps:$4 sm:$0xff]  }
 0x627   :  { %12645 = vmatpush2.bf16.msra.mxu0 %v18158_v58  ;;  %v18226_v58 = vld [vmem:[%s24755_s3 + $0x149c] ss:$28 sps:$4 sm:$0xff]  }
 0x628   :  { %12606 = vmatpush2.bf16.msra.mxu1 %v18161_v21  ;;  %12646 = vmatprep.subr.bf16.mxu0 %v18166_v51  ;;  %v18229_v21 = vld [vmem:[%s24755_s3 + $0x10e4] ss:$28 sps:$4 sm:$0xff]   ;;  %v18224_v51 = vld [vmem:[%s24755_s3 + $0x1498] ss:$28 sps:$4 sm:$0xff]  }
 0x629   :  { %12657 = vmatprep.subr.bf16.mxu1 %v18169_v3  ;;  %v18227_v3 = vld [vmem:[%s24755_s3 + $0x10e0] ss:$28 sps:$4 sm:$0xff]  }
 0x62b   :  { %12608 = vmatmul.mubr.bf16.vlgmr.msra.gmra.mxu1 %v22497_v5  ;;  %12647 = vmatpush2.bf16.msra.mxu0 %v18164_v41  ;;  %v18232_v41 = vld [vmem:[%s24755_s3 + $0x1464] ss:$28 sps:$4 sm:$0xff]  }
 0x62c   :  { %12658 = vmatpush1.bf16.msra.mxu1 %v18167_v13  ;;  %12689 = vmatprep.mubr.bf16.mxu1 %v22855_v34  ;;  %v18235_v13 = vld [vmem:[%s24755_s3 + $0x10ac] ss:$28 sps:$4 sm:$0xff]  }
 0x62d   :  { %12698 = vmatprep.subr.bf16.mxu0 %v18172_v32  ;;  %12659 = vmatprep.subr.bf16.mxu1 %v18175_v4  ;;  %v18230_v32 = vld [vmem:[%s24755_s3 + $0x1460] ss:$28 sps:$4 sm:$0xff]   ;;  %v18233_v4 = vld [vmem:[%s24755_s3 + $0x10a8] ss:$28 sps:$4 sm:$0xff]  }
 0x62e   :  { %12649 = vmatmul.mubr.bf16.vlgmr.msra.gmra.mxu0 %v22728_v33 }
 0x62f   :  { %12699 = vmatpush1.bf16.msra.mxu0 %v18170_v6  ;;  %12730 = vmatprep.mubr.bf16.mxu0 %v22905_v10  ;;  %v18238_v6 = vld [vmem:[%s24755_s3 + $0x142c] ss:$28 sps:$4 sm:$0xff]  }
 0x630   :  { %12660 = vmatpush1.bf16.msra.mxu1 %v18173_v36  ;;  %12700 = vmatprep.subr.bf16.mxu0 %v18178_v7  ;;  %v18241_v36 = vld [vmem:[%s24755_s3 + $0x1074] ss:$28 sps:$4 sm:$0xff]   ;;  %v18236_v7 = vld [vmem:[%s24755_s3 + $0x1428] ss:$28 sps:$4 sm:$0xff]  }
 0x631   :  { %12661 = vmatprep.subr.bf16.mxu1 %v18181_v44  ;;  %v18239_v44 = vld [vmem:[%s24755_s3 + $0x1070] ss:$28 sps:$4 sm:$0xff]  }
 0x633   :  { %12701 = vmatpush1.bf16.msra.mxu0 %v18176_v16  ;;  %v18244_v16 = vld [vmem:[%s24755_s3 + $0x13f4] ss:$28 sps:$4 sm:$0xff]  }
 0x634   :  { %12662 = vmatpush1.bf16.msra.mxu1 %v18179_v22  ;;  %12702 = vmatprep.subr.bf16.mxu0 %v18184_v31  ;;  %v18247_v22 = vld [vmem:[%s24755_s3 + $0x103c] ss:$28 sps:$4 sm:$0xff]   ;;  %v18242_v31 = vld [vmem:[%s24755_s3 + $0x13f0] ss:$28 sps:$4 sm:$0xff]  }
 0x635   :  { %12663 = vmatprep.subr.bf16.mxu1 %v18187_v42  ;;  %v18245_v42 = vld [vmem:[%s24755_s3 + $0x1038] ss:$28 sps:$4 sm:$0xff]  }
 0x637   :  { %12703 = vmatpush1.bf16.msra.mxu0 %v18182_v48  ;;  %v18250_v48 = vld [vmem:[%s24755_s3 + $0x13bc] ss:$28 sps:$4 sm:$0xff]  }
 0x638   :  { %12664 = vmatpush1.bf16.msra.mxu1 %v18185_v26  ;;  %12704 = vmatprep.subr.bf16.mxu0 %v18190_v17  ;;  %v18253_v26 = vld [vmem:[%s24755_s3 + $0x1004] ss:$28 sps:$4 sm:$0xff]   ;;  %v18248_v17 = vld [vmem:[%s24755_s3 + $0x13b8] ss:$28 sps:$4 sm:$0xff]  }
 0x639   :  { %12665 = vmatprep.subr.bf16.mxu1 %v18193_v55  ;;  %v18251_v55 = vld [vmem:[%s24755_s3 + $0x1000] ss:$28 sps:$4 sm:$0xff]  }
 0x63b   :  { %12705 = vmatpush1.bf16.msra.mxu0 %v18188_v62  ;;  %v18256_v62 = vld [vmem:[%s24755_s3 + $0x1384] ss:$28 sps:$4 sm:$0xff]  }
 0x63c   :  { %12666 = vmatpush1.bf16.msra.mxu1 %v18191_v18  ;;  %12706 = vmatprep.subr.bf16.mxu0 %v18196_v56  ;;  %v18259_v18 = vld [vmem:[%s24755_s3 + $0xfcc] ss:$28 sps:$4 sm:$0xff]   ;;  %v18254_v56 = vld [vmem:[%s24755_s3 + $0x1380] ss:$28 sps:$4 sm:$0xff]  }
 0x63d   :  { %12667 = vmatprep.subr.bf16.mxu1 %v18199_v47  ;;  %v18257_v47 = vld [vmem:[%s24755_s3 + $0xfc8] ss:$28 sps:$4 sm:$0xff]  }
 0x63f   :  { %12707 = vmatpush1.bf16.msra.mxu0 %v18194_v12  ;;  %v18262_v12 = vld [vmem:[%s24755_s3 + $0x134c] ss:$28 sps:$4 sm:$0xff]  }
 0x640   :  { %12668 = vmatpush1.bf16.msra.mxu1 %v18197_v38  ;;  %12708 = vmatprep.subr.bf16.mxu0 %v18202_v23  ;;  %v18265_v38 = vld [vmem:[%s24755_s3 + $0x15b4] ss:$28 sps:$4 sm:$0xff]   ;;  %v18260_v23 = vld [vmem:[%s24755_s3 + $0x1348] ss:$28 sps:$4 sm:$0xff]  }
 0x641   :  { %12669 = vmatprep.subr.bf16.mxu1 %v18205_v60  ;;  %v18263_v60 = vld [vmem:[%s24755_s3 + $0x15b0] ss:$28 sps:$4 sm:$0xff]  }
 0x643   :  { %12709 = vmatpush1.bf16.msra.mxu0 %v18200_v2  ;;  %v18268_v2 = vld [vmem:[%s24755_s3 + $0x51c] ss:$28 sps:$4 sm:$0xff]  }
 0x644   :  { %12670 = vmatpush1.bf16.msra.mxu1 %v18203_v61  ;;  %12710 = vmatprep.subr.bf16.mxu0 %v18208_v0  ;;  %v18271_v61 = vld [vmem:[%s24755_s3 + $0x157c] ss:$28 sps:$4 sm:$0xff]  }
 0x645   :  { %12671 = vmatprep.subr.bf16.mxu1 %v18211_v49  ;;  %v18266_v49 = vld [vmem:[%s24755_s3 + $0x518] ss:$28 sps:$4 sm:$0xff]  }
 0x647   :  { %12711 = vmatpush1.bf16.msra.mxu0 %v18206_v19  ;;  %v18269_v19 = vld [vmem:[%s24755_s3 + $0x1578] ss:$28 sps:$4 sm:$0xff]  }
 0x648   :  { %12672 = vmatpush1.bf16.msra.mxu1 %v18209_v1  ;;  %12712 = vmatprep.subr.bf16.mxu0 %v18214_v50  ;;  %v18274_v1 = vld [vmem:[%s24755_s3 + $0x4e4] ss:$28 sps:$4 sm:$0xff]  }
 0x649   :  { %12673 = vmatprep.subr.bf16.mxu1 %v18217_v53  ;;  %v18277_v53 = vld [vmem:[%s24755_s3 + $0x1544] ss:$28 sps:$4 sm:$0xff]  }
 0x64b   :  { %12713 = vmatpush1.bf16.msra.mxu0 %v18212_v52 }
 0x64c   :  { %12674 = vmatpush2.bf16.msra.mxu1 %v18215_v11  ;;  %12714 = vmatprep.subr.bf16.mxu0 %v18220_v59 }
 0x64d   :  { %12675 = vmatprep.subr.bf16.mxu1 %v18223_v57  ;;  %v18272_v57 = vld [vmem:[%s24755_s3 + $0x4e0] ss:$28 sps:$4 sm:$0xff]  }
 0x64f   :  { %12715 = vmatpush2.bf16.msra.mxu0 %v18218_v20 }
 0x650   :  { %12676 = vmatpush2.bf16.msra.mxu1 %v18221_v8  ;;  %12716 = vmatprep.subr.bf16.mxu0 %v18226_v58  ;;  %v18275_v8 = vld [vmem:[%s24755_s3 + $0x1540] ss:$28 sps:$4 sm:$0xff]   ;;  %v18280_v58 = vld [vmem:[%s24755_s3 + $0x4ac] ss:$28 sps:$4 sm:$0xff]  }
 0x651   :  { %12677 = vmatprep.subr.bf16.mxu1 %v18229_v21 }
 0x653   :  { %12717 = vmatpush2.bf16.msra.mxu0 %v18224_v51 }
 0x654   :  { %12678 = vmatpush2.bf16.msra.mxu1 %v18227_v3  ;;  %12718 = vmatprep.subr.bf16.mxu0 %v18232_v41  ;;  %v18283_v3 = vld [vmem:[%s24755_s3 + $0x150c] ss:$28 sps:$4 sm:$0xff]  }
 0x655   :  { %12679 = vmatprep.subr.bf16.mxu1 %v18235_v13 }
 0x657   :  { %12719 = vmatpush2.bf16.msra.mxu0 %v18230_v32 }
 0x658   :  { %12680 = vmatpush2.bf16.msra.mxu1 %v18233_v4  ;;  %12720 = vmatprep.subr.bf16.mxu0 %v18238_v6  ;;  %v18278_v4 = vld [vmem:[%s24755_s3 + $0x4a8] ss:$28 sps:$4 sm:$0xff]  }
 0x659   :  { %12681 = vmatprep.subr.bf16.mxu1 %v18241_v36  ;;  %v18286_v36 = vld [vmem:[%s24755_s3 + $0x474] ss:$28 sps:$4 sm:$0xff]  }
 0x65b   :  { %12721 = vmatpush2.bf16.msra.mxu0 %v18236_v7 }
 0x65c   :  { %12682 = vmatpush2.bf16.msra.mxu1 %v18239_v44  ;;  %12722 = vmatprep.subr.bf16.mxu0 %v18244_v16  ;;  %v18289_v44 = vld [vmem:[%s24755_s3 + $0x19c] ss:$28 sps:$4 sm:$0xff]   ;;  %v18284_v16 = vld [vmem:[%s24755_s3 + $0x470] ss:$28 sps:$4 sm:$0xff]  }
 0x65d   :  { %12683 = vmatprep.subr.bf16.mxu1 %v18247_v22  ;;  %v18287_v22 = vld [vmem:[%s24755_s3 + $0x198] ss:$28 sps:$4 sm:$0xff]  }
 0x65f   :  { %12723 = vmatpush2.bf16.msra.mxu0 %v18242_v31  ;;  %v18292_v31 = vld [vmem:[%s24755_s3 + $0x43c] ss:$28 sps:$4 sm:$0xff]  }
 0x660   :  { %12684 = vmatpush2.bf16.msra.mxu1 %v18245_v42  ;;  %12724 = vmatprep.subr.bf16.mxu0 %v18250_v48  ;;  %v18295_v42 = vld [vmem:[%s24755_s3 + $0x164] ss:$28 sps:$4 sm:$0xff]   ;;  %v18290_v48 = vld [vmem:[%s24755_s3 + $0x438] ss:$28 sps:$4 sm:$0xff]  }
 0x661   :  { %12685 = vmatprep.subr.bf16.mxu1 %v18253_v26  ;;  %v18293_v26 = vld [vmem:[%s24755_s3 + $0x160] ss:$28 sps:$4 sm:$0xff]  }
 0x663   :  { %12725 = vmatpush2.bf16.msra.mxu0 %v18248_v17  ;;  %v18298_v17 = vld [vmem:[%s24755_s3 + $0x404] ss:$28 sps:$4 sm:$0xff]  }
 0x664   :  { %12686 = vmatpush2.bf16.msra.mxu1 %v18251_v55  ;;  %12726 = vmatprep.subr.bf16.mxu0 %v18256_v62  ;;  %v18301_v55 = vld [vmem:[%s24755_s3 + $0x12c] ss:$28 sps:$4 sm:$0xff]   ;;  %v18296_v62 = vld [vmem:[%s24755_s3 + $0x400] ss:$28 sps:$4 sm:$0xff]  }
 0x665   :  { %12687 = vmatprep.subr.bf16.mxu1 %v18259_v18  ;;  %v18299_v18 = vld [vmem:[%s24755_s3 + $0x128] ss:$28 sps:$4 sm:$0xff]  }
 0x667   :  { %12727 = vmatpush2.bf16.msra.mxu0 %v18254_v56  ;;  %v18304_v56 = vld [vmem:[%s24755_s3 + $0x3cc] ss:$28 sps:$4 sm:$0xff]  }
 0x668   :  { %12688 = vmatpush2.bf16.msra.mxu1 %v18257_v47  ;;  %12728 = vmatprep.subr.bf16.mxu0 %v18262_v12  ;;  %v18307_v47 = vld [vmem:[%s24755_s3 + $0xf4] ss:$28 sps:$4 sm:$0xff]   ;;  %v18302_v12 = vld [vmem:[%s24755_s3 + $0x3c8] ss:$28 sps:$4 sm:$0xff]  }
 0x669   :  { %12747 = vmatprep.subr.bf16.mxu1 %v18265_v38  ;;  %v18305_v38 = vld [vmem:[%s24755_s3 + $0xf0] ss:$28 sps:$4 sm:$0xff]  }
 0x66b   :  { %12690 = vmatmul.mubr.bf16.vlgmr.msra.gmra.mxu1 %v22857_v14  ;;  %12729 = vmatpush2.bf16.msra.mxu0 %v18260_v23  ;;  %v12486_v0 = vpop.f32.mrf.mxu1  ;;  %v18310_v23 = vld [vmem:[%s24755_s3 + $0x394] ss:$28 sps:$4 sm:$0xff]  }
 0x66c   :  { %12748 = vmatpush1.bf16.msra.mxu1 %v18263_v60  ;;  %12821 = vmatprep.subr.bf16.mxu0 %v18268_v2  ;;  %v18313_v60 = vld [vmem:[%s24755_s3 + $0xbc] ss:$28 sps:$4 sm:$0xff]   ;;  %v18308_v2 = vld [vmem:[%s24755_s3 + $0x390] ss:$28 sps:$4 sm:$0xff]  }
 0x66d   :  { %v12488_v50 = vpop.f32.mrf.mxu1  ;;  %12749 = vmatprep.subr.bf16.mxu1 %v18271_v61  ;;  %12771 = vmatprep.mubr.bf16.mxu1 %v18741_v54  ;;  %v18311_v61 = vld [vmem:[%s24755_s3 + $0xb8] ss:$28 sps:$4 sm:$0xff]  }
 0x66e   :  { %12731 = vmatmul.mubr.bf16.vlgmr.msra.gmra.mxu0 %v22903_v27  ;;  %v12445_v52 = vpop.f32.mrf.mxu0 }
 0x66f   :  { %v12446_v11 = vadd.f32 %v12445_v52, %v23197_v30  ;;  %12822 = vmatpush1.bf16.msra.mxu0 %v18266_v49  ;;  %12853 = vmatprep.mubr.bf16.mxu0 %v22201_v40  ;;  %v12490_v59 = vpop.f32.mrf.mxu1  ;;  %v18319_v49 = vld [vmem:[%s24755_s3 + $0x84] ss:$28 sps:$4 sm:$0xff]  }
 0x670   :  { %12750 = vmatpush1.bf16.msra.mxu1 %v18269_v19  ;;  %v12447_v20 = vpop.f32.mrf.mxu0  ;;  %12823 = vmatprep.subr.bf16.mxu0 %v18274_v1  ;;  %v18314_v19 = vld [vmem:[%s24755_s3 + $0x6d8] ss:$28 sps:$4 sm:$0xff]   ;;  %v18317_v1 = vld [vmem:[%s24755_s3 + $0x80] ss:$28 sps:$4 sm:$0xff]   ;;  %v18328_v59 = vld [vmem:[%s24755_s3 + $0x66c] ss:$28 sps:$4 sm:$0xff]  }
 0x671   :  { %v12487_v30 = vadd.f32 %v12486_v0, %v12446_v11  ;;  %v12448_v21 = vadd.f32 %v12447_v20, %v23209_v35  ;;  %v12491_v51 = vpop.f32.mrf.mxu1  ;;  %12751 = vmatprep.subr.bf16.mxu1 %v18277_v53  ;;  %v18281_v35 = vld [vmem:[%s24755_s3 + $0x1508] ss:$28 sps:$4 sm:$0xff]   ;;  %v18316_v0 = vld [vmem:[%s24755_s3 + $0x6dc] ss:$28 sps:$4 sm:$0xff]  }
 0x672   :  { %v12449_v41 = vpop.f32.mrf.mxu0  ;;  %v18325_v53 = vld [vmem:[%s24755_s3 + $0x4c] ss:$28 sps:$4 sm:$0xff]   ;;  %v18320_v52 = vld [vmem:[%s24755_s3 + $0x6a0] ss:$28 sps:$4 sm:$0xff]   ;;  %v18335_v51 = vld [vmem:[%s24755_s3 + $0x358] ss:$28 sps:$4 sm:$0xff]  }
 0x673   :  { %v13347_v13 = vmax.f32 %v12487_v30, 0.0  ;;  %v12489_v32 = vadd.f32 %v12488_v50, %v12448_v21  ;;  %12824 = vmatpush1.bf16.msra.mxu0 %v18272_v57  ;;  %v18322_v50 = vld [vmem:[%s24755_s3 + $0x6a4] ss:$28 sps:$4 sm:$0xff]   ;;  %v18331_v57 = vld [vmem:[%s24755_s3 + $0x14] ss:$28 sps:$4 sm:$0xff]  }
 0x674   :  { %12752 = vmatpush1.bf16.msra.mxu1 %v18275_v8  ;;  %v12450_v6 = vpop.f32.mrf.mxu0  ;;  %12825 = vmatprep.subr.bf16.mxu0 %v18280_v58  ;;  %v18323_v11 = vld [vmem:[%s24755_s3 + $0x48] ss:$28 sps:$4 sm:$0xff]   ;;  %v18329_v8 = vld [vmem:[%s24755_s3 + $0x10] ss:$28 sps:$4 sm:$0xff]   ;;  %v18337_v30 = vld [vmem:[%s24755_s3 + $0x35c] ss:$28 sps:$4 sm:$0xff]  }
 0x675   :  { %13354 = vst [vmem:[#allocation3] sm:$0xff] %v13347_v13  ;;  %v13348_v7 = vmax.f32 %v12489_v32, 0.0  ;;  %12753 = vmatprep.subr.bf16.mxu1 %v18283_v3  ;;  %v18326_v20 = vld [vmem:[%s24755_s3 + $0x668] ss:$28 sps:$4 sm:$0xff]   ;;  %v18334_v58 = vld [vmem:[%s24755_s3 + $0x634] ss:$28 sps:$4 sm:$0xff]  }
 0x676   :  { %v18332_v21 = vld [vmem:[%s24755_s3 + $0x630] ss:$28 sps:$4 sm:$0xff]   ;;  %v18340_v3 = vld [vmem:[%s24755_s3 + $0x5fc] ss:$28 sps:$4 sm:$0xff]   ;;  %v18343_v41 = vld [vmem:[%s24755_s3 + $0x324] ss:$28 sps:$4 sm:$0xff]  }
 0x677   :  { %13355 = vst [vmem:[#allocation3 + $0x8] sm:$0xff] %v13348_v7  ;;  %12826 = vmatpush1.bf16.msra.mxu0 %v18278_v4  ;;  %v18338_v13 = vld [vmem:[%s24755_s3 + $0x5f8] ss:$28 sps:$4 sm:$0xff]   ;;  %v18341_v32 = vld [vmem:[%s24755_s3 + $0x320] ss:$28 sps:$4 sm:$0xff]  }
 0x678   :  { %12754 = vmatpush1.bf16.msra.mxu1 %v18281_v35  ;;  %12827 = vmatprep.subr.bf16.mxu0 %v18286_v36  ;;  %v18346_v4 = vld [vmem:[%s24755_s3 + $0x5c4] ss:$28 sps:$4 sm:$0xff]   ;;  %v18349_v6 = vld [vmem:[%s24755_s3 + $0x2ec] ss:$28 sps:$4 sm:$0xff]  }
 0x679   :  { %12780 = vmatprep.subr.bf16.mxu1 %v18289_v44  ;;  %v18344_v35 = vld [vmem:[%s24755_s3 + $0x5c0] ss:$28 sps:$4 sm:$0xff]   ;;  %v18347_v36 = vld [vmem:[%s24755_s3 + $0x2e8] ss:$28 sps:$4 sm:$0xff]   ;;  %v18355_v44 = vld [vmem:[%s24755_s3 + $0x2b4] ss:$28 sps:$4 sm:$0xff]  }
 0x67a   :  { %v18352_v7 = vld [vmem:[%s24755_s3 + $0x58c] ss:$28 sps:$4 sm:$0xff]  }
 0x67b   :  { %15779 = vmatmul.mubr.msk.bf16.vlgmr.msra.gmra.mxu1 %vm12202_vm4, %v22897_v63  ;;  %12828 = vmatpush1.bf16.msra.mxu0 %v18284_v16  ;;  %v18350_v16 = vld [vmem:[%s24755_s3 + $0x588] ss:$28 sps:$4 sm:$0xff]  }
 0x67c   :  { %12781 = vmatpush1.bf16.msra.mxu1 %v18287_v22  ;;  %12812 = vmatprep.mubr.bf16.mxu1 %v22062_v15  ;;  %v18353_v22 = vld [vmem:[%s24755_s3 + $0x2b0] ss:$28 sps:$4 sm:$0xff]  }
 0x67d   :  { %12829 = vmatprep.subr.bf16.mxu0 %v18292_v31  ;;  %12782 = vmatprep.subr.bf16.mxu1 %v18295_v42  ;;  %v18358_v31 = vld [vmem:[%s24755_s3 + $0x554] ss:$28 sps:$4 sm:$0xff]   ;;  %v18361_v42 = vld [vmem:[%s24755_s3 + $0x27c] ss:$28 sps:$4 sm:$0xff]  }
 0x67f   :  { %12830 = vmatpush1.bf16.msra.mxu0 %v18290_v48  ;;  %v18356_v48 = vld [vmem:[%s24755_s3 + $0x550] ss:$28 sps:$4 sm:$0xff]  }
 0x680   :  { %12783 = vmatpush1.bf16.msra.mxu1 %v18293_v26  ;;  %12831 = vmatprep.subr.bf16.mxu0 %v18298_v17  ;;  %v23698_v26 = vld [vmem:[%s24756_s4] sm:$0x7f] }
 0x681   :  { %12784 = vmatprep.subr.bf16.mxu1 %v18301_v55  ;;  %v8578_v17 = vrot.slane %v23698_v26, %v20382_v24  ;;  %v18359_v55 = vld [vmem:[%s24755_s3 + $0x278] ss:$28 sps:$4 sm:$0xff]  }
 0x682   :  { %v18362_v24 = vld [vmem:[%s24755_s3 + $0xc18] ss:$28 sps:$4 sm:$0xff]  }
 0x683   :  { %12832 = vmatpush1.bf16.msra.mxu0 %v18296_v62  ;;  %v18364_v62 = vld [vmem:[%s24755_s3 + $0xc1c] ss:$28 sps:$4 sm:$0xff]  }
 0x684   :  { %12785 = vmatpush1.bf16.msra.mxu1 %v18299_v18  ;;  %12833 = vmatprep.subr.bf16.mxu0 %v18304_v56  ;;  %v18367_v18 = vld [vmem:[%s24755_s3 + $0x244] ss:$28 sps:$4 sm:$0xff]   ;;  %v8582_v56 = vrot.slane %v23698_v26, %v20385_v25  ;;  %v18373_v25 = vld [vmem:[%s24755_s3 + $0x20c] ss:$28 sps:$4 sm:$0xff]  }
 0x685   :  { %12786 = vmatprep.subr.bf16.mxu1 %v18307_v47 }
 0x687   :  { %12834 = vmatpush1.bf16.msra.mxu0 %v18302_v12 }
 0x688   :  { %12787 = vmatpush1.bf16.msra.mxu1 %v18305_v38  ;;  %12835 = vmatprep.subr.bf16.mxu0 %v18310_v23  ;;  %v18365_v38 = vld [vmem:[%s24755_s3 + $0x240] ss:$28 sps:$4 sm:$0xff]  }
 0x689   :  { %12788 = vmatprep.subr.bf16.mxu1 %v18313_v60  ;;  %v18370_v23 = vld [vmem:[%s24755_s3 + $0xbe4] ss:$28 sps:$4 sm:$0xff]  }
 0x68b   :  { %12836 = vmatpush1.bf16.msra.mxu0 %v18308_v2 }
 0x68c   :  { %12789 = vmatpush1.bf16.msra.mxu1 %v18311_v61  ;;  %12837 = vmatprep.subr.bf16.mxu0 %v18316_v0 }
 0x68d   :  { %12790 = vmatprep.subr.bf16.mxu1 %v18319_v49 }
 0x68f   :  { %12838 = vmatpush2.bf16.msra.mxu0 %v18314_v19  ;;  %v18368_v19 = vld [vmem:[%s24755_s3 + $0xbe0] ss:$28 sps:$4 sm:$0xff]  }
 0x690   :  { %12791 = vmatpush1.bf16.msra.mxu1 %v18317_v1  ;;  %12839 = vmatprep.subr.bf16.mxu0 %v18322_v50  ;;  %v18371_v50 = vld [vmem:[%s24755_s3 + $0x208] ss:$28 sps:$4 sm:$0xff]  }
 0x691   :  { %12792 = vmatprep.subr.bf16.mxu1 %v18325_v53  ;;  %v18376_v53 = vld [vmem:[%s24755_s3 + $0xbac] ss:$28 sps:$4 sm:$0xff]  }
 0x693   :  { %12840 = vmatpush2.bf16.msra.mxu0 %v18320_v52 }
 0x694   :  { %12793 = vmatpush1.bf16.msra.mxu1 %v18323_v11  ;;  %12841 = vmatprep.subr.bf16.mxu0 %v18328_v59  ;;  %v18379_v59 = vld [vmem:[%s24755_s3 + $0x1d4] ss:$28 sps:$4 sm:$0xff]  }
 0x695   :  { %12794 = vmatprep.subr.bf16.mxu1 %v18331_v57 }
 0x697   :  { %12842 = vmatpush2.bf16.msra.mxu0 %v18326_v20  ;;  %v18374_v20 = vld [vmem:[%s24755_s3 + $0xba8] ss:$28 sps:$4 sm:$0xff]  }
 0x698   :  { %12795 = vmatpush1.bf16.msra.mxu1 %v18329_v8  ;;  %12843 = vmatprep.subr.bf16.mxu0 %v18334_v58  ;;  %v18377_v58 = vld [vmem:[%s24755_s3 + $0x1d0] ss:$28 sps:$4 sm:$0xff]  }
 0x699   :  { %12796 = vmatprep.subr.bf16.mxu1 %v18337_v30  ;;  %v18382_v30 = vld [vmem:[%s24755_s3 + $0xb74] ss:$28 sps:$4 sm:$0xff]  }
 0x69b   :  { %12844 = vmatpush2.bf16.msra.mxu0 %v18332_v21  ;;  %v18385_v21 = vld [vmem:[%s24755_s3 + $0x89c] ss:$28 sps:$4 sm:$0xff]  }
 0x69c   :  { %12797 = vmatpush2.bf16.msra.mxu1 %v18335_v51  ;;  %12845 = vmatprep.subr.bf16.mxu0 %v18340_v3  ;;  %v18380_v51 = vld [vmem:[%s24755_s3 + $0xb70] ss:$28 sps:$4 sm:$0xff]   ;;  %v18383_v3 = vld [vmem:[%s24755_s3 + $0x898] ss:$28 sps:$4 sm:$0xff]  }
 0x69d   :  { %12798 = vmatprep.subr.bf16.mxu1 %v18343_v41  ;;  %v18388_v41 = vld [vmem:[%s24755_s3 + $0xb3c] ss:$28 sps:$4 sm:$0xff]  }
 0x69f   :  { %12846 = vmatpush2.bf16.msra.mxu0 %v18338_v13  ;;  %v18391_v13 = vld [vmem:[%s24755_s3 + $0x864] ss:$28 sps:$4 sm:$0xff]  }
 0x6a0   :  { %12799 = vmatpush2.bf16.msra.mxu1 %v18341_v32  ;;  %12847 = vmatprep.subr.bf16.mxu0 %v18346_v4  ;;  %v18386_v32 = vld [vmem:[%s24755_s3 + $0xb38] ss:$28 sps:$4 sm:$0xff]   ;;  %v18389_v4 = vld [vmem:[%s24755_s3 + $0x860] ss:$28 sps:$4 sm:$0xff]  }
 0x6a1   :  { %12800 = vmatprep.subr.bf16.mxu1 %v18349_v6  ;;  %v18394_v6 = vld [vmem:[%s24755_s3 + $0xb04] ss:$28 sps:$4 sm:$0xff]  }
 0x6a3   :  { %12848 = vmatpush2.bf16.msra.mxu0 %v18344_v35  ;;  %v18397_v35 = vld [vmem:[%s24755_s3 + $0x82c] ss:$28 sps:$4 sm:$0xff]  }
 0x6a4   :  { %12801 = vmatpush2.bf16.msra.mxu1 %v18347_v36  ;;  %12849 = vmatprep.subr.bf16.mxu0 %v18352_v7  ;;  %v18392_v36 = vld [vmem:[%s24755_s3 + $0xb00] ss:$28 sps:$4 sm:$0xff]   ;;  %v18395_v7 = vld [vmem:[%s24755_s3 + $0x828] ss:$28 sps:$4 sm:$0xff]  }
 0x6a5   :  { %12802 = vmatprep.subr.bf16.mxu1 %v18355_v44  ;;  %v18400_v44 = vld [vmem:[%s24755_s3 + $0xacc] ss:$28 sps:$4 sm:$0xff]  }
 0x6a7   :  { %12850 = vmatpush2.bf16.msra.mxu0 %v18350_v16  ;;  %v18403_v16 = vld [vmem:[%s24755_s3 + $0x7f4] ss:$28 sps:$4 sm:$0xff]  }
 0x6a8   :  { %12803 = vmatpush2.bf16.msra.mxu1 %v18353_v22  ;;  %12851 = vmatprep.subr.bf16.mxu0 %v18358_v31  ;;  %v18398_v22 = vld [vmem:[%s24755_s3 + $0xac8] ss:$28 sps:$4 sm:$0xff]   ;;  %v18401_v31 = vld [vmem:[%s24755_s3 + $0x7f0] ss:$28 sps:$4 sm:$0xff]  }
 0x6a9   :  { %12804 = vmatprep.subr.bf16.mxu1 %v18361_v42  ;;  %v18406_v42 = vld [vmem:[%s24755_s3 + $0xa94] ss:$28 sps:$4 sm:$0xff]  }
 0x6ab   :  { %v12527_v47 = vpop.f32.mrf.mxu1  ;;  %12852 = vmatpush2.bf16.msra.mxu0 %v18356_v48  ;;  %v18409_v48 = vld [vmem:[%s24755_s3 + $0x7bc] ss:$28 sps:$4 sm:$0xff]  }
 0x6ac   :  { %v12528_v12 = vadd.f32 %v12527_v47, %v8578_v17  ;;  %12805 = vmatpush2.bf16.msra.mxu1 %v18359_v55  ;;  %12903 = vmatprep.subr.bf16.mxu0 %v18364_v62  ;;  %v18404_v17 = vld [vmem:[%s24755_s3 + $0xa90] ss:$28 sps:$4 sm:$0xff]   ;;  %v18407_v55 = vld [vmem:[%s24755_s3 + $0x7b8] ss:$28 sps:$4 sm:$0xff]   ;;  %v18413_v47 = vld [vmem:[%s24755_s3 + $0x780] ss:$28 sps:$4 sm:$0xff]  }
 0x6ad   :  { %v12529_v60 = vpop.f32.mrf.mxu1  ;;  %12806 = vmatprep.subr.bf16.mxu1 %v18367_v18  ;;  %v18412_v62 = vld [vmem:[%s24755_s3 + $0xddc] ss:$28 sps:$4 sm:$0xff]   ;;  %v18415_v18 = vld [vmem:[%s24755_s3 + $0x784] ss:$28 sps:$4 sm:$0xff]  }
 0x6ae   :  { %v12530_v2 = vadd.f32 %v12529_v60, %v8582_v56  ;;  %v12568_v61 = vpop.f32.mrf.mxu0  ;;  %12854 = vmatmul.mubr.bf16.vlgmr.msra.gmra.mxu0 %v22425_v9  ;;  %v18410_v56 = vld [vmem:[%s24755_s3 + $0xdd8] ss:$28 sps:$4 sm:$0xff]   ;;  %v18424_v60 = vld [vmem:[%s24755_s3 + $0xd6c] ss:$28 sps:$4 sm:$0xff]  }
 0x6af   :  { %v23726_v0 = vadd.f32 %v12568_v61, %v12528_v12  ;;  %v12531_v49 = vpop.f32.mrf.mxu1  ;;  %12904 = vmatpush1.bf16.msra.mxu0 %v18362_v24  ;;  %12935 = vmatprep.mubr.bf16.mxu0 %v22726_v45  ;;  %v18418_v24 = vld [vmem:[%s24755_s3 + $0xda4] ss:$28 sps:$4 sm:$0xff]   ;;  %v18421_v12 = vld [vmem:[%s24755_s3 + $0x74c] ss:$28 sps:$4 sm:$0xff]  }
 0x6b0   :  { %v12570_v1 = vpop.f32.mrf.mxu0  ;;  %12807 = vmatpush2.bf16.msra.mxu1 %v18365_v38  ;;  %12905 = vmatprep.subr.bf16.mxu0 %v18370_v23  ;;  %v18416_v38 = vld [vmem:[%s24755_s3 + $0xda0] ss:$28 sps:$4 sm:$0xff]   ;;  %v18419_v23 = vld [vmem:[%s24755_s3 + $0x748] ss:$28 sps:$4 sm:$0xff]   ;;  %v18425_v61 = vld [vmem:[%s24755_s3 + $0x710] ss:$28 sps:$4 sm:$0xff]  }
 0x6b1   :  { %v23738_v52 = vadd.f32 %v12570_v1, %v12530_v2  ;;  %v12532_v11 = vpop.f32.mrf.mxu1  ;;  %12808 = vmatprep.subr.bf16.mxu1 %v18373_v25  ;;  %v18427_v25 = vld [vmem:[%s24755_s3 + $0x714] ss:$28 sps:$4 sm:$0xff]   ;;  %v18422_v2 = vld [vmem:[%s24755_s3 + $0xd68] ss:$28 sps:$4 sm:$0xff]  }
 0x6b2   :  { %v12572_v57 = vpop.f32.mrf.mxu0  ;;  %v18430_v49 = vld [vmem:[%s24755_s3 + $0xd34] ss:$28 sps:$4 sm:$0xff]   ;;  %v18439_v11 = vld [vmem:[%s24755_s3 + $0xa24] ss:$28 sps:$4 sm:$0xff]  }
 0x6b3   :  { %12906 = vmatpush1.bf16.msra.mxu0 %v18368_v19  ;;  %v18433_v19 = vld [vmem:[%s24755_s3 + $0xa5c] ss:$28 sps:$4 sm:$0xff]   ;;  %v18428_v1 = vld [vmem:[%s24755_s3 + $0xd30] ss:$28 sps:$4 sm:$0xff]  }
 0x6b4   :  { %v12573_v8 = vpop.f32.mrf.mxu0  ;;  %12809 = vmatpush2.bf16.msra.mxu1 %v18371_v50  ;;  %12907 = vmatprep.subr.bf16.mxu0 %v18376_v53  ;;  %v18431_v50 = vld [vmem:[%s24755_s3 + $0xa58] ss:$28 sps:$4 sm:$0xff]   ;;  %v18437_v57 = vld [vmem:[%s24755_s3 + $0xa20] ss:$28 sps:$4 sm:$0xff]  }
 0x6b5   :  { %12810 = vmatprep.subr.bf16.mxu1 %v18379_v59  ;;  %v18436_v53 = vld [vmem:[%s24755_s3 + $0xcfc] ss:$28 sps:$4 sm:$0xff]   ;;  %v18445_v8 = vld [vmem:[%s24755_s3 + $0x9ec] ss:$28 sps:$4 sm:$0xff]  }
 0x6b6   :  { %v18434_v59 = vld [vmem:[%s24755_s3 + $0xcf8] ss:$28 sps:$4 sm:$0xff]  }
 0x6b7   :  { %12908 = vmatpush1.bf16.msra.mxu0 %v18374_v20  ;;  %v18442_v20 = vld [vmem:[%s24755_s3 + $0xcc4] ss:$28 sps:$4 sm:$0xff]  }
 0x6b8   :  { %12811 = vmatpush2.bf16.msra.mxu1 %v18377_v58  ;;  %12909 = vmatprep.subr.bf16.mxu0 %v18382_v30  ;;  %v18440_v58 = vld [vmem:[%s24755_s3 + $0xcc0] ss:$28 sps:$4 sm:$0xff]   ;;  %v18443_v30 = vld [vmem:[%s24755_s3 + $0x9e8] ss:$28 sps:$4 sm:$0xff]  }
 0x6b9   :  { %12862 = vmatprep.subr.bf16.mxu1 %v18385_v21  ;;  %v18448_v21 = vld [vmem:[%s24755_s3 + $0xc8c] ss:$28 sps:$4 sm:$0xff]  }
 0x6bb   :  { %12813 = vmatmul.mubr.bf16.vlgmr.msra.gmra.mxu1 %v22263_v46  ;;  %12910 = vmatpush1.bf16.msra.mxu0 %v18380_v51  ;;  %v18451_v51 = vld [vmem:[%s24755_s3 + $0x9b4] ss:$28 sps:$4 sm:$0xff]  }
 0x6bc   :  { %12863 = vmatpush1.bf16.msra.mxu1 %v18383_v3  ;;  %12894 = vmatprep.mubr.bf16.mxu1 %v22346_v29  ;;  %v18446_v3 = vld [vmem:[%s24755_s3 + $0xc88] ss:$28 sps:$4 sm:$0xff]  }
 0x6bd   :  { %12911 = vmatprep.subr.bf16.mxu0 %v18388_v41  ;;  %12864 = vmatprep.subr.bf16.mxu1 %v18391_v13  ;;  %v18449_v41 = vld [vmem:[%s24755_s3 + $0x9b0] ss:$28 sps:$4 sm:$0xff]  }
 0x6be   :  { %v18454_v13 = vld [vmem:[%s24755_s3 + $0xc54] ss:$28 sps:$4 sm:$0xff]  }
 0x6bf   :  { %12912 = vmatpush1.bf16.msra.mxu0 %v18386_v32  ;;  %v18457_v32 = vld [vmem:[%s24755_s3 + $0x97c] ss:$28 sps:$4 sm:$0xff]  }
 0x6c0   :  { %12865 = vmatpush1.bf16.msra.mxu1 %v18389_v4  ;;  %12913 = vmatprep.subr.bf16.mxu0 %v18394_v6  ;;  %v18452_v4 = vld [vmem:[%s24755_s3 + $0xc50] ss:$28 sps:$4 sm:$0xff]   ;;  %v18455_v6 = vld [vmem:[%s24755_s3 + $0x978] ss:$28 sps:$4 sm:$0xff]  }
 0x6c1   :  { %12866 = vmatprep.subr.bf16.mxu1 %v18397_v35  ;;  %v18460_v35 = vld [vmem:[%s24755_s3 + $0x131c] ss:$28 sps:$4 sm:$0xff]  }
 0x6c3   :  { %12914 = vmatpush1.bf16.msra.mxu0 %v18392_v36  ;;  %v18463_v36 = vld [vmem:[%s24755_s3 + $0x944] ss:$28 sps:$4 sm:$0xff]  }
 0x6c4   :  { %12867 = vmatpush1.bf16.msra.mxu1 %v18395_v7  ;;  %12915 = vmatprep.subr.bf16.mxu0 %v18400_v44  ;;  %v18458_v44 = vld [vmem:[%s24755_s3 + $0x1318] ss:$28 sps:$4 sm:$0xff]  }
 0x6c5   :  { %12868 = vmatprep.subr.bf16.mxu1 %v18403_v16 }
 0x6c7   :  { %12916 = vmatpush1.bf16.msra.mxu0 %v18398_v22  ;;  %v18461_v22 = vld [vmem:[%s24755_s3 + $0x940] ss:$28 sps:$4 sm:$0xff]  }
 0x6c8   :  { %12869 = vmatpush1.bf16.msra.mxu1 %v18401_v31  ;;  %12917 = vmatprep.subr.bf16.mxu0 %v18406_v42  ;;  %v18466_v31 = vld [vmem:[%s24755_s3 + $0x12e4] ss:$28 sps:$4 sm:$0xff]  }
 0x6c9   :  { %12870 = vmatprep.subr.bf16.mxu1 %v18409_v48  ;;  %v18469_v48 = vld [vmem:[%s24755_s3 + $0x90c] ss:$28 sps:$4 sm:$0xff]  }
 0x6cb   :  { %12918 = vmatpush1.bf16.msra.mxu0 %v18404_v17 }
 0x6cc   :  { %12871 = vmatpush1.bf16.msra.mxu1 %v18407_v55  ;;  %12919 = vmatprep.subr.bf16.mxu0 %v18412_v62 }
 0x6cd   :  { %12872 = vmatprep.subr.bf16.mxu1 %v18415_v18  ;;  %v18464_v18 = vld [vmem:[%s24755_s3 + $0x12e0] ss:$28 sps:$4 sm:$0xff]  }
 0x6cf   :  { %12920 = vmatpush2.bf16.msra.mxu0 %v18410_v56 }
 0x6d0   :  { %12873 = vmatpush1.bf16.msra.mxu1 %v18413_v47  ;;  %12921 = vmatprep.subr.bf16.mxu0 %v18418_v24  ;;  %v18472_v47 = vld [vmem:[%s24755_s3 + $0x12ac] ss:$28 sps:$4 sm:$0xff]  }
 0x6d1   :  { %12874 = vmatprep.subr.bf16.mxu1 %v18421_v12 }
 0x6d3   :  { %12922 = vmatpush2.bf16.msra.mxu0 %v18416_v38  ;;  %v18475_v38 = vld [vmem:[%s24755_s3 + $0x8d4] ss:$28 sps:$4 sm:$0xff]  }
 0x6d4   :  { %12875 = vmatpush1.bf16.msra.mxu1 %v18419_v23  ;;  %12923 = vmatprep.subr.bf16.mxu0 %v18424_v60  ;;  %v18470_v60 = vld [vmem:[%s24755_s3 + $0x12a8] ss:$28 sps:$4 sm:$0xff]  }
 0x6d5   :  { %12876 = vmatprep.subr.bf16.mxu1 %v18427_v25 }
 0x6d7   :  { %12924 = vmatpush2.bf16.msra.mxu0 %v18422_v2  ;;  %v18473_v2 = vld [vmem:[%s24755_s3 + $0x8d0] ss:$28 sps:$4 sm:$0xff]  }
 0x6d8   :  { %12877 = vmatpush1.bf16.msra.mxu1 %v18425_v61  ;;  %12925 = vmatprep.subr.bf16.mxu0 %v18430_v49  ;;  %v18478_v61 = vld [vmem:[%s24755_s3 + $0x1274] ss:$28 sps:$4 sm:$0xff]   ;;  %v18481_v49 = vld [vmem:[%s24755_s3 + $0xf9c] ss:$28 sps:$4 sm:$0xff]  }
 0x6d9   :  { %12878 = vmatprep.subr.bf16.mxu1 %v18433_v19  ;;  %v18476_v19 = vld [vmem:[%s24755_s3 + $0x1270] ss:$28 sps:$4 sm:$0xff]  }
 0x6db   :  { %12926 = vmatpush2.bf16.msra.mxu0 %v18428_v1  ;;  %v18479_v1 = vld [vmem:[%s24755_s3 + $0xf98] ss:$28 sps:$4 sm:$0xff]  }
 0x6dc   :  { %12879 = vmatpush2.bf16.msra.mxu1 %v18431_v50  ;;  %12927 = vmatprep.subr.bf16.mxu0 %v18436_v53  ;;  %v18484_v50 = vld [vmem:[%s24755_s3 + $0x123c] ss:$28 sps:$4 sm:$0xff]   ;;  %v18487_v53 = vld [vmem:[%s24755_s3 + $0xf64] ss:$28 sps:$4 sm:$0xff]  }
 0x6dd   :  { %12880 = vmatprep.subr.bf16.mxu1 %v18439_v11  ;;  %v18482_v11 = vld [vmem:[%s24755_s3 + $0x1238] ss:$28 sps:$4 sm:$0xff]  }
 0x6df   :  { %12928 = vmatpush2.bf16.msra.mxu0 %v18434_v59  ;;  %v18485_v59 = vld [vmem:[%s24755_s3 + $0xf60] ss:$28 sps:$4 sm:$0xff]  }
 0x6e0   :  { %12881 = vmatpush2.bf16.msra.mxu1 %v18437_v57  ;;  %12929 = vmatprep.subr.bf16.mxu0 %v18442_v20  ;;  %v18490_v57 = vld [vmem:[%s24755_s3 + $0x1204] ss:$28 sps:$4 sm:$0xff]   ;;  %v18493_v20 = vld [vmem:[%s24755_s3 + $0xf2c] ss:$28 sps:$4 sm:$0xff]  }
 0x6e1   :  { %12882 = vmatprep.subr.bf16.mxu1 %v18445_v8  ;;  %v18488_v8 = vld [vmem:[%s24755_s3 + $0x1200] ss:$28 sps:$4 sm:$0xff]  }
 0x6e3   :  { %12930 = vmatpush2.bf16.msra.mxu0 %v18440_v58  ;;  %v18491_v58 = vld [vmem:[%s24755_s3 + $0xf28] ss:$28 sps:$4 sm:$0xff]  }
 0x6e4   :  { %12883 = vmatpush2.bf16.msra.mxu1 %v18443_v30  ;;  %12931 = vmatprep.subr.bf16.mxu0 %v18448_v21  ;;  %v18496_v30 = vld [vmem:[%s24755_s3 + $0x11cc] ss:$28 sps:$4 sm:$0xff]   ;;  %v18499_v21 = vld [vmem:[%s24755_s3 + $0xef4] ss:$28 sps:$4 sm:$0xff]  }
 0x6e5   :  { %12884 = vmatprep.subr.bf16.mxu1 %v18451_v51  ;;  %v18494_v51 = vld [vmem:[%s24755_s3 + $0x11c8] ss:$28 sps:$4 sm:$0xff]  }
 0x6e7   :  { %12932 = vmatpush2.bf16.msra.mxu0 %v18446_v3  ;;  %v18497_v3 = vld [vmem:[%s24755_s3 + $0xef0] ss:$28 sps:$4 sm:$0xff]  }
 0x6e8   :  { %12885 = vmatpush2.bf16.msra.mxu1 %v18449_v41  ;;  %12933 = vmatprep.subr.bf16.mxu0 %v18454_v13  ;;  %v18502_v41 = vld [vmem:[%s24755_s3 + $0x1194] ss:$28 sps:$4 sm:$0xff]   ;;  %v18505_v13 = vld [vmem:[%s24755_s3 + $0xebc] ss:$28 sps:$4 sm:$0xff]  }
 0x6e9   :  { %12886 = vmatprep.subr.bf16.mxu1 %v18457_v32  ;;  %v18500_v32 = vld [vmem:[%s24755_s3 + $0x1190] ss:$28 sps:$4 sm:$0xff]  }
 0x6eb   :  { %v12609_v7 = vpop.f32.mrf.mxu1  ;;  %12934 = vmatpush2.bf16.msra.mxu0 %v18452_v4  ;;  %v18503_v4 = vld [vmem:[%s24755_s3 + $0xeb8] ss:$28 sps:$4 sm:$0xff]  }
 0x6ec   :  { %v12610_v16 = vadd.f32 %v12609_v7, %v23726_v0  ;;  %12887 = vmatpush2.bf16.msra.mxu1 %v18455_v6  ;;  %12985 = vmatprep.subr.bf16.mxu0 %v18460_v35  ;;  %v18508_v6 = vld [vmem:[%s24755_s3 + $0x14dc] ss:$28 sps:$4 sm:$0xff]   ;;  %v18511_v35 = vld [vmem:[%s24755_s3 + $0xe84] ss:$28 sps:$4 sm:$0xff]  }
 0x6ed   :  { %v12611_v42 = vpop.f32.mrf.mxu1  ;;  %12888 = vmatprep.subr.bf16.mxu1 %v18463_v36  ;;  %v18506_v36 = vld [vmem:[%s24755_s3 + $0x14d8] ss:$28 sps:$4 sm:$0xff]   ;;  %v18509_v7 = vld [vmem:[%s24755_s3 + $0xe80] ss:$28 sps:$4 sm:$0xff]  }
 0x6ee   :  { %v12612_v17 = vadd.f32 %v12611_v42, %v23738_v52  ;;  %v12650_v55 = vpop.f32.mrf.mxu0  ;;  %12936 = vmatmul.mubr.bf16.vlgmr.msra.gmra.mxu0 %v22728_v33  ;;  %v18467_v52 = vld [vmem:[%s24755_s3 + $0x908] ss:$28 sps:$4 sm:$0xff]  }
 0x6ef   :  { %v23928_v0 = vadd.f32 %v12650_v55, %v12610_v16  ;;  %v12613_v62 = vpop.f32.mrf.mxu1  ;;  %12986 = vmatpush1.bf16.msra.mxu0 %v18458_v44  ;;  %13017 = vmatprep.mubr.bf16.mxu0 %v22905_v10  ;;  %v18514_v44 = vld [vmem:[%s24755_s3 + $0x14a4] ss:$28 sps:$4 sm:$0xff]   ;;  %v18517_v16 = vld [vmem:[%s24755_s3 + $0xe4c] ss:$28 sps:$4 sm:$0xff]  }
 0x6f0   :  { %v12652_v56 = vpop.f32.mrf.mxu0  ;;  %12889 = vmatpush2.bf16.msra.mxu1 %v18461_v22  ;;  %12987 = vmatprep.subr.bf16.mxu0 %v18466_v31  ;;  %v18512_v22 = vld [vmem:[%s24755_s3 + $0x14a0] ss:$28 sps:$4 sm:$0xff]   ;;  %v18515_v31 = vld [vmem:[%s24755_s3 + $0xe48] ss:$28 sps:$4 sm:$0xff]   ;;  %v18521_v55 = vld [vmem:[%s24755_s3 + $0xe10] ss:$28 sps:$4 sm:$0xff]  }
 0x6f1   :  { %v23940_v24 = vadd.f32 %v12652_v56, %v12612_v17  ;;  %v12614_v12 = vpop.f32.mrf.mxu1  ;;  %12890 = vmatprep.subr.bf16.mxu1 %v18469_v48  ;;  %v18520_v42 = vld [vmem:[%s24755_s3 + $0x146c] ss:$28 sps:$4 sm:$0xff]   ;;  %v18523_v48 = vld [vmem:[%s24755_s3 + $0xe14] ss:$28 sps:$4 sm:$0xff]  }
 0x6f2   :  { %v12654_v23 = vpop.f32.mrf.mxu0  ;;  %v18518_v17 = vld [vmem:[%s24755_s3 + $0x1468] ss:$28 sps:$4 sm:$0xff]   ;;  %v18526_v62 = vld [vmem:[%s24755_s3 + $0x1434] ss:$28 sps:$4 sm:$0xff]  }
 0x6f3   :  { %12988 = vmatpush1.bf16.msra.mxu0 %v18464_v18  ;;  %v18529_v18 = vld [vmem:[%s24755_s3 + $0x115c] ss:$28 sps:$4 sm:$0xff]   ;;  %v18524_v56 = vld [vmem:[%s24755_s3 + $0x1430] ss:$28 sps:$4 sm:$0xff]   ;;  %v18535_v12 = vld [vmem:[%s24755_s3 + $0x1124] ss:$28 sps:$4 sm:$0xff]  }
 0x6f4   :  { %v12655_v25 = vpop.f32.mrf.mxu0  ;;  %12891 = vmatpush2.bf16.msra.mxu1 %v18467_v52  ;;  %12989 = vmatprep.subr.bf16.mxu0 %v18472_v47  ;;  %v18527_v52 = vld [vmem:[%s24755_s3 + $0x1158] ss:$28 sps:$4 sm:$0xff]   ;;  %v18533_v23 = vld [vmem:[%s24755_s3 + $0x1120] ss:$28 sps:$4 sm:$0xff]  }
 0x6f5   :  { %12892 = vmatprep.subr.bf16.mxu1 %v18475_v38  ;;  %v18532_v47 = vld [vmem:[%s24755_s3 + $0x13fc] ss:$28 sps:$4 sm:$0xff]   ;;  %v18541_v25 = vld [vmem:[%s24755_s3 + $0x10ec] ss:$28 sps:$4 sm:$0xff]  }
 0x6f6   :  { %v18530_v38 = vld [vmem:[%s24755_s3 + $0x13f8] ss:$28 sps:$4 sm:$0xff]  }
 0x6f7   :  { %12990 = vmatpush1.bf16.msra.mxu0 %v18470_v60  ;;  %v18538_v60 = vld [vmem:[%s24755_s3 + $0x13c4] ss:$28 sps:$4 sm:$0xff]  }
 0x6f8   :  { %12893 = vmatpush2.bf16.msra.mxu1 %v18473_v2  ;;  %12991 = vmatprep.subr.bf16.mxu0 %v18478_v61  ;;  %v18536_v2 = vld [vmem:[%s24755_s3 + $0x13c0] ss:$28 sps:$4 sm:$0xff]   ;;  %v18539_v61 = vld [vmem:[%s24755_s3 + $0x10e8] ss:$28 sps:$4 sm:$0xff]  }
 0x6f9   :  { %12944 = vmatprep.subr.bf16.mxu1 %v18481_v49  ;;  %v18544_v49 = vld [vmem:[%s24755_s3 + $0x138c] ss:$28 sps:$4 sm:$0xff]  }
 0x6fb   :  { %12895 = vmatmul.mubr.bf16.vlgmr.msra.gmra.mxu1 %v22497_v5  ;;  %12992 = vmatpush1.bf16.msra.mxu0 %v18476_v19  ;;  %v18547_v19 = vld [vmem:[%s24755_s3 + $0x10b4] ss:$28 sps:$4 sm:$0xff]  }
 0x6fc   :  { %12945 = vmatpush1.bf16.msra.mxu1 %v18479_v1  ;;  %12976 = vmatprep.mubr.bf16.mxu1 %v22855_v34  ;;  %v18542_v1 = vld [vmem:[%s24755_s3 + $0x1388] ss:$28 sps:$4 sm:$0xff]  }
 0x6fd   :  { %12993 = vmatprep.subr.bf16.mxu0 %v18484_v50  ;;  %12946 = vmatprep.subr.bf16.mxu1 %v18487_v53  ;;  %v18545_v50 = vld [vmem:[%s24755_s3 + $0x10b0] ss:$28 sps:$4 sm:$0xff]  }
 0x6fe   :  { %v18550_v53 = vld [vmem:[%s24755_s3 + $0x1354] ss:$28 sps:$4 sm:$0xff]  }
 0x6ff   :  { %12994 = vmatpush1.bf16.msra.mxu0 %v18482_v11  ;;  %v18553_v11 = vld [vmem:[%s24755_s3 + $0x107c] ss:$28 sps:$4 sm:$0xff]  }
 0x700   :  { %12947 = vmatpush1.bf16.msra.mxu1 %v18485_v59  ;;  %12995 = vmatprep.subr.bf16.mxu0 %v18490_v57  ;;  %v18548_v59 = vld [vmem:[%s24755_s3 + $0x1350] ss:$28 sps:$4 sm:$0xff]   ;;  %v18551_v57 = vld [vmem:[%s24755_s3 + $0x1078] ss:$28 sps:$4 sm:$0xff]  }
 0x701   :  { %12948 = vmatprep.subr.bf16.mxu1 %v18493_v20  ;;  %v18554_v20 = vld [vmem:[%s24755_s3 + $0x360] ss:$28 sps:$4 sm:$0xff]  }
 0x703   :  { %12996 = vmatpush1.bf16.msra.mxu0 %v18488_v8  ;;  %v18557_v8 = vld [vmem:[%s24755_s3 + $0x1044] ss:$28 sps:$4 sm:$0xff]  }
 0x704   :  { %12949 = vmatpush1.bf16.msra.mxu1 %v18491_v58  ;;  %12997 = vmatprep.subr.bf16.mxu0 %v18496_v30  ;;  %v18558_v30 = vld [vmem:[%s24755_s3 + $0x1a0] ss:$28 sps:$4 sm:$0xff]  }
 0x705   :  { %12950 = vmatprep.subr.bf16.mxu1 %v18499_v21  ;;  %v18555_v21 = vld [vmem:[%s24755_s3 + $0x1040] ss:$28 sps:$4 sm:$0xff]  }
 0x707   :  { %12998 = vmatpush1.bf16.msra.mxu0 %v18494_v51  ;;  %v18559_v51 = vld [vmem:[%s24755_s3 + $0x328] ss:$28 sps:$4 sm:$0xff]  }
 0x708   :  { %12951 = vmatpush1.bf16.msra.mxu1 %v18497_v3  ;;  %12999 = vmatprep.subr.bf16.mxu0 %v18502_v41  ;;  %v18562_v41 = vld [vmem:[%s24755_s3 + $0x100c] ss:$28 sps:$4 sm:$0xff]  }
 0x709   :  { %12952 = vmatprep.subr.bf16.mxu1 %v18505_v13 }
 0x70b   :  { %13000 = vmatpush1.bf16.msra.mxu0 %v18500_v32 }
 0x70c   :  { %12953 = vmatpush1.bf16.msra.mxu1 %v18503_v4  ;;  %13001 = vmatprep.subr.bf16.mxu0 %v18508_v6  ;;  %v18563_v4 = vld [vmem:[%s24755_s3 + $0x168] ss:$28 sps:$4 sm:$0xff]  }
 0x70d   :  { %12954 = vmatprep.subr.bf16.mxu1 %v18511_v35  ;;  %v18560_v35 = vld [vmem:[%s24755_s3 + $0x1008] ss:$28 sps:$4 sm:$0xff]  }
 0x70f   :  { %13002 = vmatpush2.bf16.msra.mxu0 %v18506_v36  ;;  %v18564_v36 = vld [vmem:[%s24755_s3 + $0x2f0] ss:$28 sps:$4 sm:$0xff]  }
 0x710   :  { %12955 = vmatpush1.bf16.msra.mxu1 %v18509_v7  ;;  %13003 = vmatprep.subr.bf16.mxu0 %v18514_v44 }
 0x711   :  { %12956 = vmatprep.subr.bf16.mxu1 %v18517_v16  ;;  %v18568_v16 = vld [vmem:[%s24755_s3 + $0x130] ss:$28 sps:$4 sm:$0xff]  }
 0x713   :  { %13004 = vmatpush2.bf16.msra.mxu0 %v18512_v22 }
 0x714   :  { %12957 = vmatpush1.bf16.msra.mxu1 %v18515_v31  ;;  %13005 = vmatprep.subr.bf16.mxu0 %v18520_v42  ;;  %v18565_v31 = vld [vmem:[%s24755_s3 + $0xfd0] ss:$28 sps:$4 sm:$0xff]   ;;  %v18569_v42 = vld [vmem:[%s24755_s3 + $0x2b8] ss:$28 sps:$4 sm:$0xff]  }
 0x715   :  { %12958 = vmatprep.subr.bf16.mxu1 %v18523_v48  ;;  %v18572_v48 = vld [vmem:[%s24755_s3 + $0x15bc] ss:$28 sps:$4 sm:$0xff]  }
 0x717   :  { %13006 = vmatpush2.bf16.msra.mxu0 %v18518_v17 }
 0x718   :  { %12959 = vmatpush1.bf16.msra.mxu1 %v18521_v55  ;;  %13007 = vmatprep.subr.bf16.mxu0 %v18526_v62  ;;  %v18573_v55 = vld [vmem:[%s24755_s3 + $0xf8] ss:$28 sps:$4 sm:$0xff]  }
 0x719   :  { %12960 = vmatprep.subr.bf16.mxu1 %v18529_v18  ;;  %v18570_v18 = vld [vmem:[%s24755_s3 + $0x15b8] ss:$28 sps:$4 sm:$0xff]  }
 0x71b   :  { %13008 = vmatpush2.bf16.msra.mxu0 %v18524_v56  ;;  %v18574_v56 = vld [vmem:[%s24755_s3 + $0x280] ss:$28 sps:$4 sm:$0xff]  }
 0x71c   :  { %12961 = vmatpush2.bf16.msra.mxu1 %v18527_v52  ;;  %13009 = vmatprep.subr.bf16.mxu0 %v18532_v47 }
 0x71d   :  { %12962 = vmatprep.subr.bf16.mxu1 %v18535_v12 }
 0x71f   :  { %13010 = vmatpush2.bf16.msra.mxu0 %v18530_v38 }
 0x720   :  { %12963 = vmatpush2.bf16.msra.mxu1 %v18533_v23  ;;  %13011 = vmatprep.subr.bf16.mxu0 %v18538_v60  ;;  %v18575_v23 = vld [vmem:[%s24755_s3 + $0x1580] ss:$28 sps:$4 sm:$0xff]   ;;  %v18579_v60 = vld [vmem:[%s24755_s3 + $0x248] ss:$28 sps:$4 sm:$0xff]  }
 0x721   :  { %12964 = vmatprep.subr.bf16.mxu1 %v18541_v25 }
 0x723   :  { %13012 = vmatpush2.bf16.msra.mxu0 %v18536_v2  ;;  %v18582_v2 = vld [vmem:[%s24755_s3 + $0x154c] ss:$28 sps:$4 sm:$0xff]  }
 0x724   :  { %12965 = vmatpush2.bf16.msra.mxu1 %v18539_v61  ;;  %13013 = vmatprep.subr.bf16.mxu0 %v18544_v49 }
 0x725   :  { %12966 = vmatprep.subr.bf16.mxu1 %v18547_v19 }
 0x727   :  { %13014 = vmatpush2.bf16.msra.mxu0 %v18542_v1  ;;  %v18583_v1 = vld [vmem:[%s24755_s3 + $0x88] ss:$28 sps:$4 sm:$0xff]  }
 0x728   :  { %12967 = vmatpush2.bf16.msra.mxu1 %v18545_v50  ;;  %13015 = vmatprep.subr.bf16.mxu0 %v18550_v53  ;;  %v24189_v50 = vld [vmem:[#allocation3 + $0x8] sm:$0xff] }
 0x729   :  { %12968 = vmatprep.subr.bf16.mxu1 %v18553_v11  ;;  %v18584_v11 = vld [vmem:[%s24755_s3 + $0x210] ss:$28 sps:$4 sm:$0xff]  }
 0x72b   :  { %v12691_v58 = vpop.f32.mrf.mxu1  ;;  %13016 = vmatpush2.bf16.msra.mxu0 %v18548_v59 }
 0x72c   :  { %12969 = vmatpush2.bf16.msra.mxu1 %v18551_v57  ;;  %15925 = vmatprep.subr.bf16.mxu0 %v18554_v20  ;;  %v12692_v17 = vadd.f32 %v12691_v58, %v23928_v0  ;;  %v18577_v0 = vld [vmem:[%s24755_s3 + $0x1584] ss:$28 sps:$4 sm:$0xff]   ;;  %v18587_v20 = vld [vmem:[%s24755_s3 + $0x1514] ss:$28 sps:$4 sm:$0xff]  }
 0x72d   :  { %v12693_v3 = vpop.f32.mrf.mxu1  ;;  %12970 = vmatprep.subr.bf16.mxu1 %v18557_v8  ;;  %v24204_v8 = vld [vmem:[#allocation3] sm:$0xff] }
 0x72e   :  { %v12732_v13 = vpop.f32.mrf.mxu0  ;;  %13018 = vmatmul.mubr.bf16.vlgmr.msra.gmra.mxu0 %v22903_v27  ;;  %v12694_v62 = vadd.f32 %v12693_v3, %v23940_v24  ;;  %v18578_v24 = vld [vmem:[%s24755_s3 + $0xc0] ss:$28 sps:$4 sm:$0xff]  }
 0x72f   :  { %v12695_v32 = vpop.f32.mrf.mxu1  ;;  %15926 = vmatpush3.bf16.msra.mxu0 %v18558_v30  ;;  %13099 = vmatprep.mubr.bf16.mxu0 %v22062_v15  ;;  %v18567_v15 = vld [vmem:[%s24755_s3 + $0xfd4] ss:$28 sps:$4 sm:$0xff]   ;;  %v12733_v52 = vadd.f32 %v12732_v13, %v12692_v17  ;;  %v18591_v3 = vld [vmem:[%s24755_s3 + $0x6e0] ss:$28 sps:$4 sm:$0xff]  }
 0x730   :  { %v12734_v6 = vpop.f32.mrf.mxu0  ;;  %12971 = vmatpush2.bf16.msra.mxu1 %v18555_v21  ;;  %15927 = vmatprep.subr.bf16.mxu0 %v18559_v51  ;;  %v18588_v30 = vld [vmem:[%s24755_s3 + $0x50] ss:$28 sps:$4 sm:$0xff]   ;;  %v18589_v51 = vld [vmem:[%s24755_s3 + $0x1d8] ss:$28 sps:$4 sm:$0xff]   ;;  %v18592_v13 = vld [vmem:[%s24755_s3 + $0x520] ss:$28 sps:$4 sm:$0xff]  }
 0x731   :  { %v12696_v7 = vpop.f32.mrf.mxu1  ;;  %12972 = vmatprep.subr.bf16.mxu1 %v18562_v41  ;;  %v12735_v12 = vadd.f32 %v12734_v6, %v12694_v62  ;;  %v18585_v21 = vld [vmem:[%s24755_s3 + $0x1510] ss:$28 sps:$4 sm:$0xff]   ;;  %v18590_v41 = vld [vmem:[%s24755_s3 + $0x18] ss:$28 sps:$4 sm:$0xff]   ;;  %v18593_v32 = vld [vmem:[%s24755_s3 + $0xa60] ss:$28 sps:$4 sm:$0xff]  }
 0x732   :  { %v12736_v44 = vpop.f32.mrf.mxu0  ;;  %v18595_v6 = vld [vmem:[%s24755_s3 + $0x8a0] ss:$28 sps:$4 sm:$0xff]   ;;  %v18598_v7 = vld [vmem:[%s24755_s3 + $0x670] ss:$28 sps:$4 sm:$0xff]  }
 0x733   :  { %15928 = vmatpush3.bf16.msra.mxu0 %v18563_v4  ;;  %v18594_v4 = vld [vmem:[%s24755_s3 + $0x6a8] ss:$28 sps:$4 sm:$0xff]   ;;  %v18601_v44 = vld [vmem:[%s24755_s3 + $0x9f0] ss:$28 sps:$4 sm:$0xff]   ;;  %v18609_v17 = vld [vmem:[%s24755_s3 + $0x980] ss:$28 sps:$4 sm:$0xff]  }
 0x734   :  { %v12737_v22 = vpop.f32.mrf.mxu0  ;;  %12973 = vmatpush2.bf16.msra.mxu1 %v18560_v35  ;;  %15929 = vmatprep.subr.bf16.mxu0 %v18564_v36  ;;  %v18596_v35 = vld [vmem:[%s24755_s3 + $0x4e8] ss:$28 sps:$4 sm:$0xff]   ;;  %v18611_v62 = vld [vmem:[%s24755_s3 + $0x7c0] ss:$28 sps:$4 sm:$0xff]  }
 0x735   :  { %12974 = vmatprep.subr.bf16.mxu1 %v18567_v15  ;;  %v18597_v36 = vld [vmem:[%s24755_s3 + $0xa28] ss:$28 sps:$4 sm:$0xff]   ;;  %v18600_v15 = vld [vmem:[%s24755_s3 + $0x4b0] ss:$28 sps:$4 sm:$0xff]   ;;  %v18605_v22 = vld [vmem:[%s24755_s3 + $0x9b8] ss:$28 sps:$4 sm:$0xff]  }
 0x737   :  { %15930 = vmatpush3.bf16.msra.mxu0 %v18568_v16  ;;  %v18604_v16 = vld [vmem:[%s24755_s3 + $0x478] ss:$28 sps:$4 sm:$0xff]  }
 0x738   :  { %12975 = vmatpush2.bf16.msra.mxu1 %v18565_v31  ;;  %15931 = vmatprep.subr.bf16.mxu0 %v18569_v42  ;;  %v18606_v31 = vld [vmem:[%s24755_s3 + $0x600] ss:$28 sps:$4 sm:$0xff]   ;;  %v18607_v42 = vld [vmem:[%s24755_s3 + $0x7f8] ss:$28 sps:$4 sm:$0xff]  }
 0x739   :  { %13034 = vmatprep.subr.bf16.mxu1 %v18572_v48  ;;  %v18608_v48 = vld [vmem:[%s24755_s3 + $0x440] ss:$28 sps:$4 sm:$0xff]  }
 0x73b   :  { %v12773_v47 = vpop.f32.mrf.mxu1  ;;  %12977 = vmatmul.mubr.bf16.vlgmr.msra.gmra.mxu1 %v22857_v14  ;;  %15932 = vmatpush3.bf16.msra.mxu0 %v18573_v55  ;;  %v18610_v55 = vld [vmem:[%s24755_s3 + $0x5c8] ss:$28 sps:$4 sm:$0xff]  }
 0x73c   :  { %v24171_v38 = vadd.f32 %v12773_v47, %v12733_v52  ;;  %13035 = vmatpush1.bf16.msra.mxu1 %v18570_v18  ;;  %15933 = vmatprep.subr.bf16.mxu0 %v18574_v56  ;;  %v18612_v18 = vld [vmem:[%s24755_s3 + $0x408] ss:$28 sps:$4 sm:$0xff]   ;;  %v18616_v47 = vld [vmem:[%s24755_s3 + $0x3d0] ss:$28 sps:$4 sm:$0xff]  }
 0x73d   :  { %v12775_v25 = vpop.f32.mrf.mxu1  ;;  %13036 = vmatprep.subr.bf16.mxu1 %v18577_v0  ;;  %13058 = vmatprep.mubr.bf16.mxu1 %v18741_v54  ;;  %v18580_v54 = vld [vmem:[%s24755_s3 + $0x1548] ss:$28 sps:$4 sm:$0xff]   ;;  %v18614_v0 = vld [vmem:[%s24755_s3 + $0x590] ss:$28 sps:$4 sm:$0xff]  }
 0x73e   :  { %v13349_v61 = vmax.f32 %v24171_v38, 0.0  ;;  %v24184_v49 = vadd.f32 %v12775_v25, %v12735_v12  ;;  %v18613_v56 = vld [vmem:[%s24755_s3 + $0x948] ss:$28 sps:$4 sm:$0xff]   ;;  %v18618_v12 = vld [vmem:[%s24755_s3 + $0x558] ss:$28 sps:$4 sm:$0xff]  }
 0x73f   :  { %v12777_v19 = vpop.f32.mrf.mxu1  ;;  %15934 = vmatpush3.bf16.msra.mxu0 %v18578_v24  ;;  %v18615_v52 = vld [vmem:[%s24755_s3 + $0x788] ss:$28 sps:$4 sm:$0xff]   ;;  %v18617_v24 = vld [vmem:[%s24755_s3 + $0x910] ss:$28 sps:$4 sm:$0xff]   ;;  %v18621_v25 = vld [vmem:[%s24755_s3 + $0x8d8] ss:$28 sps:$4 sm:$0xff]  }
 0x740   :  { %v13350_v53 = vmax.f32 %v24184_v49, 0.0  ;;  %13037 = vmatpush1.bf16.msra.mxu1 %v18575_v23  ;;  %15935 = vmatprep.subr.bf16.mxu0 %v18579_v60  ;;  %v16220_v59 = vpack.i.bf16 %v13349_v61, %v24189_v50  ;;  %v18619_v23 = vld [vmem:[%s24755_s3 + $0x750] ss:$28 sps:$4 sm:$0xff]   ;;  %v18620_v60 = vld [vmem:[%s24755_s3 + $0x398] ss:$28 sps:$4 sm:$0xff]  }
 0x741   :  { %v12778_v57 = vpop.f32.mrf.mxu1  ;;  %13038 = vmatprep.subr.bf16.mxu1 %v18582_v2  ;;  %v18623_v2 = vld [vmem:[%s24755_s3 + $0xde0] ss:$28 sps:$4 sm:$0xff]   ;;  %v18622_v19 = vld [vmem:[%s24755_s3 + $0x718] ss:$28 sps:$4 sm:$0xff]  }
 0x742   :  { %16221 = vrot.lane.b32.xlu1 %v16220_v59, %s18739_s14  ;;  %v16225_v58 = vpack.i.bf16 %v24204_v8, %v13350_v53  ;;  %v18627_v59 = vld [vmem:[%s24755_s3 + $0xfa0] ss:$28 sps:$4 sm:$0xff]   ;;  %v18628_v57 = vld [vmem:[%s24755_s3 + $0xbe8] ss:$28 sps:$4 sm:$0xff]   ;;  %v18677_v38 = vld [vmem:[%s24757_s5 + $0x70] sm:$0xff]  }
 0x743   :  { %15936 = vmatpush3.bf16.msra.mxu0 %v18583_v1  ;;  %v18624_v1 = vld [vmem:[%s24755_s3 + $0xc20] ss:$28 sps:$4 sm:$0xff]  }
 0x744   :  { %13039 = vmatpush1.bf16.msra.mxu1 %v18580_v54  ;;  %15937 = vmatprep.subr.bf16.mxu0 %v18584_v11  ;;  %v18625_v54 = vld [vmem:[%s24755_s3 + $0x1160] ss:$28 sps:$4 sm:$0xff]   ;;  %v18626_v11 = vld [vmem:[%s24755_s3 + $0xda8] ss:$28 sps:$4 sm:$0xff]  }
 0x745   :  { %13040 = vmatprep.subr.bf16.mxu1 %v18587_v20  ;;  %16226 = vrot.lane.b32.xlu0 %v16225_v58, %s18739_s14  ;;  %v18629_v20 = vld [vmem:[%s24755_s3 + $0x1128] ss:$28 sps:$4 sm:$0xff]  }
 0x747   :  { %15938 = vmatpush3.bf16.msra.mxu0 %v18588_v30 }
 0x748   :  { %13041 = vmatpush1.bf16.msra.mxu1 %v18585_v21  ;;  %15939 = vmatprep.subr.bf16.mxu0 %v18589_v51  ;;  %v18632_v21 = vld [vmem:[%s24755_s3 + $0xbb0] ss:$28 sps:$4 sm:$0xff]  }
 0x749   :  { %15947 = vmatprep.subr.bf16.mxu1 %v18591_v3  ;;  %v18633_v51 = vld [vmem:[%s24755_s3 + $0x10f0] ss:$28 sps:$4 sm:$0xff]  }
 0x74a   :  { %v18635_v3 = vld [vmem:[%s24755_s3 + $0xf30] ss:$28 sps:$4 sm:$0xff]  }
 0x74b   :  { %15780 = vmatmul.mubr.msk.bf16.vlgmr.msra.gmra.mxu1 %vm12202_vm4, %v22897_v63  ;;  %15940 = vmatpush3.bf16.msra.mxu0 %v18590_v41 }
 0x74c   :  { %15948 = vmatpush3.bf16.msra.mxu1 %v18592_v13  ;;  %13139 = vmatprep.mubr.bf16.mxu1 %v22201_v40  ;;  %v18599_v40 = vld [vmem:[%s24755_s3 + $0x868] ss:$28 sps:$4 sm:$0xff]   ;;  %v18636_v13 = vld [vmem:[%s24755_s3 + $0xb78] ss:$28 sps:$4 sm:$0xff]  }
 0x74d   :  { %15969 = vmatprep.subr.bf16.mxu0 %v18593_v32  ;;  %15949 = vmatprep.subr.bf16.mxu1 %v18594_v4  ;;  %v18637_v32 = vld [vmem:[%s24755_s3 + $0x10b8] ss:$28 sps:$4 sm:$0xff]   ;;  %v18638_v4 = vld [vmem:[%s24755_s3 + $0xd00] ss:$28 sps:$4 sm:$0xff]  }
 0x74e   :  { %13100 = vmatmul.mubr.bf16.vlgmr.msra.gmra.mxu0 %v22263_v46  ;;  %v18602_v46 = vld [vmem:[%s24755_s3 + $0x638] ss:$28 sps:$4 sm:$0xff]  }
 0x74f   :  { %15970 = vmatpush3.bf16.msra.mxu0 %v18595_v6  ;;  %13179 = vmatprep.mubr.bf16.mxu0 %v22346_v29  ;;  %v18603_v29 = vld [vmem:[%s24755_s3 + $0x830] ss:$28 sps:$4 sm:$0xff]   ;;  %v18639_v6 = vld [vmem:[%s24755_s3 + $0xef8] ss:$28 sps:$4 sm:$0xff]  }
 0x750   :  { %15950 = vmatpush3.bf16.msra.mxu1 %v18596_v35  ;;  %15971 = vmatprep.subr.bf16.mxu0 %v18597_v36  ;;  %v8586_v35 = vrot.slane %v23698_v26, %v20622_v28  ;;  %v18640_v36 = vld [vmem:[%s24755_s3 + $0xb40] ss:$28 sps:$4 sm:$0xff]  }
 0x751   :  { %15951 = vmatprep.subr.bf16.mxu1 %v18598_v7  ;;  %v18641_v7 = vld [vmem:[%s24755_s3 + $0x1080] ss:$28 sps:$4 sm:$0xff]  }
 0x752   :  { %v18643_v28 = vld [vmem:[%s24755_s3 + $0xec0] ss:$28 sps:$4 sm:$0xff]  }
 0x753   :  { %15972 = vmatpush3.bf16.msra.mxu0 %v18599_v40  ;;  %v18642_v40 = vld [vmem:[%s24755_s3 + $0xcc8] ss:$28 sps:$4 sm:$0xff]  }
 0x754   :  { %15952 = vmatpush3.bf16.msra.mxu1 %v18600_v15  ;;  %15973 = vmatprep.subr.bf16.mxu0 %v18601_v44  ;;  %v8590_v15 = vrot.slane %v23698_v26, %v1129_v37  ;;  %v18646_v37 = vld [vmem:[%s24755_s3 + $0xc90] ss:$28 sps:$4 sm:$0xff]  }
 0x755   :  { %15953 = vmatprep.subr.bf16.mxu1 %v18602_v46 }
 0x757   :  { %15974 = vmatpush3.bf16.msra.mxu0 %v18603_v29  ;;  %v18644_v29 = vld [vmem:[%s24755_s3 + $0xb08] ss:$28 sps:$4 sm:$0xff]  }
 0x758   :  { %15954 = vmatpush3.bf16.msra.mxu1 %v18604_v16  ;;  %15975 = vmatprep.subr.bf16.mxu0 %v18605_v22  ;;  %v18645_v16 = vld [vmem:[%s24755_s3 + $0x1048] ss:$28 sps:$4 sm:$0xff]  }
 0x759   :  { %15955 = vmatprep.subr.bf16.mxu1 %v18606_v31 }
 0x75b   :  { %15976 = vmatpush3.bf16.msra.mxu0 %v18607_v42 }
 0x75c   :  { %15956 = vmatpush3.bf16.msra.mxu1 %v18608_v48  ;;  %15977 = vmatprep.subr.bf16.mxu0 %v18609_v17  ;;  %v18647_v48 = vld [vmem:[%s24755_s3 + $0xe88] ss:$28 sps:$4 sm:$0xff]   ;;  %v18648_v17 = vld [vmem:[%s24755_s3 + $0xad0] ss:$28 sps:$4 sm:$0xff]  }
 0x75d   :  { %15957 = vmatprep.subr.bf16.mxu1 %v18610_v55  ;;  %v18649_v55 = vld [vmem:[%s24755_s3 + $0x1010] ss:$28 sps:$4 sm:$0xff]  }
 0x75f   :  { %15978 = vmatpush3.bf16.msra.mxu0 %v18611_v62 }
 0x760   :  { %15958 = vmatpush3.bf16.msra.mxu1 %v18612_v18  ;;  %15979 = vmatprep.subr.bf16.mxu0 %v18613_v56  ;;  %v18650_v56 = vld [vmem:[%s24755_s3 + $0xc58] ss:$28 sps:$4 sm:$0xff]  }
 0x761   :  { %15959 = vmatprep.subr.bf16.mxu1 %v18614_v0  ;;  %v18651_v0 = vld [vmem:[%s24755_s3 + $0xe50] ss:$28 sps:$4 sm:$0xff]  }
 0x763   :  { %15980 = vmatpush3.bf16.msra.mxu0 %v18615_v52  ;;  %v18652_v52 = vld [vmem:[%s24755_s3 + $0xa98] ss:$28 sps:$4 sm:$0xff]  }
 0x764   :  { %15960 = vmatpush3.bf16.msra.mxu1 %v18616_v47  ;;  %15981 = vmatprep.subr.bf16.mxu0 %v18617_v24  ;;  %v18653_v47 = vld [vmem:[%s24755_s3 + $0xfd8] ss:$28 sps:$4 sm:$0xff]   ;;  %v18655_v24 = vld [vmem:[%s24755_s3 + $0x14e0] ss:$28 sps:$4 sm:$0xff]  }
 0x765   :  { %15961 = vmatprep.subr.bf16.mxu1 %v18618_v12  ;;  %v18654_v12 = vld [vmem:[%s24755_s3 + $0xe18] ss:$28 sps:$4 sm:$0xff]  }
 0x767   :  { %15982 = vmatpush3.bf16.msra.mxu0 %v18619_v23  ;;  %v18656_v23 = vld [vmem:[%s24755_s3 + $0x1320] ss:$28 sps:$4 sm:$0xff]  }
 0x768   :  { %15962 = vmatpush3.bf16.msra.mxu1 %v18620_v60  ;;  %15983 = vmatprep.subr.bf16.mxu0 %v18621_v25  ;;  %v18657_v60 = vld [vmem:[%s24755_s3 + $0x14a8] ss:$28 sps:$4 sm:$0xff]   ;;  %v18658_v25 = vld [vmem:[%s24755_s3 + $0x15c0] ss:$28 sps:$4 sm:$0xff]  }
 0x769   :  { %15991 = vmatprep.subr.bf16.mxu1 %v18623_v2  ;;  %v18659_v2 = vld [vmem:[%s24755_s3 + $0x12e8] ss:$28 sps:$4 sm:$0xff]  }
 0x76b   :  { %13140 = vmatmul.mubr.bf16.vlgmr.msra.gmra.mxu1 %v22425_v9  ;;  %15984 = vmatpush3.bf16.msra.mxu0 %v18622_v19  ;;  %v18630_v9 = vld [vmem:[%s24755_s3 + $0xd70] ss:$28 sps:$4 sm:$0xff]   ;;  %v18742_v19 = vmov 0.0  }
 0x76c   :  { %15992 = vmatpush3.bf16.msra.mxu1 %v18624_v1  ;;  %13219 = vmatprep.mubr.bf16.mxu1 %v22726_v45  ;;  %v18631_v45 = vld [vmem:[%s24755_s3 + $0xf68] ss:$28 sps:$4 sm:$0xff]  }
 0x76d   :  { %16013 = vmatprep.subr.bf16.mxu0 %v18625_v54  ;;  %15993 = vmatprep.subr.bf16.mxu1 %v18626_v11  ;;  %v18661_v1 = vld [vmem:[%s24755_s3 + $0x1588] ss:$28 sps:$4 sm:$0xff]   ;;  %v18664_v54 = vld [vmem:[%s24755_s3 + $0x1550] ss:$28 sps:$4 sm:$0xff]   ;;  %v18665_v11 = vld [vmem:[%s24755_s3 + $0x1278] ss:$28 sps:$4 sm:$0xff]  }
 0x76e   :  { %v12855_v58 = vpop.f32.mrf.mxu0  ;;  %13180 = vmatmul.mubr.bf16.vlgmr.msra.gmra.mxu0 %v22497_v5  ;;  %v18634_v5 = vld [vmem:[%s24755_s3 + $0xd38] ss:$28 sps:$4 sm:$0xff]  }
 0x76f   :  { %16014 = vmatpush3.bf16.msra.mxu0 %v18627_v59  ;;  %13259 = vmatprep.mubr.bf16.mxu0 %v22855_v34  ;;  %v18666_v59 = vld [vmem:[%s24755_s3 + $0x1400] ss:$28 sps:$4 sm:$0xff]  }
 0x770   :  { %v12857_v30 = vpop.f32.mrf.mxu0  ;;  %15994 = vmatpush3.bf16.msra.mxu1 %v18628_v57  ;;  %16015 = vmatprep.subr.bf16.mxu0 %v18629_v20  ;;  %v18667_v57 = vld [vmem:[%s24755_s3 + $0x1518] ss:$28 sps:$4 sm:$0xff]   ;;  %v18668_v20 = vld [vmem:[%s24755_s3 + $0x1240] ss:$28 sps:$4 sm:$0xff]  }
 0x771   :  { %15995 = vmatprep.subr.bf16.mxu1 %v18630_v9  ;;  %v18669_v9 = vld [vmem:[%s24755_s3 + $0x13c8] ss:$28 sps:$4 sm:$0xff]  }
 0x772   :  { %v12859_v34 = vpop.f32.mrf.mxu0 }
 0x773   :  { %16016 = vmatpush3.bf16.msra.mxu0 %v18631_v45  ;;  %v18671_v45 = vld [vmem:[%s24755_s3 + $0x1390] ss:$28 sps:$4 sm:$0xff]  }
 0x774   :  { %v12860_v41 = vpop.f32.mrf.mxu0  ;;  %15996 = vmatpush3.bf16.msra.mxu1 %v18632_v21  ;;  %16017 = vmatprep.subr.bf16.mxu0 %v18633_v51  ;;  %v18673_v21 = vld [vmem:[%s24755_s3 + $0x1358] ss:$28 sps:$4 sm:$0xff]  }
 0x775   :  { %15997 = vmatprep.subr.bf16.mxu1 %v18634_v5  ;;  %v18674_v51 = vld [vmem:[%s24755_s3 + $0x1198] ss:$28 sps:$4 sm:$0xff]  }
 0x777   :  { %16018 = vmatpush3.bf16.msra.mxu0 %v18635_v3 }
 0x778   :  { %15998 = vmatpush3.bf16.msra.mxu1 %v18636_v13  ;;  %16019 = vmatprep.subr.bf16.mxu0 %v18637_v32 }
 0x779   :  { %15999 = vmatprep.subr.bf16.mxu1 %v18638_v4 }
 0x77b   :  { %v12814_v44 = vpop.f32.mrf.mxu1  ;;  %16020 = vmatpush3.bf16.msra.mxu0 %v18639_v6 }
 0x77c   :  { %v12815_v46 = vadd.f32 %v12814_v44, %v8586_v35  ;;  %16000 = vmatpush3.bf16.msra.mxu1 %v18640_v36  ;;  %16021 = vmatprep.subr.bf16.mxu0 %v18641_v7 }
 0x77d   :  { %v12816_v22 = vpop.f32.mrf.mxu1  ;;  %16001 = vmatprep.subr.bf16.mxu1 %v18642_v40 }
 0x77e   :  { %v12817_v26 = vadd.f32 %v12816_v22, %v8590_v15  ;;  %v24405_v31 = vadd.f32 %v12855_v58, %v12815_v46  ;;  %v18670_v58 = vld [vmem:[%s24755_s3 + $0x1208] ss:$28 sps:$4 sm:$0xff]  }
 0x77f   :  { %v12818_v42 = vpop.f32.mrf.mxu1  ;;  %16022 = vmatpush3.bf16.msra.mxu0 %v18643_v28 }
 0x780   :  { %16002 = vmatpush3.bf16.msra.mxu1 %v18644_v29  ;;  %16023 = vmatprep.subr.bf16.mxu0 %v18645_v16  ;;  %v24416_v62 = vadd.f32 %v12857_v30, %v12817_v26  ;;  %v18672_v30 = vld [vmem:[%s24755_s3 + $0x11d0] ss:$28 sps:$4 sm:$0xff]  }
 0x781   :  { %v12819_v18 = vpop.f32.mrf.mxu1  ;;  %16003 = vmatprep.subr.bf16.mxu1 %v18646_v37 }
 0x783   :  { %16024 = vmatpush3.bf16.msra.mxu0 %v18647_v48 }
 0x784   :  { %16004 = vmatpush3.bf16.msra.mxu1 %v18648_v17  ;;  %16025 = vmatprep.subr.bf16.mxu0 %v18649_v55 }
 0x785   :  { %16005 = vmatprep.subr.bf16.mxu1 %v18650_v56 }
 0x787   :  { %16026 = vmatpush3.bf16.msra.mxu0 %v18651_v0 }
 0x788   :  { %16006 = vmatpush3.bf16.msra.mxu1 %v18652_v52  ;;  %16027 = vmatprep.subr.bf16.mxu0 %v18653_v47 }
 0x789   :  { %16035 = vmatprep.subr.bf16.mxu1 %v18655_v24 }
 0x78b   :  { %13220 = vmatmul.mubr.bf16.vlgmr.msra.gmra.mxu1 %v22728_v33  ;;  %16028 = vmatpush3.bf16.msra.mxu0 %v18654_v12  ;;  %v18660_v33 = vld [vmem:[%s24755_s3 + $0x1470] ss:$28 sps:$4 sm:$0xff]  }
 0x78c   :  { %16036 = vmatpush3.bf16.msra.mxu1 %v18656_v23  ;;  %13299 = vmatprep.mubr.bf16.mxu1 %v22905_v10  ;;  %v18662_v10 = vld [vmem:[%s24755_s3 + $0x12b0] ss:$28 sps:$4 sm:$0xff]  }
 0x78d   :  { %16133 = vmatprep.subr.bf16.mxu0 %v18742_v19  ;;  %16037 = vmatprep.subr.bf16.mxu1 %v18657_v60 }
 0x78e   :  { %13260 = vmatmul.mubr.bf16.vlgmr.msra.gmra.mxu0 %v22857_v14  ;;  %v18663_v14 = vld [vmem:[%s24755_s3 + $0x1438] ss:$28 sps:$4 sm:$0xff]  }
 0x78f   :  { %16134 = vmatpush3.bf16.msra.mxu0 %v18658_v25  ;;  %16141 = vmatprep.mubr.msk.bf16.mxu0 %vm18743_vm5, %v18742_v19 }
 0x790   :  { %16038 = vmatpush3.bf16.msra.mxu1 %v18659_v2  ;;  %16135 = vmatprep.subr.bf16.mxu0 %v18742_v19 }
 0x791   :  { %16039 = vmatprep.subr.bf16.mxu1 %v18660_v33 }
 0x793   :  { %16136 = vmatpush3.bf16.msra.mxu0 %v18661_v1 }
 0x794   :  { %16040 = vmatpush3.bf16.msra.mxu1 %v18662_v10  ;;  %16137 = vmatprep.subr.bf16.mxu0 %v18742_v19 }
 0x795   :  { %16041 = vmatprep.subr.bf16.mxu1 %v18663_v14 }
 0x797   :  { %16138 = vmatpush3.bf16.msra.mxu0 %v18664_v54 }
 0x798   :  { %16042 = vmatpush3.bf16.msra.mxu1 %v18665_v11  ;;  %16139 = vmatprep.subr.bf16.mxu0 %v18742_v19  ;;  %v18675_v11 = vld [vmem:[%s24757_s5 + $0x78] sm:$0xff]  }
 0x799   :  { %16043 = vmatprep.subr.bf16.mxu1 %v18666_v59 }
 0x79b   :  { %16140 = vmatpush3.bf16.msra.mxu0 %v18667_v57 }
 0x79c   :  { %16044 = vmatpush3.bf16.msra.mxu1 %v18668_v20  ;;  %v18676_v20 = vld [vmem:[%s24757_s5 + $0x38] sm:$0xff]  }
 0x79d   :  { %16045 = vmatprep.subr.bf16.mxu1 %v18669_v9  ;;  %v18678_v9 = vld [vmem:[%s24757_s5 + $0x30] sm:$0xff]  }
 0x79e   :  { %16142 = vmatmul.mubr.msk.bf16.vlgmr.msra.gmra.mxu0 %vm12202_vm4, %v22897_v63 }
 0x7a0   :  { %16046 = vmatpush3.bf16.msra.mxu1 %v18670_v58  ;;  %v18680_v58 = vld [vmem:[%s24757_s5 + $0x28] sm:$0xff]  }
 0x7a1   :  { %16047 = vmatprep.subr.bf16.mxu1 %v18671_v45  ;;  %v18681_v45 = vld [vmem:[%s24757_s5 + $0x60] sm:$0xff]  }
 0x7a4   :  { %16048 = vmatpush3.bf16.msra.mxu1 %v18672_v30  ;;  %v18682_v30 = vld [vmem:[%s24757_s5 + $0x20] sm:$0xff]  }
 0x7a5   :  { %16049 = vmatprep.subr.bf16.mxu1 %v18673_v21  ;;  %v18683_v21 = vld [vmem:[%s24757_s5 + $0x58] sm:$0xff]  }
 0x7a8   :  { %16050 = vmatpush3.bf16.msra.mxu1 %v18674_v51  ;;  %v18684_v51 = vld [vmem:[%s24757_s5 + $0x18] sm:$0xff]  }
 0x7a9   :  { %16062 = vmatprep.subr.bf16.mxu1 %v18675_v11  ;;  %v18691_v11 = vld [vmem:[%s24757_s5 + $0xf0] sm:$0xff]  }
 0x7ab   :  { %13300 = vmatmul.mubr.bf16.vlgmr.msra.gmra.mxu1 %v22903_v27 }
 0x7ac   :  { %16063 = vmatpush3.bf16.msra.mxu1 %v18676_v20  ;;  %v18693_v20 = vld [vmem:[%s24757_s5 + $0xb0] sm:$0xff]  }
 0x7ad   :  { %16064 = vmatprep.subr.bf16.mxu1 %v18677_v38 }
 0x7ae   :  { %v12937_v63 = vpop.f32.mrf.mxu0 }
 0x7b0   :  { %v12939_v5 = vpop.f32.mrf.mxu0  ;;  %16065 = vmatpush3.bf16.msra.mxu1 %v18678_v9 }
 0x7b2   :  { %v12941_v34 = vpop.f32.mrf.mxu0 }
 0x7b4   :  { %v12942_v3 = vpop.f32.mrf.mxu0 }
 0x7b7   :  { %v24507_v37 = vpop.permute.xlu0 %16226 }
 0x7b8   :  { %v16228_v48 = vunpack.i.l.bf16 %v24507_v37 }
 0x7bb   :  { %v12896_v41 = vpop.f32.mrf.mxu1 }
 0x7bc   :  { %v12897_v13 = vadd.f32 %v12896_v41, %v24405_v31  ;;  %v24509_v31 = vpop.permute.xlu1 %16221 }
 0x7bd   :  { %v12898_v32 = vpop.f32.mrf.mxu1  ;;  %v16224_v18 = vunpack.i.h.bf16 %v24509_v31  ;;  %v16223_v56 = vunpack.i.l.bf16 %v24509_v31  ;;  %v18704_v31 = vld [vmem:[%s24757_s5 + $0x88] sm:$0xff]  }
 0x7be   :  { %v12899_v4 = vadd.f32 %v12898_v32, %v24416_v62  ;;  %v12938_v6 = vadd.f32 %v12937_v63, %v12897_v13  ;;  %v18685_v63 = vld [vmem:[%s24757_s5 + $0x50] sm:$0xff]  }
 0x7bf   :  { %v12900_v35 = vpop.f32.mrf.mxu1  ;;  %v13391_v12 = vsel %vm7635_vm1, %v16224_v18, %v16228_v48  ;;  %v13390_v2 = vsel %vm7635_vm1, %v16223_v56, %v16224_v18 }
 0x7c0   :  { %v12940_v36 = vadd.f32 %v12939_v5, %v12899_v4  ;;  %v24532_v54 = vmax.f32 %v13349_v61, %v13391_v12  ;;  %v24539_v57 = vmax.f32 %v24189_v50, %v13390_v2  ;;  %v18679_v50 = vld [vmem:[%s24757_s5 + $0x68] sm:$0xff]   ;;  %v18686_v5 = vld [vmem:[%s24757_s5 + $0x10] sm:$0xff]  }
 0x7c1   :  { %v12901_v7 = vpop.f32.mrf.mxu1  ;;  %16066 = vmatprep.subr.bf16.mxu1 %v18679_v50  ;;  %v18695_v50 = vld [vmem:[%s24757_s5 + $0xe8] sm:$0xff]  }
 0x7c2   :  { %v16235_v61 = vpack.i.bf16 %v24532_v54, %v24539_v57  ;;  %16067 = vmatpush3.bf16.msra.mxu1 %v18680_v58  ;;  %v18688_v58 = vld [vmem:[%s24757_s5 + $0x48] sm:$0xff]  }
 0x7c3   :  { %16068 = vmatprep.subr.bf16.mxu1 %v18681_v45  ;;  %v18696_v45 = vld [vmem:[%s24757_s5 + $0xa8] sm:$0xff]  }
 0x7c6   :  { %16069 = vmatpush3.bf16.msra.mxu1 %v18682_v30 }
 0x7c7   :  { %16070 = vmatprep.subr.bf16.mxu1 %v18683_v21  ;;  %v18690_v21 = vld [vmem:[%s24757_s5 + $0x8] sm:$0xff]  }
 0x7ca   :  { %16071 = vmatpush3.bf16.msra.mxu1 %v18684_v51  ;;  %v18697_v51 = vld [vmem:[%s24757_s5 + $0xe0] sm:$0xff]  }
 0x7cb   :  { %16072 = vmatprep.subr.bf16.mxu1 %v18685_v63  ;;  %v18692_v63 = vld [vmem:[%s24757_s5 + $0x40] sm:$0xff]  }
 0x7ce   :  { %16073 = vmatpush3.bf16.msra.mxu1 %v18686_v5  ;;  %v18698_v5 = vld [vmem:[%s24757_s5 + $0xa0] sm:$0xff]  }
 0x7cf   :  { %16074 = vmatprep.subr.bf16.mxu1 %v18688_v58  ;;  %v18716_v58 = vld [vmem:[%s24757_s5 + $0x118] sm:$0xff]  }
 0x7d2   :  { %16075 = vmatpush3.bf16.msra.mxu1 %v18690_v21  ;;  %v18720_v21 = vld [vmem:[%s24757_s5 + $0x148] sm:$0xff]  }
 0x7d3   :  { %16076 = vmatprep.subr.bf16.mxu1 %v18692_v63  ;;  %v18723_v63 = vld [vmem:[%s24757_s5 + $0x140] sm:$0xff]  }
 0x7ee   :  { %v13019_v40 = vpop.f32.mrf.mxu0 }
 0x7f0   :  { %v13021_v15 = vpop.f32.mrf.mxu0 }
 0x7f2   :  { %v13023_v44 = vpop.f32.mrf.mxu0 }
 0x7f4   :  { %v13024_v28 = vpop.f32.mrf.mxu0 }
 0x7fb   :  { %v12978_v46 = vpop.f32.mrf.mxu1 }
 0x7fc   :  { %v12979_v22 = vadd.f32 %v12978_v46, %v12938_v6 }
 0x7fd   :  { %v12980_v27 = vpop.f32.mrf.mxu1 }
 0x7fe   :  { %v12981_v26 = vadd.f32 %v12980_v27, %v12940_v36  ;;  %v13020_v42 = vadd.f32 %v13019_v40, %v12979_v22 }
 0x7ff   :  { %v12982_v29 = vpop.f32.mrf.mxu1 }
 0x800   :  { %v13022_v62 = vadd.f32 %v13021_v15, %v12981_v26  ;;  %v18738_v29 = vld [vmem:[%s24756_s4] sm:$0x7f] }
 0x801   :  { %v12983_v16 = vpop.f32.mrf.mxu1 }
 0x802   :  { %v8594_v16 = vrot.slane %v18738_v29, %v1133_v39 }
 0x80b   :  { %v13060_v17 = vpop.f32.mrf.mxu1 }
 0x80c   :  { %v24512_v55 = vadd.f32 %v13060_v17, %v13020_v42 }
 0x80d   :  { %v13062_v0 = vpop.f32.mrf.mxu1 }
 0x80e   :  { %v13351_v52 = vmax.f32 %v24512_v55, 0.0  ;;  %v24517_v47 = vadd.f32 %v13062_v0, %v13022_v62  ;;  %v15941_v24 = vpop.f32.mrf.mxu0 }
 0x80f   :  { %v13064_v23 = vpop.f32.mrf.mxu1 }
 0x810   :  { %v13352_v60 = vmax.f32 %v24517_v47, 0.0  ;;  %v15942_v25 = vpop.f32.mrf.mxu0  ;;  %v18710_v47 = vld [vmem:[%s24757_s5 + $0x130] sm:$0xff]  }
 0x811   :  { %v15943_v33 = vadd.f32 %v15942_v25, %v15941_v24  ;;  %v13065_v1 = vpop.f32.mrf.mxu1 }
 0x812   :  { %v15944_v10 = vpop.f32.mrf.mxu0  ;;  %v16230_v14 = vpack.i.bf16 %v13352_v60, %v13351_v52  ;;  %v18687_v1 = vld [vmem:[%s24757_s5 + $0xf8] sm:$0xff]  }
 0x813   :  { %v13102_v17 = vadd.f32 %v15943_v33, %v8594_v16  ;;  %16084 = vmatprep.subr.bf16.mxu0 %v18687_v1 }
 0x814   :  { %v15945_v59 = vpop.f32.mrf.mxu0  ;;  %16231 = vrot.lane.b32.xlu1 %v16230_v14, %s18739_s14  ;;  %16085 = vmatpush3.bf16.msra.mxu0 %v18689_v43 }
 0x815   :  { %16086 = vmatprep.subr.bf16.mxu0 %v18691_v11  ;;  %v18714_v11 = vld [vmem:[%s24757_s5 + $0x120] sm:$0xff]  }
 0x818   :  { %16236 = vrot.lane.b32.xlu1 %v16235_v61, %s18744_s13  ;;  %16087 = vmatpush3.bf16.msra.mxu0 %v18693_v20 }
 0x819   :  { %16088 = vmatprep.subr.bf16.mxu0 %v18695_v50  ;;  %v18719_v50 = vld [vmem:[%s24757_s5 + $0x188] sm:$0xff]  }
 0x81c   :  { %16089 = vmatpush3.bf16.msra.mxu0 %v18696_v45  ;;  %v18722_v45 = vld [vmem:[%s24757_s5 + $0x180] sm:$0xff]  }
 0x81d   :  { %16090 = vmatprep.subr.bf16.mxu0 %v18697_v51  ;;  %v18721_v51 = vld [vmem:[%s24757_s5 + $0x108] sm:$0xff]  }
 0x820   :  { %16091 = vmatpush3.bf16.msra.mxu0 %v18698_v5  ;;  %v18724_v5 = vld [vmem:[%s24757_s5 + $0x100] sm:$0xff]  }
 0x82b   :  { %v15963_v34 = vpop.f32.mrf.mxu1 }
 0x82d   :  { %v15964_v3 = vpop.f32.mrf.mxu1 }
 0x82e   :  { %v15985_v41 = vpop.f32.mrf.mxu0  ;;  %v15965_v26 = vadd.f32 %v15964_v3, %v15963_v34  ;;  %v18694_v34 = vld [vmem:[%s24757_s5] sm:$0xff]   ;;  %v16229_v3 = vunpack.i.h.bf16 %v24507_v37 }
 0x82f   :  { %v15966_v13 = vpop.f32.mrf.mxu1  ;;  %16077 = vmatpush3.bf16.msra.mxu1 %v18694_v34 }
 0x830   :  { %v15986_v32 = vpop.f32.mrf.mxu0  ;;  %v13142_v18 = vadd.f32 %v15965_v26, %v13102_v17  ;;  %v18700_v13 = vld [vmem:[%s24757_s5 + $0x98] sm:$0xff]  }
 0x831   :  { %v15967_v4 = vpop.f32.mrf.mxu1  ;;  %v15987_v0 = vadd.f32 %v15986_v32, %v15985_v41  ;;  %v18699_v41 = vld [vmem:[%s24757_s5 + $0xd8] sm:$0xff]   ;;  %v18701_v32 = vld [vmem:[%s24757_s5 + $0xd0] sm:$0xff]  }
 0x832   :  { %v15988_v6 = vpop.f32.mrf.mxu0  ;;  %16092 = vmatprep.subr.bf16.mxu0 %v18699_v41 }
 0x833   :  { %v13182_v23 = vadd.f32 %v15987_v0, %v13142_v18  ;;  %v13389_v6 = vsel %vm7635_vm1, %v16229_v3, %v16223_v56  ;;  %16093 = vmatpush3.bf16.msra.mxu0 %v18700_v13 }
 0x834   :  { %v15989_v35 = vpop.f32.mrf.mxu0  ;;  %16094 = vmatprep.subr.bf16.mxu0 %v18701_v32 }
 0x835   :  { %v18702_v35 = vld [vmem:[%s24757_s5 + $0x90] sm:$0xff]  }
 0x837   :  { %16095 = vmatpush3.bf16.msra.mxu0 %v18702_v35 }
 0x84b   :  { %v16007_v36 = vpop.f32.mrf.mxu1 }
 0x84d   :  { %v16008_v7 = vpop.f32.mrf.mxu1 }
 0x84e   :  { %v16029_v40 = vpop.f32.mrf.mxu0  ;;  %v16009_v12 = vadd.f32 %v16008_v7, %v16007_v36  ;;  %v13402_v36 = vmax.f32 %v24204_v8, %v13389_v6  ;;  %v18703_v7 = vld [vmem:[%s24757_s5 + $0xc8] sm:$0xff]   ;;  %v18706_v8 = vld [vmem:[%s24757_s5 + $0x80] sm:$0xff]  }
 0x84f   :  { %v16010_v15 = vpop.f32.mrf.mxu1  ;;  %16096 = vmatprep.subr.bf16.mxu0 %v18703_v7 }
 0x850   :  { %v16030_v44 = vpop.f32.mrf.mxu0  ;;  %v13222_v25 = vadd.f32 %v16009_v12, %v13182_v23  ;;  %16097 = vmatpush3.bf16.msra.mxu0 %v18704_v31 }
 0x851   :  { %v16011_v28 = vpop.f32.mrf.mxu1  ;;  %v16031_v2 = vadd.f32 %v16030_v44, %v16029_v40  ;;  %v18705_v40 = vld [vmem:[%s24757_s5 + $0xc0] sm:$0xff]  }
 0x852   :  { %v16032_v46 = vpop.f32.mrf.mxu0  ;;  %16098 = vmatprep.subr.bf16.mxu0 %v18705_v40 }
 0x853   :  { %v13262_v33 = vadd.f32 %v16031_v2, %v13222_v25  ;;  %v18709_v25 = vld [vmem:[%s24757_s5 + $0x170] sm:$0xff]   ;;  %v18712_v2 = vld [vmem:[%s24757_s5 + $0x128] sm:$0xff]  }
 0x854   :  { %v16033_v27 = vpop.f32.mrf.mxu0  ;;  %16099 = vmatpush3.bf16.msra.mxu0 %v18706_v8  ;;  %v18725_v8 = vld [vmem:[%s24758_s7] sm:$0xff]  }
 0x855   :  { %v18707_v27 = vld [vmem:[%s24757_s5 + $0x178] sm:$0xff]   ;;  %16145 = vmatprep.subr.bf16.mxu0 %v18742_v19 }
 0x856   :  { %16106 = vmatprep.subr.bf16.mxu1 %v18707_v27 }
 0x85e   :  { %v13341_v22 = vpop.f32.mrf.mxu0 }
 0x860   :  { %v16143_v42 = vpop.f32.mrf.mxu0 }
 0x862   :  { %v13344_v62 = vpop.f32.mrf.mxu0 }
 0x864   :  { %v16144_v24 = vpop.f32.mrf.mxu0 }
 0x86b   :  { %v16051_v10 = vpop.f32.mrf.mxu1 }
 0x86d   :  { %v16052_v39 = vpop.f32.mrf.mxu1 }
 0x86e   :  { %v16053_v14 = vadd.f32 %v16052_v39, %v16051_v10  ;;  %v18713_v10 = vld [vmem:[%s24757_s5 + $0x160] sm:$0xff]  }
 0x86f   :  { %v16054_v59 = vpop.f32.mrf.mxu1 }
 0x870   :  { %v13302_v38 = vadd.f32 %v16053_v14, %v13262_v33 }
 0x871   :  { %v16055_v61 = vpop.f32.mrf.mxu1 }
 0x872   :  { %v13342_v9 = vadd.f32 %v13341_v22, %v13302_v38  ;;  %v18715_v38 = vld [vmem:[%s24757_s5 + $0x158] sm:$0xff]  }
 0x874   :  { %v13353_v30 = vmax.f32 %v13342_v9, 0.0 }
 0x876   :  { %13360 = vst.msk [vmem:[#allocation3 + $0x30] sm:$0xff] %vm6122_vm0, %v13353_v30  ;;  %v18718_v30 = vld [vmem:[%s24757_s5 + $0x110] sm:$0xff]  }
 0x87d   :  { %v13367_v4 = vld [vmem:[#allocation3 + $0x30] sm:$0xff] }
 0x87e   :  { %13387 = vrot.lane.b32.xlu0 %v13367_v4, %s18739_s14 }
 0x882   :  { %13416 = vrot.lane.b32.xlu0 %v13402_v36, %s18744_s13 }
 0x886   :  { %v16232_v56 = vpop.permute.xlu1 %16231 }
 0x887   :  { %v16234_v15 = vunpack.i.h.bf16 %v16232_v56  ;;  %v16233_v44 = vunpack.i.l.bf16 %v16232_v56 }
 0x889   :  { %v13392_v28 = vsel %vm7635_vm1, %v16228_v48, %v16233_v44  ;;  %v13393_v46 = vsel %vm7635_vm1, %v16233_v44, %v16234_v15 }
 0x88a   :  { %v16237_v29 = vpop.permute.xlu1 %16236  ;;  %v13405_v16 = vmax.f32 %v13350_v53, %v13392_v28  ;;  %v24661_v22 = vmax.f32 %v13351_v52, %v13393_v46  ;;  %v15782_v46 = vld [vmem:[%s24759_s6] ss:$0 sm:$0xff] }
 0x88b   :  { %v16239_v37 = vunpack.i.h.bf16 %v16237_v29  ;;  %v16238_v48 = vunpack.i.l.bf16 %v16237_v29 }
 0x88c   :  { %v16240_v26 = vpack.i.bf16 %v24661_v22, %v13405_v16 }
 0x88d   :  { %v13432_v42 = vsel %vm13430_vm6, %v16238_v48, %v16239_v37 }
 0x88e   :  { %16241 = vrot.lane.b32.xlu1 %v16240_v26, %s18744_s13  ;;  %v13445_v17 = vmax.f32 %v24539_v57, %v13432_v42  ;;  %v18708_v57 = vld [vmem:[%s24757_s5 + $0x138] sm:$0xff]  }
 0x890   :  { %v13452_v49 = vpack.c.bf16 %v13445_v17, %v13445_v17 }
 0x892   :  { %13901 = vmatprep.mubr.bf16.mxu1 %v13452_v49 }
 0x8f0   :  { %v13388_v53 = vpop.permute.xlu0 %13387 }
 0x8f1   :  { %v13394_v55 = vsel %vm7635_vm1, %v16234_v15, %v13388_v53  ;;  %v13408_v52 = vmax.f32 %v13367_v4, %v13388_v53 }
 0x8f2   :  { %v24671_v62 = vmax.f32 %v13352_v60, %v13394_v55  ;;  %v18711_v60 = vld [vmem:[%s24757_s5 + $0x168] sm:$0xff]  }
 0x8f4   :  { %v16245_v18 = vpack.i.bf16 %v13408_v52, %v24671_v62  ;;  %v13417_v0 = vpop.permute.xlu0 %13416 }
 0x8f5   :  { %v13431_v24 = vsel %vm13430_vm6, %v13417_v0, %v16238_v48 }
 0x8f6   :  { %v13444_v12 = vmax.f32 %v13402_v36, %v13431_v24  ;;  %16246 = vrot.lane.b32.xlu0 %v16245_v18, %s18744_s13 }
 0x8f8   :  { %v13451_v23 = vpack.c.bf16 %v13444_v12, %v13444_v12 }
 0x8fa   :  { %13902 = vmatmul.mubr.bf16.vlgmr.msra.gmra.mxu1 %v13451_v23  ;;  %v15834_v23 = vld [vmem:[%s24760_s8] ss:$0 sm:$0xff] }
 0x8fb   :  { %16107 = vmatpush3.bf16.msra.mxu1 %v18708_v57 }
 0x8fc   :  { %16108 = vmatprep.subr.bf16.mxu1 %v18709_v25 }
 0x8ff   :  { %16109 = vmatpush3.bf16.msra.mxu1 %v18710_v47 }
 0x900   :  { %v16242_v1 = vpop.permute.xlu1 %16241  ;;  %16110 = vmatprep.subr.bf16.mxu1 %v18711_v60 }
 0x901   :  { %v16244_v43 = vunpack.i.h.bf16 %v16242_v1  ;;  %v16243_v39 = vunpack.i.l.bf16 %v16242_v1 }
 0x903   :  { %v13433_v33 = vsel %vm13430_vm6, %v16239_v37, %v16243_v39  ;;  %v13434_v14 = vsel %vm13430_vm6, %v16243_v39, %v16244_v43  ;;  %16111 = vmatpush3.bf16.msra.mxu1 %v18712_v2 }
 0x904   :  { %v13446_v59 = vmax.f32 %v24532_v54, %v13433_v33  ;;  %v13447_v20 = vmax.f32 %v13405_v16, %v13434_v14  ;;  %16112 = vmatprep.subr.bf16.mxu1 %v18713_v10  ;;  %v18717_v54 = vld [vmem:[%s24757_s5 + $0x150] sm:$0xff]  }
 0x906   :  { %v13453_v61 = vpack.c.bf16 %v13446_v59, %v13446_v59  ;;  %v13454_v9 = vpack.c.bf16 %v13447_v20, %v13447_v20 }
 0x907   :  { %16113 = vmatpush3.bf16.msra.mxu1 %v18714_v11 }
 0x908   :  { %13941 = vmatprep.mubr.bf16.mxu0 %v13454_v9  ;;  %16114 = vmatprep.subr.bf16.mxu1 %v18715_v38 }
 0x909   :  { %13942 = vmatmul.mubr.bf16.vlgmr.msra.gmra.mxu0 %v13453_v61 }
 0x90a   :  { %16146 = vmatpush3.bf16.msra.mxu0 %v18719_v50  ;;  %16149 = vmatprep.mubr.msk.bf16.mxu0 %vm18743_vm5, %v18742_v19 }
 0x90b   :  { %16115 = vmatpush3.bf16.msra.mxu1 %v18716_v58  ;;  %16147 = vmatprep.subr.bf16.mxu0 %v18742_v19 }
 0x90c   :  { %16116 = vmatprep.subr.bf16.mxu1 %v18717_v54 }
 0x90e   :  { %16148 = vmatpush3.bf16.msra.mxu0 %v18722_v45 }
 0x90f   :  { %16117 = vmatpush3.bf16.msra.mxu1 %v18718_v30  ;;  %16153 = vmatprep.subr.bf16.mxu0 %v18742_v19 }
 0x910   :  { %16118 = vmatprep.subr.bf16.mxu1 %v18720_v21 }
 0x913   :  { %16119 = vmatpush3.bf16.msra.mxu1 %v18721_v51 }
 0x914   :  { %16120 = vmatprep.subr.bf16.mxu1 %v18723_v63 }
 0x917   :  { %16121 = vmatpush3.bf16.msra.mxu1 %v18724_v5 }
 0x968   :  { %v16247_v34 = vpop.permute.xlu0 %16246 }
 0x969   :  { %v16249_v3 = vunpack.i.h.bf16 %v16247_v34  ;;  %v16248_v41 = vunpack.i.l.bf16 %v16247_v34 }
 0x96b   :  { %v13450_v13 = vmax.f32 %v13408_v52, %v16249_v3  ;;  %v13435_v32 = vsel %vm13430_vm6, %v16244_v43, %v16248_v41  ;;  %v13436_v4 = vsel %vm13430_vm6, %v16248_v41, %v16249_v3 }
 0x96c   :  { %v13448_v6 = vmax.f32 %v24661_v22, %v13435_v32  ;;  %v13449_v35 = vmax.f32 %v24671_v62, %v13436_v4 }
 0x96d   :  { %v13457_v36 = vpack.c.bf16 %v13450_v13, %v13450_v13 }
 0x96e   :  { %v13455_v7 = vpack.c.bf16 %v13448_v6, %v13448_v6  ;;  %v13456_v31 = vpack.c.bf16 %v13449_v35, %v13449_v35 }
 0x96f   :  { %16150 = vmatmul.mubr.msk.bf16.vlgmr.msra.gmra.mxu0 %vm13865_vm7, %v13457_v36 }
 0x970   :  { %13981 = vmatprep.mubr.bf16.mxu1 %v13456_v31  ;;  %16155 = vmatprep.mubr.msk.bf16.mxu0 %vm18743_vm5, %v18742_v19 }
 0x971   :  { %13982 = vmatmul.mubr.bf16.vlgmr.msra.gmra.mxu1 %v13455_v7  ;;  %16154 = vmatpush3.bf16.msra.mxu0 %v18725_v8 }
 0x9ba   :  { %v16078_v56 = vpop.f32.mrf.mxu1 }
 0x9bc   :  { %v16079_v40 = vpop.f32.mrf.mxu1 }
 0x9bd   :  { %v16080_v15 = vadd.f32 %v16079_v40, %v16078_v56 }
 0x9be   :  { %v16081_v44 = vpop.f32.mrf.mxu1 }
 0x9bf   :  { %v13904_v16 = vadd.f32 %v16080_v15, %v15782_v46 }
 0x9c0   :  { %v16082_v28 = vpop.f32.mrf.mxu1 }
 0x9c9   :  { %v16100_v27 = vpop.f32.mrf.mxu0 }
 0x9cb   :  { %v16101_v29 = vpop.f32.mrf.mxu0 }
 0x9cc   :  { %v16102_v22 = vadd.f32 %v16101_v29, %v16100_v27 }
 0x9cd   :  { %v16103_v19 = vpop.f32.mrf.mxu0 }
 0x9ce   :  { %v13944_v37 = vadd.f32 %v16102_v22, %v13904_v16 }
 0x9cf   :  { %v16104_v48 = vpop.f32.mrf.mxu0 }
 0xa2f   :  { %v14023_v26 = vpop.f32.mrf.mxu0 }
 0xa31   :  { %v16122_v42 = vpop.f32.mrf.mxu1  ;;  %v16151_v17 = vpop.f32.mrf.mxu0 }
 0xa33   :  { %v16123_v49 = vpop.f32.mrf.mxu1  ;;  %v14026_v53 = vpop.f32.mrf.mxu0 }
 0xa34   :  { %v16124_v55 = vadd.f32 %v16123_v49, %v16122_v42 }
 0xa35   :  { %v16125_v52 = vpop.f32.mrf.mxu1  ;;  %v16152_v62 = vpop.f32.mrf.mxu0 }
 0xa36   :  { %v13984_v18 = vadd.f32 %v16124_v55, %v13944_v37 }
 0xa37   :  { %v16126_v0 = vpop.f32.mrf.mxu1 }
 0xa38   :  { %v14024_v24 = vadd.f32 %v14023_v26, %v13984_v18 }
 0xa3a   :  { %v14029_v12 = vmax.f32 %v14024_v24, 0.0 }
 0xa3c   :  { %v14030_v57 = vpack.c.bf16 %v14029_v12, %v14029_v12 }
 0xa3e   :  { %16156 = vmatmul.mubr.msk.bf16.vlgmr.msra.gmra.mxu0 %vm14046_vm8, %v14030_v57 }
 0xafe   :  { %v14084_v25 = vpop.f32.mrf.mxu0 }
 0xaff   :  { %v14085_v47 = vadd.f32 %v15834_v23, %v14084_v25 }
 0xb00   :  { %v16157_v60 = vpop.f32.mrf.mxu0 }
 0xb01   :  { %14091 = vst.msk [vmem:[%s24761_s9] sm:$0xff] %vm14090_vm9, %v14085_v47 }
 0xb02   :  { %v14087_v2 = vpop.f32.mrf.mxu0 }
 0xb04   :  { %v16158_v1 = vpop.f32.mrf.mxu0 }

</bundles_post_ra>
